<compile_context>
chip_gen: v7x
topology: tpu7x:2x2x1
jax: 0.10.0
libtpu: 0.0.40
codegen_flags: <defaults>
</compile_context>

<pallas_src>
import math

import jax
import jax.numpy as jnp
from jax.experimental import pallas as pl
from jax.experimental.pallas import tpu as pltpu

D_MODEL = 512     # plugin transformer d_model
D_GPT = 768       # GPT-2 hidden size
D_TGT_EMB = 32    # tgt_looking_table embedding dim
ROW_TILE = 128    # token rows per grid step (B*T padded up to this)
VMEM_LIMIT = 32 * 1024 * 1024   # raise v5e's 16 MiB scoped default; safe on v7x


def _round_up(x, m):
    return ((x + m - 1) // m) * m


# ---------------------------------------------------------------------------
# Kernel 1: fused up_proj + gate + gated mix + trans_dim_net + cross-attention
# ---------------------------------------------------------------------------
def _fused_kernel(last_ref, tgt_ref, kv_ref, mask_ref,
                  w_up_ref, b_up_ref, w_g1_ref, w_g2_ref, b_g_ref,
                  w_t_ref, b_t_ref, out_ref):
    last = last_ref[...]          # (RT, 768)  f32
    tgt_emb = tgt_ref[...]        # (RT, 32)   f32
    kv = kv_ref[...]              # (B*S, 512) f32 (flattened topic memory)
    mask = mask_ref[...]          # (RT, B*S)  f32 (same-batch AND src_mask)

    # tgt_hidden_states = up_proj(tgt_looking_table(trg))
    tgt_hidden = (jnp.dot(tgt_emb.astype(jnp.bfloat16), w_up_ref[...],
                          preferred_element_type=jnp.float32) + b_up_ref[...])

    # gate(cat([last_hidden, tgt_hidden], -1)) = last@Wg1 + tgt_hidden@Wg2 + b
    gate_lin = (jnp.dot(last.astype(jnp.bfloat16), w_g1_ref[...],
                        preferred_element_type=jnp.float32)
                + jnp.dot(tgt_hidden.astype(jnp.bfloat16), w_g2_ref[...],
                          preferred_element_type=jnp.float32)
                + b_g_ref[...])
    attn_score = jax.nn.sigmoid(gate_lin)                       # f32 (EUP)

    # input_embed = a * last_hidden + (1 - a) * tgt_hidden
    mixed = attn_score * last + (1.0 - attn_score) * tgt_hidden

    # trg_embed = trans_dim_net(input_embed)
    q = (jnp.dot(mixed.astype(jnp.bfloat16), w_t_ref[...],
                 preferred_element_type=jnp.float32) + b_t_ref[...])  # (RT,512)

    # plugin transformer stand-in: masked cross-attention over topic memory
    kv_b = kv.astype(jnp.bfloat16)
    scores = jax.lax.dot_general(
        q.astype(jnp.bfloat16), kv_b,
        dimension_numbers=(((1,), (1,)), ((), ())),
        preferred_element_type=jnp.float32) * (1.0 / math.sqrt(D_MODEL))
    scores = jnp.where(mask > 0, scores, jnp.float32(-1e9))
    m = jnp.max(scores, axis=-1, keepdims=True)
    p = jnp.exp(scores - m)
    p = p / jnp.sum(p, axis=-1, keepdims=True)
    attn = jnp.dot(p.astype(jnp.bfloat16), kv_b,
                   preferred_element_type=jnp.float32)
    out_ref[...] = attn + q        # residual connection


def fused_gate_attention(last_hidden, tgt_emb, kv_all, attn_mask,
                         w_up, b_up, w_g1, w_g2, b_g, w_t, b_t,
                         *, row_tile=ROW_TILE):
    n_rows = last_hidden.shape[0]
    assert n_rows % row_tile == 0
    n_kv = kv_all.shape[0]
    grid = (n_rows // row_tile,)

    row_spec = lambda cols: pl.BlockSpec((row_tile, cols), lambda i: (i, 0))
    full_spec = lambda r, c: pl.BlockSpec((r, c), lambda i: (0, 0))

    return pl.pallas_call(
        _fused_kernel,
        out_shape=jax.ShapeDtypeStruct((n_rows, D_MODEL), jnp.float32),
        grid=grid,
        in_specs=[
            row_spec(D_GPT),                 # last_hidden  (RT, 768)
            row_spec(D_TGT_EMB),             # tgt_emb      (RT, 32)
            full_spec(n_kv, D_MODEL),        # kv_all       (B*S, 512)
            row_spec(n_kv),                  # attn_mask    (RT, B*S)
            full_spec(D_TGT_EMB, D_GPT),     # w_up  (bf16)
            full_spec(1, D_GPT),             # b_up
            full_spec(D_GPT, D_GPT),         # w_g1  (bf16)
            full_spec(D_GPT, D_GPT),         # w_g2  (bf16)
            full_spec(1, D_GPT),             # b_g
            full_spec(D_GPT, D_MODEL),       # w_t   (bf16)
            full_spec(1, D_MODEL),           # b_t
        ],
        out_specs=row_spec(D_MODEL),
        compiler_params=pltpu.CompilerParams(
            dimension_semantics=("parallel",),
            vmem_limit_bytes=VMEM_LIMIT),
    )(last_hidden, tgt_emb, kv_all, attn_mask,
      w_up, b_up, w_g1, w_g2, b_g, w_t, b_t)


# ---------------------------------------------------------------------------
# Kernel 2/3: generator = Linear(512 -> vocab) + log_softmax, vocab-tiled
# ---------------------------------------------------------------------------
def _gen_logits_kernel(x_ref, w_ref, b_ref, logits_ref, lse_ref, m_sc, l_sc):
    j = pl.program_id(1)

    @pl.when(j == 0)
    def _():
        m_sc[...] = jnp.full_like(m_sc, -jnp.inf)
        l_sc[...] = jnp.zeros_like(l_sc)

    logits = (jnp.dot(x_ref[...].astype(jnp.bfloat16), w_ref[...],
                      preferred_element_type=jnp.float32) + b_ref[...])
    logits_ref[...] = logits

    # online logsumexp across vocab tiles
    m_prev = m_sc[...]
    m_new = jnp.maximum(m_prev, jnp.max(logits, axis=-1, keepdims=True))
    l_sc[...] = (l_sc[...] * jnp.exp(m_prev - m_new)
                 + jnp.sum(jnp.exp(logits - m_new), axis=-1, keepdims=True))
    m_sc[...] = m_new

    @pl.when(j == pl.num_programs(1) - 1)
    def _():
        lse_ref[...] = m_sc[...] + jnp.log(l_sc[...])


def _gen_norm_kernel(logits_ref, lse_ref, out_ref):
    out_ref[...] = logits_ref[...] - lse_ref[...]


def generator(x, w_gen, b_gen, *, row_tile=ROW_TILE, vocab_tile=2048):
    n_rows, d = x.shape
    assert n_rows % row_tile == 0
    vocab = w_gen.shape[1]

    tn = min(vocab_tile, _round_up(vocab, 128))
    v_pad = _round_up(vocab, tn)
    if v_pad != vocab:
        w_gen = jnp.pad(w_gen, ((0, 0), (0, v_pad - vocab)))
        # pad bias with -1e9 so padded columns contribute ~0 to the logsumexp
        b_gen = jnp.pad(b_gen, ((0, 0), (0, v_pad - vocab)),
                        constant_values=-1e9)

    grid = (n_rows // row_tile, v_pad // tn)

    logits, lse = pl.pallas_call(
        _gen_logits_kernel,
        out_shape=(jax.ShapeDtypeStruct((n_rows, v_pad), jnp.float32),
                   jax.ShapeDtypeStruct((n_rows, 1), jnp.float32)),
        grid=grid,
        in_specs=[
            pl.BlockSpec((row_tile, d), lambda i, j: (i, 0)),
            pl.BlockSpec((d, tn), lambda i, j: (0, j)),
            pl.BlockSpec((1, tn), lambda i, j: (0, j)),
        ],
        out_specs=(pl.BlockSpec((row_tile, tn), lambda i, j: (i, j)),
                   pl.BlockSpec((row_tile, 1), lambda i, j: (i, 0))),
        scratch_shapes=[pltpu.VMEM((row_tile, 1), jnp.float32),
                        pltpu.VMEM((row_tile, 1), jnp.float32)],
        compiler_params=pltpu.CompilerParams(
            dimension_semantics=("parallel", "arbitrary"),
            vmem_limit_bytes=VMEM_LIMIT),
    )(x, w_gen, b_gen)

    logprobs = pl.pallas_call(
        _gen_norm_kernel,
        out_shape=jax.ShapeDtypeStruct((n_rows, v_pad), jnp.float32),
        grid=grid,
        in_specs=[pl.BlockSpec((row_tile, tn), lambda i, j: (i, j)),
                  pl.BlockSpec((row_tile, 1), lambda i, j: (i, 0))],
        out_specs=pl.BlockSpec((row_tile, tn), lambda i, j: (i, j)),
        compiler_params=pltpu.CompilerParams(
            dimension_semantics=("parallel", "parallel"),
            vmem_limit_bytes=VMEM_LIMIT),
    )(logits, lse)

    return logprobs[:, :vocab]


# ---------------------------------------------------------------------------
# Parameter init (deterministic, synthetic) and full forward
# ---------------------------------------------------------------------------
def init_params(key, vocab_size, topic_vocab_size):
    ks = jax.random.split(key, 12)
    s = 0.02
    bf16 = jnp.bfloat16
    return {
        "topic_table": s * jax.random.normal(ks[0], (topic_vocab_size, D_MODEL), jnp.float32),
        "tgt_table":   s * jax.random.normal(ks[1], (vocab_size, D_TGT_EMB), jnp.float32),
        # frozen GPT-2 stand-in (TODO(synk) above)
        "gpt2_table":  s * jax.random.normal(ks[2], (vocab_size, D_GPT), jnp.float32),
        # matmul weights stored bf16 (f32 accumulation inside the kernels)
        "w_up":  (s * jax.random.normal(ks[3], (D_TGT_EMB, D_GPT), jnp.float32)).astype(bf16),
        "b_up":  jnp.zeros((1, D_GPT), jnp.float32),
        "w_g1":  (s * jax.random.normal(ks[4], (D_GPT, D_GPT), jnp.float32)).astype(bf16),
        "w_g2":  (s * jax.random.normal(ks[5], (D_GPT, D_GPT), jnp.float32)).astype(bf16),
        "b_g":   jnp.zeros((1, D_GPT), jnp.float32),
        "w_t":   (s * jax.random.normal(ks[6], (D_GPT, D_MODEL), jnp.float32)).astype(bf16),
        "b_t":   jnp.zeros((1, D_MODEL), jnp.float32),
        "w_gen": (s * jax.random.normal(ks[7], (D_MODEL, vocab_size), jnp.float32)).astype(bf16),
        "b_gen": jnp.zeros((1, vocab_size), jnp.float32),
    }


def topic2essay_forward(params, src, src_mask, trg, trg_mask,
                        *, row_tile=ROW_TILE, vocab_tile=2048):
    B, T = trg.shape
    S = src.shape[1]
    n = B * T
    n_pad = _round_up(n, row_tile)

    # embedding lookups (glue, plain JAX gathers)
    src_embed = jnp.take(params["topic_table"], src, axis=0)     # (B, S, 512)
    tgt_emb = jnp.take(params["tgt_table"], trg, axis=0)         # (B, T, 32)
    last_hidden = jnp.take(params["gpt2_table"], trg, axis=0)    # (B, T, 768) GPT-2 stub

    # flatten token rows and pad to the row tile
    last_flat = jnp.pad(last_hidden.reshape(n, D_GPT), ((0, n_pad - n), (0, 0)))
    tgt_flat = jnp.pad(tgt_emb.reshape(n, D_TGT_EMB), ((0, n_pad - n), (0, 0)))

    # topic memory flattened across batch + combined (row, topic-slot) mask:
    # a row attends only to topic slots of its own batch that src_mask keeps.
    kv_all = src_embed.reshape(B * S, D_MODEL)                   # (B*S, 512)
    row_b = jnp.repeat(jnp.arange(B, dtype=jnp.int32), T)        # (B*T,)
    col_b = jnp.repeat(jnp.arange(B, dtype=jnp.int32), S)        # (B*S,)
    col_valid = (src_mask.reshape(B * S) > 0)
    attn_mask = ((row_b[:, None] == col_b[None, :])
                 & col_valid[None, :]).astype(jnp.float32)       # (B*T, B*S)
    attn_mask = jnp.pad(attn_mask, ((0, n_pad - n), (0, 0)))

    # fused: up_proj + gate + mix + trans_dim_net + cross-attention  (Pallas)
    # (trg_mask unused here -- see TODO(synk) at top of file)
    out = fused_gate_attention(
        last_flat, tgt_flat, kv_all, attn_mask,
        params["w_up"], params["b_up"],
        params["w_g1"], params["w_g2"], params["b_g"],
        params["w_t"], params["b_t"], row_tile=row_tile)         # (n_pad, 512)

    # generator: Linear + log_softmax, vocab-tiled  (Pallas)
    logprobs = generator(out, params["w_gen"], params["b_gen"],
                         row_tile=row_tile, vocab_tile=vocab_tile)
    return logprobs[:n].reshape(B, T, -1)


if __name__ == "__main__":
    B, S_SRC, T_SEQ = 2, 4, 8
    VOCAB, TOPIC_VOCAB = 256, 32

    key = jax.random.PRNGKey(0)
    kp, k1, k2 = jax.random.split(key, 3)

    params = init_params(kp, VOCAB, TOPIC_VOCAB)

    src = jax.random.randint(k1, (B, S_SRC), 0, TOPIC_VOCAB, dtype=jnp.int32)
    src_mask = jnp.ones((B, S_SRC), dtype=jnp.int32).at[1, -1].set(0)
    trg = jax.random.randint(k2, (B, T_SEQ), 0, VOCAB, dtype=jnp.int32)
    # causal (subsequent) mask, shape (B, T, T) -- unused by the stand-in
    trg_mask = jnp.broadcast_to(
        jnp.tril(jnp.ones((T_SEQ, T_SEQ), jnp.int32)), (B, T_SEQ, T_SEQ))

    # vocab_tile=128 so the small demo vocab (256) exercises the online
    # logsumexp across 2 vocab tiles; production default is 2048.
    logits = topic2essay_forward(params, src, src_mask, trg, trg_mask,
                                 vocab_tile=128)
    jax.block_until_ready(logits)

    assert logits.shape == (B, T_SEQ, VOCAB)
    # log_softmax rows must sum to ~1 in prob space
    assert bool(jnp.allclose(jnp.sum(jnp.exp(logits), axis=-1), 1.0, atol=1e-3))
    print("KERNEL_OK")
</pallas_src>

<mosaic_0001>
module attributes {stable_mosaic.version = 11 : i64} {
  func.func @_fused_kernel(%arg0: i32, %arg1: memref<128x768xf32, #tpu.memory_space<vmem>>, %arg2: memref<128x32xf32, #tpu.memory_space<vmem>>, %arg3: memref<8x512xf32, #tpu.memory_space<vmem>>, %arg4: memref<128x8xf32, #tpu.memory_space<vmem>>, %arg5: memref<32x768xbf16, #tpu.memory_space<vmem>>, %arg6: memref<1x768xf32, #tpu.memory_space<vmem>>, %arg7: memref<768x768xbf16, #tpu.memory_space<vmem>>, %arg8: memref<768x768xbf16, #tpu.memory_space<vmem>>, %arg9: memref<1x768xf32, #tpu.memory_space<vmem>>, %arg10: memref<768x512xbf16, #tpu.memory_space<vmem>>, %arg11: memref<1x512xf32, #tpu.memory_space<vmem>>, %arg12: memref<128x512xf32, #tpu.memory_space<vmem>>) attributes {dimension_semantics = [#tpu.dimension_semantics<parallel>], iteration_bounds = array<i64: 1>, scalar_prefetch = 0 : i64, scratch_operands = 0 : i64, tpu.core_type = #tpu.core_type<tc>, window_params = [{transform_indices = @transform_0, window_bounds = array<i64: 128, 768>}, {transform_indices = @transform_1, window_bounds = array<i64: 128, 32>}, {pipeline_mode = #tpu.pipeline_mode<synchronous>, transform_indices = @transform_2, window_bounds = array<i64: 8, 512>}, {transform_indices = @transform_3, window_bounds = array<i64: 128, 8>}, {pipeline_mode = #tpu.pipeline_mode<synchronous>, transform_indices = @transform_4, window_bounds = array<i64: 32, 768>}, {pipeline_mode = #tpu.pipeline_mode<synchronous>, transform_indices = @transform_5, window_bounds = array<i64: 1, 768>}, {pipeline_mode = #tpu.pipeline_mode<synchronous>, transform_indices = @transform_6, window_bounds = array<i64: 768, 768>}, {pipeline_mode = #tpu.pipeline_mode<synchronous>, transform_indices = @transform_7, window_bounds = array<i64: 768, 768>}, {pipeline_mode = #tpu.pipeline_mode<synchronous>, transform_indices = @transform_8, window_bounds = array<i64: 1, 768>}, {pipeline_mode = #tpu.pipeline_mode<synchronous>, transform_indices = @transform_9, window_bounds = array<i64: 768, 512>}, {pipeline_mode = #tpu.pipeline_mode<synchronous>, transform_indices = @transform_10, window_bounds = array<i64: 1, 512>}, {transform_indices = @transform_11, window_bounds = array<i64: 128, 512>}]} {
    %c0 = arith.constant 0 : index
    %c0_0 = arith.constant 0 : index
    %0 = vector.load %arg1[%c0, %c0_0] : memref<128x768xf32, #tpu.memory_space<vmem>>, vector<128x768xf32>
    %c0_1 = arith.constant 0 : index
    %c0_2 = arith.constant 0 : index
    %1 = vector.load %arg2[%c0_1, %c0_2] : memref<128x32xf32, #tpu.memory_space<vmem>>, vector<128x32xf32>
    %c0_3 = arith.constant 0 : index
    %c0_4 = arith.constant 0 : index
    %2 = vector.load %arg3[%c0_3, %c0_4] : memref<8x512xf32, #tpu.memory_space<vmem>>, vector<8x512xf32>
    %c0_5 = arith.constant 0 : index
    %c0_6 = arith.constant 0 : index
    %3 = vector.load %arg4[%c0_5, %c0_6] : memref<128x8xf32, #tpu.memory_space<vmem>>, vector<128x8xf32>
    %4 = arith.truncf %1 : vector<128x32xf32> to vector<128x32xbf16>
    %c0_7 = arith.constant 0 : index
    %c0_8 = arith.constant 0 : index
    %5 = vector.load %arg5[%c0_7, %c0_8] : memref<32x768xbf16, #tpu.memory_space<vmem>>, vector<32x768xbf16>
    %cst = arith.constant dense<0.000000e+00> : vector<128x768xf32>
    %6 = tpu.matmul %4, %5, %cst {dimension_numbers = #tpu.dot_dimension_numbers<[1], [0], [0], [1], [0, 0, 1, 1], [], []>} : vector<128x32xbf16>, vector<32x768xbf16>, vector<128x768xf32> -> vector<128x768xf32>
    %c0_9 = arith.constant 0 : index
    %c0_10 = arith.constant 0 : index
    %7 = vector.load %arg6[%c0_9, %c0_10] : memref<1x768xf32, #tpu.memory_space<vmem>>, vector<1x768xf32>
    %8 = vector.broadcast %7 : vector<1x768xf32> to vector<128x768xf32>
    %9 = arith.addf %6, %8 : vector<128x768xf32>
    %10 = arith.truncf %0 : vector<128x768xf32> to vector<128x768xbf16>
    %c0_11 = arith.constant 0 : index
    %c0_12 = arith.constant 0 : index
    %11 = vector.load %arg7[%c0_11, %c0_12] : memref<768x768xbf16, #tpu.memory_space<vmem>>, vector<768x768xbf16>
    %cst_13 = arith.constant dense<0.000000e+00> : vector<128x768xf32>
    %12 = tpu.matmul %10, %11, %cst_13 {dimension_numbers = #tpu.dot_dimension_numbers<[1], [0], [0], [1], [0, 0, 1, 1], [], []>} : vector<128x768xbf16>, vector<768x768xbf16>, vector<128x768xf32> -> vector<128x768xf32>
    %13 = arith.truncf %9 : vector<128x768xf32> to vector<128x768xbf16>
    %c0_14 = arith.constant 0 : index
    %c0_15 = arith.constant 0 : index
    %14 = vector.load %arg8[%c0_14, %c0_15] : memref<768x768xbf16, #tpu.memory_space<vmem>>, vector<768x768xbf16>
    %cst_16 = arith.constant dense<0.000000e+00> : vector<128x768xf32>
    %15 = tpu.matmul %13, %14, %cst_16 {dimension_numbers = #tpu.dot_dimension_numbers<[1], [0], [0], [1], [0, 0, 1, 1], [], []>} : vector<128x768xbf16>, vector<768x768xbf16>, vector<128x768xf32> -> vector<128x768xf32>
    %16 = arith.addf %12, %15 : vector<128x768xf32>
    %c0_17 = arith.constant 0 : index
    %c0_18 = arith.constant 0 : index
    %17 = vector.load %arg9[%c0_17, %c0_18] : memref<1x768xf32, #tpu.memory_space<vmem>>, vector<1x768xf32>
    %18 = vector.broadcast %17 : vector<1x768xf32> to vector<128x768xf32>
    %19 = arith.addf %16, %18 : vector<128x768xf32>
    %20 = arith.negf %19 : vector<128x768xf32>
    %21 = math.exp %20 : vector<128x768xf32>
    %cst_19 = arith.constant 1.000000e+00 : f32
    %22 = vector.broadcast %cst_19 : f32 to vector<128x768xf32>
    %23 = arith.addf %22, %21 : vector<128x768xf32>
    %24 = arith.divf %22, %23 : vector<128x768xf32>
    %25 = arith.mulf %24, %0 : vector<128x768xf32>
    %cst_20 = arith.constant 1.000000e+00 : f32
    %26 = vector.broadcast %cst_20 : f32 to vector<128x768xf32>
    %27 = arith.subf %26, %24 : vector<128x768xf32>
    %28 = arith.mulf %27, %9 : vector<128x768xf32>
    %29 = arith.addf %25, %28 : vector<128x768xf32>
    %30 = arith.truncf %29 : vector<128x768xf32> to vector<128x768xbf16>
    %c0_21 = arith.constant 0 : index
    %c0_22 = arith.constant 0 : index
    %31 = vector.load %arg10[%c0_21, %c0_22] : memref<768x512xbf16, #tpu.memory_space<vmem>>, vector<768x512xbf16>
    %cst_23 = arith.constant dense<0.000000e+00> : vector<128x512xf32>
    %32 = tpu.matmul %30, %31, %cst_23 {dimension_numbers = #tpu.dot_dimension_numbers<[1], [0], [0], [1], [0, 0, 1, 1], [], []>} : vector<128x768xbf16>, vector<768x512xbf16>, vector<128x512xf32> -> vector<128x512xf32>
    %c0_24 = arith.constant 0 : index
    %c0_25 = arith.constant 0 : index
    %33 = vector.load %arg11[%c0_24, %c0_25] : memref<1x512xf32, #tpu.memory_space<vmem>>, vector<1x512xf32>
    %34 = vector.broadcast %33 : vector<1x512xf32> to vector<128x512xf32>
    %35 = arith.addf %32, %34 : vector<128x512xf32>
    %36 = arith.truncf %2 : vector<8x512xf32> to vector<8x512xbf16>
    %37 = arith.truncf %35 : vector<128x512xf32> to vector<128x512xbf16>
    %cst_26 = arith.constant dense<0.000000e+00> : vector<128x8xf32>
    %38 = tpu.matmul %37, %36, %cst_26 {dimension_numbers = #tpu.dot_dimension_numbers<[1], [1], [0], [0], [0, 0, 1, 0], [], []>} : vector<128x512xbf16>, vector<8x512xbf16>, vector<128x8xf32> -> vector<128x8xf32>
    %cst_27 = arith.constant 0.0441941731 : f32
    %39 = vector.broadcast %cst_27 : f32 to vector<128x8xf32>
    %40 = arith.mulf %38, %39 : vector<128x8xf32>
    %cst_28 = arith.constant 0.000000e+00 : f32
    %41 = vector.broadcast %cst_28 : f32 to vector<128x8xf32>
    %42 = arith.cmpf ogt, %3, %41 : vector<128x8xf32>
    %cst_29 = arith.constant -1.000000e+09 : f32
    %43 = vector.broadcast %cst_29 : f32 to vector<128x8xf32>
    %44 = arith.select %42, %40, %43 : vector<128x8xi1>, vector<128x8xf32>
    %cst_30 = arith.constant dense<0xFF800000> : vector<128xf32>
    %45 = vector.multi_reduction <maximumf>, %44, %cst_30 [1] : vector<128x8xf32> to vector<128xf32>
    %46 = vector.shape_cast %45 : vector<128xf32> to vector<128x1xf32>
    %47 = vector.broadcast %46 : vector<128x1xf32> to vector<128x8xf32>
    %48 = arith.subf %44, %47 : vector<128x8xf32>
    %49 = math.exp %48 : vector<128x8xf32>
    %cst_31 = arith.constant dense<0.000000e+00> : vector<128xf32>
    %50 = vector.multi_reduction <add>, %49, %cst_31 [1] : vector<128x8xf32> to vector<128xf32>
    %51 = vector.shape_cast %50 : vector<128xf32> to vector<128x1xf32>
    %52 = vector.broadcast %51 : vector<128x1xf32> to vector<128x8xf32>
    %53 = arith.divf %49, %52 : vector<128x8xf32>
    %54 = arith.truncf %53 : vector<128x8xf32> to vector<128x8xbf16>
    %cst_32 = arith.constant dense<0.000000e+00> : vector<128x512xf32>
    %55 = tpu.matmul %54, %36, %cst_32 {dimension_numbers = #tpu.dot_dimension_numbers<[1], [0], [0], [1], [0, 0, 1, 1], [], []>} : vector<128x8xbf16>, vector<8x512xbf16>, vector<128x512xf32> -> vector<128x512xf32>
    %56 = arith.addf %55, %35 : vector<128x512xf32>
    %c0_33 = arith.constant 0 : index
    %c0_34 = arith.constant 0 : index
    %57 = vector.load %arg12[%c0_33, %c0_34] : memref<128x512xf32, #tpu.memory_space<vmem>>, vector<128x512xf32>
    tpu.vector_store %arg12[%c0_33, %c0_34], %56 {strides = array<i32>} : memref<128x512xf32, #tpu.memory_space<vmem>>, vector<128x512xf32>,
    return
  }
  func.func @transform_0(%arg0: i32) -> (i32, i32) {
    %c0_i32 = arith.constant 0 : i32
    %c0_i32_0 = arith.constant 0 : i32
    return %arg0, %c0_i32 : i32, i32
  }
  func.func @transform_1(%arg0: i32) -> (i32, i32) {
    %c0_i32 = arith.constant 0 : i32
    %c0_i32_0 = arith.constant 0 : i32
    return %arg0, %c0_i32 : i32, i32
  }
  func.func @transform_2(%arg0: i32) -> (i32, i32) {
    %c0_i32 = arith.constant 0 : i32
    %c0_i32_0 = arith.constant 0 : i32
    %c0_i32_1 = arith.constant 0 : i32
    return %c0_i32, %c0_i32_0 : i32, i32
  }
  func.func @transform_3(%arg0: i32) -> (i32, i32) {
    %c0_i32 = arith.constant 0 : i32
    %c0_i32_0 = arith.constant 0 : i32
    return %arg0, %c0_i32 : i32, i32
  }
  func.func @transform_4(%arg0: i32) -> (i32, i32) {
    %c0_i32 = arith.constant 0 : i32
    %c0_i32_0 = arith.constant 0 : i32
    %c0_i32_1 = arith.constant 0 : i32
    return %c0_i32, %c0_i32_0 : i32, i32
  }
  func.func @transform_5(%arg0: i32) -> (i32, i32) {
    %c0_i32 = arith.constant 0 : i32
    %c0_i32_0 = arith.constant 0 : i32
    %c0_i32_1 = arith.constant 0 : i32
    return %c0_i32, %c0_i32_0 : i32, i32
  }
  func.func @transform_6(%arg0: i32) -> (i32, i32) {
    %c0_i32 = arith.constant 0 : i32
    %c0_i32_0 = arith.constant 0 : i32
    %c0_i32_1 = arith.constant 0 : i32
    return %c0_i32, %c0_i32_0 : i32, i32
  }
  func.func @transform_7(%arg0: i32) -> (i32, i32) {
    %c0_i32 = arith.constant 0 : i32
    %c0_i32_0 = arith.constant 0 : i32
    %c0_i32_1 = arith.constant 0 : i32
    return %c0_i32, %c0_i32_0 : i32, i32
  }
  func.func @transform_8(%arg0: i32) -> (i32, i32) {
    %c0_i32 = arith.constant 0 : i32
    %c0_i32_0 = arith.constant 0 : i32
    %c0_i32_1 = arith.constant 0 : i32
    return %c0_i32, %c0_i32_0 : i32, i32
  }
  func.func @transform_9(%arg0: i32) -> (i32, i32) {
    %c0_i32 = arith.constant 0 : i32
    %c0_i32_0 = arith.constant 0 : i32
    %c0_i32_1 = arith.constant 0 : i32
    return %c0_i32, %c0_i32_0 : i32, i32
  }
  func.func @transform_10(%arg0: i32) -> (i32, i32) {
    %c0_i32 = arith.constant 0 : i32
    %c0_i32_0 = arith.constant 0 : i32
    %c0_i32_1 = arith.constant 0 : i32
    return %c0_i32, %c0_i32_0 : i32, i32
  }
  func.func @transform_11(%arg0: i32) -> (i32, i32) {
    %c0_i32 = arith.constant 0 : i32
    %c0_i32_0 = arith.constant 0 : i32
    return %arg0, %c0_i32 : i32, i32
  }
}

</mosaic_0001>

<bundles_post_ra>
// kernel: tpu_custom_call.1
= control target key start
LH: loop header
LB: loop body
LE: loop exit
PB: predicated region body
PF: predicated region fallthrough
CT: control target
= control target key end

     0   :  { %16 = vsyncpa [#allocation3], 0  ;;  %s16418_s0 = inlined_call_operand.hbm [shape: f32[128,768], index: 0, kind: input, shape index: {}]   ;;  %s16419_s1 = inlined_call_operand.vmem [shape: f32[128,32], index: 1, kind: input, shape index: {}]   ;;  %s16420_s2 = inlined_call_operand.hbm [shape: f32[8,512], index: 2, kind: input, shape index: {}]   ;;  %s16421_s3 = inlined_call_operand.vmem [shape: f32[128,8], index: 3, kind: input, shape index: {}]   ;;  %s16422_s4 = inlined_call_operand.hbm [shape: bf16[32,768], index: 4, kind: input, shape index: {}]   ;;  %s16423_s5 = inlined_call_operand.hbm [shape: f32[1,768], index: 5, kind: input, shape index: {}]   ;;  %s16424_s6 = inlined_call_operand.hbm [shape: bf16[768,768], index: 6, kind: input, shape index: {}]   ;;  %s16425_s7 = inlined_call_operand.hbm [shape: bf16[768,768], index: 7, kind: input, shape index: {}]   ;;  %s16426_s8 = inlined_call_operand.hbm [shape: f32[1,768], index: 8, kind: input, shape index: {}]   ;;  %s16427_s9 = inlined_call_operand.hbm [shape: bf16[768,512], index: 9, kind: input, shape index: {}]   ;;  %s16428_s10 = inlined_call_operand.hbm [shape: f32[1,512], index: 10, kind: input, shape index: {}]   ;;  %s16429_s11 = inlined_call_operand.hbm [shape: f32[128,512], index: 11, kind: output, shape index: {}]  }
   0x1   :  { %17 = vsyncpa [#allocation6], 0 }
   0x2   :  { %18 = vsyncpa [#allocation9], 0 }
   0x3   :  { %19 = vsyncpa [#allocation12], 0 }
   0x4   :  { %20 = vsyncpa [#allocation15], 0 }
   0x5   :  { %21 = vsyncpa [#allocation4], 0  ;;  %s13741_s17 = smov [#allocation5]   ;;  %s13742_s19 = smov [#allocation8]  }
   0x6   :  { %s42_s18 = sshll.u32 %s13741_s17, 4  ;;  %s66_s20 = sshll.u32 %s13742_s19, 4  ;;  %s43_s18 = int_to_ptr.vmem [resolvable:$true] %s42_s18  ;;  %s67_s20 = int_to_ptr.vmem [resolvable:$true] %s66_s20 }
   0x7   :  { %s13509_s23 = scalar_lea.hbm %s16420_s2, 512 }
   0x8   :  { %p13510_p0 = scmp.ne.s32.totalorder %s16420_s2, %s13509_s23  ;;  %p13513_p1 = scmp.lt.u32.totalorder %s13509_s23, %s16420_s2 }
   0xa   :  { %p13515_p2 = pnand %p13513_p1, %p13510_p0 }
   0xc   :  { %13518 = shalt.err (!%p13515_p2)
}
   0xd   :  { %s13519_s28 = scalar_lea.vmem %s43_s18, 512  ;;  %p13524_p4 = scmp.lt.s32.totalorder %s43_s18, %s43_s18 }
   0xe   :  { %p13520_p3 = scmp.ne.s32.totalorder %s43_s18, %s13519_s28  ;;  %p13525_p5 = scmp.lt.s32.totalorder %s13519_s28, %s13519_s28 }
  0x10   :  { %p13526_p6 = por %p13525_p5, %p13524_p4 }
  0x12   :  { %p13527_p7 = pnand %p13526_p6, %p13520_p3 }
  0x14   :  { %13530 = shalt.err (!%p13527_p7)
}
  0x15   :  { %45 = dma.hbm_to_vmem [thread:$0]  %s16420_s2, 512, %s43_s18, [#allocation6]  }
  0x16   :  { %s13531_s14 = scalar_lea.hbm %s16423_s5, 96 }
  0x17   :  { %p13532_p8 = scmp.ne.s32.totalorder %s16423_s5, %s13531_s14  ;;  %p13535_p9 = scmp.lt.u32.totalorder %s13531_s14, %s16423_s5 }
  0x19   :  { %p13537_p10 = pnand %p13535_p9, %p13532_p8 }
  0x1b   :  { %13540 = shalt.err (!%p13537_p10)
}
  0x1c   :  { %s13541_s21 = scalar_lea.vmem %s67_s20, 96  ;;  %p13546_p12 = scmp.lt.s32.totalorder %s67_s20, %s67_s20 }
  0x1d   :  { %p13542_p11 = scmp.ne.s32.totalorder %s67_s20, %s13541_s21  ;;  %p13547_p13 = scmp.lt.s32.totalorder %s13541_s21, %s13541_s21 }
  0x1f   :  { %p13548_p0 = por %p13547_p13, %p13546_p12 }
  0x21   :  { %p13549_p1 = pnand %p13548_p0, %p13542_p11 }
  0x23   :  { %13552 = shalt.err (!%p13549_p1)
}
  0x24   :  { %69 = dma.hbm_to_vmem [thread:$0]  %s16423_s5, 96, %s67_s20, [#allocation9]  }
  0x25   :  { %s13743_s22 = smov [#allocation11]   ;;  %s13744_s24 = smov [#allocation14]  }
  0x26   :  { %s87_s23 = sshll.u32 %s13743_s22, 4  ;;  %s109_s25 = sshll.u32 %s13744_s24, 4  ;;  %s88_s23 = int_to_ptr.vmem [resolvable:$true] %s87_s23  ;;  %s13844_s25 = int_to_ptr.vmem [resolvable:$true] %s109_s25 }
  0x27   :  { %s13553_s28 = scalar_lea.hbm %s16425_s7, 36864 }
  0x28   :  { %p13554_p2 = scmp.ne.s32.totalorder %s16425_s7, %s13553_s28  ;;  %p13557_p3 = scmp.lt.u32.totalorder %s13553_s28, %s16425_s7 }
  0x2a   :  { %p13559_p4 = pnand %p13557_p3, %p13554_p2 }
  0x2c   :  { %13562 = shalt.err (!%p13559_p4)
}
  0x2d   :  { %s13563_s5 = scalar_lea.vmem %s88_s23, 36864  ;;  %p13568_p6 = scmp.lt.s32.totalorder %s88_s23, %s88_s23 }
  0x2e   :  { %p13564_p5 = scmp.ne.s32.totalorder %s88_s23, %s13563_s5  ;;  %p13569_p7 = scmp.lt.s32.totalorder %s13563_s5, %s13563_s5 }
  0x30   :  { %p13570_p8 = por %p13569_p7, %p13568_p6 }
  0x32   :  { %p13571_p9 = pnand %p13570_p8, %p13564_p5 }
  0x34   :  { %13574 = shalt.err (!%p13571_p9)
}
  0x35   :  { %s13745_s20 = smov 384   ;;  %s13746_s14 = smov 24  }
  0x36   :  { %93 = dma.hbm_to_vmem [thread:$0]  %s16425_s7, 36864, %s88_s23, [#allocation12], %s13745_s20, %s13745_s20, %s13746_s14  }
  0x37   :  { %s13575_s21 = scalar_lea.hbm %s16427_s9, 24576 }
  0x38   :  { %p13576_p10 = scmp.ne.s32.totalorder %s16427_s9, %s13575_s21  ;;  %p13579_p11 = scmp.lt.u32.totalorder %s13575_s21, %s16427_s9 }
  0x3a   :  { %p13581_p12 = pnand %p13579_p11, %p13576_p10 }
  0x3c   :  { %13584 = shalt.err (!%p13581_p12)
}
  0x3d   :  { %s13585_s26 = scalar_lea.vmem %s13844_s25, 24576  ;;  %p13590_p0 = scmp.lt.s32.totalorder %s13844_s25, %s13844_s25 }
  0x3e   :  { %p13586_p13 = scmp.ne.s32.totalorder %s13844_s25, %s13585_s26  ;;  %p13591_p1 = scmp.lt.s32.totalorder %s13585_s26, %s13585_s26 }
  0x40   :  { %p13592_p2 = por %p13591_p1, %p13590_p0 }
  0x42   :  { %p13593_p3 = pnand %p13592_p2, %p13586_p13 }
  0x44   :  { %13596 = shalt.err (!%p13593_p3)
}
  0x45   :  { %s13747_s7 = smov 256   ;;  %s13748_s23 = smov 16  }
  0x46   :  { %115 = dma.hbm_to_vmem [thread:$0]  %s16427_s9, 24576, %s13844_s25, [#allocation15], %s13747_s7, %s13747_s7, %s13748_s23  }
  0x47   :  { %s13749_s29 = smov [#allocation2]   ;;  %s13597_s5 = scalar_lea.hbm %s16418_s0, 12288 }
  0x48   :  { %s27_s30 = sshll.u32 %s13749_s29, 4  ;;  %p13598_p4 = scmp.ne.s32.totalorder %s16418_s0, %s13597_s5  ;;  %s28_s30 = int_to_ptr.vmem [resolvable:$true] %s27_s30 }
  0x49   :  { %p13601_p5 = scmp.lt.u32.totalorder %s13597_s5, %s16418_s0 }
  0x4b   :  { %p13603_p6 = pnand %p13601_p5, %p13598_p4 }
  0x4d   :  { %13606 = shalt.err (!%p13603_p6)
}
  0x4e   :  { %s13607_s21 = scalar_lea.vmem %s28_s30, 12288  ;;  %p13612_p8 = scmp.lt.s32.totalorder %s28_s30, %s28_s30 }
  0x4f   :  { %p13608_p7 = scmp.ne.s32.totalorder %s28_s30, %s13607_s21  ;;  %p13613_p9 = scmp.lt.s32.totalorder %s13607_s21, %s13607_s21 }
  0x51   :  { %p13614_p10 = por %p13613_p9, %p13612_p8 }
  0x53   :  { %p13615_p11 = pnand %p13614_p10, %p13608_p7 }
  0x55   :  { %13618 = shalt.err (!%p13615_p11)
}
  0x56   :  { %s13750_s9 = smov 768   ;;  %s13751_s25 = smov 48  }
  0x57   :  { %33 = dma.hbm_to_vmem [thread:$0]  %s16418_s0, 12288, %s28_s30, [#allocation3], %s13750_s9, %s13750_s9, %s13751_s25  }
  0x58   :  { %s13752_s22 = smov [#allocation7]   ;;  %s13753_s26 = smov [#allocation10]  }
  0x59   :  { %s53_s24 = sshll.u32 %s13752_s22, 4  ;;  %s75_s7 = sshll.u32 %s13753_s26, 4  ;;  %s54_s24 = int_to_ptr.vmem [resolvable:$true] %s53_s24  ;;  %s76_s7 = int_to_ptr.vmem [resolvable:$true] %s75_s7 }
  0x5a   :  { %s13619_s28 = scalar_lea.hbm %s16422_s4, 1536 }
  0x5b   :  { %p13620_p12 = scmp.ne.s32.totalorder %s16422_s4, %s13619_s28  ;;  %p13623_p13 = scmp.lt.u32.totalorder %s13619_s28, %s16422_s4 }
  0x5d   :  { %p13625_p0 = pnand %p13623_p13, %p13620_p12 }
  0x5f   :  { %13628 = shalt.err (!%p13625_p0)
}
  0x60   :  { %s13629_s0 = scalar_lea.vmem %s54_s24, 1536  ;;  %p13634_p2 = scmp.lt.s32.totalorder %s54_s24, %s54_s24 }
  0x61   :  { %p13630_p1 = scmp.ne.s32.totalorder %s54_s24, %s13629_s0  ;;  %p13635_p3 = scmp.lt.s32.totalorder %s13629_s0, %s13629_s0 }
  0x63   :  { %p13636_p4 = por %p13635_p3, %p13634_p2 }
  0x65   :  { %p13637_p5 = pnand %p13636_p4, %p13630_p1 }
  0x67   :  { %13640 = shalt.err (!%p13637_p5)
}
  0x68   :  { %59 = dma.hbm_to_vmem [thread:$0]  %s16422_s4, 1536, %s54_s24, [#allocation6], %s13745_s20, %s13745_s20, %s13746_s14  }
  0x69   :  { %s13641_s19 = scalar_lea.hbm %s16424_s6, 36864 }
  0x6a   :  { %p13642_p6 = scmp.ne.s32.totalorder %s16424_s6, %s13641_s19  ;;  %p13645_p7 = scmp.lt.u32.totalorder %s13641_s19, %s16424_s6 }
  0x6c   :  { %p13647_p8 = pnand %p13645_p7, %p13642_p6 }
  0x6e   :  { %13650 = shalt.err (!%p13647_p8)
}
  0x6f   :  { %s13651_s18 = scalar_lea.vmem %s76_s7, 36864  ;;  %p13656_p10 = scmp.lt.s32.totalorder %s76_s7, %s76_s7 }
  0x70   :  { %p13652_p9 = scmp.ne.s32.totalorder %s76_s7, %s13651_s18  ;;  %p13657_p11 = scmp.lt.s32.totalorder %s13651_s18, %s13651_s18 }
  0x72   :  { %p13658_p12 = por %p13657_p11, %p13656_p10 }
  0x74   :  { %p13659_p13 = pnand %p13658_p12, %p13652_p9 }
  0x76   :  { %13662 = shalt.err (!%p13659_p13)
}
  0x77   :  { %81 = dma.hbm_to_vmem [thread:$0]  %s16424_s6, 36864, %s76_s7, [#allocation9], %s13745_s20, %s13745_s20, %s13746_s14  }
  0x78   :  { %s13754_s24 = smov [#allocation13]   ;;  %s13755_s23 = smov [#allocation16]  }
  0x79   :  { %s100_s26 = sshll.u32 %s13754_s24, 4  ;;  %s122_s27 = sshll.u32 %s13755_s23, 4  ;;  %s101_s26 = int_to_ptr.vmem [resolvable:$true] %s100_s26  ;;  %s123_s27 = int_to_ptr.vmem [resolvable:$true] %s122_s27 }
  0x7a   :  { %s13663_s12 = scalar_lea.hbm %s16426_s8, 96 }
  0x7b   :  { %p13664_p0 = scmp.ne.s32.totalorder %s16426_s8, %s13663_s12  ;;  %p13667_p1 = scmp.lt.u32.totalorder %s13663_s12, %s16426_s8 }
  0x7d   :  { %p13669_p2 = pnand %p13667_p1, %p13664_p0 }
  0x7f   :  { %13672 = shalt.err (!%p13669_p2)
}
  0x80   :  { %s13673_s6 = scalar_lea.vmem %s101_s26, 96  ;;  %p13678_p4 = scmp.lt.s32.totalorder %s101_s26, %s101_s26 }
  0x81   :  { %p13674_p3 = scmp.ne.s32.totalorder %s101_s26, %s13673_s6  ;;  %p13679_p5 = scmp.lt.s32.totalorder %s13673_s6, %s13673_s6 }
  0x83   :  { %p13680_p6 = por %p13679_p5, %p13678_p4 }
  0x85   :  { %p13681_p7 = pnand %p13680_p6, %p13674_p3 }
  0x87   :  { %13684 = shalt.err (!%p13681_p7)
}
  0x88   :  { %103 = dma.hbm_to_vmem [thread:$0]  %s16426_s8, 96, %s101_s26, [#allocation12]  }
  0x89   :  { %s13685_s16 = scalar_lea.hbm %s16428_s10, 64 }
  0x8a   :  { %p13686_p8 = scmp.ne.s32.totalorder %s16428_s10, %s13685_s16  ;;  %p13689_p9 = scmp.lt.u32.totalorder %s13685_s16, %s16428_s10 }
  0x8c   :  { %p13691_p10 = pnand %p13689_p9, %p13686_p8 }
  0x8e   :  { %13694 = shalt.err (!%p13691_p10)
}
  0x8f   :  { %s13695_s25 = scalar_lea.vmem %s123_s27, 64  ;;  %p13700_p12 = scmp.lt.s32.totalorder %s123_s27, %s123_s27 }
  0x90   :  { %p13696_p11 = scmp.ne.s32.totalorder %s123_s27, %s13695_s25  ;;  %p13701_p13 = scmp.lt.s32.totalorder %s13695_s25, %s13695_s25 }
  0x92   :  { %p13702_p0 = por %p13701_p13, %p13700_p12 }
  0x94   :  { %p13703_p1 = pnand %p13702_p0, %p13696_p11 }
  0x96   :  { %13706 = shalt.err (!%p13703_p1)
}
  0x97   :  { %125 = dma.hbm_to_vmem [thread:$0]  %s16428_s10, 64, %s123_s27, [#allocation15]  }
  0x98   :  { %13729 = dma.done.wait [#allocation3], 12288  }
  0x99   :  { %13730 = vsyncadd [#allocation3], 4294955008 }
  0x9a   :  { %13731 = dma.done.wait [#allocation6], 2048  }
  0x9b   :  { %13732 = vsyncadd [#allocation6], 4294965248 }
  0x9c   :  { %13733 = dma.done.wait [#allocation9], 36960  }
  0x9d   :  { %13734 = vsyncadd [#allocation9], 4294930336 }
  0x9e   :  { %13735 = dma.done.wait [#allocation12], 36960  }
  0x9f   :  { %13736 = vsyncadd [#allocation12], 4294930336 }
  0xa0   :  { %13737 = dma.done.wait [#allocation15], 24640  }
  0xa1   :  { %13738 = vsyncadd [#allocation15], 4294942656  ;;  %v16430_v0 = vmov 0   ;;  %v11792_v1 = vld [vmem:[#allocation7 + $0x4] ss:$24 sps:$4 sm:$0xff]   ;;  %v251_v6 = vld [vmem:[%s16419_s1 + $0x8] sm:$0xff] }
  0xa2   :  { %455 = vmatprep.mubr.bf16.mxu0 %v16430_v0  ;;  %495 = vmatprep.mubr.bf16.mxu1 %v16430_v0  ;;  %v11794_v2 = vld [vmem:[#allocation7] ss:$24 sps:$4 sm:$0xff]   ;;  %v11795_v3 = vld [vmem:[#allocation7 + $0x34] ss:$24 sps:$4 sm:$0xff]   ;;  %v11797_v4 = vld [vmem:[#allocation7 + $0x30] ss:$24 sps:$4 sm:$0xff]  }
  0xa3   :  { %423 = vmatprep.subr.bf16.mxu0 %v11792_v1  ;;  %11065 = vmatprep.subr.bf16.mxu1 %v11792_v1  ;;  %v250_v5 = vld [vmem:[%s16419_s1] sm:$0xff]  ;;  %v259_v8 = vld [vmem:[%s16419_s1 + $0x48] sm:$0xff]  ;;  %vm398_vm0 = vcmask 261120   ;;  %v252_v13 = vld [vmem:[%s16419_s1 + $0x10] sm:$0xff]  ;;  %vm9614_vm2 = vcmask 64512  }
  0xa4   :  { %424 = vmatpush1.bf16.msra.mxu0 %v11794_v2  ;;  %11067 = vmatpush1.bf16.msra.mxu1 %v11794_v2  ;;  %v258_v7 = vld [vmem:[%s16419_s1 + $0x40] sm:$0xff]  ;;  %v13958_v9 = vpack.c.bf16 %v251_v6, %v250_v5  ;;  %v253_v14 = vld [vmem:[%s16419_s1 + $0x18] sm:$0xff]  ;;  %v260_v15 = vld [vmem:[%s16419_s1 + $0x50] sm:$0xff] }
  0xa5   :  { %425 = vmatprep.subr.bf16.mxu0 %v11795_v3  ;;  %11066 = vmatprep.subr.bf16.mxu1 %v11795_v3  ;;  %v13960_v10 = vpack.c.bf16 %v259_v8, %v258_v7  ;;  %v11798_v11 = vld [vmem:[#allocation7 + $0x8] ss:$24 sps:$4 sm:$0xff]   ;;  %v11800_v12 = vld [vmem:[#allocation7 + $0xc] ss:$24 sps:$4 sm:$0xff]   ;;  %v11803_v16 = vld [vmem:[#allocation7 + $0x3c] ss:$24 sps:$4 sm:$0xff]   ;;  %v287_v22 = vpack.c.bf16 %v253_v14, %v252_v13 }
  0xa6   :  { %v261_v17 = vld [vmem:[%s16419_s1 + $0x58] sm:$0xff]  ;;  %v11804_v19 = vld [vmem:[#allocation7 + $0x10] ss:$24 sps:$4 sm:$0xff]   ;;  %v11806_v20 = vld [vmem:[#allocation7 + $0x14] ss:$24 sps:$4 sm:$0xff]  }
  0xa7   :  { %v11801_v18 = vld [vmem:[#allocation7 + $0x38] ss:$24 sps:$4 sm:$0xff]   ;;  %v11809_v21 = vld [vmem:[#allocation7 + $0x44] ss:$24 sps:$4 sm:$0xff]   ;;  %v13980_v23 = vpack.c.bf16 %v261_v17, %v260_v15  ;;  %v255_v28 = vld [vmem:[%s16419_s1 + $0x28] sm:$0xff] }
  0xa8   :  { %426 = vmatpush1.bf16.msra.mxu0 %v11797_v4  ;;  %11068 = vmatpush1.bf16.msra.mxu1 %v11797_v4  ;;  %v11812_v24 = vld [vmem:[#allocation11 + $0x4] ss:$24 sps:$4 sm:$0xff]   ;;  %v256_v33 = vld [vmem:[%s16419_s1 + $0x30] sm:$0xff]  ;;  %v257_v34 = vld [vmem:[%s16419_s1 + $0x38] sm:$0xff] }
  0xa9   :  { %536 = vmatprep.subr.bf16.mxu1 %v11800_v12  ;;  %649 = vmatprep.subr.bf16.mxu0 %v11806_v20  ;;  %v11807_v25 = vld [vmem:[#allocation7 + $0x40] ss:$24 sps:$4 sm:$0xff]   ;;  %v11815_v26 = vld [vmem:[#allocation11 + $0xc] ss:$24 sps:$4 sm:$0xff]   ;;  %v14018_v37 = vpack.c.bf16 %v257_v34, %v256_v33  ;;  %v11813_v40 = vld [vmem:[#allocation11 + $0x8] ss:$24 sps:$4 sm:$0xff]  }
  0xaa   :  { %v254_v27 = vld [vmem:[%s16419_s1 + $0x20] sm:$0xff]  ;;  %v263_v30 = vld [vmem:[%s16419_s1 + $0x68] sm:$0xff]  ;;  %v264_v35 = vld [vmem:[%s16419_s1 + $0x70] sm:$0xff] }
  0xab   :  { %10159 = vmatmul.mubr.msk.bf16.vlgmr.msra.gmra.mrb[0].mxu0 %vm398_vm0, %v13958_v9  ;;  %10163 = vmatmul.mubr.msk.bf16.vlgmr.msra.gmra.mrb[0].mxu1 %vm398_vm0, %v13960_v10  ;;  %v262_v29 = vld [vmem:[%s16419_s1 + $0x60] sm:$0xff]  ;;  %v288_v31 = vpack.c.bf16 %v255_v28, %v254_v27  ;;  %v265_v36 = vld [vmem:[%s16419_s1 + $0x78] sm:$0xff]  ;;  %v11827_v46 = vld [vmem:[#allocation11 + $0x6c] ss:$24 sps:$4 sm:$0xff]  }
  0xac   :  { %465 = vmatprep.mubr.bf16.mxu0 %v16430_v0  ;;  %537 = vmatpush1.bf16.msra.mxu1 %v11798_v11  ;;  %v13999_v32 = vpack.c.bf16 %v263_v30, %v262_v29  ;;  %v14020_v38 = vpack.c.bf16 %v265_v36, %v264_v35  ;;  %v11810_v39 = vld [vmem:[#allocation11] ss:$24 sps:$4 sm:$0xff]   ;;  %v11818_v41 = vld [vmem:[#allocation11 + $0x34] ss:$24 sps:$4 sm:$0xff]   ;;  %v11816_v43 = vld [vmem:[#allocation11 + $0x30] ss:$24 sps:$4 sm:$0xff]  }
  0xad   :  { %505 = vmatprep.mubr.bf16.mxu1 %v16430_v0  ;;  %538 = vmatprep.subr.bf16.mxu1 %v11803_v16  ;;  %v11821_v42 = vld [vmem:[#allocation11 + $0x3c] ss:$24 sps:$4 sm:$0xff]   ;;  %v11819_v44 = vld [vmem:[#allocation11 + $0x38] ss:$24 sps:$4 sm:$0xff]   ;;  %v11825_v48 = vld [vmem:[#allocation11 + $0x68] ss:$24 sps:$4 sm:$0xff]  }
  0xae   :  { %650 = vmatpush1.bf16.msra.mxu0 %v11804_v19  ;;  %v11824_v45 = vld [vmem:[#allocation11 + $0x64] ss:$24 sps:$4 sm:$0xff]   ;;  %v11822_v47 = vld [vmem:[#allocation11 + $0x60] ss:$24 sps:$4 sm:$0xff]   ;;  %v11830_v49 = vld [vmem:[#allocation11 + $0x94] ss:$24 sps:$4 sm:$0xff]  }
  0xaf   :  { %651 = vmatprep.subr.bf16.mxu0 %v11809_v21  ;;  %v11833_v50 = vld [vmem:[#allocation11 + $0x9c] ss:$24 sps:$4 sm:$0xff]   ;;  %v11828_v51 = vld [vmem:[#allocation11 + $0x90] ss:$24 sps:$4 sm:$0xff]   ;;  %v11839_v54 = vld [vmem:[#allocation11 + $0xcc] ss:$24 sps:$4 sm:$0xff]  }
  0xb0   :  { %539 = vmatpush1.bf16.msra.mxu1 %v11801_v18  ;;  %v11831_v52 = vld [vmem:[#allocation11 + $0x98] ss:$24 sps:$4 sm:$0xff]   ;;  %v11836_v53 = vld [vmem:[#allocation11 + $0xc4] ss:$24 sps:$4 sm:$0xff]   ;;  %v11837_v56 = vld [vmem:[#allocation11 + $0xc8] ss:$24 sps:$4 sm:$0xff]  }
  0xb1   :  { %2874 = vmatprep.subr.bf16.mxu1 %v11812_v24  ;;  %v11834_v55 = vld [vmem:[#allocation11 + $0xc0] ss:$24 sps:$4 sm:$0xff]   ;;  %v11842_v57 = vld [vmem:[#allocation11 + $0xf4] ss:$24 sps:$4 sm:$0xff]   ;;  %v11840_v59 = vld [vmem:[#allocation11 + $0xf0] ss:$24 sps:$4 sm:$0xff]  }
  0xb2   :  { %652 = vmatpush1.bf16.msra.mxu0 %v11807_v25  ;;  %v11845_v58 = vld [vmem:[#allocation11 + $0xfc] ss:$24 sps:$4 sm:$0xff]   ;;  %v11843_v60 = vld [vmem:[#allocation11 + $0xf8] ss:$24 sps:$4 sm:$0xff]   ;;  %v11851_v62 = vld [vmem:[#allocation11 + $0x12c] ss:$24 sps:$4 sm:$0xff]  }
  0xb3   :  { %10160 = vmatmul.mubr.msk.bf16.gmra.mrb[4].mxu0 %vm398_vm0, %v287_v22  ;;  %10164 = vmatmul.mubr.msk.bf16.gmra.mrb[4].mxu1 %vm398_vm0, %v13980_v23  ;;  %v11848_v61 = vld [vmem:[#allocation11 + $0x124] ss:$24 sps:$4 sm:$0xff]   ;;  %v11846_v63 = vld [vmem:[#allocation11 + $0x120] ss:$24 sps:$4 sm:$0xff]   ;;  %v11854_v2 = vld [vmem:[#allocation11 + $0x154] ss:$24 sps:$4 sm:$0xff]  }
  0xb4   :  { %475 = vmatprep.mubr.bf16.mxu0 %v16430_v0  ;;  %515 = vmatprep.mubr.bf16.mxu1 %v16430_v0  ;;  %v11849_v1 = vld [vmem:[#allocation11 + $0x128] ss:$24 sps:$4 sm:$0xff]   ;;  %v11857_v3 = vld [vmem:[#allocation11 + $0x15c] ss:$24 sps:$4 sm:$0xff]   ;;  %v11855_v5 = vld [vmem:[#allocation11 + $0x158] ss:$24 sps:$4 sm:$0xff]  }
  0xb5   :  { %3213 = vmatprep.subr.bf16.mxu0 %v11815_v26  ;;  %v11852_v4 = vld [vmem:[#allocation11 + $0x150] ss:$24 sps:$4 sm:$0xff]   ;;  %v11860_v6 = vld [vmem:[#allocation11 + $0x184] ss:$24 sps:$4 sm:$0xff]   ;;  %v11858_v8 = vld [vmem:[#allocation11 + $0x180] ss:$24 sps:$4 sm:$0xff]  }
  0xb6   :  { %v11863_v7 = vld [vmem:[#allocation11 + $0x18c] ss:$24 sps:$4 sm:$0xff]   ;;  %v11869_v12 = vld [vmem:[#allocation11 + $0x1bc] ss:$24 sps:$4 sm:$0xff]   ;;  %v11864_v13 = vld [vmem:[#allocation11 + $0x1b0] ss:$24 sps:$4 sm:$0xff]  }
  0xb7   :  { %v11866_v11 = vld [vmem:[#allocation11 + $0x1b4] ss:$24 sps:$4 sm:$0xff]   ;;  %v11867_v14 = vld [vmem:[#allocation11 + $0x1b8] ss:$24 sps:$4 sm:$0xff]   ;;  %v11872_v15 = vld [vmem:[#allocation11 + $0x1e4] ss:$24 sps:$4 sm:$0xff]  }
  0xb8   :  { %v11875_v16 = vld [vmem:[#allocation11 + $0x1ec] ss:$24 sps:$4 sm:$0xff]   ;;  %v11870_v17 = vld [vmem:[#allocation11 + $0x1e0] ss:$24 sps:$4 sm:$0xff]   ;;  %v11881_v20 = vld [vmem:[#allocation11 + $0x21c] ss:$24 sps:$4 sm:$0xff]  }
  0xb9   :  { %v11873_v18 = vld [vmem:[#allocation11 + $0x1e8] ss:$24 sps:$4 sm:$0xff]   ;;  %v11878_v19 = vld [vmem:[#allocation11 + $0x214] ss:$24 sps:$4 sm:$0xff]   ;;  %v11879_v21 = vld [vmem:[#allocation11 + $0x218] ss:$24 sps:$4 sm:$0xff]  }
  0xba   :  { %v11887_v24 = vld [vmem:[#allocation11 + $0x24c] ss:$24 sps:$4 sm:$0xff]   ;;  %v11882_v25 = vld [vmem:[#allocation11 + $0x240] ss:$24 sps:$4 sm:$0xff]   ;;  %v11893_v28 = vld [vmem:[#allocation11 + $0x27c] ss:$24 sps:$4 sm:$0xff]  }
  0xbb   :  { %10161 = vmatmul.mubr.msk.bf16.gmra.mrb[8].mxu0 %vm398_vm0, %v288_v31  ;;  %10165 = vmatmul.mubr.msk.bf16.gmra.mrb[8].mxu1 %vm398_vm0, %v13999_v32  ;;  %v11885_v26 = vld [vmem:[#allocation11 + $0x248] ss:$24 sps:$4 sm:$0xff]   ;;  %v11890_v27 = vld [vmem:[#allocation11 + $0x274] ss:$24 sps:$4 sm:$0xff]   ;;  %v11891_v29 = vld [vmem:[#allocation11 + $0x278] ss:$24 sps:$4 sm:$0xff]  }
  0xbc   :  { %485 = vmatprep.mubr.bf16.mxu0 %v16430_v0  ;;  %525 = vmatprep.mubr.bf16.mxu1 %v16430_v0  ;;  %v11896_v30 = vld [vmem:[#allocation11 + $0x2a4] ss:$24 sps:$4 sm:$0xff]   ;;  %v11894_v33 = vld [vmem:[#allocation11 + $0x2a0] ss:$24 sps:$4 sm:$0xff]   ;;  %v11902_v35 = vld [vmem:[#allocation11 + $0x2d4] ss:$24 sps:$4 sm:$0xff]  }
  0xbd   :  { %v11897_v34 = vld [vmem:[#allocation11 + $0x2a8] ss:$24 sps:$4 sm:$0xff]  }
  0xbe   :  { %v11900_v36 = vld [vmem:[#allocation11 + $0x2d0] ss:$24 sps:$4 sm:$0xff]  }
  0xc3   :  { %10162 = vmatmul.mubr.msk.bf16.gmra.mrb[12].mxu0 %vm398_vm0, %v14018_v37  ;;  %10166 = vmatmul.mubr.msk.bf16.gmra.mrb[12].mxu1 %vm398_vm0, %v14020_v38 }
  0xc4   :  { %568 = vmatprep.mubr.bf16.mxu1 %v16430_v0  ;;  %681 = vmatprep.mubr.bf16.mxu0 %v16430_v0 }
  0xcb   :  { %10167 = vmatmul.mubr.msk.bf16.vlgmr.msra.gmra.mrb[16].mxu1 %vm398_vm0, %v13958_v9  ;;  %10175 = vmatmul.mubr.msk.bf16.vlgmr.msra.gmra.mrb[16].mxu0 %vm398_vm0, %v13958_v9  ;;  %v11861_v9 = vld [vmem:[#allocation11 + $0x188] ss:$24 sps:$4 sm:$0xff]  }
  0xcc   :  { %578 = vmatprep.mubr.bf16.mxu1 %v16430_v0  ;;  %691 = vmatprep.mubr.bf16.mxu0 %v16430_v0 }
  0xcd   :  { %2875 = vmatpush1.bf16.msra.mxu1 %v11810_v39  ;;  %3214 = vmatpush1.bf16.msra.mxu0 %v11813_v40  ;;  %v11908_v39 = vld [vmem:[#allocation11 + $0x304] ss:$24 sps:$4 sm:$0xff]  }
  0xce   :  { %2876 = vmatprep.subr.bf16.mxu1 %v11818_v41  ;;  %3215 = vmatprep.subr.bf16.mxu0 %v11821_v42  ;;  %v11911_v40 = vld [vmem:[#allocation11 + $0x30c] ss:$24 sps:$4 sm:$0xff]   ;;  %v308_v41 = vlaneseq }
  0xd0   :  { %v14070_v42 = vshrl.u32 %v308_v41, 7 }
  0xd1   :  { %2877 = vmatpush1.bf16.msra.mxu1 %v11816_v43  ;;  %3216 = vmatpush1.bf16.msra.mxu0 %v11819_v44  ;;  %v14072_v43 = vld [vmem:[#allocation8] sm:$0x3f] }
  0xd2   :  { %2878 = vmatprep.subr.bf16.mxu1 %v11824_v45  ;;  %3217 = vmatprep.subr.bf16.mxu0 %v11827_v46  ;;  %16624 = vst [vmem:[#allocation24_spill] sm:$0xff] %v14070_v42  ;;  %v14075_v44 = vsub.s32 1, %v14070_v42 }
  0xd3   :  { %10168 = vmatmul.mubr.msk.bf16.gmra.mrb[20].mxu1 %vm398_vm0, %v287_v22  ;;  %10176 = vmatmul.mubr.msk.bf16.gmra.mrb[20].mxu0 %vm398_vm0, %v287_v22  ;;  %v11884_v22 = vld [vmem:[#allocation11 + $0x244] ss:$24 sps:$4 sm:$0xff]  }
  0xd4   :  { %588 = vmatprep.mubr.bf16.mxu1 %v16430_v0  ;;  %701 = vmatprep.mubr.bf16.mxu0 %v16430_v0  ;;  %16625 = vst [vmem:[#allocation25_spill] sm:$0xff] %v14075_v44  ;;  %v14082_v46 = vrot.slane %v14072_v43, %v14075_v44 }
  0xd5   :  { %2879 = vmatpush1.bf16.msra.mxu1 %v11822_v47  ;;  %3218 = vmatpush1.bf16.msra.mxu0 %v11825_v48 }
  0xd6   :  { %2880 = vmatprep.subr.bf16.mxu1 %v11830_v49  ;;  %3219 = vmatprep.subr.bf16.mxu0 %v11833_v50 }
  0xd9   :  { %2881 = vmatpush1.bf16.msra.mxu1 %v11828_v51  ;;  %3220 = vmatpush1.bf16.msra.mxu0 %v11831_v52 }
  0xda   :  { %2882 = vmatprep.subr.bf16.mxu1 %v11836_v53  ;;  %3221 = vmatprep.subr.bf16.mxu0 %v11839_v54 }
  0xdb   :  { %10169 = vmatmul.mubr.msk.bf16.gmra.mrb[24].mxu1 %vm398_vm0, %v288_v31  ;;  %10177 = vmatmul.mubr.msk.bf16.gmra.mrb[24].mxu0 %vm398_vm0, %v288_v31  ;;  %v11899_v31 = vld [vmem:[#allocation11 + $0x2ac] ss:$24 sps:$4 sm:$0xff]  }
  0xdc   :  { %598 = vmatprep.mubr.bf16.mxu1 %v16430_v0  ;;  %711 = vmatprep.mubr.bf16.mxu0 %v16430_v0 }
  0xdd   :  { %2883 = vmatpush1.bf16.msra.mxu1 %v11834_v55  ;;  %3222 = vmatpush1.bf16.msra.mxu0 %v11837_v56 }
  0xde   :  { %2884 = vmatprep.subr.bf16.mxu1 %v11842_v57  ;;  %3223 = vmatprep.subr.bf16.mxu0 %v11845_v58  ;;  %v11906_v58 = vld [vmem:[#allocation11 + $0x300] ss:$24 sps:$4 sm:$0xff]  }
  0xe1   :  { %2885 = vmatpush1.bf16.msra.mxu1 %v11840_v59  ;;  %3224 = vmatpush1.bf16.msra.mxu0 %v11843_v60 }
  0xe2   :  { %2886 = vmatprep.subr.bf16.mxu1 %v11848_v61  ;;  %3225 = vmatprep.subr.bf16.mxu0 %v11851_v62  ;;  %v11909_v61 = vld [vmem:[#allocation11 + $0x308] ss:$24 sps:$4 sm:$0xff]   ;;  %v11914_v62 = vld [vmem:[#allocation11 + $0x334] ss:$24 sps:$4 sm:$0xff]  }
  0xe3   :  { %10170 = vmatmul.mubr.msk.bf16.gmra.mrb[28].mxu1 %vm398_vm0, %v14018_v37  ;;  %10178 = vmatmul.mubr.msk.bf16.gmra.mrb[28].mxu0 %vm398_vm0, %v14018_v37  ;;  %v11903_v37 = vld [vmem:[#allocation11 + $0x2d8] ss:$24 sps:$4 sm:$0xff]  }
  0xe4   :  { %608 = vmatprep.mubr.bf16.mxu1 %v16430_v0  ;;  %721 = vmatprep.mubr.bf16.mxu0 %v16430_v0 }
  0xe5   :  { %2887 = vmatpush1.bf16.msra.mxu1 %v11846_v63  ;;  %3226 = vmatpush1.bf16.msra.mxu0 %v11849_v1  ;;  %v11917_v1 = vld [vmem:[#allocation11 + $0x33c] ss:$24 sps:$4 sm:$0xff]  }
  0xe6   :  { %2888 = vmatprep.subr.bf16.mxu1 %v11854_v2  ;;  %3227 = vmatprep.subr.bf16.mxu0 %v11857_v3  ;;  %v11912_v3 = vld [vmem:[#allocation11 + $0x330] ss:$24 sps:$4 sm:$0xff]  }
  0xe9   :  { %2889 = vmatpush1.bf16.msra.mxu1 %v11852_v4  ;;  %3228 = vmatpush1.bf16.msra.mxu0 %v11855_v5 }
  0xea   :  { %2890 = vmatprep.subr.bf16.mxu1 %v11860_v6  ;;  %3229 = vmatprep.subr.bf16.mxu0 %v11863_v7 }
  0xeb   :  { %10171 = vmatmul.mubr.msk.bf16.gmra.mrb[32].mxu1 %vm398_vm0, %v13960_v10  ;;  %10179 = vmatmul.mubr.msk.bf16.gmra.mrb[32].mxu0 %vm398_vm0, %v13960_v10  ;;  %v11876_v10 = vld [vmem:[#allocation11 + $0x210] ss:$24 sps:$4 sm:$0xff]  }
  0xec   :  { %618 = vmatprep.mubr.bf16.mxu1 %v16430_v0  ;;  %731 = vmatprep.mubr.bf16.mxu0 %v16430_v0 }
  0xed   :  { %2891 = vmatpush1.bf16.msra.mxu1 %v11858_v8  ;;  %3230 = vmatpush1.bf16.msra.mxu0 %v11861_v9  ;;  %v11915_v8 = vld [vmem:[#allocation11 + $0x338] ss:$24 sps:$4 sm:$0xff]   ;;  %v11920_v9 = vld [vmem:[#allocation11 + $0x364] ss:$24 sps:$4 sm:$0xff]  }
  0xee   :  { %2892 = vmatprep.subr.bf16.mxu1 %v11866_v11  ;;  %3231 = vmatprep.subr.bf16.mxu0 %v11869_v12 }
  0xf1   :  { %2893 = vmatpush1.bf16.msra.mxu1 %v11864_v13  ;;  %3232 = vmatpush1.bf16.msra.mxu0 %v11867_v14  ;;  %v11923_v14 = vld [vmem:[#allocation11 + $0x36c] ss:$24 sps:$4 sm:$0xff]  }
  0xf2   :  { %2894 = vmatprep.subr.bf16.mxu1 %v11872_v15  ;;  %3233 = vmatprep.subr.bf16.mxu0 %v11875_v16 }
  0xf3   :  { %10172 = vmatmul.mubr.msk.bf16.gmra.mrb[36].mxu1 %vm398_vm0, %v13980_v23  ;;  %10180 = vmatmul.mubr.msk.bf16.gmra.mrb[36].mxu0 %vm398_vm0, %v13980_v23  ;;  %v11888_v23 = vld [vmem:[#allocation11 + $0x270] ss:$24 sps:$4 sm:$0xff]  }
  0xf4   :  { %628 = vmatprep.mubr.bf16.mxu1 %v16430_v0  ;;  %741 = vmatprep.mubr.bf16.mxu0 %v16430_v0 }
  0xf5   :  { %2895 = vmatpush1.bf16.msra.mxu1 %v11870_v17  ;;  %3234 = vmatpush1.bf16.msra.mxu0 %v11873_v18  ;;  %v11918_v18 = vld [vmem:[#allocation11 + $0x360] ss:$24 sps:$4 sm:$0xff]  }
  0xf6   :  { %2896 = vmatprep.subr.bf16.mxu1 %v11878_v19  ;;  %3235 = vmatprep.subr.bf16.mxu0 %v11881_v20 }
  0xf9   :  { %2897 = vmatpush1.bf16.msra.mxu1 %v11876_v10  ;;  %3236 = vmatpush1.bf16.msra.mxu0 %v11879_v21  ;;  %v11921_v10 = vld [vmem:[#allocation11 + $0x368] ss:$24 sps:$4 sm:$0xff]   ;;  %v11926_v21 = vld [vmem:[#allocation11 + $0x394] ss:$24 sps:$4 sm:$0xff]  }
  0xfa   :  { %2898 = vmatprep.subr.bf16.mxu1 %v11884_v22  ;;  %3237 = vmatprep.subr.bf16.mxu0 %v11887_v24  ;;  %v11929_v24 = vld [vmem:[#allocation11 + $0x39c] ss:$24 sps:$4 sm:$0xff]  }
  0xfb   :  { %10173 = vmatmul.mubr.msk.bf16.gmra.mrb[40].mxu1 %vm398_vm0, %v13999_v32  ;;  %10181 = vmatmul.mubr.msk.bf16.gmra.mrb[40].mxu0 %vm398_vm0, %v13999_v32  ;;  %v11905_v32 = vld [vmem:[#allocation11 + $0x2dc] ss:$24 sps:$4 sm:$0xff]  }
  0xfc   :  { %638 = vmatprep.mubr.bf16.mxu1 %v16430_v0  ;;  %751 = vmatprep.mubr.bf16.mxu0 %v16430_v0 }
  0xfd   :  { %2899 = vmatpush1.bf16.msra.mxu1 %v11882_v25  ;;  %3238 = vmatpush1.bf16.msra.mxu0 %v11885_v26  ;;  %v11924_v26 = vld [vmem:[#allocation11 + $0x390] ss:$24 sps:$4 sm:$0xff]  }
  0xfe   :  { %2900 = vmatprep.subr.bf16.mxu1 %v11890_v27  ;;  %3239 = vmatprep.subr.bf16.mxu0 %v11893_v28 }
 0x101   :  { %2901 = vmatpush1.bf16.msra.mxu1 %v11888_v23  ;;  %3240 = vmatpush1.bf16.msra.mxu0 %v11891_v29 }
 0x102   :  { %2902 = vmatprep.subr.bf16.mxu1 %v11896_v30  ;;  %3241 = vmatprep.subr.bf16.mxu0 %v11899_v31  ;;  %v11927_v30 = vld [vmem:[#allocation11 + $0x398] ss:$24 sps:$4 sm:$0xff]   ;;  %v11932_v31 = vld [vmem:[#allocation11 + $0x3c4] ss:$24 sps:$4 sm:$0xff]  }
 0x103   :  { %10174 = vmatmul.mubr.msk.bf16.gmra.mrb[44].mxu1 %vm398_vm0, %v14020_v38  ;;  %10182 = vmatmul.mubr.msk.bf16.gmra.mrb[44].mxu0 %vm398_vm0, %v14020_v38  ;;  %v14078_v38 = vsub.s32 0, %v14070_v42 }
 0x105   :  { %2903 = vmatpush1.bf16.msra.mxu1 %v11894_v33  ;;  %3242 = vmatpush1.bf16.msra.mxu0 %v11897_v34  ;;  %16626 = vst [vmem:[#allocation26_spill] sm:$0xff] %v14078_v38  ;;  %v14088_v48 = vrot.slane %v14072_v43, %v14078_v38 }
 0x106   :  { %2904 = vmatprep.subr.bf16.mxu1 %v11902_v35  ;;  %3243 = vmatprep.subr.bf16.mxu0 %v11905_v32  ;;  %v11935_v32 = vld [vmem:[#allocation11 + $0x3cc] ss:$24 sps:$4 sm:$0xff]  }
 0x109   :  { %2905 = vmatpush1.bf16.msra.mxu1 %v11900_v36  ;;  %3244 = vmatpush1.bf16.msra.mxu0 %v11903_v37 }
 0x10a   :  { %2987 = vmatprep.subr.bf16.mxu1 %v11908_v39  ;;  %3326 = vmatprep.subr.bf16.mxu0 %v11911_v40  ;;  %v11930_v40 = vld [vmem:[#allocation11 + $0x3c0] ss:$24 sps:$4 sm:$0xff]  }
 0x17e   :  { %v457_v45 = vpop.f32.mrb[0].mxu0  ;;  %v14084_v47 = vpop.f32.mrb[0].mxu1 }
 0x17f   :  { %v459_v49 = vpop.f32.mrb[1].mxu0  ;;  %v14090_v50 = vpop.f32.mrb[1].mxu1  ;;  %v14106_v59 = vadd.f32 %v457_v45, %v14088_v48 }
 0x180   :  { %v461_v51 = vpop.f32.mrb[2].mxu0  ;;  %v14092_v52 = vpop.f32.mrb[2].mxu1  ;;  %v14100_v56 = vadd.f32 %v459_v49, %v14082_v46  ;;  %v11933_v49 = vld [vmem:[#allocation11 + $0x3c8] ss:$24 sps:$4 sm:$0xff]  }
 0x181   :  { %v14095_v53 = vadd.f32 %v461_v51, %v14088_v48  ;;  %v463_v54 = vpop.f32.mrb[3].mxu0  ;;  %v14097_v55 = vpop.f32.mrb[3].mxu1  ;;  %16630 = vst [vmem:[#allocation30_spill] sm:$0xff] %v14106_v59  ;;  %v11938_v51 = vld [vmem:[#allocation11 + $0x3f4] ss:$24 sps:$4 sm:$0xff]  }
 0x182   :  { %16628 = vst [vmem:[#allocation28_spill] sm:$0xff] %v14100_v56  ;;  %v14103_v57 = vadd.f32 %v463_v54, %v14082_v46 }
 0x183   :  { %16627 = vst [vmem:[#allocation27_spill] sm:$0xff] %v14095_v53  ;;  %v14114_v63 = vpack.c.bf16 %v14095_v53, %v14106_v59 }
 0x184   :  { %16629 = vst [vmem:[#allocation29_spill] sm:$0xff] %v14103_v57  ;;  %v14110_v60 = vpack.c.bf16 %v14103_v57, %v14100_v56 }
 0x185   :  { %16632 = vst [vmem:[#allocation32_spill] sm:$0xff] %v14114_v63 }
 0x186   :  { %16631 = vst [vmem:[#allocation31_spill] sm:$0xff] %v14110_v60  ;;  %v467_v2 = vpop.f32.mrb[4].mxu0  ;;  %2906 = vmatprep.mubr.bf16.mxu1 %v14110_v60  ;;  %3245 = vmatprep.mubr.bf16.mxu0 %v14110_v60  ;;  %v14118_v4 = vpop.f32.mrb[4].mxu1  ;;  %v12046_v60 = vld [vmem:[#allocation11 + $0x754] ss:$24 sps:$4 sm:$0xff]  }
 0x187   :  { %v469_v5 = vpop.f32.mrb[5].mxu0  ;;  %2907 = vmatmul.mubr.bf16.vlgmr.msra.gmra.mrb[48].mxu1 %v14114_v63  ;;  %3246 = vmatmul.mubr.bf16.vlgmr.msra.gmra.mrb[48].mxu0 %v14114_v63  ;;  %v14122_v6 = vpop.f32.mrb[5].mxu1  ;;  %v14138_v19 = vadd.f32 %v467_v2, %v14088_v48 }
 0x188   :  { %2988 = vmatpush1.bf16.msra.mxu1 %v11906_v58  ;;  %v471_v7 = vpop.f32.mrb[6].mxu0  ;;  %3327 = vmatpush1.bf16.msra.mxu0 %v11909_v61  ;;  %v14124_v11 = vpop.f32.mrb[6].mxu1  ;;  %v14132_v16 = vadd.f32 %v469_v5, %v14082_v46  ;;  %v11941_v58 = vld [vmem:[#allocation11 + $0x3fc] ss:$24 sps:$4 sm:$0xff]  }
 0x189   :  { %v14127_v12 = vadd.f32 %v471_v7, %v14088_v48  ;;  %v473_v13 = vpop.f32.mrb[7].mxu0  ;;  %2989 = vmatprep.subr.bf16.mxu1 %v11914_v62  ;;  %3328 = vmatprep.subr.bf16.mxu0 %v11917_v1  ;;  %v14129_v15 = vpop.f32.mrb[7].mxu1  ;;  %16636 = vst [vmem:[#allocation36_spill] sm:$0xff] %v14138_v19  ;;  %v11936_v62 = vld [vmem:[#allocation11 + $0x3f0] ss:$24 sps:$4 sm:$0xff]  }
 0x18a   :  { %16634 = vst [vmem:[#allocation34_spill] sm:$0xff] %v14132_v16  ;;  %v14135_v17 = vadd.f32 %v473_v13, %v14082_v46  ;;  %v11939_v7 = vld [vmem:[#allocation11 + $0x3f8] ss:$24 sps:$4 sm:$0xff]  }
 0x18b   :  { %16633 = vst [vmem:[#allocation33_spill] sm:$0xff] %v14127_v12  ;;  %v14146_v22 = vpack.c.bf16 %v14127_v12, %v14138_v19 }
 0x18c   :  { %16635 = vst [vmem:[#allocation35_spill] sm:$0xff] %v14135_v17  ;;  %v14142_v20 = vpack.c.bf16 %v14135_v17, %v14132_v16  ;;  %2990 = vmatpush1.bf16.msra.mxu1 %v11912_v3  ;;  %3329 = vmatpush1.bf16.msra.mxu0 %v11915_v8  ;;  %v11944_v8 = vld [vmem:[#allocation11 + $0x424] ss:$24 sps:$4 sm:$0xff]  }
 0x18d   :  { %16638 = vst [vmem:[#allocation38_spill] sm:$0xff] %v14146_v22  ;;  %2991 = vmatprep.subr.bf16.mxu1 %v11920_v9  ;;  %3330 = vmatprep.subr.bf16.mxu0 %v11923_v14 }
 0x18e   :  { %16637 = vst [vmem:[#allocation37_spill] sm:$0xff] %v14142_v20  ;;  %v477_v25 = vpop.f32.mrb[8].mxu0  ;;  %2916 = vmatprep.mubr.bf16.mxu1 %v14142_v20  ;;  %3255 = vmatprep.mubr.bf16.mxu0 %v14142_v20  ;;  %v14150_v27 = vpop.f32.mrb[8].mxu1  ;;  %v12037_v20 = vld [vmem:[#allocation11 + $0x6fc] ss:$24 sps:$4 sm:$0xff]  }
 0x18f   :  { %v479_v28 = vpop.f32.mrb[9].mxu0  ;;  %2917 = vmatmul.mubr.bf16.gmra.mrb[52].mxu1 %v14146_v22  ;;  %3256 = vmatmul.mubr.bf16.gmra.mrb[52].mxu0 %v14146_v22  ;;  %v14154_v23 = vpop.f32.mrb[9].mxu1  ;;  %v14170_v41 = vadd.f32 %v477_v25, %v14088_v48  ;;  %v12032_v22 = vld [vmem:[#allocation11 + $0x6f0] ss:$24 sps:$4 sm:$0xff]  }
 0x190   :  { %2992 = vmatpush1.bf16.msra.mxu1 %v11918_v18  ;;  %v481_v29 = vpop.f32.mrb[10].mxu0  ;;  %3331 = vmatpush1.bf16.msra.mxu0 %v11921_v10  ;;  %v14156_v33 = vpop.f32.mrb[10].mxu1  ;;  %v14164_v37 = vadd.f32 %v479_v28, %v14082_v46  ;;  %v14195_v18 = vadd.f32 %v14090_v50, %v14082_v46  ;;  %v14199_v10 = vadd.f32 %v14097_v55, %v14082_v46  ;;  %v11942_v55 = vld [vmem:[#allocation11 + $0x420] ss:$24 sps:$4 sm:$0xff]  }
 0x191   :  { %v14159_v34 = vadd.f32 %v481_v29, %v14088_v48  ;;  %v483_v35 = vpop.f32.mrb[11].mxu0  ;;  %2993 = vmatprep.subr.bf16.mxu1 %v11926_v21  ;;  %3332 = vmatprep.subr.bf16.mxu0 %v11929_v24  ;;  %v14161_v36 = vpop.f32.mrb[11].mxu1  ;;  %16642 = vst [vmem:[#allocation42_spill] sm:$0xff] %v14170_v41  ;;  %v11947_v21 = vld [vmem:[#allocation11 + $0x42c] ss:$24 sps:$4 sm:$0xff]  }
 0x192   :  { %16640 = vst [vmem:[#allocation40_spill] sm:$0xff] %v14164_v37  ;;  %v14167_v39 = vadd.f32 %v483_v35, %v14082_v46  ;;  %16646 = vst [vmem:[#allocation46_spill] sm:$0xff] %v14195_v18  ;;  %v11945_v29 = vld [vmem:[#allocation11 + $0x428] ss:$24 sps:$4 sm:$0xff]   ;;  %v11950_v35 = vld [vmem:[#allocation11 + $0x454] ss:$24 sps:$4 sm:$0xff]  }
 0x193   :  { %16639 = vst [vmem:[#allocation39_spill] sm:$0xff] %v14159_v34  ;;  %v14178_v54 = vpack.c.bf16 %v14159_v34, %v14170_v41  ;;  %16647 = vst [vmem:[#allocation47_spill] sm:$0xff] %v14199_v10  ;;  %v11974_v34 = vld [vmem:[#allocation11 + $0x514] ss:$24 sps:$4 sm:$0xff]  }
 0x194   :  { %16641 = vst [vmem:[#allocation41_spill] sm:$0xff] %v14167_v39  ;;  %v14174_v45 = vpack.c.bf16 %v14167_v39, %v14164_v37  ;;  %2994 = vmatpush1.bf16.msra.mxu1 %v11924_v26  ;;  %3333 = vmatpush1.bf16.msra.mxu0 %v11927_v30  ;;  %v11977_v41 = vld [vmem:[#allocation11 + $0x51c] ss:$24 sps:$4 sm:$0xff]   ;;  %v11972_v39 = vld [vmem:[#allocation11 + $0x510] ss:$24 sps:$4 sm:$0xff]  }
 0x195   :  { %16644 = vst [vmem:[#allocation44_spill] sm:$0xff] %v14178_v54  ;;  %2995 = vmatprep.subr.bf16.mxu1 %v11932_v31  ;;  %3334 = vmatprep.subr.bf16.mxu0 %v11935_v32  ;;  %v14222_v31 = vpack.c.bf16 %v14199_v10, %v14195_v18  ;;  %v11948_v32 = vld [vmem:[#allocation11 + $0x450] ss:$24 sps:$4 sm:$0xff]   ;;  %v11962_v10 = vld [vmem:[#allocation11 + $0x4b4] ss:$24 sps:$4 sm:$0xff]  }
 0x196   :  { %16643 = vst [vmem:[#allocation43_spill] sm:$0xff] %v14174_v45  ;;  %v487_v61 = vpop.f32.mrb[12].mxu0  ;;  %2926 = vmatprep.mubr.bf16.mxu1 %v14174_v45  ;;  %3265 = vmatprep.mubr.bf16.mxu0 %v14174_v45  ;;  %v14182_v1 = vpop.f32.mrb[12].mxu1  ;;  %v11960_v18 = vld [vmem:[#allocation11 + $0x4b0] ss:$24 sps:$4 sm:$0xff]  }
 0x197   :  { %v489_v2 = vpop.f32.mrb[13].mxu0  ;;  %2927 = vmatmul.mubr.bf16.gmra.mrb[56].mxu1 %v14178_v54  ;;  %3266 = vmatmul.mubr.bf16.gmra.mrb[56].mxu0 %v14178_v54  ;;  %v14186_v3 = vpop.f32.mrb[13].mxu1  ;;  %v14210_v28 = vadd.f32 %v487_v61, %v14088_v48  ;;  %16653 = vst [vmem:[#allocation53_spill] sm:$0xff] %v14222_v31  ;;  %v11975_v37 = vld [vmem:[#allocation11 + $0x518] ss:$24 sps:$4 sm:$0xff]  }
 0x198   :  { %2996 = vmatpush1.bf16.msra.mxu1 %v11930_v40  ;;  %v491_v5 = vpop.f32.mrb[14].mxu0  ;;  %3335 = vmatpush1.bf16.msra.mxu0 %v11933_v49  ;;  %v14188_v9 = vpop.f32.mrb[14].mxu1  ;;  %v14204_v25 = vadd.f32 %v489_v2, %v14082_v46  ;;  %v11953_v40 = vld [vmem:[#allocation11 + $0x45c] ss:$24 sps:$4 sm:$0xff]   ;;  %v11951_v2 = vld [vmem:[#allocation11 + $0x458] ss:$24 sps:$4 sm:$0xff]   ;;  %v14339_v19 = vadd.f32 %v14186_v3, %v14082_v46 }
 0x199   :  { %v14191_v13 = vadd.f32 %v491_v5, %v14088_v48  ;;  %v493_v14 = vpop.f32.mrb[15].mxu0  ;;  %2997 = vmatprep.subr.bf16.mxu1 %v11938_v51  ;;  %3336 = vmatprep.subr.bf16.mxu0 %v11941_v58  ;;  %v14201_v24 = vpop.f32.mrb[15].mxu1  ;;  %16650 = vst [vmem:[#allocation50_spill] sm:$0xff] %v14210_v28  ;;  %v11956_v5 = vld [vmem:[#allocation11 + $0x484] ss:$24 sps:$4 sm:$0xff]   ;;  %v14388_v59 = vadd.f32 %v14188_v9, %v14088_v48 }
 0x19a   :  { %16648 = vst [vmem:[#allocation48_spill] sm:$0xff] %v14204_v25  ;;  %v14207_v26 = vadd.f32 %v493_v14, %v14082_v46  ;;  %v14246_v14 = vadd.f32 %v14092_v52, %v14088_v48  ;;  %v11954_v52 = vld [vmem:[#allocation11 + $0x480] ss:$24 sps:$4 sm:$0xff]   ;;  %16668 = vst [vmem:[#allocation68_spill] sm:$0xff] %v14339_v19  ;;  %v12034_v45 = vld [vmem:[#allocation11 + $0x6f4] ss:$24 sps:$4 sm:$0xff]  }
 0x19b   :  { %16645 = vst [vmem:[#allocation45_spill] sm:$0xff] %v14191_v13  ;;  %v14218_v30 = vpack.c.bf16 %v14191_v13, %v14210_v28  ;;  %v11965_v13 = vld [vmem:[#allocation11 + $0x4bc] ss:$24 sps:$4 sm:$0xff]   ;;  %16675 = vst [vmem:[#allocation75_spill] sm:$0xff] %v14388_v59 }
 0x19c   :  { %16649 = vst [vmem:[#allocation49_spill] sm:$0xff] %v14207_v26  ;;  %v14214_v50 = vpack.c.bf16 %v14207_v26, %v14204_v25  ;;  %2998 = vmatpush1.bf16.msra.mxu1 %v11936_v62  ;;  %3337 = vmatpush1.bf16.msra.mxu0 %v11939_v7  ;;  %v14238_v62 = vadd.f32 %v14084_v47, %v14088_v48  ;;  %16655 = vst [vmem:[#allocation55_spill] sm:$0xff] %v14246_v14 }
 0x19d   :  { %16652 = vst [vmem:[#allocation52_spill] sm:$0xff] %v14218_v30  ;;  %2999 = vmatprep.subr.bf16.mxu1 %v11944_v8  ;;  %3338 = vmatprep.subr.bf16.mxu0 %v11947_v21  ;;  %v14251_v21 = vadd.f32 %v14122_v6, %v14082_v46  ;;  %v14255_v47 = vadd.f32 %v14129_v15, %v14082_v46 }
 0x19e   :  { %16651 = vst [vmem:[#allocation51_spill] sm:$0xff] %v14214_v50  ;;  %2936 = vmatprep.mubr.bf16.mxu1 %v14214_v50  ;;  %3275 = vmatprep.mubr.bf16.mxu0 %v14214_v50  ;;  %v14226_v49 = vpop.f32.mrb[16].mxu1  ;;  %v14228_v51 = vpop.f32.mrb[16].mxu0  ;;  %16654 = vst [vmem:[#allocation54_spill] sm:$0xff] %v14238_v62  ;;  %v14264_v6 = vpack.c.bf16 %v14246_v14, %v14238_v62  ;;  %v14290_v62 = vadd.f32 %v14124_v11, %v14088_v48  ;;  %v11966_v11 = vld [vmem:[#allocation11 + $0x4e0] ss:$24 sps:$4 sm:$0xff]  }
 0x19f   :  { %2937 = vmatmul.mubr.bf16.gmra.mrb[60].mxu1 %v14218_v30  ;;  %3276 = vmatmul.mubr.bf16.gmra.mrb[60].mxu0 %v14218_v30  ;;  %v14232_v58 = vpop.f32.mrb[17].mxu1  ;;  %v14234_v61 = vpop.f32.mrb[17].mxu0  ;;  %16656 = vst [vmem:[#allocation56_spill] sm:$0xff] %v14251_v21  ;;  %16657 = vst [vmem:[#allocation57_spill] sm:$0xff] %v14255_v47  ;;  %v14268_v15 = vpack.c.bf16 %v14255_v47, %v14251_v21  ;;  %v14282_v47 = vadd.f32 %v14118_v4, %v14088_v48  ;;  %v12020_v30 = vld [vmem:[#allocation11 + $0x690] ss:$24 sps:$4 sm:$0xff]  }
 0x1a0   :  { %3000 = vmatpush1.bf16.msra.mxu1 %v11942_v55  ;;  %3339 = vmatpush1.bf16.msra.mxu0 %v11945_v29  ;;  %v14240_v7 = vpop.f32.mrb[18].mxu1  ;;  %v14242_v8 = vpop.f32.mrb[18].mxu0  ;;  %v11959_v55 = vld [vmem:[#allocation11 + $0x48c] ss:$24 sps:$4 sm:$0xff]   ;;  %16658 = vst [vmem:[#allocation58_spill] sm:$0xff] %v14264_v6  ;;  %16661 = vst [vmem:[#allocation61_spill] sm:$0xff] %v14290_v62  ;;  %v14295_v26 = vadd.f32 %v14154_v23, %v14082_v46  ;;  %v14299_v4 = vadd.f32 %v14161_v36, %v14082_v46 }
 0x1a1   :  { %3001 = vmatprep.subr.bf16.mxu1 %v11950_v35  ;;  %2946 = vmatprep.mubr.bf16.mxu1 %v14222_v31  ;;  %v14257_v29 = vpop.f32.mrb[19].mxu1  ;;  %v14259_v0 = vpop.f32.mrb[19].mxu0  ;;  %v11957_v35 = vld [vmem:[#allocation11 + $0x488] ss:$24 sps:$4 sm:$0xff]   ;;  %16659 = vst [vmem:[#allocation59_spill] sm:$0xff] %v14268_v15  ;;  %16660 = vst [vmem:[#allocation60_spill] sm:$0xff] %v14282_v47  ;;  %v14308_v23 = vpack.c.bf16 %v14290_v62, %v14282_v47  ;;  %v14334_v47 = vadd.f32 %v14156_v33, %v14088_v48 }
 0x1a2   :  { %3285 = vmatprep.mubr.bf16.mxu0 %v14222_v31  ;;  %3340 = vmatprep.subr.bf16.mxu0 %v11953_v40  ;;  %16662 = vst [vmem:[#allocation62_spill] sm:$0xff] %v14295_v26  ;;  %16663 = vst [vmem:[#allocation63_spill] sm:$0xff] %v14299_v4  ;;  %v14312_v36 = vpack.c.bf16 %v14299_v4, %v14295_v26  ;;  %v14326_v4 = vadd.f32 %v14150_v27, %v14088_v48  ;;  %v11978_v33 = vld [vmem:[#allocation11 + $0x540] ss:$24 sps:$4 sm:$0xff]   ;;  %v12022_v31 = vld [vmem:[#allocation11 + $0x694] ss:$24 sps:$4 sm:$0xff]  }
 0x1a3   :  { %16664 = vst [vmem:[#allocation64_spill] sm:$0xff] %v14308_v23  ;;  %16667 = vst [vmem:[#allocation67_spill] sm:$0xff] %v14334_v47  ;;  %v14343_v27 = vadd.f32 %v14201_v24, %v14082_v46  ;;  %v11986_v24 = vld [vmem:[#allocation11 + $0x574] ss:$24 sps:$4 sm:$0xff]  }
 0x1a4   :  { %3002 = vmatpush1.bf16.msra.mxu1 %v11948_v32  ;;  %3341 = vmatpush1.bf16.msra.mxu0 %v11951_v2  ;;  %16665 = vst [vmem:[#allocation65_spill] sm:$0xff] %v14312_v36  ;;  %16666 = vst [vmem:[#allocation66_spill] sm:$0xff] %v14326_v4  ;;  %v14355_v3 = vpack.c.bf16 %v14334_v47, %v14326_v4  ;;  %v11987_v47 = vld [vmem:[#allocation11 + $0x578] ss:$24 sps:$4 sm:$0xff]   ;;  %v11992_v4 = vld [vmem:[#allocation11 + $0x5a4] ss:$24 sps:$4 sm:$0xff]  }
 0x1a5   :  { %3003 = vmatprep.subr.bf16.mxu1 %v11956_v5  ;;  %3342 = vmatprep.subr.bf16.mxu0 %v11959_v55  ;;  %v11963_v5 = vld [vmem:[#allocation11 + $0x4b8] ss:$24 sps:$4 sm:$0xff]   ;;  %v11968_v55 = vld [vmem:[#allocation11 + $0x4e4] ss:$24 sps:$4 sm:$0xff]   ;;  %16669 = vst [vmem:[#allocation69_spill] sm:$0xff] %v14343_v27  ;;  %v14359_v46 = vpack.c.bf16 %v14343_v27, %v14339_v19  ;;  %v14372_v27 = vsub.s32 2, %v14070_v42  ;;  %v14380_v19 = vadd.f32 %v14182_v1, %v14088_v48 }
 0x1a6   :  { %v14270_v28 = vpop.f32.mrb[20].mxu1  ;;  %v14272_v40 = vpop.f32.mrb[20].mxu0  ;;  %16671 = vst [vmem:[#allocation71_spill] sm:$0xff] %v14355_v3  ;;  %v11990_v48 = vld [vmem:[#allocation11 + $0x5a0] ss:$24 sps:$4 sm:$0xff]  }
 0x1a7   :  { %2947 = vmatmul.mubr.bf16.gmra.mrb[64].mxu1 %v14264_v6  ;;  %3286 = vmatmul.mubr.bf16.gmra.mrb[64].mxu0 %v14264_v6  ;;  %v14276_v32 = vpop.f32.mrb[21].mxu1  ;;  %v14278_v2 = vpop.f32.mrb[21].mxu0  ;;  %16672 = vst [vmem:[#allocation72_spill] sm:$0xff] %v14359_v46  ;;  %16673 = vst [vmem:[#allocation73_spill] sm:$0xff] %v14372_v27  ;;  %v14406_v9 = vrot.slane %v14072_v43, %v14372_v27  ;;  %v12025_v50 = vld [vmem:[#allocation11 + $0x69c] ss:$24 sps:$4 sm:$0xff]  }
 0x1a8   :  { %3004 = vmatpush1.bf16.msra.mxu1 %v11954_v52  ;;  %3343 = vmatpush1.bf16.msra.mxu0 %v11957_v35  ;;  %v14284_v21 = vpop.f32.mrb[22].mxu1  ;;  %v14286_v14 = vpop.f32.mrb[22].mxu0  ;;  %v11971_v52 = vld [vmem:[#allocation11 + $0x4ec] ss:$24 sps:$4 sm:$0xff]   ;;  %16674 = vst [vmem:[#allocation74_spill] sm:$0xff] %v14380_v19 }
 0x1a9   :  { %3005 = vmatprep.subr.bf16.mxu1 %v11962_v10  ;;  %2956 = vmatprep.mubr.bf16.mxu1 %v14268_v15  ;;  %v14301_v35 = vpop.f32.mrb[23].mxu1  ;;  %v14303_v25 = vpop.f32.mrb[23].mxu0  ;;  %v11969_v10 = vld [vmem:[#allocation11 + $0x4e8] ss:$24 sps:$4 sm:$0xff]  }
 0x1aa   :  { %3295 = vmatprep.mubr.bf16.mxu0 %v14268_v15  ;;  %3344 = vmatprep.subr.bf16.mxu0 %v11965_v13  ;;  %v12013_v15 = vld [vmem:[#allocation11 + $0x63c] ss:$24 sps:$4 sm:$0xff]  }
 0x1ac   :  { %3006 = vmatpush1.bf16.msra.mxu1 %v11960_v18  ;;  %3345 = vmatpush1.bf16.msra.mxu0 %v11963_v5 }
 0x1ad   :  { %3007 = vmatprep.subr.bf16.mxu1 %v11968_v55  ;;  %3346 = vmatprep.subr.bf16.mxu0 %v11971_v52  ;;  %v11980_v55 = vld [vmem:[#allocation11 + $0x544] ss:$24 sps:$4 sm:$0xff]  }
 0x1ae   :  { %v14314_v12 = vpop.f32.mrb[24].mxu1  ;;  %v14316_v13 = vpop.f32.mrb[24].mxu0  ;;  %v11983_v52 = vld [vmem:[#allocation11 + $0x54c] ss:$24 sps:$4 sm:$0xff]  }
 0x1af   :  { %2957 = vmatmul.mubr.bf16.gmra.mrb[68].mxu1 %v14308_v23  ;;  %3296 = vmatmul.mubr.bf16.gmra.mrb[68].mxu0 %v14308_v23  ;;  %v14320_v18 = vpop.f32.mrb[25].mxu1  ;;  %v14322_v5 = vpop.f32.mrb[25].mxu0  ;;  %v12008_v23 = vld [vmem:[#allocation11 + $0x630] ss:$24 sps:$4 sm:$0xff]  }
 0x1b0   :  { %3008 = vmatpush1.bf16.msra.mxu1 %v11966_v11  ;;  %3347 = vmatpush1.bf16.msra.mxu0 %v11969_v10  ;;  %v14328_v26 = vpop.f32.mrb[26].mxu1  ;;  %v14330_v62 = vpop.f32.mrb[26].mxu0  ;;  %v14346_v11 = vsub.s32 3, %v14070_v42 }
 0x1b1   :  { %3009 = vmatprep.subr.bf16.mxu1 %v11974_v34  ;;  %2966 = vmatprep.mubr.bf16.mxu1 %v14312_v36  ;;  %v14348_v10 = vpop.f32.mrb[27].mxu1  ;;  %v14350_v17 = vpop.f32.mrb[27].mxu0  ;;  %v11981_v34 = vld [vmem:[#allocation11 + $0x548] ss:$24 sps:$4 sm:$0xff]  }
 0x1b2   :  { %16670 = vst [vmem:[#allocation70_spill] sm:$0xff] %v14346_v11  ;;  %3305 = vmatprep.mubr.bf16.mxu0 %v14312_v36  ;;  %3348 = vmatprep.subr.bf16.mxu0 %v11977_v41  ;;  %v14363_v16 = vrot.slane %v14072_v43, %v14346_v11  ;;  %v11984_v41 = vld [vmem:[#allocation11 + $0x570] ss:$24 sps:$4 sm:$0xff]  }
 0x1b4   :  { %3010 = vmatpush1.bf16.msra.mxu1 %v11972_v39  ;;  %3349 = vmatpush1.bf16.msra.mxu0 %v11975_v37  ;;  %v11989_v39 = vld [vmem:[#allocation11 + $0x57c] ss:$24 sps:$4 sm:$0xff]   ;;  %v14393_v44 = vadd.f32 %v14232_v58, %v14363_v16  ;;  %v14397_v1 = vadd.f32 %v14257_v29, %v14363_v16  ;;  %v11993_v58 = vld [vmem:[#allocation11 + $0x5a8] ss:$24 sps:$4 sm:$0xff]   ;;  %v14410_v29 = vpack.c.bf16 %v14388_v59, %v14380_v19 }
 0x1b5   :  { %3011 = vmatprep.subr.bf16.mxu1 %v11980_v55  ;;  %3350 = vmatprep.subr.bf16.mxu0 %v11983_v52  ;;  %v14428_v59 = vadd.f32 %v14226_v49, %v14406_v9  ;;  %v14436_v19 = vadd.f32 %v14240_v7, %v14406_v9  ;;  %v14445_v49 = vadd.f32 %v14301_v35, %v14363_v16  ;;  %v12002_v7 = vld [vmem:[#allocation11 + $0x600] ss:$24 sps:$4 sm:$0xff]  }
 0x1b6   :  { %v14365_v37 = vpop.f32.mrb[28].mxu1  ;;  %v14367_v53 = vpop.f32.mrb[28].mxu0  ;;  %16676 = vst [vmem:[#allocation76_spill] sm:$0xff] %v14393_v44  ;;  %16677 = vst [vmem:[#allocation77_spill] sm:$0xff] %v14397_v1  ;;  %v14414_v11 = vpack.c.bf16 %v14397_v1, %v14393_v44  ;;  %v14441_v1 = vadd.f32 %v14276_v32, %v14363_v16 }
 0x1b7   :  { %2967 = vmatmul.mubr.bf16.gmra.mrb[72].mxu1 %v14355_v3  ;;  %3306 = vmatmul.mubr.bf16.gmra.mrb[72].mxu0 %v14355_v3  ;;  %v14374_v55 = vpop.f32.mrb[29].mxu1  ;;  %v14376_v52 = vpop.f32.mrb[29].mxu0  ;;  %16678 = vst [vmem:[#allocation78_spill] sm:$0xff] %v14410_v29  ;;  %v11999_v3 = vld [vmem:[#allocation11 + $0x5d8] ss:$24 sps:$4 sm:$0xff]   ;;  %16680 = vst [vmem:[#allocation80_spill] sm:$0xff] %v14428_v59  ;;  %v14454_v32 = vpack.c.bf16 %v14436_v19, %v14428_v59  ;;  %v14485_v59 = vadd.f32 %v14320_v18, %v14363_v16 }
 0x1b8   :  { %3012 = vmatpush1.bf16.msra.mxu1 %v11978_v33  ;;  %3351 = vmatpush1.bf16.msra.mxu0 %v11981_v34  ;;  %v14382_v57 = vpop.f32.mrb[30].mxu1  ;;  %v14384_v56 = vpop.f32.mrb[30].mxu0  ;;  %v11995_v33 = vld [vmem:[#allocation11 + $0x5ac] ss:$24 sps:$4 sm:$0xff]   ;;  %16679 = vst [vmem:[#allocation79_spill] sm:$0xff] %v14414_v11  ;;  %16681 = vst [vmem:[#allocation81_spill] sm:$0xff] %v14436_v19  ;;  %v14458_v35 = vpack.c.bf16 %v14445_v49, %v14441_v1 }
 0x1b9   :  { %3013 = vmatprep.subr.bf16.mxu1 %v11986_v24  ;;  %2976 = vmatprep.mubr.bf16.mxu1 %v14359_v46  ;;  %v14399_v34 = vpop.f32.mrb[31].mxu1  ;;  %v14401_v38 = vpop.f32.mrb[31].mxu0  ;;  %v11998_v24 = vld [vmem:[#allocation11 + $0x5d4] ss:$24 sps:$4 sm:$0xff]   ;;  %16682 = vst [vmem:[#allocation82_spill] sm:$0xff] %v14441_v1  ;;  %16683 = vst [vmem:[#allocation83_spill] sm:$0xff] %v14445_v49  ;;  %v14480_v1 = vadd.f32 %v14284_v21, %v14406_v9 }
 0x1ba   :  { %3315 = vmatprep.mubr.bf16.mxu0 %v14359_v46  ;;  %3352 = vmatprep.subr.bf16.mxu0 %v11989_v39  ;;  %v12001_v39 = vld [vmem:[#allocation11 + $0x5dc] ss:$24 sps:$4 sm:$0xff]   ;;  %v11996_v46 = vld [vmem:[#allocation11 + $0x5d0] ss:$24 sps:$4 sm:$0xff]   ;;  %16684 = vst [vmem:[#allocation84_spill] sm:$0xff] %v14454_v32  ;;  %16685 = vst [vmem:[#allocation85_spill] sm:$0xff] %v14458_v35 }
 0x1bb   :  { %16687 = vst [vmem:[#allocation87_spill] sm:$0xff] %v14480_v1  ;;  %16688 = vst [vmem:[#allocation88_spill] sm:$0xff] %v14485_v59  ;;  %v12014_v21 = vld [vmem:[#allocation11 + $0x660] ss:$24 sps:$4 sm:$0xff]  }
 0x1bc   :  { %3014 = vmatpush1.bf16.msra.mxu1 %v11984_v41  ;;  %3353 = vmatpush1.bf16.msra.mxu0 %v11987_v47 }
 0x1bd   :  { %3015 = vmatprep.subr.bf16.mxu1 %v11992_v4  ;;  %3354 = vmatprep.subr.bf16.mxu0 %v11995_v33 }
 0x1be   :  { %v14416_v36 = vpop.f32.mrb[32].mxu1  ;;  %v14418_v43 = vpop.f32.mrb[32].mxu0 }
 0x1bf   :  { %2977 = vmatmul.mubr.bf16.gmra.mrb[76].mxu1 %v14410_v29  ;;  %3316 = vmatmul.mubr.bf16.gmra.mrb[76].mxu0 %v14410_v29  ;;  %v14422_v47 = vpop.f32.mrb[33].mxu1  ;;  %v14424_v41 = vpop.f32.mrb[33].mxu0  ;;  %v12010_v29 = vld [vmem:[#allocation11 + $0x634] ss:$24 sps:$4 sm:$0xff]  }
 0x1c0   :  { %3016 = vmatpush1.bf16.msra.mxu1 %v11990_v48  ;;  %3355 = vmatpush1.bf16.msra.mxu0 %v11993_v58  ;;  %v14430_v4 = vpop.f32.mrb[34].mxu1  ;;  %v14432_v33 = vpop.f32.mrb[34].mxu0  ;;  %v12004_v48 = vld [vmem:[#allocation11 + $0x604] ss:$24 sps:$4 sm:$0xff]  }
 0x1c1   :  { %3017 = vmatprep.subr.bf16.mxu1 %v11998_v24  ;;  %3019 = vmatprep.mubr.bf16.mxu1 %v14414_v11  ;;  %v12007_v58 = vld [vmem:[#allocation11 + $0x60c] ss:$24 sps:$4 sm:$0xff]   ;;  %v14447_v44 = vpop.f32.mrb[35].mxu1  ;;  %v14449_v27 = vpop.f32.mrb[35].mxu0  ;;  %v12005_v24 = vld [vmem:[#allocation11 + $0x608] ss:$24 sps:$4 sm:$0xff]  }
 0x1c2   :  { %3356 = vmatprep.subr.bf16.mxu0 %v12001_v39  ;;  %3358 = vmatprep.mubr.bf16.mxu0 %v14414_v11 }
 0x1c4   :  { %3018 = vmatpush1.bf16.msra.mxu1 %v11996_v46  ;;  %3357 = vmatpush1.bf16.msra.mxu0 %v11999_v3  ;;  %v12011_v3 = vld [vmem:[#allocation11 + $0x638] ss:$24 sps:$4 sm:$0xff]  }
 0x1c5   :  { %3100 = vmatprep.subr.bf16.mxu1 %v12004_v48  ;;  %3439 = vmatprep.subr.bf16.mxu0 %v12007_v58  ;;  %v14472_v48 = vadd.f32 %v14270_v28, %v14406_v9  ;;  %v14489_v28 = vadd.f32 %v14348_v10, %v14363_v16 }
 0x1c6   :  { %v14460_v39 = vpop.f32.mrb[36].mxu1  ;;  %v14462_v11 = vpop.f32.mrb[36].mxu0 }
 0x1c7   :  { %3020 = vmatmul.mubr.bf16.vlgmr.msra.gmra.mrb[48].mxu1 %v14454_v32  ;;  %3359 = vmatmul.mubr.bf16.vlgmr.msra.gmra.mrb[48].mxu0 %v14454_v32  ;;  %v14466_v46 = vpop.f32.mrb[37].mxu1  ;;  %v14468_v19 = vpop.f32.mrb[37].mxu0  ;;  %16686 = vst [vmem:[#allocation86_spill] sm:$0xff] %v14472_v48  ;;  %16689 = vst [vmem:[#allocation89_spill] sm:$0xff] %v14489_v28  ;;  %v14498_v18 = vpack.c.bf16 %v14480_v1, %v14472_v48  ;;  %v14502_v10 = vpack.c.bf16 %v14489_v28, %v14485_v59 }
 0x1c8   :  { %3101 = vmatpush1.bf16.msra.mxu1 %v12002_v7  ;;  %3440 = vmatpush1.bf16.msra.mxu0 %v12005_v24  ;;  %v14474_v58 = vpop.f32.mrb[38].mxu1  ;;  %v14476_v49 = vpop.f32.mrb[38].mxu0  ;;  %v12016_v7 = vld [vmem:[#allocation11 + $0x664] ss:$24 sps:$4 sm:$0xff]   ;;  %v14524_v59 = vadd.f32 %v14328_v26, %v14406_v9  ;;  %v14529_v48 = vadd.f32 %v14374_v55, %v14363_v16  ;;  %v12026_v26 = vld [vmem:[#allocation11 + $0x6c0] ss:$24 sps:$4 sm:$0xff]  }
 0x1c9   :  { %3102 = vmatprep.subr.bf16.mxu1 %v12010_v29  ;;  %3029 = vmatprep.mubr.bf16.mxu1 %v14458_v35  ;;  %v12019_v24 = vld [vmem:[#allocation11 + $0x66c] ss:$24 sps:$4 sm:$0xff]   ;;  %v14491_v32 = vpop.f32.mrb[39].mxu1  ;;  %v14493_v6 = vpop.f32.mrb[39].mxu0  ;;  %v12017_v29 = vld [vmem:[#allocation11 + $0x668] ss:$24 sps:$4 sm:$0xff]  }
 0x1ca   :  { %3368 = vmatprep.mubr.bf16.mxu0 %v14458_v35  ;;  %3441 = vmatprep.subr.bf16.mxu0 %v12013_v15  ;;  %16690 = vst [vmem:[#allocation90_spill] sm:$0xff] %v14498_v18  ;;  %16691 = vst [vmem:[#allocation91_spill] sm:$0xff] %v14502_v10 }
 0x1cb   :  { %16693 = vst [vmem:[#allocation93_spill] sm:$0xff] %v14524_v59  ;;  %16694 = vst [vmem:[#allocation94_spill] sm:$0xff] %v14529_v48 }
 0x1cc   :  { %3103 = vmatpush1.bf16.msra.mxu1 %v12008_v23  ;;  %3442 = vmatpush1.bf16.msra.mxu0 %v12011_v3  ;;  %v12023_v23 = vld [vmem:[#allocation11 + $0x698] ss:$24 sps:$4 sm:$0xff]  }
 0x1cd   :  { %3104 = vmatprep.subr.bf16.mxu1 %v12016_v7  ;;  %3443 = vmatprep.subr.bf16.mxu0 %v12019_v24  ;;  %v14516_v7 = vadd.f32 %v14314_v12, %v14406_v9  ;;  %v14533_v12 = vadd.f32 %v14399_v34, %v14363_v16 }
 0x1ce   :  { %v14504_v54 = vpop.f32.mrb[40].mxu1  ;;  %v14506_v15 = vpop.f32.mrb[40].mxu0 }
 0x1cf   :  { %3030 = vmatmul.mubr.bf16.gmra.mrb[52].mxu1 %v14498_v18  ;;  %3369 = vmatmul.mubr.bf16.gmra.mrb[52].mxu0 %v14498_v18  ;;  %v14510_v3 = vpop.f32.mrb[41].mxu1  ;;  %v14512_v1 = vpop.f32.mrb[41].mxu0  ;;  %16692 = vst [vmem:[#allocation92_spill] sm:$0xff] %v14516_v7  ;;  %16695 = vst [vmem:[#allocation95_spill] sm:$0xff] %v14533_v12  ;;  %v14542_v55 = vpack.c.bf16 %v14524_v59, %v14516_v7  ;;  %v14546_v34 = vpack.c.bf16 %v14533_v12, %v14529_v48 }
 0x1d0   :  { %3105 = vmatpush1.bf16.msra.mxu1 %v12014_v21  ;;  %3444 = vmatpush1.bf16.msra.mxu0 %v12017_v29  ;;  %v14518_v24 = vpop.f32.mrb[42].mxu1  ;;  %v14520_v28 = vpop.f32.mrb[42].mxu0  ;;  %v12028_v21 = vld [vmem:[#allocation11 + $0x6c4] ss:$24 sps:$4 sm:$0xff]   ;;  %v14568_v48 = vadd.f32 %v14382_v57, %v14406_v9  ;;  %v14573_v7 = vadd.f32 %v14422_v47, %v14363_v16  ;;  %v12038_v57 = vld [vmem:[#allocation11 + $0x720] ss:$24 sps:$4 sm:$0xff]  }
 0x1d1   :  { %3106 = vmatprep.subr.bf16.mxu1 %v12022_v31  ;;  %3039 = vmatprep.mubr.bf16.mxu1 %v14502_v10  ;;  %v12031_v29 = vld [vmem:[#allocation11 + $0x6cc] ss:$24 sps:$4 sm:$0xff]   ;;  %v14535_v18 = vpop.f32.mrb[43].mxu1  ;;  %v14537_v35 = vpop.f32.mrb[43].mxu0  ;;  %v12029_v31 = vld [vmem:[#allocation11 + $0x6c8] ss:$24 sps:$4 sm:$0xff]  }
 0x1d2   :  { %3378 = vmatprep.mubr.bf16.mxu0 %v14502_v10  ;;  %3445 = vmatprep.subr.bf16.mxu0 %v12025_v50  ;;  %16696 = vst [vmem:[#allocation96_spill] sm:$0xff] %v14542_v55  ;;  %16700 = vst [vmem:[#allocation100_spill] sm:$0xff] %v14568_v48 }
 0x1d3   :  { %16701 = vst [vmem:[#allocation101_spill] sm:$0xff] %v14573_v7 }
 0x1d4   :  { %3107 = vmatpush1.bf16.msra.mxu1 %v12020_v30  ;;  %3446 = vmatpush1.bf16.msra.mxu0 %v12023_v23  ;;  %v12035_v30 = vld [vmem:[#allocation11 + $0x6f8] ss:$24 sps:$4 sm:$0xff]  }
 0x1d5   :  { %3108 = vmatprep.subr.bf16.mxu1 %v12028_v21  ;;  %3447 = vmatprep.subr.bf16.mxu0 %v12031_v29  ;;  %v14560_v21 = vadd.f32 %v14365_v37, %v14406_v9  ;;  %v14577_v37 = vadd.f32 %v14447_v44, %v14363_v16 }
 0x1d6   :  { %v14548_v63 = vpop.f32.mrb[44].mxu1  ;;  %v14550_v50 = vpop.f32.mrb[44].mxu0 }
 0x1d7   :  { %16697 = vst [vmem:[#allocation97_spill] sm:$0xff] %v14550_v50  ;;  %3040 = vmatmul.mubr.bf16.gmra.mrb[56].mxu1 %v14542_v55  ;;  %3379 = vmatmul.mubr.bf16.gmra.mrb[56].mxu0 %v14542_v55  ;;  %v14554_v23 = vpop.f32.mrb[45].mxu1  ;;  %v14556_v59 = vpop.f32.mrb[45].mxu0  ;;  %16698 = vst [vmem:[#allocation98_spill] sm:$0xff] %v14560_v21  ;;  %v14586_v47 = vpack.c.bf16 %v14568_v48, %v14560_v21  ;;  %v14590_v44 = vpack.c.bf16 %v14577_v37, %v14573_v7  ;;  %v12049_v50 = vld [vmem:[#allocation11 + $0x75c] ss:$24 sps:$4 sm:$0xff]  }
 0x1d8   :  { %3109 = vmatpush1.bf16.msra.mxu1 %v12026_v26  ;;  %3448 = vmatpush1.bf16.msra.mxu0 %v12029_v31  ;;  %v14562_v29 = vpop.f32.mrb[46].mxu1  ;;  %v14564_v12 = vpop.f32.mrb[46].mxu0  ;;  %16702 = vst [vmem:[#allocation102_spill] sm:$0xff] %v14577_v37  ;;  %v12040_v26 = vld [vmem:[#allocation11 + $0x724] ss:$24 sps:$4 sm:$0xff]  }
 0x1d9   :  { %16699 = vst [vmem:[#allocation99_spill] sm:$0xff] %v14564_v12  ;;  %3110 = vmatprep.subr.bf16.mxu1 %v12034_v45  ;;  %3049 = vmatprep.mubr.bf16.mxu1 %v14546_v34  ;;  %v12043_v31 = vld [vmem:[#allocation11 + $0x72c] ss:$24 sps:$4 sm:$0xff]   ;;  %v14579_v55 = vpop.f32.mrb[47].mxu1  ;;  %v14581_v10 = vpop.f32.mrb[47].mxu0 }
 0x1da   :  { %3388 = vmatprep.mubr.bf16.mxu0 %v14546_v34  ;;  %3449 = vmatprep.subr.bf16.mxu0 %v12037_v20  ;;  %v12041_v45 = vld [vmem:[#allocation11 + $0x728] ss:$24 sps:$4 sm:$0xff]   ;;  %v12047_v20 = vld [vmem:[#allocation11 + $0x758] ss:$24 sps:$4 sm:$0xff]   ;;  %v12052_v37 = vld [vmem:[#allocation11 + $0x784] ss:$24 sps:$4 sm:$0xff]  }
 0x1db   :  { %v12044_v12 = vld [vmem:[#allocation11 + $0x750] ss:$24 sps:$4 sm:$0xff]   ;;  %v12061_v7 = vld [vmem:[#allocation11 + $0x7bc] ss:$24 sps:$4 sm:$0xff]  }
 0x1dc   :  { %3111 = vmatpush1.bf16.msra.mxu1 %v12032_v22  ;;  %3450 = vmatpush1.bf16.msra.mxu0 %v12035_v30  ;;  %v14596_v22 = vadd.f32 %v14416_v36, %v14406_v9  ;;  %v14600_v30 = vadd.f32 %v14430_v4, %v14406_v9  ;;  %v12055_v36 = vld [vmem:[#allocation11 + $0x78c] ss:$24 sps:$4 sm:$0xff]   ;;  %v12050_v4 = vld [vmem:[#allocation11 + $0x780] ss:$24 sps:$4 sm:$0xff]  }
 0x1dd   :  { %3112 = vmatprep.subr.bf16.mxu1 %v12040_v26  ;;  %3451 = vmatprep.subr.bf16.mxu0 %v12043_v31  ;;  %v14605_v26 = vadd.f32 %v14466_v46, %v14363_v16  ;;  %v14609_v31 = vadd.f32 %v14491_v32, %v14363_v16  ;;  %v12058_v32 = vld [vmem:[#allocation11 + $0x7b4] ss:$24 sps:$4 sm:$0xff]  }
 0x1de   :  { %16703 = vst [vmem:[#allocation103_spill] sm:$0xff] %v14596_v22  ;;  %16704 = vst [vmem:[#allocation104_spill] sm:$0xff] %v14600_v30  ;;  %v16773_v48 = vld [vmem:[#allocation96_spill] sm:$0xff] }
 0x1df   :  { %3050 = vmatmul.mubr.bf16.gmra.mrb[60].mxu1 %v14586_v47  ;;  %3389 = vmatmul.mubr.bf16.gmra.mrb[60].mxu0 %v14586_v47  ;;  %16705 = vst [vmem:[#allocation105_spill] sm:$0xff] %v14605_v26  ;;  %16706 = vst [vmem:[#allocation106_spill] sm:$0xff] %v14609_v31  ;;  %v14618_v46 = vpack.c.bf16 %v14609_v31, %v14605_v26  ;;  %v12064_v31 = vld [vmem:[#allocation11 + $0x7e4] ss:$24 sps:$4 sm:$0xff]  }
 0x1e0   :  { %3113 = vmatpush1.bf16.msra.mxu1 %v12038_v57  ;;  %3452 = vmatpush1.bf16.msra.mxu0 %v12041_v45  ;;  %v12053_v57 = vld [vmem:[#allocation11 + $0x788] ss:$24 sps:$4 sm:$0xff]   ;;  %v12073_v26 = vld [vmem:[#allocation11 + $0x81c] ss:$24 sps:$4 sm:$0xff]  }
 0x1e1   :  { %3114 = vmatprep.subr.bf16.mxu1 %v12046_v60  ;;  %3059 = vmatprep.mubr.bf16.mxu1 %v14590_v44  ;;  %v14614_v60 = vpack.c.bf16 %v14600_v30, %v14596_v22  ;;  %v12056_v45 = vld [vmem:[#allocation11 + $0x7b0] ss:$24 sps:$4 sm:$0xff]   ;;  %v16771_v30 = vld [vmem:[#allocation90_spill] sm:$0xff] }
 0x1e2   :  { %3398 = vmatprep.mubr.bf16.mxu0 %v14590_v44  ;;  %3453 = vmatprep.subr.bf16.mxu0 %v12049_v50  ;;  %v14624_v50 = vadd.f32 %v14460_v39, %v14406_v9  ;;  %v12067_v39 = vld [vmem:[#allocation11 + $0x7ec] ss:$24 sps:$4 sm:$0xff]  }
 0x1e4   :  { %3115 = vmatpush1.bf16.msra.mxu1 %v12044_v12  ;;  %3454 = vmatpush1.bf16.msra.mxu0 %v12047_v20  ;;  %v12059_v12 = vld [vmem:[#allocation11 + $0x7b8] ss:$24 sps:$4 sm:$0xff]   ;;  %16707 = vst [vmem:[#allocation107_spill] sm:$0xff] %v14624_v50  ;;  %v14628_v20 = vadd.f32 %v14474_v58, %v14406_v9 }
 0x1e5   :  { %3116 = vmatprep.subr.bf16.mxu1 %v12052_v37  ;;  %3455 = vmatprep.subr.bf16.mxu0 %v12055_v36  ;;  %v14633_v37 = vadd.f32 %v14510_v3, %v14363_v16  ;;  %v14637_v36 = vadd.f32 %v14535_v18, %v14363_v16  ;;  %v12062_v58 = vld [vmem:[#allocation11 + $0x7e0] ss:$24 sps:$4 sm:$0xff]   ;;  %v12070_v18 = vld [vmem:[#allocation11 + $0x814] ss:$24 sps:$4 sm:$0xff]  }
 0x1e6   :  { %16708 = vst [vmem:[#allocation108_spill] sm:$0xff] %v14628_v20 }
 0x1e7   :  { %3060 = vmatmul.mubr.bf16.gmra.mrb[64].mxu1 %v14614_v60  ;;  %3399 = vmatmul.mubr.bf16.gmra.mrb[64].mxu0 %v14614_v60  ;;  %16709 = vst [vmem:[#allocation109_spill] sm:$0xff] %v14633_v37  ;;  %16710 = vst [vmem:[#allocation110_spill] sm:$0xff] %v14637_v36  ;;  %v14646_v3 = vpack.c.bf16 %v14637_v36, %v14633_v37  ;;  %v14666_v36 = vadd.f32 %v14579_v55, %v14363_v16  ;;  %v12082_v55 = vld [vmem:[#allocation11 + $0x874] ss:$24 sps:$4 sm:$0xff]  }
 0x1e8   :  { %3117 = vmatpush1.bf16.msra.mxu1 %v12050_v4  ;;  %3456 = vmatpush1.bf16.msra.mxu0 %v12053_v57  ;;  %v12065_v4 = vld [vmem:[#allocation11 + $0x7e8] ss:$24 sps:$4 sm:$0xff]   ;;  %v14642_v57 = vpack.c.bf16 %v14628_v20, %v14624_v50 }
 0x1e9   :  { %3118 = vmatprep.subr.bf16.mxu1 %v12058_v32  ;;  %3069 = vmatprep.mubr.bf16.mxu1 %v14618_v46  ;;  %v12068_v32 = vld [vmem:[#allocation11 + $0x810] ss:$24 sps:$4 sm:$0xff]   ;;  %16714 = vst [vmem:[#allocation114_spill] sm:$0xff] %v14666_v36 }
 0x1ea   :  { %3408 = vmatprep.mubr.bf16.mxu0 %v14618_v46  ;;  %3457 = vmatprep.subr.bf16.mxu0 %v12061_v7  ;;  %v12071_v7 = vld [vmem:[#allocation11 + $0x818] ss:$24 sps:$4 sm:$0xff]  }
 0x1eb   :  { %v16769_v20 = vld [vmem:[#allocation84_spill] sm:$0xff] }
 0x1ec   :  { %3119 = vmatpush1.bf16.msra.mxu1 %v12056_v45  ;;  %3458 = vmatpush1.bf16.msra.mxu0 %v12059_v12  ;;  %v14652_v45 = vadd.f32 %v14504_v54, %v14406_v9  ;;  %v16514_v12 = vsub.s32 5, %v14070_v42  ;;  %v12076_v54 = vld [vmem:[#allocation11 + $0x844] ss:$24 sps:$4 sm:$0xff]  }
 0x1ed   :  { %3120 = vmatprep.subr.bf16.mxu1 %v12064_v31  ;;  %3459 = vmatprep.subr.bf16.mxu0 %v12067_v39  ;;  %v14657_v31 = vadd.f32 %v14518_v24, %v14406_v9  ;;  %v14662_v39 = vadd.f32 %v14554_v23, %v14363_v16  ;;  %v12074_v24 = vld [vmem:[#allocation11 + $0x840] ss:$24 sps:$4 sm:$0xff]  }
 0x1ee   :  { %16711 = vst [vmem:[#allocation111_spill] sm:$0xff] %v14652_v45 }
 0x1ef   :  { %3070 = vmatmul.mubr.bf16.gmra.mrb[68].mxu1 %v14642_v57  ;;  %3409 = vmatmul.mubr.bf16.gmra.mrb[68].mxu0 %v14642_v57  ;;  %16712 = vst [vmem:[#allocation112_spill] sm:$0xff] %v14657_v31  ;;  %16713 = vst [vmem:[#allocation113_spill] sm:$0xff] %v14662_v39  ;;  %v14675_v23 = vpack.c.bf16 %v14657_v31, %v14652_v45  ;;  %v14679_v16 = vpack.c.bf16 %v14666_v36, %v14662_v39  ;;  %v12094_v36 = vld [vmem:[#allocation11 + $0x8d4] ss:$24 sps:$4 sm:$0xff]  }
 0x1f0   :  { %3121 = vmatpush1.bf16.msra.mxu1 %v12062_v58  ;;  %3460 = vmatpush1.bf16.msra.mxu0 %v12065_v4  ;;  %v12079_v58 = vld [vmem:[#allocation11 + $0x84c] ss:$24 sps:$4 sm:$0xff]   ;;  %v12077_v4 = vld [vmem:[#allocation11 + $0x848] ss:$24 sps:$4 sm:$0xff]   ;;  %v12097_v39 = vld [vmem:[#allocation11 + $0x8dc] ss:$24 sps:$4 sm:$0xff]  }
 0x1f1   :  { %3122 = vmatprep.subr.bf16.mxu1 %v12070_v18  ;;  %3079 = vmatprep.mubr.bf16.mxu1 %v14646_v3  ;;  %v13410_v18 = vld [vmem:[#allocation8] sm:$0x3f] }
 0x1f2   :  { %3418 = vmatprep.mubr.bf16.mxu0 %v14646_v3  ;;  %3461 = vmatprep.subr.bf16.mxu0 %v12073_v26  ;;  %v14671_v37 = vrot.slane %v13410_v18, %v16514_v12  ;;  %v12080_v26 = vld [vmem:[#allocation11 + $0x870] ss:$24 sps:$4 sm:$0xff]   ;;  %v12091_v12 = vld [vmem:[#allocation11 + $0x8ac] ss:$24 sps:$4 sm:$0xff]  }
 0x1f4   :  { %3123 = vmatpush1.bf16.msra.mxu1 %v12068_v32  ;;  %3462 = vmatpush1.bf16.msra.mxu0 %v12071_v7  ;;  %v12085_v32 = vld [vmem:[#allocation11 + $0x87c] ss:$24 sps:$4 sm:$0xff]   ;;  %v12083_v7 = vld [vmem:[#allocation11 + $0x878] ss:$24 sps:$4 sm:$0xff]   ;;  %v14686_v31 = vadd.f32 %v14234_v61, %v14671_v37  ;;  %v16719_v61 = vsub.s32 4, %v14070_v42  ;;  %v16765_v42 = vld [vmem:[#allocation71_spill] sm:$0xff] }
 0x1f5   :  { %3124 = vmatprep.subr.bf16.mxu1 %v12076_v54  ;;  %3463 = vmatprep.subr.bf16.mxu0 %v12079_v58  ;;  %v14690_v54 = vadd.f32 %v14548_v63, %v14406_v9  ;;  %v14694_v58 = vadd.f32 %v14562_v29, %v14406_v9  ;;  %v12086_v9 = vld [vmem:[#allocation11 + $0x8a0] ss:$24 sps:$4 sm:$0xff]  }
 0x1f6   :  { %16715 = vst [vmem:[#allocation115_spill] sm:$0xff] %v14686_v31  ;;  %v14704_v63 = vrot.slane %v13410_v18, %v16719_v61  ;;  %v12089_v29 = vld [vmem:[#allocation11 + $0x8a8] ss:$24 sps:$4 sm:$0xff]   ;;  %v12095_v18 = vld [vmem:[#allocation11 + $0x8d8] ss:$24 sps:$4 sm:$0xff]  }
 0x1f7   :  { %3080 = vmatmul.mubr.bf16.gmra.mrb[72].mxu1 %v14675_v23  ;;  %3419 = vmatmul.mubr.bf16.gmra.mrb[72].mxu0 %v14675_v23  ;;  %16716 = vst [vmem:[#allocation116_spill] sm:$0xff] %v14690_v54  ;;  %16717 = vst [vmem:[#allocation117_spill] sm:$0xff] %v14694_v58  ;;  %v12100_v61 = vld [vmem:[#allocation11 + $0x14] ss:$24 sps:$4 sm:$0xff]  }
 0x1f8   :  { %3125 = vmatpush1.bf16.msra.mxu1 %v12074_v24  ;;  %3464 = vmatpush1.bf16.msra.mxu0 %v12077_v4  ;;  %v14699_v24 = vadd.f32 %v14259_v0, %v14671_v37  ;;  %v12088_v4 = vld [vmem:[#allocation11 + $0x8a4] ss:$24 sps:$4 sm:$0xff]  }
 0x1f9   :  { %3126 = vmatprep.subr.bf16.mxu1 %v12082_v55  ;;  %3089 = vmatprep.mubr.bf16.mxu1 %v14679_v16  ;;  %v14708_v55 = vpack.c.bf16 %v14694_v58, %v14690_v54  ;;  %v16767_v54 = vld [vmem:[#allocation78_spill] sm:$0xff] }
 0x1fa   :  { %16718 = vst [vmem:[#allocation118_spill] sm:$0xff] %v14699_v24  ;;  %3428 = vmatprep.mubr.bf16.mxu0 %v14679_v16  ;;  %3465 = vmatprep.subr.bf16.mxu0 %v12085_v32  ;;  %v14712_v0 = vpack.c.bf16 %v14699_v24, %v14686_v31  ;;  %v12092_v32 = vld [vmem:[#allocation11 + $0x8d0] ss:$24 sps:$4 sm:$0xff]   ;;  %v12109_v24 = vld [vmem:[#allocation10 + $0x3c] ss:$24 sps:$4 sm:$0xff]  }
 0x1fb   :  { %v16763_v31 = vld [vmem:[#allocation64_spill] sm:$0xff] }
 0x1fc   :  { %3127 = vmatpush1.bf16.msra.mxu1 %v12080_v26  ;;  %3466 = vmatpush1.bf16.msra.mxu0 %v12083_v7  ;;  %v14718_v26 = vadd.f32 %v14228_v51, %v14704_v63  ;;  %v14722_v7 = vadd.f32 %v14242_v8, %v14704_v63  ;;  %v12103_v51 = vld [vmem:[#allocation10 + $0xc] ss:$24 sps:$4 sm:$0xff]   ;;  %v12098_v8 = vld [vmem:[#allocation11 + $0x10] ss:$24 sps:$4 sm:$0xff]  }
 0x1fd   :  { %3128 = vmatprep.subr.bf16.mxu1 %v12088_v4  ;;  %3467 = vmatprep.subr.bf16.mxu0 %v12091_v12  ;;  %v14727_v12 = vadd.f32 %v14278_v2, %v14671_v37  ;;  %v14731_v4 = vadd.f32 %v14303_v25, %v14671_v37  ;;  %v12106_v25 = vld [vmem:[#allocation11 + $0x44] ss:$24 sps:$4 sm:$0xff]  }
 0x1fe   :  { %16720 = vst [vmem:[#allocation119_spill] sm:$0xff] %v14718_v26  ;;  %16721 = vst [vmem:[#allocation120_spill] sm:$0xff] %v14722_v7 }
 0x1ff   :  { %3090 = vmatmul.mubr.bf16.gmra.mrb[76].mxu1 %v14708_v55  ;;  %3429 = vmatmul.mubr.bf16.gmra.mrb[76].mxu0 %v14708_v55  ;;  %16722 = vst [vmem:[#allocation121_spill] sm:$0xff] %v14727_v12  ;;  %16723 = vst [vmem:[#allocation122_spill] sm:$0xff] %v14731_v4  ;;  %v14740_v2 = vpack.c.bf16 %v14731_v4, %v14727_v12  ;;  %v12112_v4 = vld [vmem:[#allocation11 + $0x74] ss:$24 sps:$4 sm:$0xff]  }
 0x200   :  { %3129 = vmatpush1.bf16.msra.mxu1 %v12086_v9  ;;  %3468 = vmatpush1.bf16.msra.mxu0 %v12089_v29  ;;  %v12101_v9 = vld [vmem:[#allocation10 + $0x8] ss:$24 sps:$4 sm:$0xff]   ;;  %v12121_v12 = vld [vmem:[#allocation10 + $0x9c] ss:$24 sps:$4 sm:$0xff]  }
 0x201   :  { %3130 = vmatprep.subr.bf16.mxu1 %v12094_v36  ;;  %3132 = vmatprep.mubr.bf16.mxu1 %v14712_v0  ;;  %v14736_v36 = vpack.c.bf16 %v14722_v7, %v14718_v26  ;;  %v12104_v29 = vld [vmem:[#allocation11 + $0x40] ss:$24 sps:$4 sm:$0xff]  }
 0x202   :  { %3469 = vmatprep.subr.bf16.mxu0 %v12097_v39  ;;  %3471 = vmatprep.mubr.bf16.mxu0 %v14712_v0  ;;  %v12107_v39 = vld [vmem:[#allocation10 + $0x38] ss:$24 sps:$4 sm:$0xff]  }
 0x204   :  { %3131 = vmatpush1.bf16.msra.mxu1 %v12092_v32  ;;  %3470 = vmatpush1.bf16.msra.mxu0 %v12095_v18  ;;  %v14746_v32 = vadd.f32 %v14272_v40, %v14704_v63  ;;  %v14750_v18 = vadd.f32 %v14286_v14, %v14704_v63  ;;  %v12115_v40 = vld [vmem:[#allocation10 + $0x6c] ss:$24 sps:$4 sm:$0xff]   ;;  %v12110_v14 = vld [vmem:[#allocation11 + $0x70] ss:$24 sps:$4 sm:$0xff]  }
 0x205   :  { %3552 = vmatprep.subr.bf16.mxu1 %v12100_v61  ;;  %5670 = vmatprep.subr.bf16.mxu0 %v12103_v51  ;;  %v14755_v61 = vadd.f32 %v14322_v5, %v14671_v37  ;;  %v14759_v51 = vadd.f32 %v14350_v17, %v14671_v37  ;;  %v12118_v17 = vld [vmem:[#allocation11 + $0xa4] ss:$24 sps:$4 sm:$0xff]  }
 0x206   :  { %16724 = vst [vmem:[#allocation123_spill] sm:$0xff] %v14746_v32  ;;  %16725 = vst [vmem:[#allocation124_spill] sm:$0xff] %v14750_v18 }
 0x207   :  { %3133 = vmatmul.mubr.bf16.vlgmr.msra.gmra.mrb[48].mxu1 %v14736_v36  ;;  %3472 = vmatmul.mubr.bf16.vlgmr.msra.gmra.mrb[48].mxu0 %v14736_v36  ;;  %16726 = vst [vmem:[#allocation125_spill] sm:$0xff] %v14755_v61  ;;  %16727 = vst [vmem:[#allocation126_spill] sm:$0xff] %v14759_v51  ;;  %v14768_v5 = vpack.c.bf16 %v14759_v51, %v14755_v61  ;;  %v12124_v51 = vld [vmem:[#allocation11 + $0xd4] ss:$24 sps:$4 sm:$0xff]  }
 0x208   :  { %3553 = vmatpush1.bf16.msra.mxu1 %v12098_v8  ;;  %5671 = vmatpush1.bf16.msra.mxu0 %v12101_v9  ;;  %v12113_v8 = vld [vmem:[#allocation10 + $0x68] ss:$24 sps:$4 sm:$0xff]   ;;  %v14764_v9 = vpack.c.bf16 %v14750_v18, %v14746_v32  ;;  %v12133_v61 = vld [vmem:[#allocation10 + $0xfc] ss:$24 sps:$4 sm:$0xff]  }
 0x209   :  { %3554 = vmatprep.subr.bf16.mxu1 %v12106_v25  ;;  %3142 = vmatprep.mubr.bf16.mxu1 %v14740_v2  ;;  %v12116_v25 = vld [vmem:[#allocation11 + $0xa0] ss:$24 sps:$4 sm:$0xff]  }
 0x20a   :  { %3481 = vmatprep.mubr.bf16.mxu0 %v14740_v2  ;;  %5672 = vmatprep.subr.bf16.mxu0 %v12109_v24  ;;  %v12119_v24 = vld [vmem:[#allocation10 + $0x98] ss:$24 sps:$4 sm:$0xff]  }
 0x20b   :  { %v16761_v32 = vld [vmem:[#allocation58_spill] sm:$0xff] }
 0x20c   :  { %3555 = vmatpush1.bf16.msra.mxu1 %v12104_v29  ;;  %5673 = vmatpush1.bf16.msra.mxu0 %v12107_v39  ;;  %v14774_v29 = vadd.f32 %v14316_v13, %v14704_v63  ;;  %v14778_v39 = vadd.f32 %v14330_v62, %v14704_v63  ;;  %v12127_v13 = vld [vmem:[#allocation10 + $0xcc] ss:$24 sps:$4 sm:$0xff]   ;;  %v12122_v62 = vld [vmem:[#allocation11 + $0xd0] ss:$24 sps:$4 sm:$0xff]  }
 0x20d   :  { %3556 = vmatprep.subr.bf16.mxu1 %v12112_v4  ;;  %5674 = vmatprep.subr.bf16.mxu0 %v12115_v40  ;;  %v14783_v4 = vadd.f32 %v14376_v52, %v14671_v37  ;;  %v14787_v40 = vadd.f32 %v14401_v38, %v14671_v37  ;;  %v12130_v38 = vld [vmem:[#allocation11 + $0x104] ss:$24 sps:$4 sm:$0xff]  }
 0x20e   :  { %16728 = vst [vmem:[#allocation127_spill] sm:$0xff] %v14774_v29  ;;  %16729 = vst [vmem:[#allocation128_spill] sm:$0xff] %v14778_v39 }
 0x20f   :  { %3143 = vmatmul.mubr.bf16.gmra.mrb[52].mxu1 %v14764_v9  ;;  %3482 = vmatmul.mubr.bf16.gmra.mrb[52].mxu0 %v14764_v9  ;;  %16730 = vst [vmem:[#allocation129_spill] sm:$0xff] %v14783_v4  ;;  %16731 = vst [vmem:[#allocation130_spill] sm:$0xff] %v14787_v40  ;;  %v14796_v52 = vpack.c.bf16 %v14787_v40, %v14783_v4  ;;  %v12136_v40 = vld [vmem:[#allocation11 + $0x134] ss:$24 sps:$4 sm:$0xff]  }
 0x210   :  { %3557 = vmatpush1.bf16.msra.mxu1 %v12110_v14  ;;  %5675 = vmatpush1.bf16.msra.mxu0 %v12113_v8  ;;  %v12125_v14 = vld [vmem:[#allocation10 + $0xc8] ss:$24 sps:$4 sm:$0xff]   ;;  %v14792_v8 = vpack.c.bf16 %v14778_v39, %v14774_v29  ;;  %v12145_v4 = vld [vmem:[#allocation10 + $0x15c] ss:$24 sps:$4 sm:$0xff]  }
 0x211   :  { %3558 = vmatprep.subr.bf16.mxu1 %v12118_v17  ;;  %3152 = vmatprep.mubr.bf16.mxu1 %v14768_v5  ;;  %v12128_v17 = vld [vmem:[#allocation11 + $0x100] ss:$24 sps:$4 sm:$0xff]   ;;  %v16759_v29 = vld [vmem:[#allocation52_spill] sm:$0xff] }
 0x212   :  { %3491 = vmatprep.mubr.bf16.mxu0 %v14768_v5  ;;  %5676 = vmatprep.subr.bf16.mxu0 %v12121_v12  ;;  %v12131_v12 = vld [vmem:[#allocation10 + $0xf8] ss:$24 sps:$4 sm:$0xff]  }
 0x214   :  { %3559 = vmatpush1.bf16.msra.mxu1 %v12116_v25  ;;  %5677 = vmatpush1.bf16.msra.mxu0 %v12119_v24  ;;  %v14802_v25 = vadd.f32 %v14367_v53, %v14704_v63  ;;  %v14806_v24 = vadd.f32 %v14384_v56, %v14704_v63  ;;  %v12139_v53 = vld [vmem:[#allocation10 + $0x12c] ss:$24 sps:$4 sm:$0xff]   ;;  %v12134_v56 = vld [vmem:[#allocation11 + $0x130] ss:$24 sps:$4 sm:$0xff]  }
 0x215   :  { %3560 = vmatprep.subr.bf16.mxu1 %v12124_v51  ;;  %5678 = vmatprep.subr.bf16.mxu0 %v12127_v13  ;;  %v14811_v51 = vadd.f32 %v14424_v41, %v14671_v37  ;;  %v14815_v13 = vadd.f32 %v14449_v27, %v14671_v37  ;;  %v12142_v27 = vld [vmem:[#allocation11 + $0x164] ss:$24 sps:$4 sm:$0xff]  }
 0x216   :  { %16732 = vst [vmem:[#allocation131_spill] sm:$0xff] %v14802_v25  ;;  %16733 = vst [vmem:[#allocation132_spill] sm:$0xff] %v14806_v24 }
 0x217   :  { %3153 = vmatmul.mubr.bf16.gmra.mrb[56].mxu1 %v14792_v8  ;;  %3492 = vmatmul.mubr.bf16.gmra.mrb[56].mxu0 %v14792_v8  ;;  %16734 = vst [vmem:[#allocation133_spill] sm:$0xff] %v14811_v51  ;;  %16735 = vst [vmem:[#allocation134_spill] sm:$0xff] %v14815_v13  ;;  %v14824_v41 = vpack.c.bf16 %v14815_v13, %v14811_v51  ;;  %v12148_v13 = vld [vmem:[#allocation11 + $0x194] ss:$24 sps:$4 sm:$0xff]  }
 0x218   :  { %3561 = vmatpush1.bf16.msra.mxu1 %v12122_v62  ;;  %5679 = vmatpush1.bf16.msra.mxu0 %v12125_v14  ;;  %v12137_v62 = vld [vmem:[#allocation10 + $0x128] ss:$24 sps:$4 sm:$0xff]   ;;  %v14820_v14 = vpack.c.bf16 %v14806_v24, %v14802_v25  ;;  %v12157_v51 = vld [vmem:[#allocation10 + $0x1bc] ss:$24 sps:$4 sm:$0xff]  }
 0x219   :  { %3562 = vmatprep.subr.bf16.mxu1 %v12130_v38  ;;  %3162 = vmatprep.mubr.bf16.mxu1 %v14796_v52  ;;  %v12140_v38 = vld [vmem:[#allocation11 + $0x160] ss:$24 sps:$4 sm:$0xff]   ;;  %v16757_v25 = vld [vmem:[#allocation44_spill] sm:$0xff] }
 0x21a   :  { %3501 = vmatprep.mubr.bf16.mxu0 %v14796_v52  ;;  %5680 = vmatprep.subr.bf16.mxu0 %v12133_v61  ;;  %v12143_v61 = vld [vmem:[#allocation10 + $0x158] ss:$24 sps:$4 sm:$0xff]  }
 0x21c   :  { %3563 = vmatpush1.bf16.msra.mxu1 %v12128_v17  ;;  %5681 = vmatpush1.bf16.msra.mxu0 %v12131_v12  ;;  %v14830_v17 = vadd.f32 %v14418_v43, %v14704_v63  ;;  %v14834_v12 = vadd.f32 %v14432_v33, %v14704_v63  ;;  %v12151_v43 = vld [vmem:[#allocation10 + $0x18c] ss:$24 sps:$4 sm:$0xff]   ;;  %v12146_v33 = vld [vmem:[#allocation11 + $0x190] ss:$24 sps:$4 sm:$0xff]  }
 0x21d   :  { %3564 = vmatprep.subr.bf16.mxu1 %v12136_v40  ;;  %5682 = vmatprep.subr.bf16.mxu0 %v12139_v53  ;;  %v14839_v40 = vadd.f32 %v14468_v19, %v14671_v37  ;;  %v14843_v53 = vadd.f32 %v14493_v6, %v14671_v37  ;;  %v12154_v6 = vld [vmem:[#allocation11 + $0x1c4] ss:$24 sps:$4 sm:$0xff]  }
 0x21e   :  { %16736 = vst [vmem:[#allocation135_spill] sm:$0xff] %v14830_v17  ;;  %16737 = vst [vmem:[#allocation136_spill] sm:$0xff] %v14834_v12 }
 0x21f   :  { %3163 = vmatmul.mubr.bf16.gmra.mrb[60].mxu1 %v14820_v14  ;;  %3502 = vmatmul.mubr.bf16.gmra.mrb[60].mxu0 %v14820_v14  ;;  %16738 = vst [vmem:[#allocation137_spill] sm:$0xff] %v14839_v40  ;;  %16739 = vst [vmem:[#allocation138_spill] sm:$0xff] %v14843_v53  ;;  %v14852_v19 = vpack.c.bf16 %v14843_v53, %v14839_v40  ;;  %v12160_v53 = vld [vmem:[#allocation11 + $0x1f4] ss:$24 sps:$4 sm:$0xff]  }
 0x220   :  { %3565 = vmatpush1.bf16.msra.mxu1 %v12134_v56  ;;  %5683 = vmatpush1.bf16.msra.mxu0 %v12137_v62  ;;  %v12149_v56 = vld [vmem:[#allocation10 + $0x188] ss:$24 sps:$4 sm:$0xff]   ;;  %v14848_v62 = vpack.c.bf16 %v14834_v12, %v14830_v17  ;;  %v12169_v40 = vld [vmem:[#allocation10 + $0x21c] ss:$24 sps:$4 sm:$0xff]   ;;  %v12203_v12 = vld [vmem:[#allocation10 + $0x338] ss:$24 sps:$4 sm:$0xff]  }
 0x221   :  { %3566 = vmatprep.subr.bf16.mxu1 %v12142_v27  ;;  %3172 = vmatprep.mubr.bf16.mxu1 %v14824_v41  ;;  %v12152_v27 = vld [vmem:[#allocation11 + $0x1c0] ss:$24 sps:$4 sm:$0xff]  }
 0x222   :  { %3511 = vmatprep.mubr.bf16.mxu0 %v14824_v41  ;;  %5684 = vmatprep.subr.bf16.mxu0 %v12145_v4  ;;  %v12155_v4 = vld [vmem:[#allocation10 + $0x1b8] ss:$24 sps:$4 sm:$0xff]  }
 0x224   :  { %3567 = vmatpush1.bf16.msra.mxu1 %v12140_v38  ;;  %5685 = vmatpush1.bf16.msra.mxu0 %v12143_v61  ;;  %v14858_v38 = vadd.f32 %v14462_v11, %v14704_v63  ;;  %v14862_v61 = vadd.f32 %v14476_v49, %v14704_v63  ;;  %v12163_v11 = vld [vmem:[#allocation10 + $0x1ec] ss:$24 sps:$4 sm:$0xff]   ;;  %v12158_v49 = vld [vmem:[#allocation11 + $0x1f0] ss:$24 sps:$4 sm:$0xff]  }
 0x225   :  { %3568 = vmatprep.subr.bf16.mxu1 %v12148_v13  ;;  %5686 = vmatprep.subr.bf16.mxu0 %v12151_v43  ;;  %v14867_v13 = vadd.f32 %v14512_v1, %v14671_v37  ;;  %v14871_v43 = vadd.f32 %v14537_v35, %v14671_v37  ;;  %v12166_v35 = vld [vmem:[#allocation11 + $0x224] ss:$24 sps:$4 sm:$0xff]  }
 0x226   :  { %16740 = vst [vmem:[#allocation139_spill] sm:$0xff] %v14858_v38  ;;  %16741 = vst [vmem:[#allocation140_spill] sm:$0xff] %v14862_v61 }
 0x227   :  { %3173 = vmatmul.mubr.bf16.gmra.mrb[64].mxu1 %v14848_v62  ;;  %3512 = vmatmul.mubr.bf16.gmra.mrb[64].mxu0 %v14848_v62  ;;  %16742 = vst [vmem:[#allocation141_spill] sm:$0xff] %v14867_v13  ;;  %16743 = vst [vmem:[#allocation142_spill] sm:$0xff] %v14871_v43  ;;  %v14880_v1 = vpack.c.bf16 %v14871_v43, %v14867_v13  ;;  %v12172_v43 = vld [vmem:[#allocation11 + $0x254] ss:$24 sps:$4 sm:$0xff]  }
 0x228   :  { %3569 = vmatpush1.bf16.msra.mxu1 %v12146_v33  ;;  %5687 = vmatpush1.bf16.msra.mxu0 %v12149_v56  ;;  %v12161_v33 = vld [vmem:[#allocation10 + $0x1e8] ss:$24 sps:$4 sm:$0xff]   ;;  %v14876_v56 = vpack.c.bf16 %v14862_v61, %v14858_v38  ;;  %v161_v13 = vld [vmem:[#allocation2 + $0x38] sm:$0xff] }
 0x229   :  { %3570 = vmatprep.subr.bf16.mxu1 %v12154_v6  ;;  %3182 = vmatprep.mubr.bf16.mxu1 %v14852_v19  ;;  %v12164_v6 = vld [vmem:[#allocation11 + $0x220] ss:$24 sps:$4 sm:$0xff]  }
 0x22a   :  { %3521 = vmatprep.mubr.bf16.mxu0 %v14852_v19  ;;  %5688 = vmatprep.subr.bf16.mxu0 %v12157_v51  ;;  %v12167_v51 = vld [vmem:[#allocation10 + $0x218] ss:$24 sps:$4 sm:$0xff]   ;;  %v12197_v38 = vld [vmem:[#allocation10 + $0x308] ss:$24 sps:$4 sm:$0xff]  }
 0x22b   :  { %v173_v61 = vld [vmem:[#allocation2 + $0x98] sm:$0xff] }
 0x22c   :  { %3571 = vmatpush1.bf16.msra.mxu1 %v12152_v27  ;;  %5689 = vmatpush1.bf16.msra.mxu0 %v12155_v4  ;;  %v14886_v27 = vadd.f32 %v14506_v15, %v14704_v63  ;;  %v14890_v4 = vadd.f32 %v14520_v28, %v14704_v63  ;;  %v12175_v15 = vld [vmem:[#allocation10 + $0x24c] ss:$24 sps:$4 sm:$0xff]   ;;  %v12170_v28 = vld [vmem:[#allocation11 + $0x250] ss:$24 sps:$4 sm:$0xff]  }
 0x22d   :  { %3572 = vmatprep.subr.bf16.mxu1 %v12160_v53  ;;  %5690 = vmatprep.subr.bf16.mxu0 %v12163_v11  ;;  %v14895_v53 = vadd.f32 %v14556_v59, %v14671_v37  ;;  %v14899_v11 = vadd.f32 %v14581_v10, %v14671_v37  ;;  %v12178_v10 = vld [vmem:[#allocation11 + $0x284] ss:$24 sps:$4 sm:$0xff]   ;;  %v12176_v37 = vld [vmem:[#allocation11 + $0x280] ss:$24 sps:$4 sm:$0xff]  }
 0x22e   :  { %16744 = vst [vmem:[#allocation143_spill] sm:$0xff] %v14886_v27  ;;  %16745 = vst [vmem:[#allocation144_spill] sm:$0xff] %v14890_v4 }
 0x22f   :  { %3183 = vmatmul.mubr.bf16.gmra.mrb[68].mxu1 %v14876_v56  ;;  %3522 = vmatmul.mubr.bf16.gmra.mrb[68].mxu0 %v14876_v56  ;;  %16746 = vst [vmem:[#allocation145_spill] sm:$0xff] %v14895_v53  ;;  %16747 = vst [vmem:[#allocation146_spill] sm:$0xff] %v14899_v11  ;;  %v14908_v59 = vpack.c.bf16 %v14899_v11, %v14895_v53  ;;  %v155_v53 = vld [vmem:[#allocation2 + $0x8] sm:$0xff] }
 0x230   :  { %3573 = vmatpush1.bf16.msra.mxu1 %v12158_v49  ;;  %5691 = vmatpush1.bf16.msra.mxu0 %v12161_v33  ;;  %v12173_v49 = vld [vmem:[#allocation10 + $0x248] ss:$24 sps:$4 sm:$0xff]   ;;  %v14904_v33 = vpack.c.bf16 %v14890_v4, %v14886_v27  ;;  %v14926_v27 = vpack.c.bf16 %v161_v13, %v155_v53 }
 0x231   :  { %3574 = vmatprep.subr.bf16.mxu1 %v12166_v35  ;;  %3192 = vmatprep.mubr.bf16.mxu1 %v14880_v1  ;;  %v12181_v35 = vld [vmem:[#allocation10 + $0x27c] ss:$24 sps:$4 sm:$0xff]   ;;  %v16750_v4 = vld [vmem:[#allocation99_spill] sm:$0xff] }
 0x232   :  { %3531 = vmatprep.mubr.bf16.mxu0 %v14880_v1  ;;  %5692 = vmatprep.subr.bf16.mxu0 %v12169_v40  ;;  %v12179_v40 = vld [vmem:[#allocation10 + $0x278] ss:$24 sps:$4 sm:$0xff]   ;;  %v14918_v11 = vadd.f32 %v16750_v4, %v14704_v63  ;;  %v12190_v4 = vld [vmem:[#allocation11 + $0x2e4] ss:$24 sps:$4 sm:$0xff]  }
 0x233   :  { %v167_v53 = vld [vmem:[#allocation2 + $0x68] sm:$0xff] }
 0x234   :  { %3575 = vmatpush1.bf16.msra.mxu1 %v12164_v6  ;;  %5693 = vmatpush1.bf16.msra.mxu0 %v12167_v51  ;;  %v16748_v6 = vld [vmem:[#allocation97_spill] sm:$0xff]  ;;  %16751 = vst [vmem:[#allocation99_spill] sm:$0xff] %v14918_v11  ;;  %v14935_v17 = vpack.c.bf16 %v173_v61, %v167_v53  ;;  %v12214_v53 = vld [vmem:[#allocation11 + $0x3a4] ss:$24 sps:$4 sm:$0xff]  }
 0x235   :  { %3576 = vmatprep.subr.bf16.mxu1 %v12172_v43  ;;  %5694 = vmatprep.subr.bf16.mxu0 %v12175_v15  ;;  %v14914_v51 = vadd.f32 %v16748_v6, %v14704_v63  ;;  %v12184_v43 = vld [vmem:[#allocation11 + $0x2b4] ss:$24 sps:$4 sm:$0xff]   ;;  %v12185_v63 = vld [vmem:[#allocation10 + $0x2a8] ss:$24 sps:$4 sm:$0xff]  }
 0x236   :  { %v12187_v15 = vld [vmem:[#allocation10 + $0x2ac] ss:$24 sps:$4 sm:$0xff]   ;;  %v12193_v6 = vld [vmem:[#allocation10 + $0x2dc] ss:$24 sps:$4 sm:$0xff]  }
 0x237   :  { %3193 = vmatmul.mubr.bf16.gmra.mrb[72].mxu1 %v14904_v33  ;;  %3532 = vmatmul.mubr.bf16.gmra.mrb[72].mxu0 %v14904_v33  ;;  %16749 = vst [vmem:[#allocation97_spill] sm:$0xff] %v14914_v51  ;;  %v185_v61 = vld [vmem:[#allocation2 + $0xf8] sm:$0xff] }
 0x238   :  { %3577 = vmatpush1.bf16.msra.mxu1 %v12170_v28  ;;  %5695 = vmatpush1.bf16.msra.mxu0 %v12173_v49  ;;  %v12182_v28 = vld [vmem:[#allocation11 + $0x2b0] ss:$24 sps:$4 sm:$0xff]   ;;  %v14924_v49 = vpack.c.bf16 %v14918_v11, %v14914_v51  ;;  %v154_v11 = vld [vmem:[#allocation2] sm:$0xff] }
 0x239   :  { %3578 = vmatprep.subr.bf16.mxu1 %v12178_v10  ;;  %3202 = vmatprep.mubr.bf16.mxu1 %v14908_v59  ;;  %v12188_v10 = vld [vmem:[#allocation11 + $0x2e0] ss:$24 sps:$4 sm:$0xff]   ;;  %v12194_v51 = vld [vmem:[#allocation11 + $0x310] ss:$24 sps:$4 sm:$0xff]  }
 0x23a   :  { %3541 = vmatprep.mubr.bf16.mxu0 %v14908_v59  ;;  %5696 = vmatprep.subr.bf16.mxu0 %v12181_v35  ;;  %v12191_v35 = vld [vmem:[#allocation10 + $0x2d8] ss:$24 sps:$4 sm:$0xff]  }
 0x23c   :  { %3579 = vmatpush1.bf16.msra.mxu1 %v12176_v37  ;;  %5697 = vmatpush1.bf16.msra.mxu0 %v12179_v40  ;;  %v12196_v37 = vld [vmem:[#allocation11 + $0x314] ss:$24 sps:$4 sm:$0xff]   ;;  %v16752_v40 = vld [vmem:[#allocation31_spill] sm:$0xff] }
 0x23d   :  { %3580 = vmatprep.subr.bf16.mxu1 %v12184_v43  ;;  %5698 = vmatprep.subr.bf16.mxu0 %v12187_v15  ;;  %v160_v43 = vld [vmem:[#allocation2 + $0x30] sm:$0xff] }
 0x23e   :  { %v12199_v15 = vld [vmem:[#allocation10 + $0x30c] ss:$24 sps:$4 sm:$0xff]   ;;  %v14932_v13 = vpack.c.bf16 %v160_v43, %v154_v11  ;;  %v16754_v11 = vld [vmem:[#allocation37_spill] sm:$0xff] }
 0x23f   :  { %3203 = vmatmul.mubr.bf16.gmra.mrb[76].mxu1 %v14924_v49  ;;  %3542 = vmatmul.mubr.bf16.gmra.mrb[76].mxu0 %v14924_v49  ;;  %v12206_v43 = vld [vmem:[#allocation11 + $0x370] ss:$24 sps:$4 sm:$0xff]  }
 0x240   :  { %3581 = vmatpush1.bf16.msra.mxu1 %v12182_v28  ;;  %3584 = vmatprep.mubr.bf16.mxu1 %v16752_v40  ;;  %v12202_v28 = vld [vmem:[#allocation11 + $0x344] ss:$24 sps:$4 sm:$0xff]   ;;  %v12200_v40 = vld [vmem:[#allocation11 + $0x340] ss:$24 sps:$4 sm:$0xff]  }
 0x241   :  { %5699 = vmatpush1.bf16.msra.mxu0 %v12185_v63  ;;  %3582 = vmatprep.subr.bf16.mxu1 %v12190_v4  ;;  %v12205_v63 = vld [vmem:[#allocation10 + $0x33c] ss:$24 sps:$4 sm:$0xff]   ;;  %v16753_v4 = vld [vmem:[#allocation32_spill] sm:$0xff] }
 0x242   :  { %5700 = vmatprep.subr.bf16.mxu0 %v12193_v6  ;;  %5702 = vmatprep.mubr.bf16.mxu0 %v14926_v27  ;;  %v12208_v6 = vld [vmem:[#allocation11 + $0x374] ss:$24 sps:$4 sm:$0xff]  }
 0x244   :  { %3583 = vmatpush1.bf16.msra.mxu1 %v12188_v10  ;;  %v166_v10 = vld [vmem:[#allocation2 + $0x60] sm:$0xff] }
 0x245   :  { %5701 = vmatpush1.bf16.msra.mxu0 %v12191_v35  ;;  %3665 = vmatprep.subr.bf16.mxu1 %v12196_v37  ;;  %v172_v35 = vld [vmem:[#allocation2 + $0x90] sm:$0xff] }
 0x246   :  { %5783 = vmatprep.subr.bf16.mxu0 %v12199_v15  ;;  %v12211_v37 = vld [vmem:[#allocation10 + $0x36c] ss:$24 sps:$4 sm:$0xff]   ;;  %v14940_v15 = vpack.c.bf16 %v172_v35, %v166_v10  ;;  %v178_v35 = vld [vmem:[#allocation2 + $0xc0] sm:$0xff] }
 0x247   :  { %3585 = vmatmul.mubr.bf16.vlgmr.msra.gmra.mrb[80].mxu1 %v16753_v4  ;;  %v179_v4 = vld [vmem:[#allocation2 + $0xc8] sm:$0xff]  ;;  %v12220_v10 = vld [vmem:[#allocation11 + $0x3d4] ss:$24 sps:$4 sm:$0xff]  }
 0x248   :  { %3666 = vmatpush1.bf16.msra.mxu1 %v12194_v51  ;;  %5703 = vmatmul.mubr.bf16.vlgmr.msra.gmra.mrb[48].mxu0 %v14932_v13  ;;  %v12209_v51 = vld [vmem:[#allocation10 + $0x368] ss:$24 sps:$4 sm:$0xff]   ;;  %v14943_v24 = vpack.c.bf16 %v185_v61, %v179_v4  ;;  %v197_v61 = vld [vmem:[#allocation2 + $0x158] sm:$0xff] }
 0x249   :  { %3594 = vmatprep.mubr.bf16.mxu1 %v16754_v11  ;;  %5784 = vmatpush1.bf16.msra.mxu0 %v12197_v38  ;;  %v12217_v11 = vld [vmem:[#allocation10 + $0x39c] ss:$24 sps:$4 sm:$0xff]  }
 0x24a   :  { %3667 = vmatprep.subr.bf16.mxu1 %v12202_v28  ;;  %5785 = vmatprep.subr.bf16.mxu0 %v12205_v63  ;;  %v16755_v38 = vld [vmem:[#allocation38_spill] sm:$0xff]  ;;  %v16756_v63 = vld [vmem:[#allocation43_spill] sm:$0xff] }
 0x24b   :  { %5712 = vmatprep.mubr.bf16.mxu0 %v14935_v17  ;;  %v12212_v28 = vld [vmem:[#allocation11 + $0x3a0] ss:$24 sps:$4 sm:$0xff]  }
 0x24c   :  { %3668 = vmatpush1.bf16.msra.mxu1 %v12200_v40  ;;  %v12215_v40 = vld [vmem:[#allocation10 + $0x398] ss:$24 sps:$4 sm:$0xff]  }
 0x24d   :  { %5786 = vmatpush1.bf16.msra.mxu0 %v12203_v12  ;;  %3669 = vmatprep.subr.bf16.mxu1 %v12208_v6  ;;  %v184_v12 = vld [vmem:[#allocation2 + $0xf0] sm:$0xff] }
 0x24e   :  { %5787 = vmatprep.subr.bf16.mxu0 %v12211_v37  ;;  %v12223_v6 = vld [vmem:[#allocation10 + $0x3cc] ss:$24 sps:$4 sm:$0xff]   ;;  %v12218_v37 = vld [vmem:[#allocation11 + $0x3d0] ss:$24 sps:$4 sm:$0xff]   ;;  %v14948_v4 = vpack.c.bf16 %v184_v12, %v178_v35  ;;  %v190_v12 = vld [vmem:[#allocation2 + $0x120] sm:$0xff] }
 0x24f   :  { %3595 = vmatmul.mubr.bf16.gmra.mrb[84].mxu1 %v16755_v38  ;;  %v12221_v38 = vld [vmem:[#allocation10 + $0x3c8] ss:$24 sps:$4 sm:$0xff]   ;;  %v12232_v35 = vld [vmem:[#allocation11 + $0x434] ss:$24 sps:$4 sm:$0xff]  }
 0x250   :  { %3670 = vmatpush1.bf16.msra.mxu1 %v12206_v43  ;;  %5713 = vmatmul.mubr.bf16.gmra.mrb[52].mxu0 %v14940_v15  ;;  %v191_v43 = vld [vmem:[#allocation2 + $0x128] sm:$0xff] }
 0x251   :  { %3604 = vmatprep.mubr.bf16.mxu1 %v16756_v63  ;;  %5788 = vmatpush1.bf16.msra.mxu0 %v12209_v51  ;;  %v12226_v63 = vld [vmem:[#allocation11 + $0x404] ss:$24 sps:$4 sm:$0xff]   ;;  %v14951_v39 = vpack.c.bf16 %v197_v61, %v191_v43  ;;  %v209_v43 = vld [vmem:[#allocation2 + $0x1b8] sm:$0xff]  ;;  %v12233_v61 = vld [vmem:[#allocation10 + $0x428] ss:$24 sps:$4 sm:$0xff]  }
 0x252   :  { %3671 = vmatprep.subr.bf16.mxu1 %v12214_v53  ;;  %5789 = vmatprep.subr.bf16.mxu0 %v12217_v11  ;;  %v12229_v51 = vld [vmem:[#allocation10 + $0x3fc] ss:$24 sps:$4 sm:$0xff]   ;;  %v12224_v53 = vld [vmem:[#allocation11 + $0x400] ss:$24 sps:$4 sm:$0xff]  }
 0x253   :  { %5722 = vmatprep.mubr.bf16.mxu0 %v14943_v24  ;;  %v12227_v11 = vld [vmem:[#allocation10 + $0x3f8] ss:$24 sps:$4 sm:$0xff]  }
 0x254   :  { %3672 = vmatpush1.bf16.msra.mxu1 %v12212_v28  ;;  %v16758_v28 = vld [vmem:[#allocation51_spill] sm:$0xff] }
 0x255   :  { %5790 = vmatpush1.bf16.msra.mxu0 %v12215_v40  ;;  %3673 = vmatprep.subr.bf16.mxu1 %v12220_v10  ;;  %v196_v40 = vld [vmem:[#allocation2 + $0x150] sm:$0xff] }
 0x256   :  { %5791 = vmatprep.subr.bf16.mxu0 %v12223_v6  ;;  %v12235_v10 = vld [vmem:[#allocation10 + $0x42c] ss:$24 sps:$4 sm:$0xff]   ;;  %v14956_v6 = vpack.c.bf16 %v196_v40, %v190_v12  ;;  %v202_v40 = vld [vmem:[#allocation2 + $0x180] sm:$0xff] }
 0x257   :  { %3605 = vmatmul.mubr.bf16.gmra.mrb[88].mxu1 %v16757_v25  ;;  %v12230_v25 = vld [vmem:[#allocation11 + $0x430] ss:$24 sps:$4 sm:$0xff]   ;;  %v12244_v12 = vld [vmem:[#allocation11 + $0x494] ss:$24 sps:$4 sm:$0xff]  }
 0x258   :  { %3674 = vmatpush1.bf16.msra.mxu1 %v12218_v37  ;;  %5723 = vmatmul.mubr.bf16.gmra.mrb[56].mxu0 %v14948_v4  ;;  %v203_v37 = vld [vmem:[#allocation2 + $0x188] sm:$0xff] }
 0x259   :  { %3614 = vmatprep.mubr.bf16.mxu1 %v16758_v28  ;;  %5792 = vmatpush1.bf16.msra.mxu0 %v12221_v38  ;;  %v12238_v28 = vld [vmem:[#allocation11 + $0x464] ss:$24 sps:$4 sm:$0xff]   ;;  %v14959_v18 = vpack.c.bf16 %v209_v43, %v203_v37  ;;  %v221_v37 = vld [vmem:[#allocation2 + $0x218] sm:$0xff]  ;;  %v12245_v43 = vld [vmem:[#allocation10 + $0x488] ss:$24 sps:$4 sm:$0xff]  }
 0x25a   :  { %3675 = vmatprep.subr.bf16.mxu1 %v12226_v63  ;;  %5793 = vmatprep.subr.bf16.mxu0 %v12229_v51  ;;  %v12241_v38 = vld [vmem:[#allocation10 + $0x45c] ss:$24 sps:$4 sm:$0xff]   ;;  %v12236_v63 = vld [vmem:[#allocation11 + $0x460] ss:$24 sps:$4 sm:$0xff]  }
 0x25b   :  { %5732 = vmatprep.mubr.bf16.mxu0 %v14951_v39  ;;  %v12239_v51 = vld [vmem:[#allocation10 + $0x458] ss:$24 sps:$4 sm:$0xff]  }
 0x25c   :  { %3676 = vmatpush1.bf16.msra.mxu1 %v12224_v53  ;;  %v16760_v53 = vld [vmem:[#allocation53_spill] sm:$0xff] }
 0x25d   :  { %5794 = vmatpush1.bf16.msra.mxu0 %v12227_v11  ;;  %3677 = vmatprep.subr.bf16.mxu1 %v12232_v35  ;;  %v208_v11 = vld [vmem:[#allocation2 + $0x1b0] sm:$0xff] }
 0x25e   :  { %5795 = vmatprep.subr.bf16.mxu0 %v12235_v10  ;;  %v12247_v35 = vld [vmem:[#allocation10 + $0x48c] ss:$24 sps:$4 sm:$0xff]   ;;  %v14964_v10 = vpack.c.bf16 %v208_v11, %v202_v40  ;;  %v214_v11 = vld [vmem:[#allocation2 + $0x1e0] sm:$0xff] }
 0x25f   :  { %3615 = vmatmul.mubr.bf16.gmra.mrb[92].mxu1 %v16759_v29  ;;  %v12242_v29 = vld [vmem:[#allocation11 + $0x490] ss:$24 sps:$4 sm:$0xff]   ;;  %v12256_v40 = vld [vmem:[#allocation11 + $0x4f4] ss:$24 sps:$4 sm:$0xff]  }
 0x260   :  { %3678 = vmatpush1.bf16.msra.mxu1 %v12230_v25  ;;  %5733 = vmatmul.mubr.bf16.gmra.mrb[60].mxu0 %v14956_v6  ;;  %v215_v25 = vld [vmem:[#allocation2 + $0x1e8] sm:$0xff] }
 0x261   :  { %3624 = vmatprep.mubr.bf16.mxu1 %v16760_v53  ;;  %5796 = vmatpush1.bf16.msra.mxu0 %v12233_v61  ;;  %v12250_v53 = vld [vmem:[#allocation11 + $0x4c4] ss:$24 sps:$4 sm:$0xff]   ;;  %v14967_v7 = vpack.c.bf16 %v221_v37, %v215_v25  ;;  %v233_v25 = vld [vmem:[#allocation2 + $0x278] sm:$0xff]  ;;  %v12257_v37 = vld [vmem:[#allocation10 + $0x4e8] ss:$24 sps:$4 sm:$0xff]  }
 0x262   :  { %3679 = vmatprep.subr.bf16.mxu1 %v12238_v28  ;;  %5797 = vmatprep.subr.bf16.mxu0 %v12241_v38  ;;  %v12253_v61 = vld [vmem:[#allocation10 + $0x4bc] ss:$24 sps:$4 sm:$0xff]   ;;  %v12248_v28 = vld [vmem:[#allocation11 + $0x4c0] ss:$24 sps:$4 sm:$0xff]  }
 0x263   :  { %5742 = vmatprep.mubr.bf16.mxu0 %v14959_v18  ;;  %v12251_v38 = vld [vmem:[#allocation10 + $0x4b8] ss:$24 sps:$4 sm:$0xff]  }
 0x264   :  { %3680 = vmatpush1.bf16.msra.mxu1 %v12236_v63  ;;  %v16762_v63 = vld [vmem:[#allocation59_spill] sm:$0xff] }
 0x265   :  { %5798 = vmatpush1.bf16.msra.mxu0 %v12239_v51  ;;  %3681 = vmatprep.subr.bf16.mxu1 %v12244_v12  ;;  %v220_v51 = vld [vmem:[#allocation2 + $0x210] sm:$0xff] }
 0x266   :  { %5799 = vmatprep.subr.bf16.mxu0 %v12247_v35  ;;  %v12259_v12 = vld [vmem:[#allocation10 + $0x4ec] ss:$24 sps:$4 sm:$0xff]   ;;  %v14972_v35 = vpack.c.bf16 %v220_v51, %v214_v11  ;;  %v226_v51 = vld [vmem:[#allocation2 + $0x240] sm:$0xff] }
 0x267   :  { %3625 = vmatmul.mubr.bf16.gmra.mrb[96].mxu1 %v16761_v32  ;;  %v12254_v32 = vld [vmem:[#allocation11 + $0x4f0] ss:$24 sps:$4 sm:$0xff]   ;;  %v12268_v11 = vld [vmem:[#allocation11 + $0x554] ss:$24 sps:$4 sm:$0xff]  }
 0x268   :  { %3682 = vmatpush1.bf16.msra.mxu1 %v12242_v29  ;;  %5743 = vmatmul.mubr.bf16.gmra.mrb[64].mxu0 %v14964_v10  ;;  %v227_v29 = vld [vmem:[#allocation2 + $0x248] sm:$0xff] }
 0x269   :  { %3634 = vmatprep.mubr.bf16.mxu1 %v16762_v63  ;;  %5800 = vmatpush1.bf16.msra.mxu0 %v12245_v43  ;;  %v12262_v63 = vld [vmem:[#allocation11 + $0x524] ss:$24 sps:$4 sm:$0xff]   ;;  %v14975_v26 = vpack.c.bf16 %v233_v25, %v227_v29  ;;  %v245_v29 = vld [vmem:[#allocation2 + $0x2d8] sm:$0xff]  ;;  %v12269_v25 = vld [vmem:[#allocation10 + $0x548] ss:$24 sps:$4 sm:$0xff]  }
 0x26a   :  { %3683 = vmatprep.subr.bf16.mxu1 %v12250_v53  ;;  %5801 = vmatprep.subr.bf16.mxu0 %v12253_v61  ;;  %v12265_v43 = vld [vmem:[#allocation10 + $0x51c] ss:$24 sps:$4 sm:$0xff]   ;;  %v12260_v53 = vld [vmem:[#allocation11 + $0x520] ss:$24 sps:$4 sm:$0xff]  }
 0x26b   :  { %5752 = vmatprep.mubr.bf16.mxu0 %v14967_v7  ;;  %v12263_v61 = vld [vmem:[#allocation10 + $0x518] ss:$24 sps:$4 sm:$0xff]  }
 0x26c   :  { %3684 = vmatpush1.bf16.msra.mxu1 %v12248_v28  ;;  %v16764_v28 = vld [vmem:[#allocation65_spill] sm:$0xff] }
 0x26d   :  { %5802 = vmatpush1.bf16.msra.mxu0 %v12251_v38  ;;  %3685 = vmatprep.subr.bf16.mxu1 %v12256_v40  ;;  %v232_v38 = vld [vmem:[#allocation2 + $0x270] sm:$0xff] }
 0x26e   :  { %5803 = vmatprep.subr.bf16.mxu0 %v12259_v12  ;;  %v12271_v40 = vld [vmem:[#allocation10 + $0x54c] ss:$24 sps:$4 sm:$0xff]   ;;  %v14980_v12 = vpack.c.bf16 %v232_v38, %v226_v51  ;;  %v238_v38 = vld [vmem:[#allocation2 + $0x2a0] sm:$0xff] }
 0x26f   :  { %3635 = vmatmul.mubr.bf16.gmra.mrb[100].mxu1 %v16763_v31  ;;  %v12266_v31 = vld [vmem:[#allocation11 + $0x550] ss:$24 sps:$4 sm:$0xff]   ;;  %v12280_v51 = vld [vmem:[#allocation11 + $0x5b4] ss:$24 sps:$4 sm:$0xff]  }
 0x270   :  { %3686 = vmatpush1.bf16.msra.mxu1 %v12254_v32  ;;  %5753 = vmatmul.mubr.bf16.gmra.mrb[68].mxu0 %v14972_v35  ;;  %v239_v32 = vld [vmem:[#allocation2 + $0x2a8] sm:$0xff] }
 0x271   :  { %3644 = vmatprep.mubr.bf16.mxu1 %v16764_v28  ;;  %5804 = vmatpush1.bf16.msra.mxu0 %v12257_v37  ;;  %v12274_v28 = vld [vmem:[#allocation11 + $0x584] ss:$24 sps:$4 sm:$0xff]   ;;  %v14983_v58 = vpack.c.bf16 %v245_v29, %v239_v32  ;;  %v12281_v29 = vld [vmem:[#allocation10 + $0x5a8] ss:$24 sps:$4 sm:$0xff]  }
 0x272   :  { %3687 = vmatprep.subr.bf16.mxu1 %v12262_v63  ;;  %5805 = vmatprep.subr.bf16.mxu0 %v12265_v43  ;;  %v12277_v37 = vld [vmem:[#allocation10 + $0x57c] ss:$24 sps:$4 sm:$0xff]   ;;  %v12272_v63 = vld [vmem:[#allocation11 + $0x580] ss:$24 sps:$4 sm:$0xff]  }
 0x273   :  { %5762 = vmatprep.mubr.bf16.mxu0 %v14975_v26  ;;  %v12275_v43 = vld [vmem:[#allocation10 + $0x578] ss:$24 sps:$4 sm:$0xff]   ;;  %v163_v32 = vld [vmem:[#allocation2 + $0x48] sm:$0xff] }
 0x274   :  { %3688 = vmatpush1.bf16.msra.mxu1 %v12260_v53  ;;  %v16766_v53 = vld [vmem:[#allocation72_spill] sm:$0xff] }
 0x275   :  { %5806 = vmatpush1.bf16.msra.mxu0 %v12263_v61  ;;  %3689 = vmatprep.subr.bf16.mxu1 %v12268_v11  ;;  %v244_v61 = vld [vmem:[#allocation2 + $0x2d0] sm:$0xff] }
 0x276   :  { %5807 = vmatprep.subr.bf16.mxu0 %v12271_v40  ;;  %v12283_v11 = vld [vmem:[#allocation10 + $0x5ac] ss:$24 sps:$4 sm:$0xff]   ;;  %v14988_v40 = vpack.c.bf16 %v244_v61, %v238_v38 }
 0x277   :  { %3645 = vmatmul.mubr.bf16.gmra.mrb[104].mxu1 %v16765_v42  ;;  %v12278_v42 = vld [vmem:[#allocation11 + $0x5b0] ss:$24 sps:$4 sm:$0xff]   ;;  %v12292_v38 = vld [vmem:[#allocation11 + $0x614] ss:$24 sps:$4 sm:$0xff]  }
 0x278   :  { %3690 = vmatpush1.bf16.msra.mxu1 %v12266_v31  ;;  %5763 = vmatmul.mubr.bf16.gmra.mrb[72].mxu0 %v14980_v12  ;;  %v157_v31 = vld [vmem:[#allocation2 + $0x18] sm:$0xff]  ;;  %v156_v61 = vld [vmem:[#allocation2 + $0x10] sm:$0xff] }
 0x279   :  { %3654 = vmatprep.mubr.bf16.mxu1 %v16766_v53  ;;  %5808 = vmatpush1.bf16.msra.mxu0 %v12269_v25  ;;  %v12286_v53 = vld [vmem:[#allocation11 + $0x5e4] ss:$24 sps:$4 sm:$0xff]   ;;  %v14991_v45 = vpack.c.bf16 %v163_v32, %v157_v31  ;;  %v12293_v32 = vld [vmem:[#allocation10 + $0x608] ss:$24 sps:$4 sm:$0xff]  }
 0x27a   :  { %3691 = vmatprep.subr.bf16.mxu1 %v12274_v28  ;;  %5809 = vmatprep.subr.bf16.mxu0 %v12277_v37  ;;  %v12289_v25 = vld [vmem:[#allocation10 + $0x5dc] ss:$24 sps:$4 sm:$0xff]   ;;  %v12284_v28 = vld [vmem:[#allocation11 + $0x5e0] ss:$24 sps:$4 sm:$0xff]  }
 0x27b   :  { %5772 = vmatprep.mubr.bf16.mxu0 %v14983_v58  ;;  %v12287_v37 = vld [vmem:[#allocation10 + $0x5d8] ss:$24 sps:$4 sm:$0xff]   ;;  %v175_v31 = vld [vmem:[#allocation2 + $0xa8] sm:$0xff] }
 0x27c   :  { %3692 = vmatpush1.bf16.msra.mxu1 %v12272_v63  ;;  %v16768_v63 = vld [vmem:[#allocation79_spill] sm:$0xff] }
 0x27d   :  { %5810 = vmatpush1.bf16.msra.mxu0 %v12275_v43  ;;  %3693 = vmatprep.subr.bf16.mxu1 %v12280_v51  ;;  %v162_v43 = vld [vmem:[#allocation2 + $0x40] sm:$0xff]  ;;  %v12295_v51 = vld [vmem:[#allocation10 + $0x60c] ss:$24 sps:$4 sm:$0xff]  }
 0x27e   :  { %5811 = vmatprep.subr.bf16.mxu0 %v12283_v11  ;;  %v14996_v11 = vpack.c.bf16 %v162_v43, %v156_v61  ;;  %v12304_v61 = vld [vmem:[#allocation11 + $0x674] ss:$24 sps:$4 sm:$0xff]  }
 0x27f   :  { %3655 = vmatmul.mubr.bf16.gmra.mrb[108].mxu1 %v16767_v54  ;;  %v12290_v54 = vld [vmem:[#allocation11 + $0x610] ss:$24 sps:$4 sm:$0xff]  }
 0x280   :  { %3694 = vmatpush1.bf16.msra.mxu1 %v12278_v42  ;;  %5773 = vmatmul.mubr.bf16.gmra.mrb[76].mxu0 %v14988_v40  ;;  %v169_v42 = vld [vmem:[#allocation2 + $0x78] sm:$0xff]  ;;  %v168_v43 = vld [vmem:[#allocation2 + $0x70] sm:$0xff] }
 0x281   :  { %3697 = vmatprep.mubr.bf16.mxu1 %v16768_v63  ;;  %5812 = vmatpush1.bf16.msra.mxu0 %v12281_v29  ;;  %v12298_v63 = vld [vmem:[#allocation11 + $0x644] ss:$24 sps:$4 sm:$0xff]   ;;  %v14999_v50 = vpack.c.bf16 %v175_v31, %v169_v42  ;;  %v12305_v31 = vld [vmem:[#allocation10 + $0x668] ss:$24 sps:$4 sm:$0xff]  }
 0x282   :  { %3695 = vmatprep.subr.bf16.mxu1 %v12286_v53  ;;  %5813 = vmatprep.subr.bf16.mxu0 %v12289_v25  ;;  %v12301_v29 = vld [vmem:[#allocation10 + $0x63c] ss:$24 sps:$4 sm:$0xff]   ;;  %v12296_v53 = vld [vmem:[#allocation11 + $0x640] ss:$24 sps:$4 sm:$0xff]  }
 0x283   :  { %5815 = vmatprep.mubr.bf16.mxu0 %v14991_v45  ;;  %v12299_v25 = vld [vmem:[#allocation10 + $0x638] ss:$24 sps:$4 sm:$0xff]   ;;  %v187_v42 = vld [vmem:[#allocation2 + $0x108] sm:$0xff] }
 0x284   :  { %3696 = vmatpush1.bf16.msra.mxu1 %v12284_v28  ;;  %v16770_v28 = vld [vmem:[#allocation85_spill] sm:$0xff] }
 0x285   :  { %5814 = vmatpush1.bf16.msra.mxu0 %v12287_v37  ;;  %3778 = vmatprep.subr.bf16.mxu1 %v12292_v38  ;;  %v174_v37 = vld [vmem:[#allocation2 + $0xa0] sm:$0xff]  ;;  %v12307_v38 = vld [vmem:[#allocation10 + $0x66c] ss:$24 sps:$4 sm:$0xff]  }
 0x286   :  { %5896 = vmatprep.subr.bf16.mxu0 %v12295_v51  ;;  %v15004_v51 = vpack.c.bf16 %v174_v37, %v168_v43  ;;  %v12316_v43 = vld [vmem:[#allocation11 + $0x6d4] ss:$24 sps:$4 sm:$0xff]  }
 0x287   :  { %3698 = vmatmul.mubr.bf16.vlgmr.msra.gmra.mrb[80].mxu1 %v16769_v20  ;;  %v12302_v20 = vld [vmem:[#allocation11 + $0x670] ss:$24 sps:$4 sm:$0xff]  }
 0x288   :  { %3779 = vmatpush1.bf16.msra.mxu1 %v12290_v54  ;;  %5816 = vmatmul.mubr.bf16.vlgmr.msra.gmra.mrb[48].mxu0 %v14996_v11  ;;  %v181_v54 = vld [vmem:[#allocation2 + $0xd8] sm:$0xff]  ;;  %v180_v37 = vld [vmem:[#allocation2 + $0xd0] sm:$0xff] }
 0x289   :  { %3707 = vmatprep.mubr.bf16.mxu1 %v16770_v28  ;;  %5897 = vmatpush1.bf16.msra.mxu0 %v12293_v32  ;;  %v12310_v28 = vld [vmem:[#allocation11 + $0x6a4] ss:$24 sps:$4 sm:$0xff]   ;;  %v15007_v22 = vpack.c.bf16 %v187_v42, %v181_v54  ;;  %v12317_v42 = vld [vmem:[#allocation10 + $0x6c8] ss:$24 sps:$4 sm:$0xff]  }
 0x28a   :  { %3780 = vmatprep.subr.bf16.mxu1 %v12298_v63  ;;  %5898 = vmatprep.subr.bf16.mxu0 %v12301_v29  ;;  %v12313_v32 = vld [vmem:[#allocation10 + $0x69c] ss:$24 sps:$4 sm:$0xff]   ;;  %v12308_v63 = vld [vmem:[#allocation11 + $0x6a0] ss:$24 sps:$4 sm:$0xff]  }
 0x28b   :  { %5825 = vmatprep.mubr.bf16.mxu0 %v14999_v50  ;;  %v12311_v29 = vld [vmem:[#allocation10 + $0x698] ss:$24 sps:$4 sm:$0xff]   ;;  %v199_v54 = vld [vmem:[#allocation2 + $0x168] sm:$0xff] }
 0x28c   :  { %3781 = vmatpush1.bf16.msra.mxu1 %v12296_v53  ;;  %v16772_v53 = vld [vmem:[#allocation91_spill] sm:$0xff] }
 0x28d   :  { %5899 = vmatpush1.bf16.msra.mxu0 %v12299_v25  ;;  %3782 = vmatprep.subr.bf16.mxu1 %v12304_v61  ;;  %v186_v25 = vld [vmem:[#allocation2 + $0x100] sm:$0xff]  ;;  %v12319_v61 = vld [vmem:[#allocation10 + $0x6cc] ss:$24 sps:$4 sm:$0xff]  }
 0x28e   :  { %5900 = vmatprep.subr.bf16.mxu0 %v12307_v38  ;;  %v15012_v38 = vpack.c.bf16 %v186_v25, %v180_v37  ;;  %v192_v37 = vld [vmem:[#allocation2 + $0x130] sm:$0xff] }
 0x28f   :  { %3708 = vmatmul.mubr.bf16.gmra.mrb[84].mxu1 %v16771_v30  ;;  %v12314_v30 = vld [vmem:[#allocation11 + $0x6d0] ss:$24 sps:$4 sm:$0xff]  }
 0x290   :  { %3783 = vmatpush1.bf16.msra.mxu1 %v12302_v20  ;;  %5826 = vmatmul.mubr.bf16.gmra.mrb[52].mxu0 %v15004_v51  ;;  %v193_v20 = vld [vmem:[#allocation2 + $0x138] sm:$0xff] }
 0x291   :  { %3717 = vmatprep.mubr.bf16.mxu1 %v16772_v53  ;;  %5901 = vmatpush1.bf16.msra.mxu0 %v12305_v31  ;;  %v12322_v53 = vld [vmem:[#allocation11 + $0x704] ss:$24 sps:$4 sm:$0xff]   ;;  %v15015_v21 = vpack.c.bf16 %v199_v54, %v193_v20  ;;  %v12329_v20 = vld [vmem:[#allocation10 + $0x728] ss:$24 sps:$4 sm:$0xff]  }
 0x292   :  { %3784 = vmatprep.subr.bf16.mxu1 %v12310_v28  ;;  %5902 = vmatprep.subr.bf16.mxu0 %v12313_v32  ;;  %v12325_v31 = vld [vmem:[#allocation10 + $0x6fc] ss:$24 sps:$4 sm:$0xff]   ;;  %v12320_v28 = vld [vmem:[#allocation11 + $0x700] ss:$24 sps:$4 sm:$0xff]  }
 0x293   :  { %5835 = vmatprep.mubr.bf16.mxu0 %v15007_v22  ;;  %v12323_v32 = vld [vmem:[#allocation10 + $0x6f8] ss:$24 sps:$4 sm:$0xff]   ;;  %v12337_v54 = vld [vmem:[#allocation10 + $0x75c] ss:$24 sps:$4 sm:$0xff]  }
 0x294   :  { %3785 = vmatpush1.bf16.msra.mxu1 %v12308_v63  ;;  %v12328_v63 = vld [vmem:[#allocation11 + $0x734] ss:$24 sps:$4 sm:$0xff]  }
 0x295   :  { %5903 = vmatpush1.bf16.msra.mxu0 %v12311_v29  ;;  %3786 = vmatprep.subr.bf16.mxu1 %v12316_v43  ;;  %v198_v29 = vld [vmem:[#allocation2 + $0x160] sm:$0xff]  ;;  %v12331_v43 = vld [vmem:[#allocation10 + $0x72c] ss:$24 sps:$4 sm:$0xff]  }
 0x296   :  { %5904 = vmatprep.subr.bf16.mxu0 %v12319_v61  ;;  %v15020_v25 = vpack.c.bf16 %v198_v29, %v192_v37  ;;  %v205_v61 = vld [vmem:[#allocation2 + $0x198] sm:$0xff]  ;;  %v204_v37 = vld [vmem:[#allocation2 + $0x190] sm:$0xff] }
 0x297   :  { %3718 = vmatmul.mubr.bf16.gmra.mrb[88].mxu1 %v16773_v48  ;;  %v12326_v48 = vld [vmem:[#allocation11 + $0x730] ss:$24 sps:$4 sm:$0xff]  }
 0x298   :  { %3787 = vmatpush1.bf16.msra.mxu1 %v12314_v30  ;;  %5836 = vmatmul.mubr.bf16.gmra.mrb[56].mxu0 %v15012_v38  ;;  %v211_v30 = vld [vmem:[#allocation2 + $0x1c8] sm:$0xff] }
 0x299   :  { %3727 = vmatprep.mubr.bf16.mxu1 %v14546_v34  ;;  %5905 = vmatpush1.bf16.msra.mxu0 %v12317_v42  ;;  %v12334_v34 = vld [vmem:[#allocation11 + $0x764] ss:$24 sps:$4 sm:$0xff]   ;;  %v15023_v42 = vpack.c.bf16 %v211_v30, %v205_v61  ;;  %v12341_v61 = vld [vmem:[#allocation10 + $0x788] ss:$24 sps:$4 sm:$0xff]  }
 0x29a   :  { %3788 = vmatprep.subr.bf16.mxu1 %v12322_v53  ;;  %5906 = vmatprep.subr.bf16.mxu0 %v12325_v31  ;;  %v12332_v53 = vld [vmem:[#allocation11 + $0x760] ss:$24 sps:$4 sm:$0xff]   ;;  %v12349_v30 = vld [vmem:[#allocation10 + $0x7bc] ss:$24 sps:$4 sm:$0xff]  }
 0x29b   :  { %5845 = vmatprep.mubr.bf16.mxu0 %v15015_v21  ;;  %v12335_v31 = vld [vmem:[#allocation10 + $0x758] ss:$24 sps:$4 sm:$0xff]  }
 0x29c   :  { %3789 = vmatpush1.bf16.msra.mxu1 %v12320_v28  ;;  %v12340_v28 = vld [vmem:[#allocation11 + $0x794] ss:$24 sps:$4 sm:$0xff]  }
 0x29d   :  { %5907 = vmatpush1.bf16.msra.mxu0 %v12323_v32  ;;  %3790 = vmatprep.subr.bf16.mxu1 %v12328_v63  ;;  %v210_v32 = vld [vmem:[#allocation2 + $0x1c0] sm:$0xff]  ;;  %v12343_v63 = vld [vmem:[#allocation10 + $0x78c] ss:$24 sps:$4 sm:$0xff]  }
 0x29e   :  { %5908 = vmatprep.subr.bf16.mxu0 %v12331_v43  ;;  %v15028_v29 = vpack.c.bf16 %v210_v32, %v204_v37  ;;  %v217_v43 = vld [vmem:[#allocation2 + $0x1f8] sm:$0xff]  ;;  %v216_v37 = vld [vmem:[#allocation2 + $0x1f0] sm:$0xff] }
 0x29f   :  { %3728 = vmatmul.mubr.bf16.gmra.mrb[92].mxu1 %v14586_v47  ;;  %v12338_v47 = vld [vmem:[#allocation11 + $0x790] ss:$24 sps:$4 sm:$0xff]  }
 0x2a0   :  { %3791 = vmatpush1.bf16.msra.mxu1 %v12326_v48  ;;  %5846 = vmatmul.mubr.bf16.gmra.mrb[60].mxu0 %v15020_v25  ;;  %v223_v48 = vld [vmem:[#allocation2 + $0x228] sm:$0xff] }
 0x2a1   :  { %3737 = vmatprep.mubr.bf16.mxu1 %v14590_v44  ;;  %5909 = vmatpush1.bf16.msra.mxu0 %v12329_v20  ;;  %v12346_v44 = vld [vmem:[#allocation11 + $0x7c4] ss:$24 sps:$4 sm:$0xff]   ;;  %v15031_v20 = vpack.c.bf16 %v223_v48, %v217_v43  ;;  %v12353_v43 = vld [vmem:[#allocation10 + $0x7e8] ss:$24 sps:$4 sm:$0xff]  }
 0x2a2   :  { %3792 = vmatprep.subr.bf16.mxu1 %v12334_v34  ;;  %5910 = vmatprep.subr.bf16.mxu0 %v12337_v54  ;;  %v12344_v34 = vld [vmem:[#allocation11 + $0x7c0] ss:$24 sps:$4 sm:$0xff]   ;;  %v12361_v48 = vld [vmem:[#allocation10 + $0x81c] ss:$24 sps:$4 sm:$0xff]  }
 0x2a3   :  { %5855 = vmatprep.mubr.bf16.mxu0 %v15023_v42  ;;  %v12347_v54 = vld [vmem:[#allocation10 + $0x7b8] ss:$24 sps:$4 sm:$0xff]  }
 0x2a4   :  { %3793 = vmatpush1.bf16.msra.mxu1 %v12332_v53  ;;  %v12352_v53 = vld [vmem:[#allocation11 + $0x7f4] ss:$24 sps:$4 sm:$0xff]  }
 0x2a5   :  { %5911 = vmatpush1.bf16.msra.mxu0 %v12335_v31  ;;  %3794 = vmatprep.subr.bf16.mxu1 %v12340_v28  ;;  %v222_v31 = vld [vmem:[#allocation2 + $0x220] sm:$0xff]  ;;  %v12355_v28 = vld [vmem:[#allocation10 + $0x7ec] ss:$24 sps:$4 sm:$0xff]  }
 0x2a6   :  { %5912 = vmatprep.subr.bf16.mxu0 %v12343_v63  ;;  %v15036_v32 = vpack.c.bf16 %v222_v31, %v216_v37  ;;  %v229_v63 = vld [vmem:[#allocation2 + $0x258] sm:$0xff]  ;;  %v228_v37 = vld [vmem:[#allocation2 + $0x250] sm:$0xff] }
 0x2a7   :  { %3738 = vmatmul.mubr.bf16.gmra.mrb[96].mxu1 %v14614_v60  ;;  %v12350_v60 = vld [vmem:[#allocation11 + $0x7f0] ss:$24 sps:$4 sm:$0xff]  }
 0x2a8   :  { %3795 = vmatpush1.bf16.msra.mxu1 %v12338_v47  ;;  %5856 = vmatmul.mubr.bf16.gmra.mrb[64].mxu0 %v15028_v29  ;;  %v235_v47 = vld [vmem:[#allocation2 + $0x288] sm:$0xff] }
 0x2a9   :  { %3747 = vmatprep.mubr.bf16.mxu1 %v14618_v46  ;;  %5913 = vmatpush1.bf16.msra.mxu0 %v12341_v61  ;;  %v12358_v46 = vld [vmem:[#allocation11 + $0x824] ss:$24 sps:$4 sm:$0xff]   ;;  %v15039_v61 = vpack.c.bf16 %v235_v47, %v229_v63  ;;  %v12365_v63 = vld [vmem:[#allocation10 + $0x848] ss:$24 sps:$4 sm:$0xff]  }
 0x2aa   :  { %3796 = vmatprep.subr.bf16.mxu1 %v12346_v44  ;;  %5914 = vmatprep.subr.bf16.mxu0 %v12349_v30  ;;  %v12356_v44 = vld [vmem:[#allocation11 + $0x820] ss:$24 sps:$4 sm:$0xff]   ;;  %v12373_v47 = vld [vmem:[#allocation10 + $0x87c] ss:$24 sps:$4 sm:$0xff]  }
 0x2ab   :  { %5865 = vmatprep.mubr.bf16.mxu0 %v15031_v20  ;;  %v12359_v30 = vld [vmem:[#allocation10 + $0x818] ss:$24 sps:$4 sm:$0xff]  }
 0x2ac   :  { %3797 = vmatpush1.bf16.msra.mxu1 %v12344_v34  ;;  %v12364_v34 = vld [vmem:[#allocation11 + $0x854] ss:$24 sps:$4 sm:$0xff]  }
 0x2ad   :  { %5915 = vmatpush1.bf16.msra.mxu0 %v12347_v54  ;;  %3798 = vmatprep.subr.bf16.mxu1 %v12352_v53  ;;  %v234_v54 = vld [vmem:[#allocation2 + $0x280] sm:$0xff]  ;;  %v12367_v53 = vld [vmem:[#allocation10 + $0x84c] ss:$24 sps:$4 sm:$0xff]  }
 0x2ae   :  { %5916 = vmatprep.subr.bf16.mxu0 %v12355_v28  ;;  %v15044_v31 = vpack.c.bf16 %v234_v54, %v228_v37  ;;  %v241_v28 = vld [vmem:[#allocation2 + $0x2b8] sm:$0xff]  ;;  %v240_v37 = vld [vmem:[#allocation2 + $0x2b0] sm:$0xff] }
 0x2af   :  { %3748 = vmatmul.mubr.bf16.gmra.mrb[100].mxu1 %v14642_v57  ;;  %v12362_v57 = vld [vmem:[#allocation11 + $0x850] ss:$24 sps:$4 sm:$0xff]  }
 0x2b0   :  { %3799 = vmatpush1.bf16.msra.mxu1 %v12350_v60  ;;  %5866 = vmatmul.mubr.bf16.gmra.mrb[68].mxu0 %v15036_v32  ;;  %v247_v60 = vld [vmem:[#allocation2 + $0x2e8] sm:$0xff] }
 0x2b1   :  { %3757 = vmatprep.mubr.bf16.mxu1 %v14646_v3  ;;  %5917 = vmatpush1.bf16.msra.mxu0 %v12353_v43  ;;  %v12370_v3 = vld [vmem:[#allocation11 + $0x884] ss:$24 sps:$4 sm:$0xff]   ;;  %v15047_v43 = vpack.c.bf16 %v247_v60, %v241_v28  ;;  %v12377_v28 = vld [vmem:[#allocation10 + $0x8a8] ss:$24 sps:$4 sm:$0xff]  }
 0x2b2   :  { %3800 = vmatprep.subr.bf16.mxu1 %v12358_v46  ;;  %5918 = vmatprep.subr.bf16.mxu0 %v12361_v48  ;;  %v12368_v46 = vld [vmem:[#allocation11 + $0x880] ss:$24 sps:$4 sm:$0xff]   ;;  %v12385_v60 = vld [vmem:[#allocation10 + $0x8dc] ss:$24 sps:$4 sm:$0xff]  }
 0x2b3   :  { %5875 = vmatprep.mubr.bf16.mxu0 %v15039_v61  ;;  %16774 = vst [vmem:[#allocation31_spill] sm:$0xff] %v15047_v43  ;;  %v12371_v48 = vld [vmem:[#allocation10 + $0x878] ss:$24 sps:$4 sm:$0xff]  }
 0x2b4   :  { %3801 = vmatpush1.bf16.msra.mxu1 %v12356_v44  ;;  %v12376_v44 = vld [vmem:[#allocation11 + $0x8b4] ss:$24 sps:$4 sm:$0xff]  }
 0x2b5   :  { %5919 = vmatpush1.bf16.msra.mxu0 %v12359_v30  ;;  %3802 = vmatprep.subr.bf16.mxu1 %v12364_v34  ;;  %v246_v30 = vld [vmem:[#allocation2 + $0x2e0] sm:$0xff]  ;;  %v12379_v34 = vld [vmem:[#allocation10 + $0x8ac] ss:$24 sps:$4 sm:$0xff]  }
 0x2b6   :  { %5920 = vmatprep.subr.bf16.mxu0 %v12367_v53  ;;  %v15052_v54 = vpack.c.bf16 %v246_v30, %v240_v37  ;;  %v159_v53 = vld [vmem:[#allocation2 + $0x28] sm:$0xff]  ;;  %v158_v37 = vld [vmem:[#allocation2 + $0x20] sm:$0xff]  ;;  %v177_v30 = vld [vmem:[#allocation2 + $0xb8] sm:$0xff] }
 0x2b7   :  { %3758 = vmatmul.mubr.bf16.gmra.mrb[104].mxu1 %v14675_v23  ;;  %v12374_v23 = vld [vmem:[#allocation11 + $0x8b0] ss:$24 sps:$4 sm:$0xff]  }
 0x2b8   :  { %3803 = vmatpush1.bf16.msra.mxu1 %v12362_v57  ;;  %5876 = vmatmul.mubr.bf16.gmra.mrb[72].mxu0 %v15044_v31  ;;  %16775 = vst [vmem:[#allocation32_spill] sm:$0xff] %v15052_v54  ;;  %v165_v57 = vld [vmem:[#allocation2 + $0x58] sm:$0xff] }
 0x2b9   :  { %3767 = vmatprep.mubr.bf16.mxu1 %v14679_v16  ;;  %5921 = vmatpush1.bf16.msra.mxu0 %v12365_v63  ;;  %v12382_v16 = vld [vmem:[#allocation11 + $0x8e4] ss:$24 sps:$4 sm:$0xff]   ;;  %v15055_v63 = vpack.c.bf16 %v165_v57, %v159_v53 }
 0x2ba   :  { %3804 = vmatprep.subr.bf16.mxu1 %v12370_v3  ;;  %5922 = vmatprep.subr.bf16.mxu0 %v12373_v47  ;;  %v12380_v3 = vld [vmem:[#allocation11 + $0x8e0] ss:$24 sps:$4 sm:$0xff]   ;;  %v12394_v57 = vld [vmem:[#allocation10 + $0x64] ss:$24 sps:$4 sm:$0xff]  }
 0x2bb   :  { %5885 = vmatprep.mubr.bf16.mxu0 %v15047_v43  ;;  %16776 = vst [vmem:[#allocation37_spill] sm:$0xff] %v15055_v63  ;;  %v12383_v47 = vld [vmem:[#allocation10 + $0x8d8] ss:$24 sps:$4 sm:$0xff]  }
 0x2bc   :  { %3805 = vmatpush1.bf16.msra.mxu1 %v12368_v46  ;;  %v12388_v46 = vld [vmem:[#allocation10 + $0x4] ss:$24 sps:$4 sm:$0xff]  }
 0x2bd   :  { %5923 = vmatpush1.bf16.msra.mxu0 %v12371_v48  ;;  %3806 = vmatprep.subr.bf16.mxu1 %v12376_v44  ;;  %v164_v48 = vld [vmem:[#allocation2 + $0x50] sm:$0xff]  ;;  %v171_v44 = vld [vmem:[#allocation2 + $0x88] sm:$0xff] }
 0x2be   :  { %5924 = vmatprep.subr.bf16.mxu0 %v12379_v34  ;;  %v15060_v34 = vpack.c.bf16 %v164_v48, %v158_v37  ;;  %v15062_v53 = vpack.c.bf16 %v177_v30, %v171_v44  ;;  %v12400_v48 = vld [vmem:[#allocation10 + $0xc4] ss:$24 sps:$4 sm:$0xff]   ;;  %v188_v30 = vld [vmem:[#allocation2 + $0x110] sm:$0xff] }
 0x2bf   :  { %3768 = vmatmul.mubr.bf16.gmra.mrb[108].mxu1 %v14708_v55  ;;  %v12386_v55 = vld [vmem:[#allocation10] ss:$24 sps:$4 sm:$0xff]  }
 0x2c0   :  { %3807 = vmatpush1.bf16.msra.mxu1 %v12374_v23  ;;  %5886 = vmatmul.mubr.bf16.gmra.mrb[76].mxu0 %v15052_v54  ;;  %16777 = vst [vmem:[#allocation38_spill] sm:$0xff] %v15060_v34  ;;  %v12391_v23 = vld [vmem:[#allocation10 + $0x34] ss:$24 sps:$4 sm:$0xff]   ;;  %16778 = vst [vmem:[#allocation43_spill] sm:$0xff] %v15062_v53  ;;  %v182_v44 = vld [vmem:[#allocation2 + $0xe0] sm:$0xff] }
 0x2c1   :  { %3810 = vmatprep.mubr.bf16.mxu1 %v14712_v0  ;;  %5925 = vmatpush1.bf16.msra.mxu0 %v12377_v28  ;;  %v12389_v0 = vld [vmem:[#allocation10 + $0x30] ss:$24 sps:$4 sm:$0xff]   ;;  %v170_v28 = vld [vmem:[#allocation2 + $0x80] sm:$0xff] }
 0x2c2   :  { %3808 = vmatprep.subr.bf16.mxu1 %v12382_v16  ;;  %5926 = vmatprep.subr.bf16.mxu0 %v12385_v60  ;;  %v176_v16 = vld [vmem:[#allocation2 + $0xb0] sm:$0xff]  ;;  %v183_v60 = vld [vmem:[#allocation2 + $0xe8] sm:$0xff] }
 0x2c3   :  { %5928 = vmatprep.mubr.bf16.mxu0 %v15055_v63 }
 0x2c4   :  { %3809 = vmatpush1.bf16.msra.mxu1 %v12380_v3  ;;  %v189_v3 = vld [vmem:[#allocation2 + $0x118] sm:$0xff] }
 0x2c5   :  { %5927 = vmatpush1.bf16.msra.mxu0 %v12383_v47  ;;  %5331 = vmatprep.subr.bf16.mxu1 %v12388_v46  ;;  %v12392_v47 = vld [vmem:[#allocation10 + $0x60] ss:$24 sps:$4 sm:$0xff]   ;;  %v15068_v46 = vpack.c.bf16 %v176_v16, %v170_v28  ;;  %v15070_v37 = vpack.c.bf16 %v189_v3, %v183_v60  ;;  %v12406_v16 = vld [vmem:[#allocation10 + $0x124] ss:$24 sps:$4 sm:$0xff]   ;;  %v200_v3 = vld [vmem:[#allocation2 + $0x170] sm:$0xff] }
 0x2c6   :  { %v194_v60 = vld [vmem:[#allocation2 + $0x140] sm:$0xff] }
 0x2c7   :  { %3811 = vmatmul.mubr.bf16.vlgmr.msra.gmra.mrb[80].mxu1 %v14736_v36  ;;  %16779 = vst [vmem:[#allocation44_spill] sm:$0xff] %v15068_v46  ;;  %v12397_v36 = vld [vmem:[#allocation10 + $0x94] ss:$24 sps:$4 sm:$0xff]   ;;  %16780 = vst [vmem:[#allocation51_spill] sm:$0xff] %v15070_v37 }
 0x2c8   :  { %5332 = vmatpush1.bf16.msra.mxu1 %v12386_v55  ;;  %5929 = vmatmul.mubr.bf16.vlgmr.msra.gmra.mrb[48].mxu0 %v15060_v34  ;;  %v195_v55 = vld [vmem:[#allocation2 + $0x148] sm:$0xff] }
 0x2c9   :  { %3820 = vmatprep.mubr.bf16.mxu1 %v14740_v2  ;;  %5333 = vmatprep.subr.bf16.mxu1 %v12391_v23  ;;  %v12395_v2 = vld [vmem:[#allocation10 + $0x90] ss:$24 sps:$4 sm:$0xff]  }
 0x2ca   :  { %5938 = vmatprep.mubr.bf16.mxu0 %v15062_v53  ;;  %v201_v23 = vld [vmem:[#allocation2 + $0x178] sm:$0xff] }
 0x2cb   :  { %v15078_v28 = vpack.c.bf16 %v201_v23, %v195_v55  ;;  %v206_v55 = vld [vmem:[#allocation2 + $0x1a0] sm:$0xff]  ;;  %v212_v23 = vld [vmem:[#allocation2 + $0x1d0] sm:$0xff] }
 0x2cc   :  { %5334 = vmatpush1.bf16.msra.mxu1 %v12389_v0  ;;  %v12398_v0 = vld [vmem:[#allocation10 + $0xc0] ss:$24 sps:$4 sm:$0xff]  }
 0x2cd   :  { %5335 = vmatprep.subr.bf16.mxu1 %v12394_v57  ;;  %v15076_v57 = vpack.c.bf16 %v188_v30, %v182_v44  ;;  %16782 = vst [vmem:[#allocation53_spill] sm:$0xff] %v15078_v28  ;;  %v12412_v30 = vld [vmem:[#allocation10 + $0x184] ss:$24 sps:$4 sm:$0xff]  }
 0x2cf   :  { %3821 = vmatmul.mubr.bf16.gmra.mrb[84].mxu1 %v14764_v9  ;;  %16781 = vst [vmem:[#allocation52_spill] sm:$0xff] %v15076_v57  ;;  %v12403_v9 = vld [vmem:[#allocation10 + $0xf4] ss:$24 sps:$4 sm:$0xff]  }
 0x2d0   :  { %5336 = vmatpush1.bf16.msra.mxu1 %v12392_v47  ;;  %5939 = vmatmul.mubr.bf16.gmra.mrb[52].mxu0 %v15068_v46  ;;  %v207_v47 = vld [vmem:[#allocation2 + $0x1a8] sm:$0xff] }
 0x2d1   :  { %3830 = vmatprep.mubr.bf16.mxu1 %v14768_v5  ;;  %5337 = vmatprep.subr.bf16.mxu1 %v12397_v36  ;;  %v12401_v5 = vld [vmem:[#allocation10 + $0xf0] ss:$24 sps:$4 sm:$0xff]  }
 0x2d2   :  { %5948 = vmatprep.mubr.bf16.mxu0 %v15070_v37  ;;  %v213_v36 = vld [vmem:[#allocation2 + $0x1d8] sm:$0xff] }
 0x2d3   :  { %v15086_v44 = vpack.c.bf16 %v213_v36, %v207_v47  ;;  %v218_v47 = vld [vmem:[#allocation2 + $0x200] sm:$0xff]  ;;  %v224_v36 = vld [vmem:[#allocation2 + $0x230] sm:$0xff] }
 0x2d4   :  { %5338 = vmatpush1.bf16.msra.mxu1 %v12395_v2  ;;  %v12404_v2 = vld [vmem:[#allocation10 + $0x120] ss:$24 sps:$4 sm:$0xff]  }
 0x2d5   :  { %5339 = vmatprep.subr.bf16.mxu1 %v12400_v48  ;;  %v15084_v48 = vpack.c.bf16 %v200_v3, %v194_v60  ;;  %16784 = vst [vmem:[#allocation59_spill] sm:$0xff] %v15086_v44  ;;  %v12418_v3 = vld [vmem:[#allocation10 + $0x1e4] ss:$24 sps:$4 sm:$0xff]  }
 0x2d7   :  { %3831 = vmatmul.mubr.bf16.gmra.mrb[88].mxu1 %v14792_v8  ;;  %16783 = vst [vmem:[#allocation58_spill] sm:$0xff] %v15084_v48  ;;  %v12409_v8 = vld [vmem:[#allocation10 + $0x154] ss:$24 sps:$4 sm:$0xff]  }
 0x2d8   :  { %5340 = vmatpush1.bf16.msra.mxu1 %v12398_v0  ;;  %5949 = vmatmul.mubr.bf16.gmra.mrb[56].mxu0 %v15076_v57  ;;  %v219_v0 = vld [vmem:[#allocation2 + $0x208] sm:$0xff] }
 0x2d9   :  { %3840 = vmatprep.mubr.bf16.mxu1 %v14796_v52  ;;  %5341 = vmatprep.subr.bf16.mxu1 %v12403_v9  ;;  %v12407_v52 = vld [vmem:[#allocation10 + $0x150] ss:$24 sps:$4 sm:$0xff]  }
 0x2da   :  { %5958 = vmatprep.mubr.bf16.mxu0 %v15078_v28  ;;  %v225_v9 = vld [vmem:[#allocation2 + $0x238] sm:$0xff] }
 0x2db   :  { %v15094_v60 = vpack.c.bf16 %v225_v9, %v219_v0  ;;  %v230_v0 = vld [vmem:[#allocation2 + $0x260] sm:$0xff]  ;;  %v236_v9 = vld [vmem:[#allocation2 + $0x290] sm:$0xff] }
 0x2dc   :  { %5342 = vmatpush1.bf16.msra.mxu1 %v12401_v5  ;;  %v12410_v5 = vld [vmem:[#allocation10 + $0x180] ss:$24 sps:$4 sm:$0xff]  }
 0x2dd   :  { %5343 = vmatprep.subr.bf16.mxu1 %v12406_v16  ;;  %v15092_v16 = vpack.c.bf16 %v212_v23, %v206_v55  ;;  %16786 = vst [vmem:[#allocation65_spill] sm:$0xff] %v15094_v60  ;;  %v12424_v23 = vld [vmem:[#allocation10 + $0x244] ss:$24 sps:$4 sm:$0xff]  }
 0x2df   :  { %3841 = vmatmul.mubr.bf16.gmra.mrb[92].mxu1 %v14820_v14  ;;  %16785 = vst [vmem:[#allocation64_spill] sm:$0xff] %v15092_v16  ;;  %v12415_v14 = vld [vmem:[#allocation10 + $0x1b4] ss:$24 sps:$4 sm:$0xff]  }
 0x2e0   :  { %5344 = vmatpush1.bf16.msra.mxu1 %v12404_v2  ;;  %5959 = vmatmul.mubr.bf16.gmra.mrb[60].mxu0 %v15084_v48  ;;  %v231_v2 = vld [vmem:[#allocation2 + $0x268] sm:$0xff] }
 0x2e1   :  { %3850 = vmatprep.mubr.bf16.mxu1 %v14824_v41  ;;  %5345 = vmatprep.subr.bf16.mxu1 %v12409_v8  ;;  %v12413_v41 = vld [vmem:[#allocation10 + $0x1b0] ss:$24 sps:$4 sm:$0xff]  }
 0x2e2   :  { %5968 = vmatprep.mubr.bf16.mxu0 %v15086_v44  ;;  %v237_v8 = vld [vmem:[#allocation2 + $0x298] sm:$0xff] }
 0x2e3   :  { %v15102_v55 = vpack.c.bf16 %v237_v8, %v231_v2  ;;  %v242_v2 = vld [vmem:[#allocation2 + $0x2c0] sm:$0xff]  ;;  %v248_v8 = vld [vmem:[#allocation2 + $0x2f0] sm:$0xff] }
 0x2e4   :  { %5346 = vmatpush1.bf16.msra.mxu1 %v12407_v52  ;;  %v12416_v52 = vld [vmem:[#allocation10 + $0x1e0] ss:$24 sps:$4 sm:$0xff]  }
 0x2e5   :  { %5347 = vmatprep.subr.bf16.mxu1 %v12412_v30  ;;  %v15100_v30 = vpack.c.bf16 %v224_v36, %v218_v47  ;;  %16788 = vst [vmem:[#allocation72_spill] sm:$0xff] %v15102_v55  ;;  %v12430_v36 = vld [vmem:[#allocation10 + $0x2a4] ss:$24 sps:$4 sm:$0xff]  }
 0x2e7   :  { %3851 = vmatmul.mubr.bf16.gmra.mrb[96].mxu1 %v14848_v62  ;;  %16787 = vst [vmem:[#allocation71_spill] sm:$0xff] %v15100_v30  ;;  %v12421_v62 = vld [vmem:[#allocation10 + $0x214] ss:$24 sps:$4 sm:$0xff]  }
 0x2e8   :  { %5348 = vmatpush1.bf16.msra.mxu1 %v12410_v5  ;;  %5969 = vmatmul.mubr.bf16.gmra.mrb[64].mxu0 %v15092_v16  ;;  %v243_v5 = vld [vmem:[#allocation2 + $0x2c8] sm:$0xff] }
 0x2e9   :  { %3860 = vmatprep.mubr.bf16.mxu1 %v14852_v19  ;;  %5349 = vmatprep.subr.bf16.mxu1 %v12415_v14  ;;  %v12419_v19 = vld [vmem:[#allocation10 + $0x210] ss:$24 sps:$4 sm:$0xff]  }
 0x2ea   :  { %5978 = vmatprep.mubr.bf16.mxu0 %v15094_v60  ;;  %v249_v14 = vld [vmem:[#allocation2 + $0x2f8] sm:$0xff] }
 0x2eb   :  { %v15110_v47 = vpack.c.bf16 %v249_v14, %v243_v5  ;;  %v12440_v5 = vld [vmem:[#allocation10 + $0x360] ss:$24 sps:$4 sm:$0xff]   ;;  %v12445_v14 = vld [vmem:[#allocation10 + $0x394] ss:$24 sps:$4 sm:$0xff]  }
 0x2ec   :  { %5350 = vmatpush1.bf16.msra.mxu1 %v12413_v41  ;;  %v12422_v41 = vld [vmem:[#allocation10 + $0x240] ss:$24 sps:$4 sm:$0xff]  }
 0x2ed   :  { %5351 = vmatprep.subr.bf16.mxu1 %v12418_v3  ;;  %v15108_v3 = vpack.c.bf16 %v236_v9, %v230_v0  ;;  %16790 = vst [vmem:[#allocation79_spill] sm:$0xff] %v15110_v47  ;;  %v12439_v0 = vld [vmem:[#allocation10 + $0x334] ss:$24 sps:$4 sm:$0xff]   ;;  %v12437_v9 = vld [vmem:[#allocation10 + $0x330] ss:$24 sps:$4 sm:$0xff]  }
 0x2ef   :  { %3861 = vmatmul.mubr.bf16.gmra.mrb[100].mxu1 %v14876_v56  ;;  %16789 = vst [vmem:[#allocation78_spill] sm:$0xff] %v15108_v3  ;;  %v12427_v56 = vld [vmem:[#allocation10 + $0x274] ss:$24 sps:$4 sm:$0xff]  }
 0x2f0   :  { %5352 = vmatpush1.bf16.msra.mxu1 %v12416_v52  ;;  %5979 = vmatmul.mubr.bf16.gmra.mrb[68].mxu0 %v15100_v30  ;;  %v12428_v52 = vld [vmem:[#allocation10 + $0x2a0] ss:$24 sps:$4 sm:$0xff]  }
 0x2f1   :  { %3870 = vmatprep.mubr.bf16.mxu1 %v14880_v1  ;;  %5353 = vmatprep.subr.bf16.mxu1 %v12421_v62  ;;  %v12425_v1 = vld [vmem:[#allocation10 + $0x270] ss:$24 sps:$4 sm:$0xff]   ;;  %v15116_v62 = vpack.c.bf16 %v248_v8, %v242_v2  ;;  %v12454_v8 = vld [vmem:[#allocation10 + $0x424] ss:$24 sps:$4 sm:$0xff]  }
 0x2f2   :  { %5988 = vmatprep.mubr.bf16.mxu0 %v15102_v55  ;;  %v12449_v2 = vld [vmem:[#allocation10 + $0x3f0] ss:$24 sps:$4 sm:$0xff]  }
 0x2f4   :  { %5354 = vmatpush1.bf16.msra.mxu1 %v12419_v19  ;;  %v12433_v19 = vld [vmem:[#allocation10 + $0x2d4] ss:$24 sps:$4 sm:$0xff]  }
 0x2f5   :  { %5355 = vmatprep.subr.bf16.mxu1 %v12424_v23  ;;  %v12434_v23 = vld [vmem:[#allocation10 + $0x300] ss:$24 sps:$4 sm:$0xff]  }
 0x2f7   :  { %3871 = vmatmul.mubr.bf16.gmra.mrb[104].mxu1 %v14904_v33  ;;  %v12431_v33 = vld [vmem:[#allocation10 + $0x2d0] ss:$24 sps:$4 sm:$0xff]  }
 0x2f8   :  { %5356 = vmatpush1.bf16.msra.mxu1 %v12422_v41  ;;  %5989 = vmatmul.mubr.bf16.gmra.mrb[72].mxu0 %v15108_v3  ;;  %v12443_v41 = vld [vmem:[#allocation10 + $0x390] ss:$24 sps:$4 sm:$0xff]  }
 0x2f9   :  { %3880 = vmatprep.mubr.bf16.mxu1 %v14908_v59  ;;  %5357 = vmatprep.subr.bf16.mxu1 %v12427_v56  ;;  %v12436_v59 = vld [vmem:[#allocation10 + $0x304] ss:$24 sps:$4 sm:$0xff]  }
 0x2fa   :  { %5998 = vmatprep.mubr.bf16.mxu0 %v15110_v47  ;;  %v12448_v56 = vld [vmem:[#allocation10 + $0x3c4] ss:$24 sps:$4 sm:$0xff]  }
 0x2fc   :  { %5358 = vmatpush1.bf16.msra.mxu1 %v12425_v1  ;;  %v12446_v1 = vld [vmem:[#allocation10 + $0x3c0] ss:$24 sps:$4 sm:$0xff]  }
 0x2fd   :  { %5359 = vmatprep.subr.bf16.mxu1 %v12430_v36  ;;  %v12451_v36 = vld [vmem:[#allocation10 + $0x3f4] ss:$24 sps:$4 sm:$0xff]  }
 0x2ff   :  { %3881 = vmatmul.mubr.bf16.gmra.mrb[108].mxu1 %v14924_v49  ;;  %v12442_v49 = vld [vmem:[#allocation10 + $0x364] ss:$24 sps:$4 sm:$0xff]  }
 0x300   :  { %5360 = vmatpush1.bf16.msra.mxu1 %v12428_v52  ;;  %5999 = vmatmul.mubr.bf16.gmra.mrb[76].mxu0 %v15116_v62  ;;  %v12452_v52 = vld [vmem:[#allocation10 + $0x420] ss:$24 sps:$4 sm:$0xff]  }
 0x301   :  { %5361 = vmatprep.subr.bf16.mxu1 %v12433_v19  ;;  %5363 = vmatprep.mubr.bf16.mxu1 %v14926_v27  ;;  %v12457_v19 = vld [vmem:[#allocation10 + $0x454] ss:$24 sps:$4 sm:$0xff]  }
 0x304   :  { %5362 = vmatpush1.bf16.msra.mxu1 %v12431_v33  ;;  %v12455_v33 = vld [vmem:[#allocation10 + $0x450] ss:$24 sps:$4 sm:$0xff]  }
 0x305   :  { %5444 = vmatprep.subr.bf16.mxu1 %v12436_v59  ;;  %v12460_v59 = vld [vmem:[#allocation10 + $0x484] ss:$24 sps:$4 sm:$0xff]  }
 0x307   :  { %5364 = vmatmul.mubr.bf16.vlgmr.msra.gmra.mrb[48].mxu1 %v14932_v13 }
 0x308   :  { %5445 = vmatpush1.bf16.msra.mxu1 %v12434_v23  ;;  %5373 = vmatprep.mubr.bf16.mxu1 %v14935_v17  ;;  %v12458_v23 = vld [vmem:[#allocation10 + $0x480] ss:$24 sps:$4 sm:$0xff]  }
 0x309   :  { %5446 = vmatprep.subr.bf16.mxu1 %v12439_v0  ;;  %v12463_v0 = vld [vmem:[#allocation10 + $0x4b4] ss:$24 sps:$4 sm:$0xff]  }
 0x30c   :  { %5447 = vmatpush1.bf16.msra.mxu1 %v12437_v9  ;;  %v12461_v9 = vld [vmem:[#allocation10 + $0x4b0] ss:$24 sps:$4 sm:$0xff]  }
 0x30d   :  { %5448 = vmatprep.subr.bf16.mxu1 %v12442_v49  ;;  %v12466_v49 = vld [vmem:[#allocation10 + $0x4e4] ss:$24 sps:$4 sm:$0xff]  }
 0x30f   :  { %5374 = vmatmul.mubr.bf16.gmra.mrb[52].mxu1 %v14940_v15 }
 0x310   :  { %5449 = vmatpush1.bf16.msra.mxu1 %v12440_v5  ;;  %5383 = vmatprep.mubr.bf16.mxu1 %v14943_v24  ;;  %v12464_v5 = vld [vmem:[#allocation10 + $0x4e0] ss:$24 sps:$4 sm:$0xff]  }
 0x311   :  { %5450 = vmatprep.subr.bf16.mxu1 %v12445_v14  ;;  %v12469_v14 = vld [vmem:[#allocation10 + $0x514] ss:$24 sps:$4 sm:$0xff]  }
 0x314   :  { %5451 = vmatpush1.bf16.msra.mxu1 %v12443_v41  ;;  %v12467_v41 = vld [vmem:[#allocation10 + $0x510] ss:$24 sps:$4 sm:$0xff]  }
 0x315   :  { %5452 = vmatprep.subr.bf16.mxu1 %v12448_v56  ;;  %v12472_v56 = vld [vmem:[#allocation10 + $0x544] ss:$24 sps:$4 sm:$0xff]  }
 0x317   :  { %5384 = vmatmul.mubr.bf16.gmra.mrb[56].mxu1 %v14948_v4 }
 0x318   :  { %5453 = vmatpush1.bf16.msra.mxu1 %v12446_v1  ;;  %5393 = vmatprep.mubr.bf16.mxu1 %v14951_v39  ;;  %v12470_v1 = vld [vmem:[#allocation10 + $0x540] ss:$24 sps:$4 sm:$0xff]  }
 0x319   :  { %5454 = vmatprep.subr.bf16.mxu1 %v12451_v36  ;;  %v12475_v36 = vld [vmem:[#allocation10 + $0x574] ss:$24 sps:$4 sm:$0xff]  }
 0x31c   :  { %5455 = vmatpush1.bf16.msra.mxu1 %v12449_v2  ;;  %v12473_v2 = vld [vmem:[#allocation10 + $0x570] ss:$24 sps:$4 sm:$0xff]  }
 0x31d   :  { %5456 = vmatprep.subr.bf16.mxu1 %v12454_v8  ;;  %v12478_v8 = vld [vmem:[#allocation10 + $0x5a4] ss:$24 sps:$4 sm:$0xff]  }
 0x31f   :  { %5394 = vmatmul.mubr.bf16.gmra.mrb[60].mxu1 %v14956_v6 }
 0x320   :  { %5457 = vmatpush1.bf16.msra.mxu1 %v12452_v52  ;;  %5403 = vmatprep.mubr.bf16.mxu1 %v14959_v18  ;;  %v12476_v52 = vld [vmem:[#allocation10 + $0x5a0] ss:$24 sps:$4 sm:$0xff]  }
 0x321   :  { %5458 = vmatprep.subr.bf16.mxu1 %v12457_v19  ;;  %v12481_v19 = vld [vmem:[#allocation10 + $0x5d4] ss:$24 sps:$4 sm:$0xff]  }
 0x324   :  { %5459 = vmatpush1.bf16.msra.mxu1 %v12455_v33  ;;  %v12479_v33 = vld [vmem:[#allocation10 + $0x5d0] ss:$24 sps:$4 sm:$0xff]  }
 0x325   :  { %5460 = vmatprep.subr.bf16.mxu1 %v12460_v59  ;;  %v12484_v59 = vld [vmem:[#allocation10 + $0x604] ss:$24 sps:$4 sm:$0xff]  }
 0x327   :  { %5404 = vmatmul.mubr.bf16.gmra.mrb[64].mxu1 %v14964_v10 }
 0x328   :  { %5461 = vmatpush1.bf16.msra.mxu1 %v12458_v23  ;;  %5413 = vmatprep.mubr.bf16.mxu1 %v14967_v7  ;;  %v12482_v23 = vld [vmem:[#allocation10 + $0x600] ss:$24 sps:$4 sm:$0xff]  }
 0x329   :  { %5462 = vmatprep.subr.bf16.mxu1 %v12463_v0  ;;  %v12487_v0 = vld [vmem:[#allocation10 + $0x634] ss:$24 sps:$4 sm:$0xff]  }
 0x32c   :  { %5463 = vmatpush1.bf16.msra.mxu1 %v12461_v9  ;;  %v12485_v9 = vld [vmem:[#allocation10 + $0x630] ss:$24 sps:$4 sm:$0xff]  }
 0x32d   :  { %5464 = vmatprep.subr.bf16.mxu1 %v12466_v49  ;;  %v12490_v49 = vld [vmem:[#allocation10 + $0x664] ss:$24 sps:$4 sm:$0xff]  }
 0x32f   :  { %5414 = vmatmul.mubr.bf16.gmra.mrb[68].mxu1 %v14972_v35 }
 0x330   :  { %5465 = vmatpush1.bf16.msra.mxu1 %v12464_v5  ;;  %5423 = vmatprep.mubr.bf16.mxu1 %v14975_v26  ;;  %v12488_v5 = vld [vmem:[#allocation10 + $0x660] ss:$24 sps:$4 sm:$0xff]  }
 0x331   :  { %5466 = vmatprep.subr.bf16.mxu1 %v12469_v14  ;;  %v12493_v14 = vld [vmem:[#allocation10 + $0x694] ss:$24 sps:$4 sm:$0xff]  }
 0x334   :  { %5467 = vmatpush1.bf16.msra.mxu1 %v12467_v41  ;;  %v12491_v41 = vld [vmem:[#allocation10 + $0x690] ss:$24 sps:$4 sm:$0xff]  }
 0x335   :  { %5468 = vmatprep.subr.bf16.mxu1 %v12472_v56  ;;  %v12496_v56 = vld [vmem:[#allocation10 + $0x6c4] ss:$24 sps:$4 sm:$0xff]  }
 0x337   :  { %5424 = vmatmul.mubr.bf16.gmra.mrb[72].mxu1 %v14980_v12 }
 0x338   :  { %5469 = vmatpush1.bf16.msra.mxu1 %v12470_v1  ;;  %5433 = vmatprep.mubr.bf16.mxu1 %v14983_v58  ;;  %v12494_v1 = vld [vmem:[#allocation10 + $0x6c0] ss:$24 sps:$4 sm:$0xff]  }
 0x339   :  { %5470 = vmatprep.subr.bf16.mxu1 %v12475_v36  ;;  %v12499_v36 = vld [vmem:[#allocation10 + $0x6f4] ss:$24 sps:$4 sm:$0xff]  }
 0x33c   :  { %5471 = vmatpush1.bf16.msra.mxu1 %v12473_v2  ;;  %v12497_v2 = vld [vmem:[#allocation10 + $0x6f0] ss:$24 sps:$4 sm:$0xff]  }
 0x33d   :  { %5472 = vmatprep.subr.bf16.mxu1 %v12478_v8  ;;  %v12502_v8 = vld [vmem:[#allocation10 + $0x724] ss:$24 sps:$4 sm:$0xff]  }
 0x33f   :  { %5434 = vmatmul.mubr.bf16.gmra.mrb[76].mxu1 %v14988_v40 }
 0x340   :  { %5473 = vmatpush1.bf16.msra.mxu1 %v12476_v52  ;;  %5476 = vmatprep.mubr.bf16.mxu1 %v14991_v45  ;;  %v12500_v52 = vld [vmem:[#allocation10 + $0x720] ss:$24 sps:$4 sm:$0xff]  }
 0x341   :  { %5474 = vmatprep.subr.bf16.mxu1 %v12481_v19  ;;  %v12505_v19 = vld [vmem:[#allocation10 + $0x754] ss:$24 sps:$4 sm:$0xff]  }
 0x344   :  { %5475 = vmatpush1.bf16.msra.mxu1 %v12479_v33  ;;  %v12503_v33 = vld [vmem:[#allocation10 + $0x750] ss:$24 sps:$4 sm:$0xff]  }
 0x345   :  { %5557 = vmatprep.subr.bf16.mxu1 %v12484_v59  ;;  %v12508_v59 = vld [vmem:[#allocation10 + $0x784] ss:$24 sps:$4 sm:$0xff]  }
 0x347   :  { %5477 = vmatmul.mubr.bf16.vlgmr.msra.gmra.mrb[48].mxu1 %v14996_v11 }
 0x348   :  { %5558 = vmatpush1.bf16.msra.mxu1 %v12482_v23  ;;  %5486 = vmatprep.mubr.bf16.mxu1 %v14999_v50  ;;  %v12506_v23 = vld [vmem:[#allocation10 + $0x780] ss:$24 sps:$4 sm:$0xff]  }
 0x349   :  { %5559 = vmatprep.subr.bf16.mxu1 %v12487_v0  ;;  %v12511_v0 = vld [vmem:[#allocation10 + $0x7b4] ss:$24 sps:$4 sm:$0xff]  }
 0x34c   :  { %5560 = vmatpush1.bf16.msra.mxu1 %v12485_v9  ;;  %v12509_v9 = vld [vmem:[#allocation10 + $0x7b0] ss:$24 sps:$4 sm:$0xff]  }
 0x34d   :  { %5561 = vmatprep.subr.bf16.mxu1 %v12490_v49  ;;  %v12514_v49 = vld [vmem:[#allocation10 + $0x7e4] ss:$24 sps:$4 sm:$0xff]  }
 0x34f   :  { %5487 = vmatmul.mubr.bf16.gmra.mrb[52].mxu1 %v15004_v51 }
 0x350   :  { %5562 = vmatpush1.bf16.msra.mxu1 %v12488_v5  ;;  %5496 = vmatprep.mubr.bf16.mxu1 %v15007_v22  ;;  %v12512_v5 = vld [vmem:[#allocation10 + $0x7e0] ss:$24 sps:$4 sm:$0xff]  }
 0x351   :  { %5563 = vmatprep.subr.bf16.mxu1 %v12493_v14  ;;  %v12517_v14 = vld [vmem:[#allocation10 + $0x814] ss:$24 sps:$4 sm:$0xff]  }
 0x354   :  { %5564 = vmatpush1.bf16.msra.mxu1 %v12491_v41  ;;  %v12515_v41 = vld [vmem:[#allocation10 + $0x810] ss:$24 sps:$4 sm:$0xff]  }
 0x355   :  { %5565 = vmatprep.subr.bf16.mxu1 %v12496_v56  ;;  %v12520_v56 = vld [vmem:[#allocation10 + $0x844] ss:$24 sps:$4 sm:$0xff]  }
 0x357   :  { %5497 = vmatmul.mubr.bf16.gmra.mrb[56].mxu1 %v15012_v38 }
 0x358   :  { %5566 = vmatpush1.bf16.msra.mxu1 %v12494_v1  ;;  %5506 = vmatprep.mubr.bf16.mxu1 %v15015_v21  ;;  %v12518_v1 = vld [vmem:[#allocation10 + $0x840] ss:$24 sps:$4 sm:$0xff]  }
 0x359   :  { %5567 = vmatprep.subr.bf16.mxu1 %v12499_v36  ;;  %v12523_v36 = vld [vmem:[#allocation10 + $0x874] ss:$24 sps:$4 sm:$0xff]  }
 0x35c   :  { %5568 = vmatpush1.bf16.msra.mxu1 %v12497_v2  ;;  %v12521_v2 = vld [vmem:[#allocation10 + $0x870] ss:$24 sps:$4 sm:$0xff]  }
 0x35d   :  { %5569 = vmatprep.subr.bf16.mxu1 %v12502_v8  ;;  %v12526_v8 = vld [vmem:[#allocation10 + $0x8a4] ss:$24 sps:$4 sm:$0xff]  }
 0x35f   :  { %5507 = vmatmul.mubr.bf16.gmra.mrb[60].mxu1 %v15020_v25 }
 0x360   :  { %5570 = vmatpush1.bf16.msra.mxu1 %v12500_v52  ;;  %5516 = vmatprep.mubr.bf16.mxu1 %v15023_v42  ;;  %v12524_v52 = vld [vmem:[#allocation10 + $0x8a0] ss:$24 sps:$4 sm:$0xff]  }
 0x361   :  { %5571 = vmatprep.subr.bf16.mxu1 %v12505_v19  ;;  %v12529_v19 = vld [vmem:[#allocation10 + $0x8d4] ss:$24 sps:$4 sm:$0xff]  }
 0x364   :  { %5572 = vmatpush1.bf16.msra.mxu1 %v12503_v33  ;;  %v12527_v33 = vld [vmem:[#allocation10 + $0x8d0] ss:$24 sps:$4 sm:$0xff]  }
 0x365   :  { %5573 = vmatprep.subr.bf16.mxu1 %v12508_v59  ;;  %v12532_v59 = vld [vmem:[#allocation10 + $0x14] ss:$24 sps:$4 sm:$0xff]  }
 0x367   :  { %5517 = vmatmul.mubr.bf16.gmra.mrb[64].mxu1 %v15028_v29 }
 0x368   :  { %5574 = vmatpush1.bf16.msra.mxu1 %v12506_v23  ;;  %5526 = vmatprep.mubr.bf16.mxu1 %v15031_v20  ;;  %v12530_v23 = vld [vmem:[#allocation10 + $0x10] ss:$24 sps:$4 sm:$0xff]  }
 0x369   :  { %5575 = vmatprep.subr.bf16.mxu1 %v12511_v0  ;;  %v12535_v0 = vld [vmem:[#allocation10 + $0x44] ss:$24 sps:$4 sm:$0xff]  }
 0x36c   :  { %5576 = vmatpush1.bf16.msra.mxu1 %v12509_v9  ;;  %v12533_v9 = vld [vmem:[#allocation10 + $0x40] ss:$24 sps:$4 sm:$0xff]  }
 0x36d   :  { %5577 = vmatprep.subr.bf16.mxu1 %v12514_v49  ;;  %v12538_v49 = vld [vmem:[#allocation10 + $0x74] ss:$24 sps:$4 sm:$0xff]  }
 0x36f   :  { %5527 = vmatmul.mubr.bf16.gmra.mrb[68].mxu1 %v15036_v32 }
 0x370   :  { %5578 = vmatpush1.bf16.msra.mxu1 %v12512_v5  ;;  %5536 = vmatprep.mubr.bf16.mxu1 %v15039_v61  ;;  %v12536_v5 = vld [vmem:[#allocation10 + $0x70] ss:$24 sps:$4 sm:$0xff]  }
 0x371   :  { %5579 = vmatprep.subr.bf16.mxu1 %v12517_v14  ;;  %v12541_v14 = vld [vmem:[#allocation10 + $0xa4] ss:$24 sps:$4 sm:$0xff]  }
 0x374   :  { %5580 = vmatpush1.bf16.msra.mxu1 %v12515_v41  ;;  %v12539_v41 = vld [vmem:[#allocation10 + $0xa0] ss:$24 sps:$4 sm:$0xff]  }
 0x375   :  { %5581 = vmatprep.subr.bf16.mxu1 %v12520_v56  ;;  %v12544_v56 = vld [vmem:[#allocation10 + $0xd4] ss:$24 sps:$4 sm:$0xff]  }
 0x377   :  { %5537 = vmatmul.mubr.bf16.gmra.mrb[72].mxu1 %v15044_v31 }
 0x378   :  { %5582 = vmatpush1.bf16.msra.mxu1 %v12518_v1  ;;  %5546 = vmatprep.mubr.bf16.mxu1 %v15047_v43  ;;  %v12542_v1 = vld [vmem:[#allocation10 + $0xd0] ss:$24 sps:$4 sm:$0xff]  }
 0x379   :  { %5583 = vmatprep.subr.bf16.mxu1 %v12523_v36  ;;  %v6348_v36 = vld [vmem:[#allocation13] sm:$0x3f] }
 0x37c   :  { %5584 = vmatpush1.bf16.msra.mxu1 %v12521_v2  ;;  %v12547_v2 = vld [vmem:[#allocation10 + $0x104] ss:$24 sps:$4 sm:$0xff]  }
 0x37d   :  { %5585 = vmatprep.subr.bf16.mxu1 %v12526_v8  ;;  %v16791_v8 = vld [vmem:[#allocation73_spill] sm:$0xff] }
 0x37f   :  { %5547 = vmatmul.mubr.bf16.gmra.mrb[76].mxu1 %v15052_v54 }
 0x380   :  { %5586 = vmatpush1.bf16.msra.mxu1 %v12524_v52  ;;  %5589 = vmatprep.mubr.bf16.mxu1 %v15055_v63  ;;  %v15159_v52 = vrot.slane %v6348_v36, %v16791_v8 }
 0x381   :  { %5587 = vmatprep.subr.bf16.mxu1 %v12529_v19  ;;  %v12545_v19 = vld [vmem:[#allocation10 + $0x100] ss:$24 sps:$4 sm:$0xff]  }
 0x384   :  { %5588 = vmatpush1.bf16.msra.mxu1 %v12527_v33  ;;  %v16792_v33 = vld [vmem:[#allocation70_spill] sm:$0xff] }
 0x385   :  { %6009 = vmatprep.subr.bf16.mxu1 %v12532_v59  ;;  %v15163_v59 = vrot.slane %v6348_v36, %v16792_v33 }
 0x387   :  { %5590 = vmatmul.mubr.bf16.vlgmr.msra.gmra.mrb[48].mxu1 %v15060_v34 }
 0x388   :  { %6010 = vmatpush1.bf16.msra.mxu1 %v12530_v23  ;;  %5599 = vmatprep.mubr.bf16.mxu1 %v15062_v53  ;;  %v12550_v23 = vld [vmem:[#allocation10 + $0x134] ss:$24 sps:$4 sm:$0xff]  }
 0x389   :  { %6011 = vmatprep.subr.bf16.mxu1 %v12535_v0  ;;  %v16793_v53 = vld [vmem:[#allocation80_spill] sm:$0xff] }
 0x38c   :  { %6012 = vmatpush1.bf16.msra.mxu1 %v12533_v9 }
 0x38d   :  { %6013 = vmatprep.subr.bf16.mxu1 %v12538_v49 }
 0x38f   :  { %5600 = vmatmul.mubr.bf16.gmra.mrb[52].mxu1 %v15068_v46 }
 0x390   :  { %6014 = vmatpush1.bf16.msra.mxu1 %v12536_v5  ;;  %5609 = vmatprep.mubr.bf16.mxu1 %v15070_v37  ;;  %v12548_v5 = vld [vmem:[#allocation10 + $0x130] ss:$24 sps:$4 sm:$0xff]  }
 0x391   :  { %6015 = vmatprep.subr.bf16.mxu1 %v12541_v14  ;;  %v13414_v37 = vld [vmem:[#allocation2 + $0x48] sm:$0xff] }
 0x394   :  { %6016 = vmatpush1.bf16.msra.mxu1 %v12539_v41 }
 0x395   :  { %6017 = vmatprep.subr.bf16.mxu1 %v12544_v56  ;;  %v12553_v56 = vld [vmem:[#allocation10 + $0x164] ss:$24 sps:$4 sm:$0xff]  }
 0x397   :  { %5610 = vmatmul.mubr.bf16.gmra.mrb[56].mxu1 %v15076_v57  ;;  %v13413_v57 = vld [vmem:[#allocation2 + $0x18] sm:$0xff] }
 0x398   :  { %6018 = vmatpush1.bf16.msra.mxu1 %v12542_v1  ;;  %5619 = vmatprep.mubr.bf16.mxu1 %v15078_v28 }
 0x399   :  { %6019 = vmatprep.subr.bf16.mxu1 %v12547_v2 }
 0x39b   :  { %v5930_v0 = vpop.f32.mrb[48].mxu0 }
 0x39c   :  { %v6382_v9 = vadd.f32 %v15159_v52, %v5930_v0  ;;  %v5932_v49 = vpop.f32.mrb[49].mxu0  ;;  %6020 = vmatpush1.bf16.msra.mxu1 %v12545_v19  ;;  %v12551_v0 = vld [vmem:[#allocation10 + $0x160] ss:$24 sps:$4 sm:$0xff]  }
 0x39d   :  { %v6383_v14 = vadd.f32 %v15163_v59, %v5932_v49  ;;  %v5934_v41 = vpop.f32.mrb[50].mxu0  ;;  %6021 = vmatprep.subr.bf16.mxu1 %v12550_v23  ;;  %v12556_v23 = vld [vmem:[#allocation10 + $0x194] ss:$24 sps:$4 sm:$0xff]  }
 0x39e   :  { %v10761_v1 = vmul.f32 -1.442695, %v6382_v9  ;;  %v6388_v8 = vadd.f32 %v15159_v52, %v5934_v41  ;;  %v5936_v28 = vpop.f32.mrb[51].mxu0 }
 0x39f   :  { %v10762_v2 = vmul.f32 -1.442695, %v6383_v14  ;;  %v6389_v36 = vadd.f32 %v15163_v59, %v5936_v28  ;;  %5620 = vmatmul.mubr.bf16.gmra.mrb[60].mxu1 %v15084_v48  ;;  %v12554_v28 = vld [vmem:[#allocation10 + $0x190] ss:$24 sps:$4 sm:$0xff]  }
 0x3a0   :  { %12962 = vpow2.f32 %v10761_v1  ;;  %v10767_v33 = vmul.f32 -1.442695, %v6388_v8  ;;  %6022 = vmatpush1.bf16.msra.mxu1 %v12548_v5  ;;  %5629 = vmatprep.mubr.bf16.mxu1 %v15086_v44  ;;  %v12559_v8 = vld [vmem:[#allocation10 + $0x1c4] ss:$24 sps:$4 sm:$0xff]  }
 0x3a1   :  { %12964 = vpow2.f32 %v10762_v2  ;;  %v10768_v19 = vmul.f32 -1.442695, %v6389_v36  ;;  %6023 = vmatprep.subr.bf16.mxu1 %v12553_v56 }
 0x3a2   :  { %12966 = vpow2.f32 %v10767_v33 }
 0x3a3   :  { %12968 = vpow2.f32 %v10768_v19  ;;  %v5940_v9 = vpop.f32.mrb[52].mxu0  ;;  %v12557_v19 = vld [vmem:[#allocation10 + $0x1c0] ss:$24 sps:$4 sm:$0xff]  }
 0x3a4   :  { %v6394_v49 = vadd.f32 %v15159_v52, %v5940_v9  ;;  %v5942_v14 = vpop.f32.mrb[53].mxu0  ;;  %6024 = vmatpush1.bf16.msra.mxu1 %v12551_v0 }
 0x3a5   :  { %v6395_v41 = vadd.f32 %v15163_v59, %v5942_v14  ;;  %v5944_v1 = vpop.f32.mrb[54].mxu0  ;;  %6025 = vmatprep.subr.bf16.mxu1 %v12556_v23  ;;  %v12562_v23 = vld [vmem:[#allocation10 + $0x1f4] ss:$24 sps:$4 sm:$0xff]  }
 0x3a6   :  { %v10773_v5 = vmul.f32 -1.442695, %v6394_v49  ;;  %v6400_v44 = vadd.f32 %v15159_v52, %v5944_v1  ;;  %v5946_v2 = vpop.f32.mrb[55].mxu0 }
 0x3a7   :  { %v10774_v36 = vmul.f32 -1.442695, %v6395_v41  ;;  %v6401_v56 = vadd.f32 %v15163_v59, %v5946_v2  ;;  %5630 = vmatmul.mubr.bf16.gmra.mrb[64].mxu1 %v15092_v16 }
 0x3a8   :  { %12970 = vpow2.f32 %v10773_v5  ;;  %v10779_v33 = vmul.f32 -1.442695, %v6400_v44  ;;  %6026 = vmatpush1.bf16.msra.mxu1 %v12554_v28  ;;  %5639 = vmatprep.mubr.bf16.mxu1 %v15094_v60  ;;  %v12560_v44 = vld [vmem:[#allocation10 + $0x1f0] ss:$24 sps:$4 sm:$0xff]  }
 0x3a9   :  { %12972 = vpow2.f32 %v10774_v36  ;;  %v10780_v0 = vmul.f32 -1.442695, %v6401_v56  ;;  %6027 = vmatprep.subr.bf16.mxu1 %v12559_v8  ;;  %v12565_v56 = vld [vmem:[#allocation10 + $0x224] ss:$24 sps:$4 sm:$0xff]  }
 0x3aa   :  { %v12963_v9 = vpop.eup %12962  ;;  %12974 = vpow2.f32 %v10779_v33 }
 0x3ab   :  { %v12965_v49 = vpop.eup %12964  ;;  %v6766_v14 = vadd.f32 1.0, %v12963_v9  ;;  %12976 = vpow2.f32 %v10780_v0  ;;  %v5950_v41 = vpop.f32.mrb[56].mxu0 }
 0x3ac   :  { %v12967_v1 = vpop.eup %12966  ;;  %v6767_v2 = vadd.f32 1.0, %v12965_v49  ;;  %v6406_v16 = vadd.f32 %v15159_v52, %v5950_v41  ;;  %v5952_v5 = vpop.f32.mrb[57].mxu0  ;;  %6028 = vmatpush1.bf16.msra.mxu1 %v12557_v19 }
 0x3ad   :  { %v12969_v28 = vpop.eup %12968  ;;  %12978 = vrcp.f32 %v6766_v14  ;;  %v6772_v60 = vadd.f32 1.0, %v12967_v1  ;;  %v6407_v36 = vadd.f32 %v15163_v59, %v5952_v5  ;;  %v5954_v8 = vpop.f32.mrb[58].mxu0  ;;  %6029 = vmatprep.subr.bf16.mxu1 %v12562_v23  ;;  %v12563_v14 = vld [vmem:[#allocation10 + $0x220] ss:$24 sps:$4 sm:$0xff]   ;;  %v12568_v1 = vld [vmem:[#allocation10 + $0x254] ss:$24 sps:$4 sm:$0xff]  }
 0x3ae   :  { %12980 = vrcp.f32 %v6767_v2  ;;  %v6773_v33 = vadd.f32 1.0, %v12969_v28  ;;  %v10785_v9 = vmul.f32 -1.442695, %v6406_v16  ;;  %v6412_v0 = vadd.f32 %v15159_v52, %v5954_v8  ;;  %v5956_v48 = vpop.f32.mrb[59].mxu0 }
 0x3af   :  { %12982 = vrcp.f32 %v6772_v60  ;;  %v10786_v49 = vmul.f32 -1.442695, %v6407_v36  ;;  %v6413_v41 = vadd.f32 %v15163_v59, %v5956_v48  ;;  %5640 = vmatmul.mubr.bf16.gmra.mrb[68].mxu1 %v15100_v30 }
 0x3b0   :  { %12984 = vrcp.f32 %v6773_v33  ;;  %v10791_v19 = vmul.f32 -1.442695, %v6412_v0  ;;  %6030 = vmatpush1.bf16.msra.mxu1 %v12560_v44  ;;  %5649 = vmatprep.mubr.bf16.mxu1 %v15102_v55  ;;  %v12566_v44 = vld [vmem:[#allocation10 + $0x250] ss:$24 sps:$4 sm:$0xff]  }
 0x3b1   :  { %12986 = vpow2.f32 %v10785_v9  ;;  %v10792_v23 = vmul.f32 -1.442695, %v6413_v41  ;;  %6031 = vmatprep.subr.bf16.mxu1 %v12565_v56 }
 0x3b2   :  { %v12971_v16 = vpop.eup %12970  ;;  %12988 = vpow2.f32 %v10786_v49  ;;  %v12571_v49 = vld [vmem:[#allocation10 + $0x284] ss:$24 sps:$4 sm:$0xff]  }
 0x3b3   :  { %v12973_v2 = vpop.eup %12972  ;;  %v6778_v5 = vadd.f32 1.0, %v12971_v16  ;;  %12990 = vpow2.f32 %v10791_v19  ;;  %v5960_v60 = vpop.f32.mrb[60].mxu0 }
 0x3b4   :  { %v12975_v28 = vpop.eup %12974  ;;  %v6779_v48 = vadd.f32 1.0, %v12973_v2  ;;  %12992 = vpow2.f32 %v10792_v23  ;;  %v6418_v36 = vadd.f32 %v15159_v52, %v5960_v60  ;;  %v5962_v8 = vpop.f32.mrb[61].mxu0  ;;  %6032 = vmatpush1.bf16.msra.mxu1 %v12563_v14 }
 0x3b5   :  { %v12977_v33 = vpop.eup %12976  ;;  %12994 = vrcp.f32 %v6778_v5  ;;  %v6784_v9 = vadd.f32 1.0, %v12975_v28  ;;  %v6419_v56 = vadd.f32 %v15163_v59, %v5962_v8  ;;  %v5964_v0 = vpop.f32.mrb[62].mxu0  ;;  %6033 = vmatprep.subr.bf16.mxu1 %v12568_v1  ;;  %v12569_v1 = vld [vmem:[#allocation10 + $0x280] ss:$24 sps:$4 sm:$0xff]  }
 0x3b6   :  { %12996 = vrcp.f32 %v6779_v48  ;;  %v6785_v41 = vadd.f32 1.0, %v12977_v33  ;;  %v10797_v19 = vmul.f32 -1.442695, %v6418_v36  ;;  %v6424_v16 = vadd.f32 %v15159_v52, %v5964_v0  ;;  %v5966_v2 = vpop.f32.mrb[63].mxu0  ;;  %v13411_v36 = vld [vmem:[#allocation2 + $0x10] sm:$0xff] }
 0x3b7   :  { %v12979_v23 = vpop.eup %12978  ;;  %12998 = vrcp.f32 %v6784_v9  ;;  %v10798_v60 = vmul.f32 -1.442695, %v6419_v56  ;;  %v6425_v14 = vadd.f32 %v15163_v59, %v5966_v2  ;;  %5650 = vmatmul.mubr.bf16.gmra.mrb[72].mxu1 %v15108_v3  ;;  %v12574_v9 = vld [vmem:[#allocation10 + $0x2b4] ss:$24 sps:$4 sm:$0xff]   ;;  %v13412_v2 = vld [vmem:[#allocation2 + $0x40] sm:$0xff] }
 0x3b8   :  { %v12981_v5 = vpop.eup %12980  ;;  %v7150_v28 = vsub.f32 1.0, %v12979_v23  ;;  %13000 = vrcp.f32 %v6785_v41  ;;  %v10803_v8 = vmul.f32 -1.442695, %v6424_v16  ;;  %6034 = vmatpush1.bf16.msra.mxu1 %v12566_v44  ;;  %5659 = vmatprep.mubr.bf16.mxu1 %v15110_v47  ;;  %v7054_v33 = vmul.f32 %v13411_v36, %v12979_v23 }
 0x3b9   :  { %v12983_v48 = vpop.eup %12982  ;;  %13002 = vpow2.f32 %v10797_v19  ;;  %v10804_v0 = vmul.f32 -1.442695, %v6425_v14  ;;  %6035 = vmatprep.subr.bf16.mxu1 %v12571_v49  ;;  %v7151_v56 = vsub.f32 1.0, %v12981_v5  ;;  %v7055_v41 = vmul.f32 %v13413_v57, %v12981_v5 }
 0x3ba   :  { %v12985_v55 = vpop.eup %12984  ;;  %v7060_v30 = vmul.f32 %v13412_v2, %v12983_v48  ;;  %v7156_v3 = vsub.f32 1.0, %v12983_v48  ;;  %13004 = vpow2.f32 %v10798_v60  ;;  %v7246_v23 = vmul.f32 %v7150_v28, %v16793_v53  ;;  %v12572_v2 = vld [vmem:[#allocation10 + $0x2b0] ss:$24 sps:$4 sm:$0xff]  }
 0x3bb   :  { %v12987_v16 = vpop.eup %12986  ;;  %13006 = vpow2.f32 %v10803_v8  ;;  %v5970_v44 = vpop.f32.mrb[64].mxu0  ;;  %v7061_v47 = vmul.f32 %v13414_v37, %v12985_v55  ;;  %v7157_v46 = vsub.f32 1.0, %v12985_v55  ;;  %v16794_v48 = vld [vmem:[#allocation76_spill] sm:$0xff]  ;;  %v12577_v37 = vld [vmem:[#allocation10 + $0x2e4] ss:$24 sps:$4 sm:$0xff]   ;;  %v16795_v55 = vld [vmem:[#allocation77_spill] sm:$0xff] }
 0x3bc   :  { %v12989_v19 = vpop.eup %12988  ;;  %v6790_v14 = vadd.f32 1.0, %v12987_v16  ;;  %13008 = vpow2.f32 %v10804_v0  ;;  %v6430_v49 = vadd.f32 %v15159_v52, %v5970_v44  ;;  %v5972_v36 = vpop.f32.mrb[65].mxu0  ;;  %6036 = vmatpush1.bf16.msra.mxu1 %v12569_v1  ;;  %v7247_v60 = vmul.f32 %v7151_v56, %v16794_v48  ;;  %v16796_v53 = vld [vmem:[#allocation81_spill] sm:$0xff] }
 0x3bd   :  { %v12991_v34 = vpop.eup %12990  ;;  %v6791_v57 = vadd.f32 1.0, %v12989_v19  ;;  %v6431_v5 = vadd.f32 %v15163_v59, %v5972_v36  ;;  %v5974_v8 = vpop.f32.mrb[66].mxu0  ;;  %6037 = vmatprep.subr.bf16.mxu1 %v12574_v9  ;;  %v7253_v63 = vmul.f32 %v7157_v46, %v16795_v55  ;;  %v7252_v28 = vmul.f32 %v7156_v3, %v16796_v53  ;;  %v12575_v3 = vld [vmem:[#allocation10 + $0x2e0] ss:$24 sps:$4 sm:$0xff]  }
 0x3be   :  { %v12993_v16 = vpop.eup %12992  ;;  %13010 = vrcp.f32 %v6790_v14  ;;  %v6796_v0 = vadd.f32 1.0, %v12991_v34  ;;  %v10809_v44 = vmul.f32 -1.442695, %v6430_v49  ;;  %v6436_v1 = vadd.f32 %v15159_v52, %v5974_v8  ;;  %v5976_v54 = vpop.f32.mrb[67].mxu0  ;;  %v13415_v53 = vld [vmem:[#allocation2 + $0x78] sm:$0xff] }
 0x3bf   :  { %v15196_v43 = vpop.eup %12994  ;;  %13012 = vrcp.f32 %v6791_v57  ;;  %v6797_v56 = vadd.f32 1.0, %v12993_v16  ;;  %v10810_v19 = vmul.f32 -1.442695, %v6431_v5  ;;  %v6437_v36 = vadd.f32 %v15163_v59, %v5976_v54  ;;  %5660 = vmatmul.mubr.bf16.gmra.mrb[76].mxu1 %v15116_v62  ;;  %v12580_v57 = vld [vmem:[#allocation10 + $0x314] ss:$24 sps:$4 sm:$0xff]  }
 0x3c0   :  { %v12997_v9 = vpop.eup %12996  ;;  %13014 = vrcp.f32 %v6796_v0  ;;  %v10815_v46 = vmul.f32 -1.442695, %v6436_v1  ;;  %6038 = vmatpush1.bf16.msra.mxu1 %v12572_v2  ;;  %6041 = vmatprep.mubr.bf16.mxu1 %v14926_v27  ;;  %v7343_v34 = vadd.f32 %v7247_v60, %v7055_v41  ;;  %v7349_v14 = vadd.f32 %v7253_v63, %v7061_v47  ;;  %v12578_v41 = vld [vmem:[#allocation10 + $0x310] ss:$24 sps:$4 sm:$0xff]  }
 0x3c1   :  { %v15201_v49 = vpop.eup %12998  ;;  %13016 = vrcp.f32 %v6797_v56  ;;  %v10816_v48 = vmul.f32 -1.442695, %v6437_v36  ;;  %6039 = vmatprep.subr.bf16.mxu1 %v12577_v37  ;;  %v7342_v5 = vadd.f32 %v7246_v23, %v7054_v33  ;;  %v7348_v8 = vadd.f32 %v7252_v28, %v7060_v30  ;;  %v13416_v47 = vld [vmem:[#allocation2 + $0xa8] sm:$0xff]  ;;  %v12676_v28 = vld [vmem:[#allocation14 + $0x4] ss:$16 sps:$4 sm:$0xff]  }
 0x3c2   :  { %v13001_v54 = vpop.eup %13000  ;;  %13018 = vpow2.f32 %v10809_v44  ;;  %v15203_v55 = vpack.c.bf16 %v7349_v14, %v7343_v34  ;;  %v7067_v16 = vmul.f32 %v13415_v53, %v12997_v9  ;;  %v7163_v2 = vsub.f32 1.0, %v12997_v9  ;;  %v12674_v23 = vld [vmem:[#allocation14] ss:$16 sps:$4 sm:$0xff]   ;;  %v16798_v44 = vld [vmem:[#allocation82_spill] sm:$0xff]  ;;  %8658 = vmatprep.subr.bf16.mxu0 %v12676_v28 }
 0x3c3   :  { %v13003_v0 = vpop.eup %13002  ;;  %13020 = vpow2.f32 %v10810_v19  ;;  %v5980_v27 = vpop.f32.mrb[68].mxu0  ;;  %v15205_v63 = vpack.c.bf16 %v7348_v8, %v7342_v5  ;;  %v7073_v60 = vmul.f32 %v13416_v47, %v13001_v54  ;;  %v7169_v1 = vsub.f32 1.0, %v13001_v54  ;;  %v12583_v5 = vld [vmem:[#allocation10 + $0x344] ss:$24 sps:$4 sm:$0xff]   ;;  %v12581_v47 = vld [vmem:[#allocation10 + $0x340] ss:$24 sps:$4 sm:$0xff]   ;;  %8659 = vmatpush1.bf16.msra.mxu0 %v12674_v23 }
 0x3c4   :  { %v13005_v37 = vpop.eup %13004  ;;  %v6802_v56 = vadd.f32 1.0, %v13003_v0  ;;  %13022 = vpow2.f32 %v10815_v46  ;;  %v6442_v30 = vadd.f32 %v15159_v52, %v5980_v27  ;;  %v5982_v33 = vpop.f32.mrb[69].mxu0  ;;  %6040 = vmatpush1.bf16.msra.mxu1 %v12575_v3  ;;  %v7259_v36 = vmul.f32 %v7163_v2, %v16798_v44  ;;  %v16799_v8 = vld [vmem:[#allocation83_spill] sm:$0xff] }
 0x3c5   :  { %16797 = vst [vmem:[#allocation84_spill] sm:$0xff] %v15205_v63  ;;  %v13007_v9 = vpop.eup %13006  ;;  %v6803_v19 = vadd.f32 1.0, %v13005_v37  ;;  %13024 = vpow2.f32 %v10816_v48  ;;  %v6443_v34 = vadd.f32 %v15163_v59, %v5982_v33  ;;  %v5984_v14 = vpop.f32.mrb[70].mxu0  ;;  %6122 = vmatprep.subr.bf16.mxu1 %v12580_v57  ;;  %v7265_v54 = vmul.f32 %v7169_v1, %v16799_v8  ;;  %v12677_v57 = vld [vmem:[#allocation14 + $0x20] ss:$16 sps:$4 sm:$0xff]   ;;  %v13418_v8 = vld [vmem:[#allocation2 + $0xa0] sm:$0xff] }
 0x3c6   :  { %v13009_v53 = vpop.eup %13008  ;;  %13026 = vrcp.f32 %v6802_v56  ;;  %v6808_v46 = vadd.f32 1.0, %v13007_v9  ;;  %v10821_v0 = vmul.f32 -1.442695, %v6442_v30  ;;  %v6448_v3 = vadd.f32 %v15159_v52, %v5984_v14  ;;  %v5986_v27 = vpop.f32.mrb[71].mxu0  ;;  %v12586_v56 = vld [vmem:[#allocation10 + $0x374] ss:$24 sps:$4 sm:$0xff]  }
 0x3c7   :  { %13028 = vrcp.f32 %v6803_v19  ;;  %v6809_v2 = vadd.f32 1.0, %v13009_v53  ;;  %v10822_v37 = vmul.f32 -1.442695, %v6443_v34  ;;  %v6449_v48 = vadd.f32 %v15163_v59, %v5986_v27  ;;  %6042 = vmatmul.mubr.bf16.vlgmr.msra.gmra.mrb[80].mxu1 %v14932_v13  ;;  %v12679_v30 = vld [vmem:[#allocation14 + $0x24] ss:$16 sps:$4 sm:$0xff]  }
 0x3c8   :  { %v15214_v33 = vpop.eup %13010  ;;  %13030 = vrcp.f32 %v6808_v46  ;;  %v10827_v1 = vmul.f32 -1.442695, %v6448_v3  ;;  %6123 = vmatpush1.bf16.msra.mxu1 %v12578_v41  ;;  %6051 = vmatprep.mubr.bf16.mxu1 %v14935_v17  ;;  %v7355_v44 = vadd.f32 %v7259_v36, %v7067_v16  ;;  %v7361_v28 = vadd.f32 %v7265_v54, %v7073_v60  ;;  %v12682_v34 = vld [vmem:[#allocation14 + $0x44] ss:$16 sps:$4 sm:$0xff]  }
 0x3c9   :  { %v15217_v9 = vpop.eup %13012  ;;  %13032 = vrcp.f32 %v6809_v2  ;;  %v10828_v19 = vmul.f32 -1.442695, %v6449_v48  ;;  %6124 = vmatprep.subr.bf16.mxu1 %v12583_v5  ;;  %v7162_v13 = vsub.f32 1.0, %v15196_v43  ;;  %8660 = vmatprep.subr.bf16.mxu0 %v12679_v30  ;;  %v13417_v41 = vld [vmem:[#allocation2 + $0x70] sm:$0xff]  ;;  %v7168_v16 = vsub.f32 1.0, %v15201_v49  ;;  %v16801_v53 = vld [vmem:[#allocation86_spill] sm:$0xff] }
 0x3ca   :  { %v15220_v23 = vpop.eup %13014  ;;  %13034 = vpow2.f32 %v10821_v0  ;;  %v15222_v14 = vpack.c.bf16 %v7361_v28, %v7355_v44  ;;  %v7066_v17 = vmul.f32 %v13417_v41, %v15196_v43  ;;  %8661 = vmatpush1.bf16.msra.mxu0 %v12677_v57  ;;  %v12680_v5 = vld [vmem:[#allocation14 + $0x40] ss:$16 sps:$4 sm:$0xff]   ;;  %v7072_v54 = vmul.f32 %v13418_v8, %v15201_v49  ;;  %v13420_v8 = vld [vmem:[#allocation2 + $0xd0] sm:$0xff] }
 0x3cb   :  { %v15226_v60 = vpop.eup %13016  ;;  %13036 = vpow2.f32 %v10822_v37  ;;  %v5990_v36 = vpop.f32.mrb[72].mxu0  ;;  %v7258_v46 = vmul.f32 %v7162_v13, %v16801_v53  ;;  %v13419_v0 = vld [vmem:[#allocation2 + $0xd8] sm:$0xff]  ;;  %8662 = vmatprep.subr.bf16.mxu0 %v12682_v34  ;;  %v16802_v37 = vld [vmem:[#allocation87_spill] sm:$0xff]  ;;  %v7175_v30 = vsub.f32 1.0, %v15217_v9 }
 0x3cc   :  { %16800 = vst [vmem:[#allocation85_spill] sm:$0xff] %v15222_v14  ;;  %v15231_v3 = vmul.f32 %v13419_v0, %v15217_v9  ;;  %v13019_v27 = vpop.eup %13018  ;;  %13038 = vpow2.f32 %v10827_v1  ;;  %v6454_v43 = vadd.f32 %v15159_v52, %v5990_v36  ;;  %v5992_v2 = vpop.f32.mrb[73].mxu0  ;;  %6125 = vmatpush1.bf16.msra.mxu1 %v12581_v47  ;;  %v12584_v48 = vld [vmem:[#allocation10 + $0x370] ss:$24 sps:$4 sm:$0xff]   ;;  %v7264_v57 = vmul.f32 %v7168_v16, %v16802_v37  ;;  %v12589_v41 = vld [vmem:[#allocation10 + $0x3a4] ss:$24 sps:$4 sm:$0xff]  }
 0x3cd   :  { %v13021_v44 = vpop.eup %13020  ;;  %v6814_v49 = vadd.f32 1.0, %v13019_v27  ;;  %13040 = vpow2.f32 %v10828_v19  ;;  %v6455_v28 = vadd.f32 %v15163_v59, %v5992_v2  ;;  %v5994_v13 = vpop.f32.mrb[74].mxu0  ;;  %6126 = vmatprep.subr.bf16.mxu1 %v12586_v56  ;;  %v15238_v1 = vmul.f32 %v13420_v8, %v15214_v33  ;;  %v12587_v16 = vld [vmem:[#allocation10 + $0x3a0] ss:$24 sps:$4 sm:$0xff]   ;;  %v12592_v56 = vld [vmem:[#allocation10 + $0x3d4] ss:$24 sps:$4 sm:$0xff]  }
 0x3ce   :  { %v13023_v36 = vpop.eup %13022  ;;  %v6815_v47 = vadd.f32 1.0, %v13021_v44  ;;  %v6460_v34 = vadd.f32 %v15159_v52, %v5994_v13  ;;  %v5996_v53 = vpop.f32.mrb[75].mxu0  ;;  %v7354_v0 = vadd.f32 %v7258_v46, %v7066_v17  ;;  %v7360_v9 = vadd.f32 %v7264_v57, %v7072_v54  ;;  %8663 = vmatpush1.bf16.msra.mxu0 %v12680_v5  ;;  %v12683_v8 = vld [vmem:[#allocation14 + $0x60] ss:$16 sps:$4 sm:$0xff]   ;;  %v12685_v17 = vld [vmem:[#allocation14 + $0x64] ss:$16 sps:$4 sm:$0xff]  }
 0x3cf   :  { %v13025_v37 = vpop.eup %13024  ;;  %13042 = vrcp.f32 %v6814_v49  ;;  %v6820_v19 = vadd.f32 1.0, %v13023_v36  ;;  %v10833_v27 = vmul.f32 -1.442695, %v6454_v43  ;;  %v6461_v2 = vadd.f32 %v15163_v59, %v5996_v53  ;;  %6052 = vmatmul.mubr.bf16.gmra.mrb[84].mxu1 %v14940_v15  ;;  %v12688_v15 = vld [vmem:[#allocation14 + $0x84] ss:$16 sps:$4 sm:$0xff]   ;;  %8664 = vmatprep.subr.bf16.mxu0 %v12685_v17 }
 0x3d0   :  { %v15243_v14 = vpop.eup %13026  ;;  %13044 = vrcp.f32 %v6815_v47  ;;  %v6821_v44 = vadd.f32 1.0, %v13025_v37  ;;  %v10834_v13 = vmul.f32 -1.442695, %v6455_v28  ;;  %6127 = vmatpush1.bf16.msra.mxu1 %v12584_v48  ;;  %6061 = vmatprep.mubr.bf16.mxu1 %v14943_v24  ;;  %v15246_v54 = vpack.c.bf16 %v7360_v9, %v7354_v0  ;;  %v16804_v5 = vld [vmem:[#allocation88_spill] sm:$0xff]  ;;  %v13422_v9 = vld [vmem:[#allocation2 + $0x100] sm:$0xff] }
 0x3d1   :  { %v15248_v46 = vpop.eup %13028  ;;  %13046 = vrcp.f32 %v6820_v19  ;;  %v10839_v43 = vmul.f32 -1.442695, %v6460_v34  ;;  %v10840_v57 = vmul.f32 -1.442695, %v6461_v2  ;;  %6128 = vmatprep.subr.bf16.mxu1 %v12589_v41  ;;  %v7271_v49 = vmul.f32 %v7175_v30, %v16804_v5  ;;  %v12686_v34 = vld [vmem:[#allocation14 + $0x80] ss:$16 sps:$4 sm:$0xff]  }
 0x3d2   :  { %16803 = vst [vmem:[#allocation90_spill] sm:$0xff] %v15246_v54  ;;  %v15251_v36 = vpop.eup %13030  ;;  %13048 = vrcp.f32 %v6821_v44  ;;  %v7181_v48 = vsub.f32 1.0, %v15226_v60  ;;  %v7174_v24 = vsub.f32 1.0, %v15214_v33  ;;  %v7180_v28 = vsub.f32 1.0, %v15220_v23  ;;  %8665 = vmatpush1.bf16.msra.mxu0 %v12683_v8  ;;  %v13421_v41 = vld [vmem:[#allocation2 + $0x108] sm:$0xff]  ;;  %v16806_v8 = vld [vmem:[#allocation92_spill] sm:$0xff] }
 0x3d3   :  { %v15256_v47 = vpop.eup %13032  ;;  %13050 = vpow2.f32 %v10833_v27  ;;  %v6000_v53 = vpop.f32.mrb[76].mxu0  ;;  %v7085_v0 = vmul.f32 %v13421_v41, %v15226_v60  ;;  %v7367_v30 = vadd.f32 %v7271_v49, %v15231_v3  ;;  %v7084_v37 = vmul.f32 %v13422_v9, %v15220_v23  ;;  %v12590_v44 = vld [vmem:[#allocation10 + $0x3d0] ss:$24 sps:$4 sm:$0xff]   ;;  %8666 = vmatprep.subr.bf16.mxu0 %v12688_v15  ;;  %v12595_v23 = vld [vmem:[#allocation10 + $0x404] ss:$24 sps:$4 sm:$0xff]  }
 0x3d4   :  { %v13035_v19 = vpop.eup %13034  ;;  %13052 = vpow2.f32 %v10834_v13  ;;  %v6466_v33 = vadd.f32 %v15159_v52, %v6000_v53  ;;  %v6002_v2 = vpop.f32.mrb[77].mxu0  ;;  %6129 = vmatpush1.bf16.msra.mxu1 %v12587_v16  ;;  %v16805_v27 = vld [vmem:[#allocation89_spill] sm:$0xff]  ;;  %v7270_v5 = vmul.f32 %v7174_v24, %v16806_v8 }
 0x3d5   :  { %v7277_v17 = vmul.f32 %v7181_v48, %v16805_v27  ;;  %v13037_v54 = vpop.eup %13036  ;;  %v6826_v63 = vadd.f32 1.0, %v13035_v19  ;;  %13054 = vpow2.f32 %v10839_v43  ;;  %v6467_v60 = vadd.f32 %v15163_v59, %v6002_v2  ;;  %v6004_v3 = vpop.f32.mrb[78].mxu0  ;;  %6130 = vmatprep.subr.bf16.mxu1 %v12592_v56  ;;  %v16807_v49 = vld [vmem:[#allocation93_spill] sm:$0xff] }
 0x3d6   :  { %v7276_v13 = vmul.f32 %v7180_v28, %v16807_v49  ;;  %v13039_v41 = vpop.eup %13038  ;;  %v6827_v53 = vadd.f32 1.0, %v13037_v54  ;;  %13056 = vpow2.f32 %v10840_v57  ;;  %v6472_v16 = vadd.f32 %v15159_v52, %v6004_v3  ;;  %v6006_v15 = vpop.f32.mrb[79].mxu0  ;;  %v12593_v9 = vld [vmem:[#allocation10 + $0x400] ss:$24 sps:$4 sm:$0xff]   ;;  %8667 = vmatpush1.bf16.msra.mxu0 %v12686_v34 }
 0x3d7   :  { %v7187_v48 = vsub.f32 1.0, %v15248_v46  ;;  %v13041_v24 = vpop.eup %13040  ;;  %13058 = vrcp.f32 %v6826_v63  ;;  %v6832_v19 = vadd.f32 1.0, %v13039_v41  ;;  %v10845_v43 = vmul.f32 -1.442695, %v6466_v33  ;;  %6062 = vmatmul.mubr.bf16.gmra.mrb[88].mxu1 %v14948_v4  ;;  %v12689_v56 = vld [vmem:[#allocation14 + $0xa0] ss:$16 sps:$4 sm:$0xff]  }
 0x3d8   :  { %v6473_v2 = vadd.f32 %v15163_v59, %v6006_v15  ;;  %13060 = vrcp.f32 %v6827_v53  ;;  %v6833_v28 = vadd.f32 1.0, %v13041_v24  ;;  %v10846_v54 = vmul.f32 -1.442695, %v6467_v60  ;;  %6131 = vmatpush1.bf16.msra.mxu1 %v12590_v44  ;;  %6071 = vmatprep.mubr.bf16.mxu1 %v14951_v39  ;;  %v12691_v52 = vld [vmem:[#allocation14 + $0xa4] ss:$16 sps:$4 sm:$0xff]   ;;  %v13423_v44 = vld [vmem:[#allocation2 + $0x138] sm:$0xff] }
 0x3d9   :  { %v7373_v57 = vadd.f32 %v7277_v17, %v7085_v0  ;;  %v15271_v27 = vpop.eup %13042  ;;  %13062 = vrcp.f32 %v6832_v19  ;;  %v10851_v63 = vmul.f32 -1.442695, %v6472_v16  ;;  %6132 = vmatprep.subr.bf16.mxu1 %v12595_v23  ;;  %v12598_v33 = vld [vmem:[#allocation10 + $0x434] ss:$24 sps:$4 sm:$0xff]   ;;  %v7366_v59 = vadd.f32 %v7270_v5, %v15238_v1  ;;  %8668 = vmatprep.subr.bf16.mxu0 %v12691_v52  ;;  %v16808_v1 = vld [vmem:[#allocation94_spill] sm:$0xff]  ;;  %v16809_v24 = vld [vmem:[#allocation95_spill] sm:$0xff] }
 0x3da   :  { %v7372_v8 = vadd.f32 %v7276_v13, %v7084_v37  ;;  %v15274_v4 = vpop.eup %13044  ;;  %13064 = vrcp.f32 %v6833_v28  ;;  %v10852_v34 = vmul.f32 -1.442695, %v6473_v2  ;;  %v7091_v39 = vmul.f32 %v13423_v44, %v15248_v46  ;;  %8669 = vmatpush1.bf16.msra.mxu0 %v12689_v56  ;;  %v12596_v23 = vld [vmem:[#allocation10 + $0x430] ss:$24 sps:$4 sm:$0xff]   ;;  %v12601_v16 = vld [vmem:[#allocation10 + $0x464] ss:$24 sps:$4 sm:$0xff]  }
 0x3db   :  { %v15276_v60 = vpack.c.bf16 %v7373_v57, %v7367_v30  ;;  %v15279_v0 = vpop.eup %13046  ;;  %13066 = vpow2.f32 %v10845_v43  ;;  %v7193_v3 = vsub.f32 1.0, %v15256_v47  ;;  %v7283_v37 = vmul.f32 %v7187_v48, %v16808_v1  ;;  %v13424_v30 = vld [vmem:[#allocation2 + $0x168] sm:$0xff]  ;;  %v13425_v13 = vld [vmem:[#allocation2 + $0x130] sm:$0xff]  ;;  %v13426_v19 = vld [vmem:[#allocation2 + $0x160] sm:$0xff] }
 0x3dc   :  { %v15281_v17 = vpack.c.bf16 %v7372_v8, %v7366_v59  ;;  %v15285_v5 = vpop.eup %13048  ;;  %13068 = vpow2.f32 %v10846_v54  ;;  %6133 = vmatpush1.bf16.msra.mxu1 %v12593_v9  ;;  %v7097_v49 = vmul.f32 %v13424_v30, %v15256_v47  ;;  %v7090_v46 = vmul.f32 %v13425_v13, %v15243_v14  ;;  %v12694_v15 = vld [vmem:[#allocation14 + $0xc4] ss:$16 sps:$4 sm:$0xff]   ;;  %v12692_v47 = vld [vmem:[#allocation14 + $0xc0] ss:$16 sps:$4 sm:$0xff]  }
 0x3dd   :  { %v7186_v41 = vsub.f32 1.0, %v15243_v14  ;;  %v13051_v53 = vpop.eup %13050  ;;  %13070 = vpow2.f32 %v10851_v63  ;;  %6134 = vmatprep.subr.bf16.mxu1 %v12598_v33  ;;  %v7289_v48 = vmul.f32 %v7193_v3, %v16809_v24  ;;  %v7096_v43 = vmul.f32 %v13426_v19, %v15251_v36  ;;  %v16810_v54 = vld [vmem:[#allocation98_spill] sm:$0xff]  ;;  %8670 = vmatprep.subr.bf16.mxu0 %v12694_v15  ;;  %v16811_v33 = vld [vmem:[#allocation100_spill] sm:$0xff]  ;;  %v13427_v8 = vld [vmem:[#allocation2 + $0x198] sm:$0xff] }
 0x3de   :  { %v7192_v9 = vsub.f32 1.0, %v15251_v36  ;;  %v13053_v2 = vpop.eup %13052  ;;  %v6838_v56 = vadd.f32 1.0, %v13051_v53  ;;  %13072 = vpow2.f32 %v10852_v34  ;;  %v7379_v28 = vadd.f32 %v7283_v37, %v7091_v39  ;;  %v12599_v34 = vld [vmem:[#allocation10 + $0x460] ss:$24 sps:$4 sm:$0xff]   ;;  %8671 = vmatpush1.bf16.msra.mxu0 %v12692_v47  ;;  %v13429_v24 = vld [vmem:[#allocation2 + $0x190] sm:$0xff] }
 0x3df   :  { %v7282_v52 = vmul.f32 %v7186_v41, %v16810_v54  ;;  %v13055_v14 = vpop.eup %13054  ;;  %v6839_v57 = vadd.f32 1.0, %v13053_v2  ;;  %6072 = vmatmul.mubr.bf16.gmra.mrb[92].mxu1 %v14956_v6  ;;  %v7385_v63 = vadd.f32 %v7289_v48, %v7097_v49  ;;  %v7103_v44 = vmul.f32 %v13427_v8, %v15274_v4  ;;  %v13428_v1 = vld [vmem:[#allocation2 + $0x1c8] sm:$0xff]  ;;  %v12604_v49 = vld [vmem:[#allocation10 + $0x494] ss:$24 sps:$4 sm:$0xff]  }
 0x3e0   :  { %v7288_v59 = vmul.f32 %v7192_v9, %v16811_v33  ;;  %v13057_v3 = vpop.eup %13056  ;;  %13074 = vrcp.f32 %v6838_v56  ;;  %v6844_v36 = vadd.f32 1.0, %v13055_v14  ;;  %6135 = vmatpush1.bf16.msra.mxu1 %v12596_v23  ;;  %6081 = vmatprep.mubr.bf16.mxu1 %v14959_v18  ;;  %v7109_v37 = vmul.f32 %v13428_v1, %v15285_v5  ;;  %v12697_v13 = vld [vmem:[#allocation14 + $0xe4] ss:$16 sps:$4 sm:$0xff]   ;;  %v12695_v23 = vld [vmem:[#allocation14 + $0xe0] ss:$16 sps:$4 sm:$0xff]  }
 0x3e1   :  { %v7378_v39 = vadd.f32 %v7282_v52, %v7090_v46  ;;  %v15299_v30 = vpop.eup %13058  ;;  %13076 = vrcp.f32 %v6839_v57  ;;  %v6845_v6 = vadd.f32 1.0, %v13057_v3  ;;  %6136 = vmatprep.subr.bf16.mxu1 %v12601_v16  ;;  %v15301_v41 = vpack.c.bf16 %v7385_v63, %v7379_v28  ;;  %8672 = vmatprep.subr.bf16.mxu0 %v12697_v13  ;;  %v13430_v9 = vld [vmem:[#allocation2 + $0x1c0] sm:$0xff]  ;;  %v12602_v47 = vld [vmem:[#allocation10 + $0x490] ss:$24 sps:$4 sm:$0xff]  }
 0x3e2   :  { %v7384_v53 = vadd.f32 %v7288_v59, %v7096_v43  ;;  %v13061_v15 = vpop.eup %13060  ;;  %13078 = vrcp.f32 %v6844_v36  ;;  %v7199_v18 = vsub.f32 1.0, %v15274_v4  ;;  %v7205_v46 = vsub.f32 1.0, %v15285_v5  ;;  %v16812_v4 = vld [vmem:[#allocation101_spill] sm:$0xff]  ;;  %v16813_v5 = vld [vmem:[#allocation102_spill] sm:$0xff]  ;;  %8673 = vmatpush1.bf16.msra.mxu0 %v12695_v23  ;;  %v16814_v8 = vld [vmem:[#allocation103_spill] sm:$0xff] }
 0x3e3   :  { %v7102_v48 = vmul.f32 %v13429_v24, %v15271_v27  ;;  %v15306_v19 = vpop.eup %13062  ;;  %13080 = vrcp.f32 %v6845_v6  ;;  %v7108_v2 = vmul.f32 %v13430_v9, %v15279_v0  ;;  %v7198_v43 = vsub.f32 1.0, %v15271_v27  ;;  %v13431_v14 = vld [vmem:[#allocation2 + $0x1f8] sm:$0xff]  ;;  %v12607_v33 = vld [vmem:[#allocation10 + $0x4c4] ss:$24 sps:$4 sm:$0xff]  }
 0x3e4   :  { %v15308_v16 = vpack.c.bf16 %v7384_v53, %v7378_v39  ;;  %v13065_v56 = vpop.eup %13064  ;;  %6137 = vmatpush1.bf16.msra.mxu1 %v12599_v34  ;;  %v7295_v28 = vmul.f32 %v7199_v18, %v16812_v4  ;;  %v7301_v54 = vmul.f32 %v7205_v46, %v16813_v5  ;;  %v7204_v52 = vsub.f32 1.0, %v15279_v0  ;;  %v12700_v59 = vld [vmem:[#allocation14 + $0x104] ss:$16 sps:$4 sm:$0xff]   ;;  %v13432_v36 = vld [vmem:[#allocation2 + $0x228] sm:$0xff]  ;;  %v16816_v23 = vld [vmem:[#allocation105_spill] sm:$0xff] }
 0x3e5   :  { %v7115_v57 = vmul.f32 %v13431_v14, %v13061_v15  ;;  %v13067_v63 = vpop.eup %13066  ;;  %6138 = vmatprep.subr.bf16.mxu1 %v12604_v49  ;;  %v7294_v3 = vmul.f32 %v7198_v43, %v16814_v8  ;;  %v7121_v27 = vmul.f32 %v13432_v36, %v13065_v56  ;;  %v7211_v39 = vsub.f32 1.0, %v13061_v15  ;;  %v12698_v13 = vld [vmem:[#allocation14 + $0x100] ss:$16 sps:$4 sm:$0xff]   ;;  %v16815_v46 = vld [vmem:[#allocation104_spill] sm:$0xff]  ;;  %8674 = vmatprep.subr.bf16.mxu0 %v12700_v59  ;;  %v16817_v43 = vld [vmem:[#allocation106_spill] sm:$0xff] }
 0x3e6   :  { %v7217_v34 = vsub.f32 1.0, %v13065_v56  ;;  %v13069_v1 = vpop.eup %13068  ;;  %v6850_v6 = vadd.f32 1.0, %v13067_v63  ;;  %v7391_v53 = vadd.f32 %v7295_v28, %v7103_v44  ;;  %v7397_v18 = vadd.f32 %v7301_v54, %v7109_v37  ;;  %v12605_v56 = vld [vmem:[#allocation10 + $0x4c0] ss:$24 sps:$4 sm:$0xff]   ;;  %8675 = vmatpush1.bf16.msra.mxu0 %v12698_v13  ;;  %v12608_v36 = vld [vmem:[#allocation10 + $0x4f0] ss:$24 sps:$4 sm:$0xff]  }
 0x3e7   :  { %v7300_v0 = vmul.f32 %v7204_v52, %v16815_v46  ;;  %v13071_v24 = vpop.eup %13070  ;;  %v6851_v9 = vadd.f32 1.0, %v13069_v1  ;;  %6082 = vmatmul.mubr.bf16.gmra.mrb[96].mxu1 %v14964_v10  ;;  %v7390_v49 = vadd.f32 %v7294_v3, %v7102_v48  ;;  %v7307_v4 = vmul.f32 %v7211_v39, %v16816_v23  ;;  %v12610_v10 = vld [vmem:[#allocation10 + $0x4f4] ss:$24 sps:$4 sm:$0xff]   ;;  %v16818_v46 = vld [vmem:[#allocation107_spill] sm:$0xff] }
 0x3e8   :  { %v7313_v5 = vmul.f32 %v7217_v34, %v16817_v43  ;;  %v13073_v14 = vpop.eup %13072  ;;  %13082 = vrcp.f32 %v6850_v6  ;;  %v6856_v15 = vadd.f32 1.0, %v13071_v24  ;;  %6139 = vmatpush1.bf16.msra.mxu1 %v12602_v47  ;;  %6091 = vmatprep.mubr.bf16.mxu1 %v14967_v7  ;;  %v15321_v44 = vpack.c.bf16 %v7397_v18, %v7391_v53  ;;  %v12703_v48 = vld [vmem:[#allocation14 + $0x124] ss:$16 sps:$4 sm:$0xff]   ;;  %v12701_v59 = vld [vmem:[#allocation14 + $0x120] ss:$16 sps:$4 sm:$0xff]  }
 0x3e9   :  { %v7396_v37 = vadd.f32 %v7300_v0, %v7108_v2  ;;  %13084 = vrcp.f32 %v6851_v9  ;;  %v6857_v28 = vadd.f32 1.0, %v13073_v14  ;;  %6140 = vmatprep.subr.bf16.mxu1 %v12607_v33  ;;  %v7403_v54 = vadd.f32 %v7307_v4, %v7115_v57  ;;  %8676 = vmatprep.subr.bf16.mxu0 %v12703_v48  ;;  %v13433_v39 = vld [vmem:[#allocation2 + $0x1f0] sm:$0xff]  ;;  %v12613_v53 = vld [vmem:[#allocation10 + $0x524] ss:$24 sps:$4 sm:$0xff]  }
 0x3ea   :  { %v7409_v52 = vadd.f32 %v7313_v5, %v7121_v27  ;;  %v13075_v63 = vpop.eup %13074  ;;  %13086 = vrcp.f32 %v6856_v15  ;;  %v7210_v2 = vsub.f32 1.0, %v15299_v30  ;;  %v7216_v3 = vsub.f32 1.0, %v15306_v19  ;;  %v13434_v27 = vld [vmem:[#allocation2 + $0x220] sm:$0xff]  ;;  %8677 = vmatpush1.bf16.msra.mxu0 %v12701_v59  ;;  %v16819_v24 = vld [vmem:[#allocation108_spill] sm:$0xff]  ;;  %v12704_v43 = vld [vmem:[#allocation14 + $0x140] ss:$16 sps:$4 sm:$0xff]  }
 0x3eb   :  { %v15323_v8 = vpack.c.bf16 %v7396_v37, %v7390_v49  ;;  %v13077_v47 = vpop.eup %13076  ;;  %13088 = vrcp.f32 %v6857_v28  ;;  %v7114_v57 = vmul.f32 %v13433_v39, %v15299_v30  ;;  %v7120_v34 = vmul.f32 %v13434_v27, %v15306_v19  ;;  %v12706_v18 = vld [vmem:[#allocation14 + $0x144] ss:$16 sps:$4 sm:$0xff]   ;;  %v16820_v30 = vld [vmem:[#allocation109_spill] sm:$0xff] }
 0x3ec   :  { %v15325_v7 = vpack.c.bf16 %v7409_v52, %v7403_v54  ;;  %v13079_v33 = vpop.eup %13078  ;;  %6141 = vmatpush1.bf16.msra.mxu1 %v12605_v56  ;;  %v7223_v1 = vsub.f32 1.0, %v13077_v47  ;;  %v7222_v6 = vsub.f32 1.0, %v13075_v63  ;;  %v7306_v0 = vmul.f32 %v7210_v2, %v16818_v46  ;;  %v13435_v49 = vld [vmem:[#allocation2 + $0x250] sm:$0xff]  ;;  %v13436_v15 = vld [vmem:[#allocation2 + $0x280] sm:$0xff]  ;;  %v16821_v56 = vld [vmem:[#allocation111_spill] sm:$0xff]  ;;  %8678 = vmatprep.subr.bf16.mxu0 %v12706_v18 }
 0x3ed   :  { %v13081_v13 = vpop.eup %13080  ;;  %6142 = vmatprep.subr.bf16.mxu1 %v12610_v10  ;;  %v7312_v9 = vmul.f32 %v7216_v3, %v16819_v24  ;;  %v7126_v23 = vmul.f32 %v13435_v49, %v13075_v63  ;;  %v7228_v4 = vsub.f32 1.0, %v13079_v33  ;;  %v7132_v19 = vmul.f32 %v13436_v15, %v13079_v33  ;;  %v16822_v48 = vld [vmem:[#allocation112_spill] sm:$0xff]  ;;  %v12611_v52 = vld [vmem:[#allocation10 + $0x520] ss:$24 sps:$4 sm:$0xff]  }
 0x3ee   :  { %v7229_v5 = vsub.f32 1.0, %v13081_v13  ;;  %v7319_v14 = vmul.f32 %v7223_v1, %v16820_v30  ;;  %v7318_v37 = vmul.f32 %v7222_v6, %v16821_v56  ;;  %v7402_v28 = vadd.f32 %v7306_v0, %v7114_v57  ;;  %v13437_v63 = vld [vmem:[#allocation2 + $0x258] sm:$0xff]  ;;  %v13438_v2 = vld [vmem:[#allocation2 + $0x288] sm:$0xff]  ;;  %v16823_v39 = vld [vmem:[#allocation110_spill] sm:$0xff]  ;;  %8679 = vmatpush1.bf16.msra.mxu0 %v12704_v43 }
 0x3ef   :  { %6092 = vmatmul.mubr.bf16.gmra.mrb[100].mxu1 %v14972_v35  ;;  %v7408_v10 = vadd.f32 %v7312_v9, %v7120_v34  ;;  %v7324_v54 = vmul.f32 %v7228_v4, %v16822_v48  ;;  %v7127_v59 = vmul.f32 %v13437_v63, %v13077_v47  ;;  %v7133_v3 = vmul.f32 %v13438_v2, %v13081_v13  ;;  %v12616_v33 = vld [vmem:[#allocation10 + $0x554] ss:$24 sps:$4 sm:$0xff]   ;;  %v12614_v24 = vld [vmem:[#allocation10 + $0x550] ss:$24 sps:$4 sm:$0xff]   ;;  %v12619_v4 = vld [vmem:[#allocation10 + $0x584] ss:$24 sps:$4 sm:$0xff]  }
 0x3f0   :  { %6143 = vmatpush1.bf16.msra.mxu1 %v12608_v36  ;;  %6101 = vmatprep.mubr.bf16.mxu1 %v14975_v26  ;;  %v7325_v27 = vmul.f32 %v7229_v5, %v16823_v39  ;;  %v12709_v1 = vld [vmem:[#allocation14 + $0x164] ss:$16 sps:$4 sm:$0xff]   ;;  %v7414_v57 = vadd.f32 %v7318_v37, %v7126_v23  ;;  %v12707_v18 = vld [vmem:[#allocation14 + $0x160] ss:$16 sps:$4 sm:$0xff]  }
 0x3f1   :  { %6144 = vmatprep.subr.bf16.mxu1 %v12613_v53  ;;  %v15339_v35 = vpack.c.bf16 %v7408_v10, %v7402_v28  ;;  %v7420_v34 = vadd.f32 %v7324_v54, %v7132_v19  ;;  %v7415_v36 = vadd.f32 %v7319_v14, %v7127_v59  ;;  %8680 = vmatprep.subr.bf16.mxu0 %v12709_v1  ;;  %v12712_v23 = vld [vmem:[#allocation14 + $0x184] ss:$16 sps:$4 sm:$0xff]   ;;  %v12710_v14 = vld [vmem:[#allocation14 + $0x180] ss:$16 sps:$4 sm:$0xff]  }
 0x3f2   :  { %v13083_v6 = vpop.eup %13082  ;;  %v7421_v46 = vadd.f32 %v7325_v27, %v7133_v3  ;;  %8681 = vmatpush1.bf16.msra.mxu0 %v12707_v18  ;;  %v16825_v5 = vld [vmem:[#allocation116_spill] sm:$0xff]  ;;  %v16826_v19 = vld [vmem:[#allocation113_spill] sm:$0xff]  ;;  %v13440_v10 = vld [vmem:[#allocation2 + $0x2e0] sm:$0xff] }
 0x3f3   :  { %v13085_v0 = vpop.eup %13084  ;;  %v15341_v26 = vpack.c.bf16 %v7420_v34, %v7414_v57  ;;  %v7234_v47 = vsub.f32 1.0, %v13083_v6  ;;  %8682 = vmatprep.subr.bf16.mxu0 %v12712_v23  ;;  %v13439_v37 = vld [vmem:[#allocation2 + $0x2b0] sm:$0xff]  ;;  %v16827_v54 = vld [vmem:[#allocation117_spill] sm:$0xff]  ;;  %v13442_v3 = vld [vmem:[#allocation2 + $0x2e8] sm:$0xff] }
 0x3f4   :  { %v13087_v13 = vpop.eup %13086  ;;  %6145 = vmatpush1.bf16.msra.mxu1 %v12611_v52  ;;  %v15343_v53 = vpack.c.bf16 %v7421_v46, %v7415_v36  ;;  %v7235_v9 = vsub.f32 1.0, %v13085_v0  ;;  %v7138_v28 = vmul.f32 %v13439_v37, %v13083_v6  ;;  %v12617_v63 = vld [vmem:[#allocation10 + $0x580] ss:$24 sps:$4 sm:$0xff]   ;;  %v12622_v1 = vld [vmem:[#allocation10 + $0x5b4] ss:$24 sps:$4 sm:$0xff]  }
 0x3f5   :  { %16824 = vst [vmem:[#allocation91_spill] sm:$0xff] %v15341_v26  ;;  %v13089_v49 = vpop.eup %13088  ;;  %6146 = vmatprep.subr.bf16.mxu1 %v12616_v33  ;;  %v7240_v43 = vsub.f32 1.0, %v13087_v13  ;;  %v7330_v30 = vmul.f32 %v7234_v47, %v16825_v5  ;;  %v7144_v48 = vmul.f32 %v13440_v10, %v13087_v13  ;;  %v13441_v59 = vld [vmem:[#allocation2 + $0x2b8] sm:$0xff]  ;;  %v16828_v27 = vld [vmem:[#allocation114_spill] sm:$0xff] }
 0x3f6   :  { %v7241_v15 = vsub.f32 1.0, %v13089_v49  ;;  %v7331_v56 = vmul.f32 %v7235_v9, %v16826_v19  ;;  %v7139_v2 = vmul.f32 %v13441_v59, %v13085_v0  ;;  %v7145_v39 = vmul.f32 %v13442_v3, %v13089_v49  ;;  %8683 = vmatpush1.bf16.msra.mxu0 %v12710_v14  ;;  %v12713_v6 = vld [vmem:[#allocation14 + $0x1a0] ss:$16 sps:$4 sm:$0xff]   ;;  %v12718_v13 = vld [vmem:[#allocation14 + $0x1c4] ss:$16 sps:$4 sm:$0xff]  }
 0x3f7   :  { %6102 = vmatmul.mubr.bf16.gmra.mrb[104].mxu1 %v14980_v12  ;;  %v7336_v52 = vmul.f32 %v7240_v43, %v16827_v54  ;;  %v12715_v12 = vld [vmem:[#allocation14 + $0x1a4] ss:$16 sps:$4 sm:$0xff]   ;;  %v7426_v57 = vadd.f32 %v7330_v30, %v7138_v28  ;;  %v12719_v23 = vld [vmem:[#allocation14 + $0x1e0] ss:$16 sps:$4 sm:$0xff]  }
 0x3f8   :  { %6147 = vmatpush1.bf16.msra.mxu1 %v12614_v24  ;;  %6111 = vmatprep.mubr.bf16.mxu1 %v14983_v58  ;;  %v7337_v33 = vmul.f32 %v7241_v15, %v16828_v27  ;;  %v7427_v18 = vadd.f32 %v7331_v56, %v7139_v2  ;;  %v12620_v58 = vld [vmem:[#allocation10 + $0x5b0] ss:$24 sps:$4 sm:$0xff]   ;;  %v12625_v0 = vld [vmem:[#allocation10 + $0x5e4] ss:$24 sps:$4 sm:$0xff]   ;;  %v12623_v9 = vld [vmem:[#allocation10 + $0x5e0] ss:$24 sps:$4 sm:$0xff]  }
 0x3f9   :  { %6148 = vmatprep.subr.bf16.mxu1 %v12619_v4  ;;  %v7432_v34 = vadd.f32 %v7336_v52, %v7144_v48  ;;  %8684 = vmatprep.subr.bf16.mxu0 %v12715_v12  ;;  %v12716_v24 = vld [vmem:[#allocation14 + $0x1c0] ss:$16 sps:$4 sm:$0xff]   ;;  %v12721_v4 = vld [vmem:[#allocation14 + $0x1e4] ss:$16 sps:$4 sm:$0xff]  }
 0x3fa   :  { %v7433_v36 = vadd.f32 %v7337_v33, %v7145_v39  ;;  %8685 = vmatpush1.bf16.msra.mxu0 %v12713_v6  ;;  %v12628_v49 = vld [vmem:[#allocation10 + $0x614] ss:$24 sps:$4 sm:$0xff]   ;;  %v12626_v43 = vld [vmem:[#allocation10 + $0x610] ss:$24 sps:$4 sm:$0xff]   ;;  %v12631_v5 = vld [vmem:[#allocation10 + $0x644] ss:$24 sps:$4 sm:$0xff]  }
 0x3fb   :  { %v15351_v46 = vpack.c.bf16 %v7432_v34, %v7426_v57  ;;  %8686 = vmatprep.subr.bf16.mxu0 %v12718_v13  ;;  %v12724_v30 = vld [vmem:[#allocation14 + $0x204] ss:$16 sps:$4 sm:$0xff]   ;;  %v16831_v3 = vld [vmem:[#allocation31_spill] sm:$0xff] }
 0x3fc   :  { %6149 = vmatpush1.bf16.msra.mxu1 %v12617_v63  ;;  %v15353_v47 = vpack.c.bf16 %v7433_v36, %v7427_v18  ;;  %v12632_v14 = vld [vmem:[#allocation10 + $0x670] ss:$24 sps:$4 sm:$0xff]   ;;  %v12637_v15 = vld [vmem:[#allocation10 + $0x6a4] ss:$24 sps:$4 sm:$0xff]   ;;  %v12635_v19 = vld [vmem:[#allocation10 + $0x6a0] ss:$24 sps:$4 sm:$0xff]  }
 0x3fd   :  { %16829 = vst [vmem:[#allocation96_spill] sm:$0xff] %v15351_v46  ;;  %6150 = vmatprep.subr.bf16.mxu1 %v12622_v1  ;;  %v12640_v56 = vld [vmem:[#allocation10 + $0x6d4] ss:$24 sps:$4 sm:$0xff]   ;;  %v12643_v37 = vld [vmem:[#allocation10 + $0x704] ss:$24 sps:$4 sm:$0xff]  }
 0x3fe   :  { %16830 = vst [vmem:[#allocation80_spill] sm:$0xff] %v15353_v47  ;;  %8687 = vmatpush1.bf16.msra.mxu0 %v12716_v24  ;;  %v12646_v28 = vld [vmem:[#allocation10 + $0x734] ss:$24 sps:$4 sm:$0xff]   ;;  %v12649_v10 = vld [vmem:[#allocation10 + $0x764] ss:$24 sps:$4 sm:$0xff]  }
 0x3ff   :  { %6112 = vmatmul.mubr.bf16.gmra.mrb[108].mxu1 %v14988_v40  ;;  %8688 = vmatprep.subr.bf16.mxu0 %v12721_v4  ;;  %v12629_v40 = vld [vmem:[#allocation10 + $0x640] ss:$24 sps:$4 sm:$0xff]   ;;  %v12652_v48 = vld [vmem:[#allocation10 + $0x794] ss:$24 sps:$4 sm:$0xff]   ;;  %v12655_v54 = vld [vmem:[#allocation10 + $0x7c4] ss:$24 sps:$4 sm:$0xff]  }
 0x400   :  { %6151 = vmatpush1.bf16.msra.mxu1 %v12620_v58  ;;  %6154 = vmatprep.mubr.bf16.mxu1 %v14991_v45  ;;  %v12634_v45 = vld [vmem:[#allocation10 + $0x674] ss:$24 sps:$4 sm:$0xff]   ;;  %v12661_v63 = vld [vmem:[#allocation10 + $0x824] ss:$24 sps:$4 sm:$0xff]  }
 0x401   :  { %6152 = vmatprep.subr.bf16.mxu1 %v12625_v0  ;;  %v12658_v52 = vld [vmem:[#allocation10 + $0x7f4] ss:$24 sps:$4 sm:$0xff]   ;;  %v12667_v2 = vld [vmem:[#allocation10 + $0x884] ss:$24 sps:$4 sm:$0xff]  }
 0x402   :  { %8689 = vmatpush1.bf16.msra.mxu0 %v12719_v23  ;;  %v12664_v59 = vld [vmem:[#allocation10 + $0x854] ss:$24 sps:$4 sm:$0xff]   ;;  %v12673_v27 = vld [vmem:[#allocation10 + $0x8e4] ss:$24 sps:$4 sm:$0xff]  }
 0x403   :  { %8771 = vmatprep.subr.bf16.mxu0 %v12724_v30  ;;  %v12670_v39 = vld [vmem:[#allocation10 + $0x8b4] ss:$24 sps:$4 sm:$0xff]   ;;  %v16834_v12 = vld [vmem:[#allocation38_spill] sm:$0xff]  ;;  %v16837_v34 = vld [vmem:[#allocation51_spill] sm:$0xff] }
 0x404   :  { %6153 = vmatpush1.bf16.msra.mxu1 %v12623_v9  ;;  %v16832_v33 = vld [vmem:[#allocation32_spill] sm:$0xff]  ;;  %v16833_v1 = vld [vmem:[#allocation37_spill] sm:$0xff]  ;;  %v13443_v18 = vld [vmem:[#allocation13] sm:$0x3f] }
 0x405   :  { %6235 = vmatprep.subr.bf16.mxu1 %v12628_v49  ;;  %v16836_v57 = vld [vmem:[#allocation44_spill] sm:$0xff]  ;;  %v16839_v36 = vld [vmem:[#allocation26_spill] sm:$0xff]  ;;  %v16840_v0 = vld [vmem:[#allocation25_spill] sm:$0xff] }
 0x406   :  { %v16838_v6 = vld [vmem:[#allocation52_spill] sm:$0xff]  ;;  %v15379_v58 = vrot.slane %v13443_v18, %v16839_v36  ;;  %v15382_v13 = vrot.slane %v13443_v18, %v16840_v0  ;;  %v16841_v24 = vld [vmem:[#allocation53_spill] sm:$0xff] }
 0x407   :  { %6155 = vmatmul.mubr.bf16.vlgmr.msra.gmra.mrb[80].mxu1 %v14996_v11  ;;  %v12638_v11 = vld [vmem:[#allocation10 + $0x6d0] ss:$24 sps:$4 sm:$0xff]  }
 0x408   :  { %6236 = vmatpush1.bf16.msra.mxu1 %v12626_v43  ;;  %6164 = vmatprep.mubr.bf16.mxu1 %v14999_v50  ;;  %v12641_v50 = vld [vmem:[#allocation10 + $0x700] ss:$24 sps:$4 sm:$0xff]  }
 0x409   :  { %6237 = vmatprep.subr.bf16.mxu1 %v12631_v5 }
 0x40c   :  { %6238 = vmatpush1.bf16.msra.mxu1 %v12629_v40 }
 0x40d   :  { %6239 = vmatprep.subr.bf16.mxu1 %v12634_v45 }
 0x40f   :  { %6165 = vmatmul.mubr.bf16.gmra.mrb[84].mxu1 %v15004_v51  ;;  %v12644_v51 = vld [vmem:[#allocation10 + $0x730] ss:$24 sps:$4 sm:$0xff]  }
 0x410   :  { %6240 = vmatpush1.bf16.msra.mxu1 %v12632_v14  ;;  %6174 = vmatprep.mubr.bf16.mxu1 %v15007_v22  ;;  %v12647_v22 = vld [vmem:[#allocation10 + $0x760] ss:$24 sps:$4 sm:$0xff]  }
 0x411   :  { %6241 = vmatprep.subr.bf16.mxu1 %v12637_v15 }
 0x414   :  { %6242 = vmatpush1.bf16.msra.mxu1 %v12635_v19  ;;  %v16842_v19 = vld [vmem:[#allocation58_spill] sm:$0xff] }
 0x415   :  { %6243 = vmatprep.subr.bf16.mxu1 %v12640_v56 }
 0x417   :  { %6175 = vmatmul.mubr.bf16.gmra.mrb[88].mxu1 %v15012_v38  ;;  %v12650_v38 = vld [vmem:[#allocation10 + $0x790] ss:$24 sps:$4 sm:$0xff]  }
 0x418   :  { %6244 = vmatpush1.bf16.msra.mxu1 %v12638_v11  ;;  %6184 = vmatprep.mubr.bf16.mxu1 %v15015_v21  ;;  %v12653_v21 = vld [vmem:[#allocation10 + $0x7c0] ss:$24 sps:$4 sm:$0xff]  }
 0x419   :  { %6245 = vmatprep.subr.bf16.mxu1 %v12643_v37  ;;  %v16843_v11 = vld [vmem:[#allocation59_spill] sm:$0xff] }
 0x41c   :  { %6246 = vmatpush1.bf16.msra.mxu1 %v12641_v50 }
 0x41d   :  { %6247 = vmatprep.subr.bf16.mxu1 %v12646_v28 }
 0x41f   :  { %6185 = vmatmul.mubr.bf16.gmra.mrb[92].mxu1 %v15020_v25  ;;  %v12656_v25 = vld [vmem:[#allocation10 + $0x7f0] ss:$24 sps:$4 sm:$0xff]  }
 0x420   :  { %6248 = vmatpush1.bf16.msra.mxu1 %v12644_v51  ;;  %6194 = vmatprep.mubr.bf16.mxu1 %v15023_v42  ;;  %v12659_v42 = vld [vmem:[#allocation10 + $0x820] ss:$24 sps:$4 sm:$0xff]  }
 0x421   :  { %6249 = vmatprep.subr.bf16.mxu1 %v12649_v10 }
 0x424   :  { %6250 = vmatpush1.bf16.msra.mxu1 %v12647_v22 }
 0x425   :  { %6251 = vmatprep.subr.bf16.mxu1 %v12652_v48 }
 0x427   :  { %6195 = vmatmul.mubr.bf16.gmra.mrb[96].mxu1 %v15028_v29  ;;  %v12662_v29 = vld [vmem:[#allocation10 + $0x850] ss:$24 sps:$4 sm:$0xff]  }
 0x428   :  { %6252 = vmatpush1.bf16.msra.mxu1 %v12650_v38  ;;  %6204 = vmatprep.mubr.bf16.mxu1 %v15031_v20  ;;  %v12665_v20 = vld [vmem:[#allocation10 + $0x880] ss:$24 sps:$4 sm:$0xff]  }
 0x429   :  { %6253 = vmatprep.subr.bf16.mxu1 %v12655_v54 }
 0x42c   :  { %6254 = vmatpush1.bf16.msra.mxu1 %v12653_v21 }
 0x42d   :  { %6255 = vmatprep.subr.bf16.mxu1 %v12658_v52 }
 0x42f   :  { %6205 = vmatmul.mubr.bf16.gmra.mrb[100].mxu1 %v15036_v32  ;;  %v12668_v32 = vld [vmem:[#allocation10 + $0x8b0] ss:$24 sps:$4 sm:$0xff]  }
 0x430   :  { %6256 = vmatpush1.bf16.msra.mxu1 %v12656_v25  ;;  %6214 = vmatprep.mubr.bf16.mxu1 %v15039_v61  ;;  %v12671_v61 = vld [vmem:[#allocation10 + $0x8e0] ss:$24 sps:$4 sm:$0xff]   ;;  %v16844_v25 = vld [vmem:[#allocation64_spill] sm:$0xff] }
 0x431   :  { %6257 = vmatprep.subr.bf16.mxu1 %v12661_v63 }
 0x434   :  { %6258 = vmatpush1.bf16.msra.mxu1 %v12659_v42  ;;  %v16845_v42 = vld [vmem:[#allocation65_spill] sm:$0xff] }
 0x435   :  { %6259 = vmatprep.subr.bf16.mxu1 %v12664_v59 }
 0x437   :  { %6215 = vmatmul.mubr.bf16.gmra.mrb[104].mxu1 %v15044_v31  ;;  %v16835_v31 = vld [vmem:[#allocation43_spill] sm:$0xff] }
 0x438   :  { %6260 = vmatpush1.bf16.msra.mxu1 %v12662_v29  ;;  %6224 = vmatprep.mubr.bf16.mxu1 %v16831_v3 }
 0x439   :  { %6261 = vmatprep.subr.bf16.mxu1 %v12667_v2 }
 0x43c   :  { %6262 = vmatpush1.bf16.msra.mxu1 %v12665_v20 }
 0x43d   :  { %6263 = vmatprep.subr.bf16.mxu1 %v12670_v39 }
 0x43f   :  { %6225 = vmatmul.mubr.bf16.gmra.mrb[108].mxu1 %v16832_v33 }
 0x440   :  { %6264 = vmatpush1.bf16.msra.mxu1 %v12668_v32  ;;  %6267 = vmatprep.mubr.bf16.mxu1 %v16833_v1 }
 0x441   :  { %6265 = vmatprep.subr.bf16.mxu1 %v12673_v27 }
 0x444   :  { %6266 = vmatpush1.bf16.msra.mxu1 %v12671_v61 }
 0x447   :  { %6268 = vmatmul.mubr.bf16.vlgmr.msra.gmra.mrb[80].mxu1 %v16834_v12 }
 0x448   :  { %6277 = vmatprep.mubr.bf16.mxu1 %v16835_v31 }
 0x44f   :  { %6278 = vmatmul.mubr.bf16.gmra.mrb[84].mxu1 %v16836_v57 }
 0x450   :  { %6287 = vmatprep.mubr.bf16.mxu1 %v16837_v34 }
 0x457   :  { %6288 = vmatmul.mubr.bf16.gmra.mrb[88].mxu1 %v16838_v6 }
 0x458   :  { %6297 = vmatprep.mubr.bf16.mxu1 %v16841_v24 }
 0x45a   :  { %v5591_v9 = vpop.f32.mrb[48].mxu1 }
 0x45b   :  { %v6380_v49 = vadd.f32 %v15379_v58, %v5591_v9  ;;  %v5593_v4 = vpop.f32.mrb[49].mxu1 }
 0x45c   :  { %v6381_v23 = vadd.f32 %v15382_v13, %v5593_v4  ;;  %v5595_v43 = vpop.f32.mrb[50].mxu1 }
 0x45d   :  { %v10759_v5 = vmul.f32 -1.442695, %v6380_v49  ;;  %v6386_v30 = vadd.f32 %v15379_v58, %v5595_v43  ;;  %v5597_v40 = vpop.f32.mrb[51].mxu1  ;;  %v16846_v49 = vld [vmem:[#allocation71_spill] sm:$0xff] }
 0x45e   :  { %v10760_v45 = vmul.f32 -1.442695, %v6381_v23  ;;  %v6387_v14 = vadd.f32 %v15382_v13, %v5597_v40  ;;  %v16847_v23 = vld [vmem:[#allocation72_spill] sm:$0xff] }
 0x45f   :  { %13090 = vpow2.f32 %v10759_v5  ;;  %v10765_v15 = vmul.f32 -1.442695, %v6386_v30  ;;  %6298 = vmatmul.mubr.bf16.gmra.mrb[92].mxu1 %v16842_v19 }
 0x460   :  { %13092 = vpow2.f32 %v10760_v45  ;;  %v10766_v56 = vmul.f32 -1.442695, %v6387_v14  ;;  %6307 = vmatprep.mubr.bf16.mxu1 %v16843_v11 }
 0x461   :  { %13094 = vpow2.f32 %v10765_v15 }
 0x462   :  { %13096 = vpow2.f32 %v10766_v56  ;;  %v5601_v37 = vpop.f32.mrb[52].mxu1 }
 0x463   :  { %v6392_v50 = vadd.f32 %v15379_v58, %v5601_v37  ;;  %v5603_v28 = vpop.f32.mrb[53].mxu1 }
 0x464   :  { %v6393_v51 = vadd.f32 %v15382_v13, %v5603_v28  ;;  %v5605_v10 = vpop.f32.mrb[54].mxu1 }
 0x465   :  { %v10771_v22 = vmul.f32 -1.442695, %v6392_v50  ;;  %v6398_v48 = vadd.f32 %v15379_v58, %v5605_v10  ;;  %v5607_v38 = vpop.f32.mrb[55].mxu1 }
 0x466   :  { %v10772_v54 = vmul.f32 -1.442695, %v6393_v51  ;;  %v6399_v21 = vadd.f32 %v15382_v13, %v5607_v38 }
 0x467   :  { %13098 = vpow2.f32 %v10771_v22  ;;  %v10777_v52 = vmul.f32 -1.442695, %v6398_v48  ;;  %6308 = vmatmul.mubr.bf16.gmra.mrb[96].mxu1 %v16844_v25 }
 0x468   :  { %13100 = vpow2.f32 %v10772_v54  ;;  %v10778_v63 = vmul.f32 -1.442695, %v6399_v21  ;;  %6317 = vmatprep.mubr.bf16.mxu1 %v16845_v42 }
 0x469   :  { %v13091_v59 = vpop.eup %13090  ;;  %13102 = vpow2.f32 %v10777_v52 }
 0x46a   :  { %v13093_v29 = vpop.eup %13092  ;;  %v6764_v2 = vadd.f32 1.0, %v13091_v59  ;;  %13104 = vpow2.f32 %v10778_v63  ;;  %v5611_v20 = vpop.f32.mrb[56].mxu1  ;;  %v16848_v63 = vld [vmem:[#allocation78_spill] sm:$0xff] }
 0x46b   :  { %v13095_v3 = vpop.eup %13094  ;;  %v6765_v39 = vadd.f32 1.0, %v13093_v29  ;;  %v6404_v32 = vadd.f32 %v15379_v58, %v5611_v20  ;;  %v5613_v27 = vpop.f32.mrb[57].mxu1  ;;  %v13444_v59 = vld [vmem:[#allocation2] sm:$0xff]  ;;  %v16849_v20 = vld [vmem:[#allocation79_spill] sm:$0xff] }
 0x46c   :  { %v13097_v33 = vpop.eup %13096  ;;  %13106 = vrcp.f32 %v6764_v2  ;;  %v6770_v61 = vadd.f32 1.0, %v13095_v3  ;;  %v6405_v1 = vadd.f32 %v15382_v13, %v5613_v27  ;;  %v5615_v12 = vpop.f32.mrb[58].mxu1 }
 0x46d   :  { %13108 = vrcp.f32 %v6765_v39  ;;  %v6771_v31 = vadd.f32 1.0, %v13097_v33  ;;  %v10783_v57 = vmul.f32 -1.442695, %v6404_v32  ;;  %v6410_v34 = vadd.f32 %v15379_v58, %v5615_v12  ;;  %v5617_v6 = vpop.f32.mrb[59].mxu1  ;;  %v13445_v32 = vld [vmem:[#allocation2 + $0x30] sm:$0xff] }
 0x46e   :  { %13110 = vrcp.f32 %v6770_v61  ;;  %v10784_v18 = vmul.f32 -1.442695, %v6405_v1  ;;  %v6411_v24 = vadd.f32 %v15382_v13, %v5617_v6  ;;  %v13446_v61 = vld [vmem:[#allocation2 + $0x8] sm:$0xff] }
 0x46f   :  { %13112 = vrcp.f32 %v6771_v31  ;;  %v10789_v9 = vmul.f32 -1.442695, %v6410_v34  ;;  %6318 = vmatmul.mubr.bf16.gmra.mrb[100].mxu1 %v16846_v49 }
 0x470   :  { %13114 = vpow2.f32 %v10783_v57  ;;  %v10790_v4 = vmul.f32 -1.442695, %v6411_v24  ;;  %6327 = vmatprep.mubr.bf16.mxu1 %v16847_v23  ;;  %v13447_v57 = vld [vmem:[#allocation2 + $0x38] sm:$0xff] }
 0x471   :  { %v13099_v43 = vpop.eup %13098  ;;  %13116 = vpow2.f32 %v10784_v18  ;;  %v16850_v18 = vld [vmem:[#allocation30_spill] sm:$0xff] }
 0x472   :  { %v13101_v5 = vpop.eup %13100  ;;  %v6776_v30 = vadd.f32 1.0, %v13099_v43  ;;  %13118 = vpow2.f32 %v10789_v9  ;;  %v5621_v40 = vpop.f32.mrb[60].mxu1  ;;  %v16851_v43 = vld [vmem:[#allocation28_spill] sm:$0xff] }
 0x473   :  { %v13103_v45 = vpop.eup %13102  ;;  %v6777_v14 = vadd.f32 1.0, %v13101_v5  ;;  %13120 = vpow2.f32 %v10790_v4  ;;  %v6416_v15 = vadd.f32 %v15379_v58, %v5621_v40  ;;  %v5623_v19 = vpop.f32.mrb[61].mxu1 }
 0x474   :  { %v13105_v56 = vpop.eup %13104  ;;  %13122 = vrcp.f32 %v6776_v30  ;;  %v6782_v11 = vadd.f32 1.0, %v13103_v45  ;;  %v6417_v37 = vadd.f32 %v15382_v13, %v5623_v19  ;;  %v5625_v50 = vpop.f32.mrb[62].mxu1 }
 0x475   :  { %13124 = vrcp.f32 %v6777_v14  ;;  %v6783_v28 = vadd.f32 1.0, %v13105_v56  ;;  %v10795_v51 = vmul.f32 -1.442695, %v6416_v15  ;;  %v6422_v10 = vadd.f32 %v15379_v58, %v5625_v50  ;;  %v5627_v22 = vpop.f32.mrb[63].mxu1  ;;  %v16852_v15 = vld [vmem:[#allocation29_spill] sm:$0xff]  ;;  %v16853_v56 = vld [vmem:[#allocation27_spill] sm:$0xff] }
 0x476   :  { %v13107_v48 = vpop.eup %13106  ;;  %13126 = vrcp.f32 %v6782_v11  ;;  %v10796_v38 = vmul.f32 -1.442695, %v6417_v37  ;;  %v6423_v54 = vadd.f32 %v15382_v13, %v5627_v22 }
 0x477   :  { %v13109_v21 = vpop.eup %13108  ;;  %v7148_v52 = vsub.f32 1.0, %v13107_v48  ;;  %13128 = vrcp.f32 %v6783_v28  ;;  %v10801_v25 = vmul.f32 -1.442695, %v6422_v10  ;;  %6328 = vmatmul.mubr.bf16.gmra.mrb[104].mxu1 %v16848_v63  ;;  %v7052_v29 = vmul.f32 %v13444_v59, %v13107_v48 }
 0x478   :  { %v13111_v42 = vpop.eup %13110  ;;  %13130 = vpow2.f32 %v10795_v51  ;;  %v10802_v2 = vmul.f32 -1.442695, %v6423_v54  ;;  %6337 = vmatprep.mubr.bf16.mxu1 %v16849_v20  ;;  %v7149_v3 = vsub.f32 1.0, %v13109_v21  ;;  %v7053_v1 = vmul.f32 %v13446_v61, %v13109_v21 }
 0x479   :  { %v13113_v39 = vpop.eup %13112  ;;  %v7058_v27 = vmul.f32 %v13445_v32, %v13111_v42  ;;  %v7154_v33 = vsub.f32 1.0, %v13111_v42  ;;  %13132 = vpow2.f32 %v10796_v38  ;;  %v7244_v24 = vmul.f32 %v7148_v52, %v16850_v18  ;;  %v12722_v32 = vld [vmem:[#allocation14 + $0x200] ss:$16 sps:$4 sm:$0xff]  }
 0x47a   :  { %v13115_v12 = vpop.eup %13114  ;;  %13134 = vpow2.f32 %v10801_v25  ;;  %v5631_v31 = vpop.f32.mrb[64].mxu1  ;;  %v7059_v34 = vmul.f32 %v13447_v57, %v13113_v39  ;;  %v7155_v6 = vsub.f32 1.0, %v13113_v39  ;;  %v7245_v5 = vmul.f32 %v7149_v3, %v16851_v43 }
 0x47b   :  { %v13117_v9 = vpop.eup %13116  ;;  %v6788_v49 = vadd.f32 1.0, %v13115_v12  ;;  %13136 = vpow2.f32 %v10802_v2  ;;  %v6428_v4 = vadd.f32 %v15379_v58, %v5631_v31  ;;  %v5633_v23 = vpop.f32.mrb[65].mxu1  ;;  %v7250_v11 = vmul.f32 %v7154_v33, %v16853_v56  ;;  %v13448_v33 = vld [vmem:[#allocation2 + $0x68] sm:$0xff] }
 0x47c   :  { %v13119_v30 = vpop.eup %13118  ;;  %v6789_v40 = vadd.f32 1.0, %v13117_v9  ;;  %v6429_v45 = vadd.f32 %v15382_v13, %v5633_v23  ;;  %v5635_v14 = vpop.f32.mrb[66].mxu1  ;;  %v7251_v19 = vmul.f32 %v7155_v6, %v16852_v15  ;;  %v7341_v25 = vadd.f32 %v7245_v5, %v7053_v1  ;;  %v12727_v1 = vld [vmem:[#allocation14 + $0x224] ss:$16 sps:$4 sm:$0xff]  }
 0x47d   :  { %v13121_v37 = vpop.eup %13120  ;;  %13138 = vrcp.f32 %v6788_v49  ;;  %v6794_v50 = vadd.f32 1.0, %v13119_v30  ;;  %v10807_v28 = vmul.f32 -1.442695, %v6428_v4  ;;  %v6434_v51 = vadd.f32 %v15379_v58, %v5635_v14  ;;  %v5637_v10 = vpop.f32.mrb[67].mxu1  ;;  %v16854_v49 = vld [vmem:[#allocation34_spill] sm:$0xff] }
 0x47e   :  { %v15416_v22 = vpop.eup %13122  ;;  %13140 = vrcp.f32 %v6789_v40  ;;  %v6795_v48 = vadd.f32 1.0, %v13121_v37  ;;  %v10808_v38 = vmul.f32 -1.442695, %v6429_v45  ;;  %v6435_v54 = vadd.f32 %v15382_v13, %v5637_v10  ;;  %v16855_v40 = vld [vmem:[#allocation35_spill] sm:$0xff]  ;;  %v12730_v10 = vld [vmem:[#allocation14 + $0x244] ss:$16 sps:$4 sm:$0xff]  }
 0x47f   :  { %v13125_v21 = vpop.eup %13124  ;;  %13142 = vrcp.f32 %v6794_v50  ;;  %v10813_v52 = vmul.f32 -1.442695, %v6434_v51  ;;  %6338 = vmatmul.mubr.bf16.gmra.mrb[108].mxu1 %v15116_v62  ;;  %v7347_v63 = vadd.f32 %v7251_v19, %v7059_v34  ;;  %v7340_v2 = vadd.f32 %v7244_v24, %v7052_v29  ;;  %v13449_v34 = vld [vmem:[#allocation2 + $0x98] sm:$0xff] }
 0x480   :  { %v15420_v42 = vpop.eup %13126  ;;  %13144 = vrcp.f32 %v6795_v48  ;;  %v10814_v59 = vmul.f32 -1.442695, %v6435_v54  ;;  %v7346_v20 = vadd.f32 %v7250_v11, %v7058_v27  ;;  %v7065_v61 = vmul.f32 %v13448_v33, %v13125_v21  ;;  %v12725_v37 = vld [vmem:[#allocation14 + $0x220] ss:$16 sps:$4 sm:$0xff]  }
 0x481   :  { %v13129_v3 = vpop.eup %13128  ;;  %13146 = vpow2.f32 %v10807_v28  ;;  %v15422_v39 = vpack.c.bf16 %v7347_v63, %v7341_v25  ;;  %v7161_v12 = vsub.f32 1.0, %v13125_v21  ;;  %v13450_v63 = vld [vmem:[#allocation2 + $0x60] sm:$0xff] }
 0x482   :  { %v13131_v31 = vpop.eup %13130  ;;  %13148 = vpow2.f32 %v10808_v38  ;;  %v5641_v57 = vpop.f32.mrb[68].mxu1  ;;  %v15424_v62 = vpack.c.bf16 %v7346_v20, %v7340_v2  ;;  %v7071_v6 = vmul.f32 %v13449_v34, %v13129_v3  ;;  %v7167_v18 = vsub.f32 1.0, %v13129_v3 }
 0x483   :  { %v13133_v9 = vpop.eup %13132  ;;  %v6800_v29 = vadd.f32 1.0, %v13131_v31  ;;  %13150 = vpow2.f32 %v10813_v52  ;;  %v6440_v27 = vadd.f32 %v15379_v58, %v5641_v57  ;;  %8690 = vmatprep.mubr.bf16.mxu0 %v15422_v39  ;;  %v5643_v24 = vpop.f32.mrb[69].mxu1  ;;  %v7257_v4 = vmul.f32 %v7161_v12, %v16854_v49  ;;  %v12728_v12 = vld [vmem:[#allocation14 + $0x240] ss:$16 sps:$4 sm:$0xff]  }
 0x484   :  { %v13135_v23 = vpop.eup %13134  ;;  %v6801_v43 = vadd.f32 1.0, %v13133_v9  ;;  %13152 = vpow2.f32 %v10814_v59  ;;  %v6441_v5 = vadd.f32 %v15382_v13, %v5643_v24  ;;  %8691 = vmatmul.mubr.bf16.vlgmr.msra.gmra.mrb[80].mxu0 %v15424_v62  ;;  %v5645_v30 = vpop.f32.mrb[70].mxu1  ;;  %v7263_v45 = vmul.f32 %v7167_v18, %v16855_v40  ;;  %v16857_v24 = vld [vmem:[#allocation33_spill] sm:$0xff] }
 0x485   :  { %v13137_v14 = vpop.eup %13136  ;;  %13154 = vrcp.f32 %v6800_v29  ;;  %v6806_v15 = vadd.f32 1.0, %v13135_v23  ;;  %v10819_v19 = vmul.f32 -1.442695, %v6440_v27  ;;  %v6446_v56 = vadd.f32 %v15379_v58, %v5645_v30  ;;  %8772 = vmatpush1.bf16.msra.mxu0 %v12722_v32  ;;  %v5647_v11 = vpop.f32.mrb[71].mxu1  ;;  %v13451_v32 = vld [vmem:[#allocation2 + $0x90] sm:$0xff] }
 0x486   :  { %13156 = vrcp.f32 %v6801_v43  ;;  %v6807_v50 = vadd.f32 1.0, %v13137_v14  ;;  %v10820_v28 = vmul.f32 -1.442695, %v6441_v5  ;;  %v6447_v51 = vadd.f32 %v15382_v13, %v5647_v11  ;;  %8773 = vmatprep.subr.bf16.mxu0 %v12727_v1  ;;  %v16856_v1 = vld [vmem:[#allocation36_spill] sm:$0xff] }
 0x487   :  { %v15434_v48 = vpop.eup %13138  ;;  %13158 = vrcp.f32 %v6806_v15  ;;  %v10825_v38 = vmul.f32 -1.442695, %v6446_v56  ;;  %v7353_v54 = vadd.f32 %v7257_v4, %v7065_v61  ;;  %v7359_v21 = vadd.f32 %v7263_v45, %v7071_v6  ;;  %v12733_v6 = vld [vmem:[#allocation14 + $0x264] ss:$16 sps:$4 sm:$0xff]   ;;  %v13454_v45 = vld [vmem:[#allocation2 + $0xf8] sm:$0xff] }
 0x488   :  { %v15436_v52 = vpop.eup %13140  ;;  %13160 = vrcp.f32 %v6807_v50  ;;  %v10826_v25 = vmul.f32 -1.442695, %v6447_v51  ;;  %v7064_v59 = vmul.f32 %v13450_v63, %v15416_v22  ;;  %v7160_v2 = vsub.f32 1.0, %v15416_v22  ;;  %v13452_v22 = vld [vmem:[#allocation2 + $0xc8] sm:$0xff]  ;;  %v13453_v4 = vld [vmem:[#allocation2 + $0xc0] sm:$0xff] }
 0x489   :  { %v15440_v20 = vpop.eup %13142  ;;  %13162 = vpow2.f32 %v10819_v19  ;;  %8774 = vmatpush1.bf16.msra.mxu0 %v12725_v37  ;;  %v15442_v3 = vpack.c.bf16 %v7359_v21, %v7353_v54  ;;  %v7070_v33 = vmul.f32 %v13451_v32, %v15420_v42  ;;  %v7166_v61 = vsub.f32 1.0, %v15420_v42  ;;  %v12731_v54 = vld [vmem:[#allocation14 + $0x260] ss:$16 sps:$4 sm:$0xff]  }
 0x48a   :  { %v13145_v31 = vpop.eup %13144  ;;  %13164 = vpow2.f32 %v10820_v28  ;;  %v5651_v57 = vpop.f32.mrb[72].mxu1  ;;  %v7256_v34 = vmul.f32 %v7160_v2, %v16856_v1  ;;  %8775 = vmatprep.subr.bf16.mxu0 %v12730_v10  ;;  %v7077_v18 = vmul.f32 %v13452_v22, %v15436_v52  ;;  %v7173_v9 = vsub.f32 1.0, %v15436_v52 }
 0x48b   :  { %v13147_v29 = vpop.eup %13146  ;;  %13166 = vpow2.f32 %v10825_v38  ;;  %v6452_v27 = vadd.f32 %v15379_v58, %v5651_v57  ;;  %8700 = vmatprep.mubr.bf16.mxu0 %v15442_v3  ;;  %v5653_v42 = vpop.f32.mrb[73].mxu1  ;;  %v7262_v49 = vmul.f32 %v7166_v61, %v16857_v24  ;;  %v15453_v23 = vmul.f32 %v13453_v4, %v15434_v48  ;;  %v16858_v61 = vld [vmem:[#allocation40_spill] sm:$0xff] }
 0x48c   :  { %v13149_v43 = vpop.eup %13148  ;;  %v6812_v5 = vadd.f32 1.0, %v13147_v29  ;;  %13168 = vpow2.f32 %v10826_v25  ;;  %v6453_v30 = vadd.f32 %v15382_v13, %v5653_v42  ;;  %v5655_v40 = vpop.f32.mrb[74].mxu1  ;;  %v7083_v14 = vmul.f32 %v13454_v45, %v13145_v31  ;;  %v13455_v24 = vld [vmem:[#allocation2 + $0xf0] sm:$0xff] }
 0x48d   :  { %v13151_v15 = vpop.eup %13150  ;;  %v6813_v19 = vadd.f32 1.0, %v13149_v43  ;;  %v7352_v56 = vadd.f32 %v7256_v34, %v7064_v59  ;;  %v7358_v11 = vadd.f32 %v7262_v49, %v7070_v33  ;;  %v6458_v37 = vadd.f32 %v15379_v58, %v5655_v40  ;;  %8776 = vmatpush1.bf16.msra.mxu0 %v12728_v12  ;;  %v5657_v50 = vpop.f32.mrb[75].mxu1  ;;  %v12736_v59 = vld [vmem:[#allocation14 + $0x284] ss:$16 sps:$4 sm:$0xff]   ;;  %v12734_v49 = vld [vmem:[#allocation14 + $0x280] ss:$16 sps:$4 sm:$0xff]  }
 0x48e   :  { %v13153_v28 = vpop.eup %13152  ;;  %13170 = vrcp.f32 %v6812_v5  ;;  %v6818_v51 = vadd.f32 1.0, %v13151_v15  ;;  %v10831_v10 = vmul.f32 -1.442695, %v6452_v27  ;;  %v6459_v38 = vadd.f32 %v15382_v13, %v5657_v50  ;;  %8777 = vmatprep.subr.bf16.mxu0 %v12733_v6  ;;  %v16859_v27 = vld [vmem:[#allocation41_spill] sm:$0xff]  ;;  %v16861_v40 = vld [vmem:[#allocation39_spill] sm:$0xff] }
 0x48f   :  { %v15458_v21 = vpop.eup %13154  ;;  %13172 = vrcp.f32 %v6813_v19  ;;  %v6819_v52 = vadd.f32 1.0, %v13153_v28  ;;  %v10832_v25 = vmul.f32 -1.442695, %v6453_v30  ;;  %v15460_v63 = vpack.c.bf16 %v7358_v11, %v7352_v56  ;;  %v12739_v15 = vld [vmem:[#allocation14 + $0x2a4] ss:$16 sps:$4 sm:$0xff]  }
 0x490   :  { %v15462_v2 = vpop.eup %13156  ;;  %13174 = vrcp.f32 %v6818_v51  ;;  %v10837_v32 = vmul.f32 -1.442695, %v6458_v37  ;;  %v7179_v33 = vsub.f32 1.0, %v13145_v31  ;;  %v7269_v12 = vmul.f32 %v7173_v9, %v16858_v61  ;;  %v12742_v61 = vld [vmem:[#allocation14 + $0x2c4] ss:$16 sps:$4 sm:$0xff]  }
 0x491   :  { %v15465_v57 = vpop.eup %13158  ;;  %13176 = vrcp.f32 %v6819_v52  ;;  %8701 = vmatmul.mubr.bf16.gmra.mrb[84].mxu0 %v15460_v63  ;;  %v10838_v1 = vmul.f32 -1.442695, %v6459_v38  ;;  %v7172_v34 = vsub.f32 1.0, %v15434_v48  ;;  %v7178_v6 = vsub.f32 1.0, %v15440_v20  ;;  %v16860_v48 = vld [vmem:[#allocation42_spill] sm:$0xff] }
 0x492   :  { %v15470_v22 = vpop.eup %13160  ;;  %13178 = vpow2.f32 %v10831_v10  ;;  %8778 = vmatpush1.bf16.msra.mxu0 %v12731_v54  ;;  %v5661_v29 = vpop.f32.mrb[76].mxu1  ;;  %v7275_v42 = vmul.f32 %v7179_v33, %v16859_v27  ;;  %v7365_v31 = vadd.f32 %v7269_v12, %v7077_v18  ;;  %v7082_v9 = vmul.f32 %v13455_v24, %v15440_v20 }
 0x493   :  { %v13163_v4 = vpop.eup %13162  ;;  %13180 = vpow2.f32 %v10832_v25  ;;  %v6464_v43 = vadd.f32 %v15379_v58, %v5661_v29  ;;  %v5663_v5 = vpop.f32.mrb[77].mxu1  ;;  %v7268_v30 = vmul.f32 %v7172_v34, %v16860_v48  ;;  %v7274_v45 = vmul.f32 %v7178_v6, %v16861_v40  ;;  %8779 = vmatprep.subr.bf16.mxu0 %v12736_v59  ;;  %v12737_v59 = vld [vmem:[#allocation14 + $0x2a0] ss:$16 sps:$4 sm:$0xff]  }
 0x494   :  { %v13165_v19 = vpop.eup %13164  ;;  %v6824_v56 = vadd.f32 1.0, %v13163_v4  ;;  %13182 = vpow2.f32 %v10837_v32  ;;  %v7371_v11 = vadd.f32 %v7275_v42, %v7083_v14  ;;  %v6465_v18 = vadd.f32 %v15382_v13, %v5663_v5  ;;  %v5665_v37 = vpop.f32.mrb[78].mxu1  ;;  %v16863_v48 = vld [vmem:[#allocation49_spill] sm:$0xff] }
 0x495   :  { %v13167_v20 = vpop.eup %13166  ;;  %v6825_v50 = vadd.f32 1.0, %v13165_v19  ;;  %13184 = vpow2.f32 %v10838_v1  ;;  %v10843_v28 = vmul.f32 -1.442695, %v6464_v43  ;;  %v7364_v51 = vadd.f32 %v7268_v30, %v15453_v23  ;;  %v5667_v10 = vpop.f32.mrb[79].mxu1  ;;  %v13457_v43 = vld [vmem:[#allocation2 + $0x158] sm:$0xff] }
 0x496   :  { %v13169_v38 = vpop.eup %13168  ;;  %13186 = vrcp.f32 %v6824_v56  ;;  %v6830_v54 = vadd.f32 1.0, %v13167_v20  ;;  %v15479_v52 = vpack.c.bf16 %v7371_v11, %v7365_v31  ;;  %v10844_v25 = vmul.f32 -1.442695, %v6465_v18  ;;  %8780 = vmatpush1.bf16.msra.mxu0 %v12734_v49  ;;  %v13456_v31 = vld [vmem:[#allocation2 + $0x128] sm:$0xff] }
 0x497   :  { %13188 = vrcp.f32 %v6825_v50  ;;  %v6831_v14 = vadd.f32 1.0, %v13169_v38  ;;  %v7370_v32 = vadd.f32 %v7274_v45, %v7082_v9  ;;  %v6470_v33 = vadd.f32 %v15379_v58, %v5665_v37  ;;  %8781 = vmatprep.subr.bf16.mxu0 %v12739_v15  ;;  %v16862_v9 = vld [vmem:[#allocation48_spill] sm:$0xff]  ;;  %v16864_v50 = vld [vmem:[#allocation50_spill] sm:$0xff] }
 0x498   :  { %v15482_v12 = vpop.eup %13170  ;;  %13190 = vrcp.f32 %v6830_v54  ;;  %8710 = vmatprep.mubr.bf16.mxu0 %v15479_v52  ;;  %v6471_v23 = vadd.f32 %v15382_v13, %v5667_v10  ;;  %v7185_v1 = vsub.f32 1.0, %v15462_v2  ;;  %v7191_v27 = vsub.f32 1.0, %v15470_v22  ;;  %v12740_v13 = vld [vmem:[#allocation14 + $0x2c0] ss:$16 sps:$4 sm:$0xff]   ;;  %v12745_v45 = vld [vmem:[#allocation14 + $0x2e4] ss:$16 sps:$4 sm:$0xff]  }
 0x499   :  { %v13173_v34 = vpop.eup %13172  ;;  %13192 = vrcp.f32 %v6831_v14  ;;  %v15487_v6 = vpack.c.bf16 %v7370_v32, %v7364_v51  ;;  %v10849_v29 = vmul.f32 -1.442695, %v6470_v33  ;;  %v7089_v24 = vmul.f32 %v13456_v31, %v15462_v2  ;;  %v13458_v2 = vld [vmem:[#allocation2 + $0x120] sm:$0xff]  ;;  %v13459_v10 = vld [vmem:[#allocation2 + $0x150] sm:$0xff]  ;;  %v16865_v54 = vld [vmem:[#allocation45_spill] sm:$0xff] }
 0x49a   :  { %v15490_v42 = vpop.eup %13174  ;;  %13194 = vpow2.f32 %v10843_v28  ;;  %v10850_v58 = vmul.f32 -1.442695, %v6471_v23  ;;  %8782 = vmatpush1.bf16.msra.mxu0 %v12737_v59  ;;  %v7281_v49 = vmul.f32 %v7185_v1, %v16862_v9  ;;  %v7095_v5 = vmul.f32 %v13457_v43, %v15470_v22  ;;  %v12743_v59 = vld [vmem:[#allocation14 + $0x2e0] ss:$16 sps:$4 sm:$0xff]   ;;  %v12748_v23 = vld [vmem:[#allocation14 + $0x304] ss:$16 sps:$4 sm:$0xff]  }
 0x49b   :  { %v13177_v4 = vpop.eup %13176  ;;  %13196 = vpow2.f32 %v10844_v25  ;;  %8711 = vmatmul.mubr.bf16.gmra.mrb[88].mxu0 %v15487_v6  ;;  %v7287_v30 = vmul.f32 %v7191_v27, %v16863_v48  ;;  %v7184_v40 = vsub.f32 1.0, %v15458_v21  ;;  %8783 = vmatprep.subr.bf16.mxu0 %v12742_v61  ;;  %v7088_v56 = vmul.f32 %v13458_v2, %v15458_v21  ;;  %v13460_v31 = vld [vmem:[#allocation2 + $0x188] sm:$0xff]  ;;  %v13461_v9 = vld [vmem:[#allocation2 + $0x1b8] sm:$0xff]  ;;  %v13462_v2 = vld [vmem:[#allocation2 + $0x180] sm:$0xff] }
 0x49c   :  { %v13179_v15 = vpop.eup %13178  ;;  %13198 = vpow2.f32 %v10849_v29  ;;  %v7377_v19 = vadd.f32 %v7281_v49, %v7089_v24  ;;  %v7190_v11 = vsub.f32 1.0, %v15465_v57  ;;  %v7094_v38 = vmul.f32 %v13459_v10, %v15465_v57 }
 0x49d   :  { %v13181_v18 = vpop.eup %13180  ;;  %v6836_v37 = vadd.f32 1.0, %v13179_v15  ;;  %13200 = vpow2.f32 %v10850_v58  ;;  %v7383_v20 = vadd.f32 %v7287_v30, %v7095_v5  ;;  %v7280_v22 = vmul.f32 %v7184_v40, %v16864_v50  ;;  %v16867_v30 = vld [vmem:[#allocation47_spill] sm:$0xff] }
 0x49e   :  { %v13183_v28 = vpop.eup %13182  ;;  %v6837_v51 = vadd.f32 1.0, %v13181_v18  ;;  %v7286_v25 = vmul.f32 %v7190_v11, %v16865_v54  ;;  %8784 = vmatpush1.bf16.msra.mxu0 %v12740_v13  ;;  %v7197_v14 = vsub.f32 1.0, %v13173_v34  ;;  %v7203_v58 = vsub.f32 1.0, %v13177_v4  ;;  %v16866_v13 = vld [vmem:[#allocation46_spill] sm:$0xff]  ;;  %v12746_v15 = vld [vmem:[#allocation14 + $0x300] ss:$16 sps:$4 sm:$0xff]  }
 0x49f   :  { %v13185_v32 = vpop.eup %13184  ;;  %13202 = vrcp.f32 %v6836_v37  ;;  %v6842_v21 = vadd.f32 1.0, %v13183_v28  ;;  %v15503_v33 = vpack.c.bf16 %v7383_v20, %v7377_v19  ;;  %v7376_v61 = vadd.f32 %v7280_v22, %v7088_v56  ;;  %8785 = vmatprep.subr.bf16.mxu0 %v12745_v45  ;;  %v12751_v18 = vld [vmem:[#allocation14 + $0x324] ss:$16 sps:$4 sm:$0xff]  }
 0x4a0   :  { %v15505_v1 = vpop.eup %13186  ;;  %13204 = vrcp.f32 %v6837_v51  ;;  %v6843_v29 = vadd.f32 1.0, %v13185_v32  ;;  %v7382_v27 = vadd.f32 %v7286_v25, %v7094_v38  ;;  %v7101_v24 = vmul.f32 %v13460_v31, %v13173_v34  ;;  %v13463_v34 = vld [vmem:[#allocation2 + $0x1b0] sm:$0xff]  ;;  %v16868_v28 = vld [vmem:[#allocation54_spill] sm:$0xff]  ;;  %v16869_v25 = vld [vmem:[#allocation55_spill] sm:$0xff] }
 0x4a1   :  { %v13189_v57 = vpop.eup %13188  ;;  %13206 = vrcp.f32 %v6842_v21  ;;  %8720 = vmatprep.mubr.bf16.mxu0 %v15503_v33  ;;  %v7107_v49 = vmul.f32 %v13461_v9, %v13177_v4  ;;  %v7293_v43 = vmul.f32 %v7197_v14, %v16866_v13  ;;  %v7299_v40 = vmul.f32 %v7203_v58, %v16867_v30  ;;  %v16870_v32 = vld [vmem:[#allocation56_spill] sm:$0xff]  ;;  %v16871_v31 = vld [vmem:[#allocation57_spill] sm:$0xff] }
 0x4a2   :  { %v15509_v5 = vpop.eup %13190  ;;  %13208 = vrcp.f32 %v6843_v29  ;;  %v15511_v48 = vpack.c.bf16 %v7382_v27, %v7376_v61  ;;  %8786 = vmatpush1.bf16.msra.mxu0 %v12743_v59  ;;  %v7196_v45 = vsub.f32 1.0, %v15482_v12  ;;  %v7100_v56 = vmul.f32 %v13462_v2, %v15482_v12  ;;  %v13464_v59 = vld [vmem:[#allocation2 + $0x1e8] sm:$0xff]  ;;  %v13465_v27 = vld [vmem:[#allocation2 + $0x218] sm:$0xff]  ;;  %v12754_v30 = vld [vmem:[#allocation14 + $0x344] ss:$16 sps:$4 sm:$0xff]  }
 0x4a3   :  { %v13193_v19 = vpop.eup %13192  ;;  %v7106_v4 = vmul.f32 %v13463_v34, %v15490_v42  ;;  %v7202_v11 = vsub.f32 1.0, %v15490_v42  ;;  %8787 = vmatprep.subr.bf16.mxu0 %v12748_v23  ;;  %v7209_v37 = vsub.f32 1.0, %v13189_v57  ;;  %v7389_v50 = vadd.f32 %v7293_v43, %v7101_v24  ;;  %v12749_v29 = vld [vmem:[#allocation14 + $0x320] ss:$16 sps:$4 sm:$0xff]  }
 0x4a4   :  { %v13195_v20 = vpop.eup %13194  ;;  %8721 = vmatmul.mubr.bf16.gmra.mrb[92].mxu0 %v15511_v48  ;;  %v7395_v22 = vadd.f32 %v7299_v40, %v7107_v49  ;;  %v7292_v51 = vmul.f32 %v7196_v45, %v16868_v28  ;;  %v7215_v10 = vsub.f32 1.0, %v13193_v19  ;;  %v7113_v14 = vmul.f32 %v13464_v59, %v13189_v57 }
 0x4a5   :  { %v13197_v38 = vpop.eup %13196  ;;  %v6848_v54 = vadd.f32 1.0, %v13195_v20  ;;  %v7298_v12 = vmul.f32 %v7202_v11, %v16869_v25  ;;  %v7305_v21 = vmul.f32 %v7209_v37, %v16870_v32  ;;  %v7119_v58 = vmul.f32 %v13465_v27, %v13193_v19  ;;  %v12752_v37 = vld [vmem:[#allocation14 + $0x340] ss:$16 sps:$4 sm:$0xff]   ;;  %v12757_v25 = vld [vmem:[#allocation14 + $0x364] ss:$16 sps:$4 sm:$0xff]  }
 0x4a6   :  { %v13199_v42 = vpop.eup %13198  ;;  %v6849_v61 = vadd.f32 1.0, %v13197_v38  ;;  %v15522_v23 = vpack.c.bf16 %v7395_v22, %v7389_v50  ;;  %8788 = vmatpush1.bf16.msra.mxu0 %v12746_v15  ;;  %v7311_v24 = vmul.f32 %v7215_v10, %v16871_v31  ;;  %v7388_v13 = vadd.f32 %v7292_v51, %v7100_v56  ;;  %v13467_v22 = vld [vmem:[#allocation2 + $0x210] sm:$0xff]  ;;  %v16873_v38 = vld [vmem:[#allocation61_spill] sm:$0xff]  ;;  %v16874_v32 = vld [vmem:[#allocation66_spill] sm:$0xff] }
 0x4a7   :  { %v13201_v9 = vpop.eup %13200  ;;  %13210 = vrcp.f32 %v6848_v54  ;;  %v6854_v49 = vadd.f32 1.0, %v13199_v42  ;;  %v7394_v43 = vadd.f32 %v7298_v12, %v7106_v4  ;;  %8789 = vmatprep.subr.bf16.mxu0 %v12751_v18  ;;  %v7401_v40 = vadd.f32 %v7305_v21, %v7113_v14  ;;  %v13466_v4 = vld [vmem:[#allocation2 + $0x1e0] sm:$0xff]  ;;  %v16872_v51 = vld [vmem:[#allocation60_spill] sm:$0xff] }
 0x4a8   :  { %13212 = vrcp.f32 %v6849_v61  ;;  %v6855_v57 = vadd.f32 1.0, %v13201_v9  ;;  %8730 = vmatprep.mubr.bf16.mxu0 %v15522_v23  ;;  %v7407_v45 = vadd.f32 %v7311_v24, %v7119_v58  ;;  %v7208_v19 = vsub.f32 1.0, %v15505_v1  ;;  %v13468_v58 = vld [vmem:[#allocation2 + $0x240] sm:$0xff]  ;;  %v13469_v24 = vld [vmem:[#allocation2 + $0x270] sm:$0xff] }
 0x4a9   :  { %v13203_v2 = vpop.eup %13202  ;;  %13214 = vrcp.f32 %v6854_v49  ;;  %v15526_v15 = vpack.c.bf16 %v7394_v43, %v7388_v13  ;;  %v7214_v34 = vsub.f32 1.0, %v15509_v5  ;;  %v7112_v18 = vmul.f32 %v13466_v4, %v15505_v1  ;;  %v16876_v49 = vld [vmem:[#allocation67_spill] sm:$0xff]  ;;  %v12760_v4 = vld [vmem:[#allocation14 + $0x384] ss:$16 sps:$4 sm:$0xff]  }
 0x4aa   :  { %v13205_v11 = vpop.eup %13204  ;;  %13216 = vrcp.f32 %v6855_v57  ;;  %8790 = vmatpush1.bf16.msra.mxu0 %v12749_v29  ;;  %v15530_v56 = vpack.c.bf16 %v7407_v45, %v7401_v40  ;;  %v7220_v20 = vsub.f32 1.0, %v13203_v2  ;;  %v7118_v28 = vmul.f32 %v13467_v22, %v15509_v5  ;;  %v12755_v5 = vld [vmem:[#allocation14 + $0x360] ss:$16 sps:$4 sm:$0xff]   ;;  %v16875_v29 = vld [vmem:[#allocation62_spill] sm:$0xff] }
 0x4ab   :  { %v13207_v50 = vpop.eup %13206  ;;  %v7304_v10 = vmul.f32 %v7208_v19, %v16872_v51  ;;  %v7310_v54 = vmul.f32 %v7214_v34, %v16873_v38  ;;  %8791 = vmatprep.subr.bf16.mxu0 %v12754_v30  ;;  %v7221_v12 = vsub.f32 1.0, %v13205_v11  ;;  %v7124_v31 = vmul.f32 %v13468_v58, %v13203_v2  ;;  %v13470_v30 = vld [vmem:[#allocation2 + $0x248] sm:$0xff]  ;;  %v13471_v40 = vld [vmem:[#allocation2 + $0x278] sm:$0xff] }
 0x4ac   :  { %v13209_v59 = vpop.eup %13208  ;;  %8731 = vmatmul.mubr.bf16.gmra.mrb[96].mxu0 %v15526_v15  ;;  %v7226_v14 = vsub.f32 1.0, %v13207_v50  ;;  %v7316_v21 = vmul.f32 %v7220_v20, %v16874_v32  ;;  %v7130_v9 = vmul.f32 %v13469_v24, %v13207_v50  ;;  %v7125_v57 = vmul.f32 %v13470_v30, %v13205_v11  ;;  %v16877_v19 = vld [vmem:[#allocation63_spill] sm:$0xff]  ;;  %v12763_v11 = vld [vmem:[#allocation14 + $0x3a4] ss:$16 sps:$4 sm:$0xff]  }
 0x4ad   :  { %8740 = vmatprep.mubr.bf16.mxu0 %v15530_v56  ;;  %v7400_v1 = vadd.f32 %v7304_v10, %v7112_v18  ;;  %v7406_v42 = vadd.f32 %v7310_v54, %v7118_v28  ;;  %v7227_v61 = vsub.f32 1.0, %v13209_v59  ;;  %v7317_v27 = vmul.f32 %v7221_v12, %v16875_v29  ;;  %v12758_v51 = vld [vmem:[#allocation14 + $0x380] ss:$16 sps:$4 sm:$0xff]  }
 0x4ae   :  { %8792 = vmatpush1.bf16.msra.mxu0 %v12752_v37  ;;  %v7322_v13 = vmul.f32 %v7226_v14, %v16876_v49  ;;  %v7131_v45 = vmul.f32 %v13471_v40, %v13209_v59  ;;  %v7412_v18 = vadd.f32 %v7316_v21, %v7124_v31  ;;  %v16878_v14 = vld [vmem:[#allocation74_spill] sm:$0xff]  ;;  %v16880_v31 = vld [vmem:[#allocation75_spill] sm:$0xff] }
 0x4af   :  { %v15541_v43 = vpack.c.bf16 %v7406_v42, %v7400_v1  ;;  %8793 = vmatprep.subr.bf16.mxu0 %v12757_v25  ;;  %v7323_v34 = vmul.f32 %v7227_v61, %v16877_v19  ;;  %v7413_v22 = vadd.f32 %v7317_v27, %v7125_v57  ;;  %v16879_v1 = vld [vmem:[#allocation68_spill] sm:$0xff]  ;;  %v12761_v61 = vld [vmem:[#allocation14 + $0x3a0] ss:$16 sps:$4 sm:$0xff]  }
 0x4b0   :  { %v7418_v37 = vadd.f32 %v7322_v13, %v7130_v9  ;;  %v13473_v27 = vld [vmem:[#allocation2 + $0x2d0] sm:$0xff]  ;;  %v13474_v9 = vld [vmem:[#allocation2 + $0x2a8] sm:$0xff]  ;;  %v13475_v13 = vld [vmem:[#allocation2 + $0x2d8] sm:$0xff] }
 0x4b1   :  { %v13211_v20 = vpop.eup %13210  ;;  %v7419_v28 = vadd.f32 %v7323_v34, %v7131_v45  ;;  %v16881_v57 = vld [vmem:[#allocation69_spill] sm:$0xff]  ;;  %v12766_v45 = vld [vmem:[#allocation14 + $0x3c4] ss:$16 sps:$4 sm:$0xff]  }
 0x4b2   :  { %v13213_v2 = vpop.eup %13212  ;;  %8794 = vmatpush1.bf16.msra.mxu0 %v12755_v5  ;;  %v15544_v50 = vpack.c.bf16 %v7418_v37, %v7412_v18  ;;  %v7232_v10 = vsub.f32 1.0, %v13211_v20  ;;  %v13472_v5 = vld [vmem:[#allocation2 + $0x2a0] sm:$0xff] }
 0x4b3   :  { %v13215_v38 = vpop.eup %13214  ;;  %v15546_v54 = vpack.c.bf16 %v7419_v28, %v7413_v22  ;;  %8795 = vmatprep.subr.bf16.mxu0 %v12760_v4  ;;  %v7233_v25 = vsub.f32 1.0, %v13213_v2  ;;  %v7136_v29 = vmul.f32 %v13472_v5, %v13211_v20  ;;  %v7137_v49 = vmul.f32 %v13474_v9, %v13213_v2  ;;  %v12764_v20 = vld [vmem:[#allocation14 + $0x3c0] ss:$16 sps:$4 sm:$0xff]   ;;  %v12769_v28 = vld [vmem:[#allocation14 + $0x3e4] ss:$16 sps:$4 sm:$0xff]  }
 0x4b4   :  { %v13217_v12 = vpop.eup %13216  ;;  %8741 = vmatmul.mubr.bf16.gmra.mrb[100].mxu0 %v15541_v43  ;;  %v7238_v59 = vsub.f32 1.0, %v13215_v38  ;;  %v7328_v32 = vmul.f32 %v7232_v10, %v16878_v14  ;;  %v7142_v58 = vmul.f32 %v13473_v27, %v13215_v38  ;;  %v12767_v2 = vld [vmem:[#allocation14 + $0x3e0] ss:$16 sps:$4 sm:$0xff]   ;;  %v12775_v38 = vld [vmem:[#allocation14 + $0x424] ss:$16 sps:$4 sm:$0xff]  }
 0x4b5   :  { %8750 = vmatprep.mubr.bf16.mxu0 %v15546_v54  ;;  %v7239_v21 = vsub.f32 1.0, %v13217_v12  ;;  %v7329_v42 = vmul.f32 %v7233_v25, %v16879_v1  ;;  %v7143_v30 = vmul.f32 %v13475_v13, %v13217_v12  ;;  %v12770_v10 = vld [vmem:[#allocation14 + $0x400] ss:$16 sps:$4 sm:$0xff]   ;;  %v12787_v5 = vld [vmem:[#allocation14 + $0x4a4] ss:$16 sps:$4 sm:$0xff]  }
 0x4b6   :  { %8796 = vmatpush1.bf16.msra.mxu0 %v12758_v51  ;;  %v7334_v24 = vmul.f32 %v7238_v59, %v16880_v31  ;;  %v7424_v19 = vadd.f32 %v7328_v32, %v7136_v29  ;;  %v12772_v51 = vld [vmem:[#allocation14 + $0x404] ss:$16 sps:$4 sm:$0xff]   ;;  %v16883_v25 = vld [vmem:[#allocation85_spill] sm:$0xff] }
 0x4b7   :  { %8797 = vmatprep.subr.bf16.mxu0 %v12763_v11  ;;  %v7335_v40 = vmul.f32 %v7239_v21, %v16881_v57  ;;  %v7425_v4 = vadd.f32 %v7329_v42, %v7137_v49  ;;  %v16882_v11 = vld [vmem:[#allocation84_spill] sm:$0xff]  ;;  %v12773_v12 = vld [vmem:[#allocation14 + $0x420] ss:$16 sps:$4 sm:$0xff]   ;;  %v16884_v21 = vld [vmem:[#allocation90_spill] sm:$0xff] }
 0x4b8   :  { %v7430_v34 = vadd.f32 %v7334_v24, %v7142_v58  ;;  %v12778_v59 = vld [vmem:[#allocation14 + $0x444] ss:$16 sps:$4 sm:$0xff]   ;;  %v12776_v14 = vld [vmem:[#allocation14 + $0x440] ss:$16 sps:$4 sm:$0xff]  }
 0x4b9   :  { %v7431_v18 = vadd.f32 %v7335_v40, %v7143_v30  ;;  %v12781_v32 = vld [vmem:[#allocation14 + $0x464] ss:$16 sps:$4 sm:$0xff]   ;;  %v12779_v1 = vld [vmem:[#allocation14 + $0x460] ss:$16 sps:$4 sm:$0xff]  }
 0x4ba   :  { %8798 = vmatpush1.bf16.msra.mxu0 %v12761_v61  ;;  %v15554_v37 = vpack.c.bf16 %v7430_v34, %v7424_v19  ;;  %v12784_v42 = vld [vmem:[#allocation14 + $0x484] ss:$16 sps:$4 sm:$0xff]   ;;  %v12782_v61 = vld [vmem:[#allocation14 + $0x480] ss:$16 sps:$4 sm:$0xff]  }
 0x4bb   :  { %v15556_v22 = vpack.c.bf16 %v7431_v18, %v7425_v4  ;;  %8799 = vmatprep.subr.bf16.mxu0 %v12766_v45  ;;  %v12785_v29 = vld [vmem:[#allocation14 + $0x4a0] ss:$16 sps:$4 sm:$0xff]   ;;  %v12790_v27 = vld [vmem:[#allocation14 + $0x4c4] ss:$16 sps:$4 sm:$0xff]  }
 0x4bc   :  { %8751 = vmatmul.mubr.bf16.gmra.mrb[104].mxu0 %v15544_v50  ;;  %v12788_v58 = vld [vmem:[#allocation14 + $0x4c0] ss:$16 sps:$4 sm:$0xff]   ;;  %v12793_v31 = vld [vmem:[#allocation14 + $0x4e4] ss:$16 sps:$4 sm:$0xff]  }
 0x4bd   :  { %8760 = vmatprep.mubr.bf16.mxu0 %v15556_v22  ;;  %v12791_v24 = vld [vmem:[#allocation14 + $0x4e0] ss:$16 sps:$4 sm:$0xff]   ;;  %v12796_v9 = vld [vmem:[#allocation14 + $0x504] ss:$16 sps:$4 sm:$0xff]  }
 0x4be   :  { %8800 = vmatpush1.bf16.msra.mxu0 %v12764_v20  ;;  %v12794_v49 = vld [vmem:[#allocation14 + $0x500] ss:$16 sps:$4 sm:$0xff]   ;;  %v12799_v13 = vld [vmem:[#allocation14 + $0x524] ss:$16 sps:$4 sm:$0xff]  }
 0x4bf   :  { %8801 = vmatprep.subr.bf16.mxu0 %v12769_v28  ;;  %v12797_v30 = vld [vmem:[#allocation14 + $0x520] ss:$16 sps:$4 sm:$0xff]   ;;  %v12802_v57 = vld [vmem:[#allocation14 + $0x544] ss:$16 sps:$4 sm:$0xff]  }
 0x4c0   :  { %v12800_v40 = vld [vmem:[#allocation14 + $0x540] ss:$16 sps:$4 sm:$0xff]   ;;  %v12805_v45 = vld [vmem:[#allocation14 + $0x564] ss:$16 sps:$4 sm:$0xff]  }
 0x4c1   :  { %v12803_v19 = vld [vmem:[#allocation14 + $0x560] ss:$16 sps:$4 sm:$0xff]   ;;  %v12808_v34 = vld [vmem:[#allocation14 + $0x584] ss:$16 sps:$4 sm:$0xff]  }
 0x4c2   :  { %8802 = vmatpush1.bf16.msra.mxu0 %v12767_v2  ;;  %v12806_v4 = vld [vmem:[#allocation14 + $0x580] ss:$16 sps:$4 sm:$0xff]   ;;  %v12811_v18 = vld [vmem:[#allocation14 + $0x5a4] ss:$16 sps:$4 sm:$0xff]  }
 0x4c3   :  { %8884 = vmatprep.subr.bf16.mxu0 %v12772_v51  ;;  %v12809_v20 = vld [vmem:[#allocation14 + $0x5a0] ss:$16 sps:$4 sm:$0xff]   ;;  %v12814_v28 = vld [vmem:[#allocation14 + $0x5c4] ss:$16 sps:$4 sm:$0xff]  }
 0x4c4   :  { %8761 = vmatmul.mubr.bf16.gmra.mrb[108].mxu0 %v15554_v37  ;;  %v12812_v2 = vld [vmem:[#allocation14 + $0x5c0] ss:$16 sps:$4 sm:$0xff]   ;;  %v12817_v51 = vld [vmem:[#allocation14 + $0x5e4] ss:$16 sps:$4 sm:$0xff]  }
 0x4c5   :  { %8803 = vmatprep.mubr.bf16.mxu0 %v15203_v55 }
 0x4cc   :  { %8804 = vmatmul.mubr.bf16.vlgmr.msra.gmra.mrb[80].mxu0 %v16882_v11 }
 0x4cd   :  { %8813 = vmatprep.mubr.bf16.mxu0 %v16883_v25  ;;  %8885 = vmatpush1.bf16.msra.mxu0 %v12770_v10  ;;  %v12815_v10 = vld [vmem:[#allocation14 + $0x5e0] ss:$16 sps:$4 sm:$0xff]  }
 0x4ce   :  { %8886 = vmatprep.subr.bf16.mxu0 %v12775_v38  ;;  %v12820_v38 = vld [vmem:[#allocation14 + $0xc] ss:$16 sps:$4 sm:$0xff]  }
 0x4d1   :  { %8887 = vmatpush1.bf16.msra.mxu0 %v12773_v12  ;;  %v13476_v12 = vld [vmem:[#allocation13] sm:$0x3f] }
 0x4d2   :  { %8888 = vmatprep.subr.bf16.mxu0 %v12778_v59  ;;  %v16885_v59 = vld [vmem:[#allocation24_spill] sm:$0xff] }
 0x4d4   :  { %8814 = vmatmul.mubr.bf16.gmra.mrb[84].mxu0 %v16884_v21 }
 0x4d5   :  { %8823 = vmatprep.mubr.bf16.mxu0 %v15276_v60  ;;  %8889 = vmatpush1.bf16.msra.mxu0 %v12776_v14  ;;  %v16886_v14 = vsub.s32 4, %v16885_v59 }
 0x4d6   :  { %8890 = vmatprep.subr.bf16.mxu0 %v12781_v32 }
 0x4d7   :  { %v15579_v32 = vrot.slane %v13476_v12, %v16886_v14 }
 0x4d9   :  { %8891 = vmatpush1.bf16.msra.mxu0 %v12779_v1  ;;  %v16887_v1 = vsub.s32 5, %v16885_v59 }
 0x4da   :  { %8892 = vmatprep.subr.bf16.mxu0 %v12784_v42 }
 0x4db   :  { %v15583_v42 = vrot.slane %v13476_v12, %v16887_v1 }
 0x4dc   :  { %8824 = vmatmul.mubr.bf16.gmra.mrb[88].mxu0 %v15281_v17 }
 0x4dd   :  { %8833 = vmatprep.mubr.bf16.mxu0 %v15301_v41  ;;  %8893 = vmatpush1.bf16.msra.mxu0 %v12782_v61 }
 0x4de   :  { %8894 = vmatprep.subr.bf16.mxu0 %v12787_v5 }
 0x4e1   :  { %8895 = vmatpush1.bf16.msra.mxu0 %v12785_v29 }
 0x4e2   :  { %8896 = vmatprep.subr.bf16.mxu0 %v12790_v27 }
 0x4e4   :  { %8834 = vmatmul.mubr.bf16.gmra.mrb[92].mxu0 %v15308_v16 }
 0x4e5   :  { %8843 = vmatprep.mubr.bf16.mxu0 %v15321_v44  ;;  %8897 = vmatpush1.bf16.msra.mxu0 %v12788_v58 }
 0x4e6   :  { %8898 = vmatprep.subr.bf16.mxu0 %v12793_v31 }
 0x4e9   :  { %8899 = vmatpush1.bf16.msra.mxu0 %v12791_v24 }
 0x4ea   :  { %8900 = vmatprep.subr.bf16.mxu0 %v12796_v9 }
 0x4ec   :  { %8844 = vmatmul.mubr.bf16.gmra.mrb[96].mxu0 %v15323_v8 }
 0x4ed   :  { %8853 = vmatprep.mubr.bf16.mxu0 %v15325_v7  ;;  %8901 = vmatpush1.bf16.msra.mxu0 %v12794_v49 }
 0x4ee   :  { %8902 = vmatprep.subr.bf16.mxu0 %v12799_v13 }
 0x4f1   :  { %8903 = vmatpush1.bf16.msra.mxu0 %v12797_v30 }
 0x4f2   :  { %8904 = vmatprep.subr.bf16.mxu0 %v12802_v57 }
 0x4f4   :  { %8854 = vmatmul.mubr.bf16.gmra.mrb[100].mxu0 %v15339_v35 }
 0x4f5   :  { %8863 = vmatprep.mubr.bf16.mxu0 %v15343_v53  ;;  %8905 = vmatpush1.bf16.msra.mxu0 %v12800_v40 }
 0x4f6   :  { %8906 = vmatprep.subr.bf16.mxu0 %v12805_v45 }
 0x4f9   :  { %8907 = vmatpush1.bf16.msra.mxu0 %v12803_v19 }
 0x4fa   :  { %8908 = vmatprep.subr.bf16.mxu0 %v12808_v34 }
 0x4fc   :  { %8864 = vmatmul.mubr.bf16.gmra.mrb[104].mxu0 %v15341_v26 }
 0x4fd   :  { %8873 = vmatprep.mubr.bf16.mxu0 %v15353_v47  ;;  %8909 = vmatpush1.bf16.msra.mxu0 %v12806_v4 }
 0x4fe   :  { %8910 = vmatprep.subr.bf16.mxu0 %v12811_v18 }
 0x501   :  { %8911 = vmatpush1.bf16.msra.mxu0 %v12809_v20 }
 0x502   :  { %8912 = vmatprep.subr.bf16.mxu0 %v12814_v28 }
 0x504   :  { %8874 = vmatmul.mubr.bf16.gmra.mrb[108].mxu0 %v15351_v46 }
 0x505   :  { %8913 = vmatpush1.bf16.msra.mxu0 %v12812_v2 }
 0x506   :  { %8914 = vmatprep.subr.bf16.mxu0 %v12817_v51 }
 0x509   :  { %8915 = vmatpush1.bf16.msra.mxu0 %v12815_v10 }
 0x50a   :  { %8997 = vmatprep.subr.bf16.mxu0 %v12820_v38 }
 0x51a   :  { %v6269_v61 = vpop.f32.mrb[80].mxu1 }
 0x51b   :  { %v6384_v5 = vadd.f32 %v15579_v32, %v6269_v61  ;;  %v6271_v29 = vpop.f32.mrb[81].mxu1 }
 0x51c   :  { %v6385_v27 = vadd.f32 %v15583_v42, %v6271_v29  ;;  %v6273_v58 = vpop.f32.mrb[82].mxu1 }
 0x51d   :  { %v10763_v31 = vmul.f32 -1.442695, %v6384_v5  ;;  %v6390_v24 = vadd.f32 %v15579_v32, %v6273_v58  ;;  %v6275_v9 = vpop.f32.mrb[83].mxu1 }
 0x51e   :  { %v10764_v49 = vmul.f32 -1.442695, %v6385_v27  ;;  %v6391_v13 = vadd.f32 %v15583_v42, %v6275_v9 }
 0x51f   :  { %13218 = vpow2.f32 %v10763_v31  ;;  %v10769_v30 = vmul.f32 -1.442695, %v6390_v24 }
 0x520   :  { %13220 = vpow2.f32 %v10764_v49  ;;  %v10770_v57 = vmul.f32 -1.442695, %v6391_v13 }
 0x521   :  { %13222 = vpow2.f32 %v10769_v30 }
 0x522   :  { %13224 = vpow2.f32 %v10770_v57  ;;  %v6279_v40 = vpop.f32.mrb[84].mxu1 }
 0x523   :  { %v6396_v45 = vadd.f32 %v15579_v32, %v6279_v40  ;;  %v6281_v19 = vpop.f32.mrb[85].mxu1 }
 0x524   :  { %v6397_v34 = vadd.f32 %v15583_v42, %v6281_v19  ;;  %v6283_v4 = vpop.f32.mrb[86].mxu1 }
 0x525   :  { %v10775_v18 = vmul.f32 -1.442695, %v6396_v45  ;;  %v6402_v20 = vadd.f32 %v15579_v32, %v6283_v4  ;;  %v6285_v28 = vpop.f32.mrb[87].mxu1 }
 0x526   :  { %v10776_v2 = vmul.f32 -1.442695, %v6397_v34  ;;  %v6403_v51 = vadd.f32 %v15583_v42, %v6285_v28 }
 0x527   :  { %13226 = vpow2.f32 %v10775_v18  ;;  %v10781_v10 = vmul.f32 -1.442695, %v6402_v20 }
 0x528   :  { %13228 = vpow2.f32 %v10776_v2  ;;  %v10782_v38 = vmul.f32 -1.442695, %v6403_v51 }
 0x529   :  { %v13219_v12 = vpop.eup %13218  ;;  %13230 = vpow2.f32 %v10781_v10 }
 0x52a   :  { %v13221_v59 = vpop.eup %13220  ;;  %v6768_v14 = vadd.f32 1.0, %v13219_v12  ;;  %13232 = vpow2.f32 %v10782_v38  ;;  %v6289_v1 = vpop.f32.mrb[88].mxu1 }
 0x52b   :  { %v13223_v61 = vpop.eup %13222  ;;  %v6769_v5 = vadd.f32 1.0, %v13221_v59  ;;  %v6408_v29 = vadd.f32 %v15579_v32, %v6289_v1  ;;  %v6291_v27 = vpop.f32.mrb[89].mxu1 }
 0x52c   :  { %v13225_v58 = vpop.eup %13224  ;;  %13234 = vrcp.f32 %v6768_v14  ;;  %v6774_v31 = vadd.f32 1.0, %v13223_v61  ;;  %v6409_v24 = vadd.f32 %v15583_v42, %v6291_v27  ;;  %v6293_v9 = vpop.f32.mrb[90].mxu1 }
 0x52d   :  { %13236 = vrcp.f32 %v6769_v5  ;;  %v6775_v49 = vadd.f32 1.0, %v13225_v58  ;;  %v10787_v13 = vmul.f32 -1.442695, %v6408_v29  ;;  %v6414_v30 = vadd.f32 %v15579_v32, %v6293_v9  ;;  %v6295_v57 = vpop.f32.mrb[91].mxu1 }
 0x52e   :  { %13238 = vrcp.f32 %v6774_v31  ;;  %v10788_v40 = vmul.f32 -1.442695, %v6409_v24  ;;  %v6415_v45 = vadd.f32 %v15583_v42, %v6295_v57  ;;  %v13477_v57 = vld [vmem:[#allocation2 + $0x20] sm:$0xff] }
 0x52f   :  { %13240 = vrcp.f32 %v6775_v49  ;;  %v10793_v19 = vmul.f32 -1.442695, %v6414_v30 }
 0x530   :  { %13242 = vpow2.f32 %v10787_v13  ;;  %v10794_v34 = vmul.f32 -1.442695, %v6415_v45 }
 0x531   :  { %v13227_v4 = vpop.eup %13226  ;;  %13244 = vpow2.f32 %v10788_v40 }
 0x532   :  { %v13229_v18 = vpop.eup %13228  ;;  %v6780_v20 = vadd.f32 1.0, %v13227_v4  ;;  %13246 = vpow2.f32 %v10793_v19  ;;  %v6299_v28 = vpop.f32.mrb[92].mxu1  ;;  %v13478_v4 = vld [vmem:[#allocation2 + $0x50] sm:$0xff] }
 0x533   :  { %v13231_v2 = vpop.eup %13230  ;;  %v6781_v51 = vadd.f32 1.0, %v13229_v18  ;;  %13248 = vpow2.f32 %v10794_v34  ;;  %v6420_v10 = vadd.f32 %v15579_v32, %v6299_v28  ;;  %v6301_v38 = vpop.f32.mrb[93].mxu1  ;;  %v13479_v28 = vld [vmem:[#allocation2 + $0x28] sm:$0xff] }
 0x534   :  { %v13233_v12 = vpop.eup %13232  ;;  %13250 = vrcp.f32 %v6780_v20  ;;  %v6786_v59 = vadd.f32 1.0, %v13231_v2  ;;  %v6421_v14 = vadd.f32 %v15583_v42, %v6301_v38  ;;  %v6303_v1 = vpop.f32.mrb[94].mxu1  ;;  %v13480_v38 = vld [vmem:[#allocation2 + $0x58] sm:$0xff] }
 0x535   :  { %13252 = vrcp.f32 %v6781_v51  ;;  %v6787_v61 = vadd.f32 1.0, %v13233_v12  ;;  %v10799_v5 = vmul.f32 -1.442695, %v6420_v10  ;;  %v6426_v29 = vadd.f32 %v15579_v32, %v6303_v1  ;;  %v6305_v27 = vpop.f32.mrb[95].mxu1 }
 0x536   :  { %v13235_v58 = vpop.eup %13234  ;;  %13254 = vrcp.f32 %v6786_v59  ;;  %v10800_v31 = vmul.f32 -1.442695, %v6421_v14  ;;  %v6427_v24 = vadd.f32 %v15583_v42, %v6305_v27  ;;  %v16888_v14 = vld [vmem:[#allocation119_spill] sm:$0xff] }
 0x537   :  { %v13237_v9 = vpop.eup %13236  ;;  %v7152_v49 = vsub.f32 1.0, %v13235_v58  ;;  %13256 = vrcp.f32 %v6787_v61  ;;  %v10805_v13 = vmul.f32 -1.442695, %v6426_v29  ;;  %v7056_v40 = vmul.f32 %v13477_v57, %v13235_v58  ;;  %v16889_v58 = vld [vmem:[#allocation115_spill] sm:$0xff] }
 0x538   :  { %v13239_v30 = vpop.eup %13238  ;;  %13258 = vpow2.f32 %v10799_v5  ;;  %v10806_v45 = vmul.f32 -1.442695, %v6427_v24  ;;  %v7153_v19 = vsub.f32 1.0, %v13237_v9  ;;  %v7057_v2 = vmul.f32 %v13479_v28, %v13237_v9  ;;  %v16891_v28 = vld [vmem:[#allocation120_spill] sm:$0xff] }
 0x539   :  { %v13241_v34 = vpop.eup %13240  ;;  %v7062_v18 = vmul.f32 %v13478_v4, %v13239_v30  ;;  %v7158_v20 = vsub.f32 1.0, %v13239_v30  ;;  %13260 = vpow2.f32 %v10800_v31  ;;  %v7248_v1 = vmul.f32 %v7152_v49, %v16888_v14 }
 0x53a   :  { %v13243_v51 = vpop.eup %13242  ;;  %13262 = vpow2.f32 %v10805_v13  ;;  %v6309_v10 = vpop.f32.mrb[96].mxu1  ;;  %v7063_v12 = vmul.f32 %v13480_v38, %v13241_v34  ;;  %v7159_v59 = vsub.f32 1.0, %v13241_v34  ;;  %v7249_v24 = vmul.f32 %v7153_v19, %v16889_v58  ;;  %v16890_v13 = vld [vmem:[#allocation118_spill] sm:$0xff] }
 0x53b   :  { %v13245_v61 = vpop.eup %13244  ;;  %v6792_v29 = vadd.f32 1.0, %v13243_v51  ;;  %13264 = vpow2.f32 %v10806_v45  ;;  %v6432_v5 = vadd.f32 %v15579_v32, %v6309_v10  ;;  %v6311_v27 = vpop.f32.mrb[97].mxu1  ;;  %v7254_v38 = vmul.f32 %v7158_v20, %v16891_v28 }
 0x53c   :  { %v13247_v30 = vpop.eup %13246  ;;  %v6793_v31 = vadd.f32 1.0, %v13245_v61  ;;  %v6433_v9 = vadd.f32 %v15583_v42, %v6311_v27  ;;  %v6313_v57 = vpop.f32.mrb[98].mxu1  ;;  %v7255_v4 = vmul.f32 %v7159_v59, %v16890_v13  ;;  %v7345_v59 = vadd.f32 %v7249_v24, %v7057_v2  ;;  %v12823_v2 = vld [vmem:[#allocation14 + $0x2c] ss:$16 sps:$4 sm:$0xff]  }
 0x53d   :  { %v13249_v34 = vpop.eup %13248  ;;  %13266 = vrcp.f32 %v6792_v29  ;;  %v6798_v49 = vadd.f32 1.0, %v13247_v30  ;;  %v10811_v14 = vmul.f32 -1.442695, %v6432_v5  ;;  %v6438_v45 = vadd.f32 %v15579_v32, %v6313_v57  ;;  %v6315_v51 = vpop.f32.mrb[99].mxu1 }
 0x53e   :  { %v15608_v10 = vpop.eup %13250  ;;  %13268 = vrcp.f32 %v6793_v31  ;;  %v6799_v19 = vadd.f32 1.0, %v13249_v34  ;;  %v10812_v58 = vmul.f32 -1.442695, %v6433_v9  ;;  %v6439_v61 = vadd.f32 %v15583_v42, %v6315_v51  ;;  %v12818_v31 = vld [vmem:[#allocation14 + $0x8] ss:$16 sps:$4 sm:$0xff]   ;;  %v13481_v34 = vld [vmem:[#allocation2 + $0x88] sm:$0xff] }
 0x53f   :  { %v13253_v27 = vpop.eup %13252  ;;  %13270 = vrcp.f32 %v6798_v49  ;;  %v10817_v36 = vmul.f32 -1.442695, %v6438_v45  ;;  %v7351_v13 = vadd.f32 %v7255_v4, %v7063_v12  ;;  %v7344_v5 = vadd.f32 %v7248_v1, %v7056_v40  ;;  %v13482_v12 = vld [vmem:[#allocation2 + $0xb8] sm:$0xff] }
 0x540   :  { %v15611_v20 = vpop.eup %13254  ;;  %13272 = vrcp.f32 %v6799_v19  ;;  %v10818_v29 = vmul.f32 -1.442695, %v6439_v61  ;;  %v7350_v30 = vadd.f32 %v7254_v38, %v7062_v18  ;;  %v7069_v9 = vmul.f32 %v13481_v34, %v13253_v27  ;;  %v16894_v38 = vld [vmem:[#allocation121_spill] sm:$0xff] }
 0x541   :  { %v13257_v57 = vpop.eup %13256  ;;  %13274 = vpow2.f32 %v10811_v14  ;;  %v15613_v28 = vpack.c.bf16 %v7351_v13, %v7345_v59  ;;  %v7165_v0 = vsub.f32 1.0, %v13253_v27  ;;  %v16895_v13 = vld [vmem:[#allocation122_spill] sm:$0xff] }
 0x542   :  { %v13259_v51 = vpop.eup %13258  ;;  %13276 = vpow2.f32 %v10812_v58  ;;  %v6319_v49 = vpop.f32.mrb[100].mxu1  ;;  %v15615_v45 = vpack.c.bf16 %v7350_v30, %v7344_v5  ;;  %v7075_v24 = vmul.f32 %v13482_v12, %v13257_v57  ;;  %v7171_v4 = vsub.f32 1.0, %v13257_v57 }
 0x543   :  { %16892 = vst [vmem:[#allocation76_spill] sm:$0xff] %v15613_v28  ;;  %v13261_v19 = vpop.eup %13260  ;;  %v6804_v40 = vadd.f32 1.0, %v13259_v51  ;;  %13278 = vpow2.f32 %v10817_v36  ;;  %v6444_v18 = vadd.f32 %v15579_v32, %v6319_v49  ;;  %8916 = vmatprep.mubr.bf16.mxu0 %v15613_v28  ;;  %v6321_v1 = vpop.f32.mrb[101].mxu1  ;;  %v7261_v14 = vmul.f32 %v7165_v0, %v16894_v38  ;;  %v12821_v49 = vld [vmem:[#allocation14 + $0x28] ss:$16 sps:$4 sm:$0xff]  }
 0x544   :  { %16893 = vst [vmem:[#allocation77_spill] sm:$0xff] %v15615_v45  ;;  %v13263_v61 = vpop.eup %13262  ;;  %v6805_v27 = vadd.f32 1.0, %v13261_v19  ;;  %13280 = vpow2.f32 %v10818_v29  ;;  %v6445_v58 = vadd.f32 %v15583_v42, %v6321_v1  ;;  %8917 = vmatmul.mubr.bf16.vlgmr.msra.gmra.mrb[80].mxu0 %v15615_v45  ;;  %v6323_v59 = vpop.f32.mrb[102].mxu1  ;;  %v7267_v5 = vmul.f32 %v7171_v4, %v16895_v13  ;;  %v12826_v19 = vld [vmem:[#allocation14 + $0x4c] ss:$16 sps:$4 sm:$0xff]  }
 0x545   :  { %v13265_v30 = vpop.eup %13264  ;;  %13282 = vrcp.f32 %v6804_v40  ;;  %v6810_v36 = vadd.f32 1.0, %v13263_v61  ;;  %v10823_v57 = vmul.f32 -1.442695, %v6444_v18  ;;  %8998 = vmatpush1.bf16.msra.mxu0 %v12818_v31  ;;  %v6450_v34 = vadd.f32 %v15579_v32, %v6323_v59  ;;  %v6325_v51 = vpop.f32.mrb[103].mxu1  ;;  %v13483_v18 = vld [vmem:[#allocation2 + $0x80] sm:$0xff] }
 0x546   :  { %13284 = vrcp.f32 %v6805_v27  ;;  %v6811_v0 = vadd.f32 1.0, %v13265_v30  ;;  %v10824_v12 = vmul.f32 -1.442695, %v6445_v58  ;;  %v6451_v29 = vadd.f32 %v15583_v42, %v6325_v51  ;;  %8999 = vmatprep.subr.bf16.mxu0 %v12823_v2  ;;  %v12824_v13 = vld [vmem:[#allocation14 + $0x48] ss:$16 sps:$4 sm:$0xff]  }
 0x547   :  { %v15625_v1 = vpop.eup %13266  ;;  %13286 = vrcp.f32 %v6810_v36  ;;  %v10829_v4 = vmul.f32 -1.442695, %v6450_v34  ;;  %v7357_v38 = vadd.f32 %v7261_v14, %v7069_v9  ;;  %v7363_v40 = vadd.f32 %v7267_v5, %v7075_v24  ;;  %v13484_v30 = vld [vmem:[#allocation2 + $0xb0] sm:$0xff]  ;;  %v16897_v36 = vld [vmem:[#allocation123_spill] sm:$0xff] }
 0x548   :  { %v15627_v61 = vpop.eup %13268  ;;  %13288 = vrcp.f32 %v6811_v0  ;;  %v10830_v31 = vmul.f32 -1.442695, %v6451_v29  ;;  %v7068_v59 = vmul.f32 %v13483_v18, %v15608_v10  ;;  %v7164_v27 = vsub.f32 1.0, %v15608_v10  ;;  %v12829_v51 = vld [vmem:[#allocation14 + $0x6c] ss:$16 sps:$4 sm:$0xff]  }
 0x549   :  { %v15631_v58 = vpop.eup %13270  ;;  %13290 = vpow2.f32 %v10823_v57  ;;  %9000 = vmatpush1.bf16.msra.mxu0 %v12821_v49  ;;  %v15633_v2 = vpack.c.bf16 %v7363_v40, %v7357_v38  ;;  %v7074_v9 = vmul.f32 %v13484_v30, %v15611_v20  ;;  %v7170_v24 = vsub.f32 1.0, %v15611_v20  ;;  %v13485_v10 = vld [vmem:[#allocation2 + $0xe8] sm:$0xff]  ;;  %v16898_v20 = vld [vmem:[#allocation124_spill] sm:$0xff] }
 0x54a   :  { %v13273_v14 = vpop.eup %13272  ;;  %13292 = vpow2.f32 %v10824_v12  ;;  %v6329_v5 = vpop.f32.mrb[104].mxu1  ;;  %9001 = vmatprep.subr.bf16.mxu0 %v12826_v19  ;;  %v7260_v34 = vmul.f32 %v7164_v27, %v16897_v36  ;;  %v7081_v0 = vmul.f32 %v13485_v10, %v15627_v61  ;;  %v7177_v57 = vsub.f32 1.0, %v15627_v61  ;;  %v13486_v12 = vld [vmem:[#allocation2 + $0xe0] sm:$0xff]  ;;  %v13487_v61 = vld [vmem:[#allocation2 + $0x118] sm:$0xff] }
 0x54b   :  { %16896 = vst [vmem:[#allocation81_spill] sm:$0xff] %v15633_v2  ;;  %v13275_v49 = vpop.eup %13274  ;;  %13294 = vpow2.f32 %v10829_v4  ;;  %v6456_v29 = vadd.f32 %v15579_v32, %v6329_v5  ;;  %8926 = vmatprep.mubr.bf16.mxu0 %v15633_v2  ;;  %v6331_v38 = vpop.f32.mrb[105].mxu1  ;;  %v7266_v40 = vmul.f32 %v7170_v24, %v16898_v20  ;;  %v15644_v19 = vmul.f32 %v13486_v12, %v15625_v1 }
 0x54c   :  { %v13277_v18 = vpop.eup %13276  ;;  %v6816_v27 = vadd.f32 1.0, %v13275_v49  ;;  %13296 = vpow2.f32 %v10830_v31  ;;  %v6457_v30 = vadd.f32 %v15583_v42, %v6331_v38  ;;  %v6333_v36 = vpop.f32.mrb[106].mxu1  ;;  %v7087_v10 = vmul.f32 %v13487_v61, %v13273_v14  ;;  %v12827_v31 = vld [vmem:[#allocation14 + $0x68] ss:$16 sps:$4 sm:$0xff]  }
 0x54d   :  { %v13279_v4 = vpop.eup %13278  ;;  %v6817_v45 = vadd.f32 1.0, %v13277_v18  ;;  %v7356_v5 = vadd.f32 %v7260_v34, %v7068_v59  ;;  %v7362_v28 = vadd.f32 %v7266_v40, %v7074_v9  ;;  %9002 = vmatpush1.bf16.msra.mxu0 %v12824_v13  ;;  %v6462_v2 = vadd.f32 %v15579_v32, %v6333_v36  ;;  %v6335_v24 = vpop.f32.mrb[107].mxu1  ;;  %v12832_v59 = vld [vmem:[#allocation14 + $0x8c] ss:$16 sps:$4 sm:$0xff]  }
 0x54e   :  { %v13281_v20 = vpop.eup %13280  ;;  %13298 = vrcp.f32 %v6816_v27  ;;  %v6822_v12 = vadd.f32 1.0, %v13279_v4  ;;  %v10835_v46 = vmul.f32 -1.442695, %v6456_v29  ;;  %v6463_v49 = vadd.f32 %v15583_v42, %v6335_v24  ;;  %9003 = vmatprep.subr.bf16.mxu0 %v12829_v51  ;;  %v16900_v40 = vld [vmem:[#allocation125_spill] sm:$0xff]  ;;  %v16901_v4 = vld [vmem:[#allocation126_spill] sm:$0xff] }
 0x54f   :  { %v15649_v38 = vpop.eup %13282  ;;  %13300 = vrcp.f32 %v6817_v45  ;;  %v6823_v61 = vadd.f32 1.0, %v13281_v20  ;;  %v10836_v47 = vmul.f32 -1.442695, %v6457_v30  ;;  %v15651_v18 = vpack.c.bf16 %v7362_v28, %v7356_v5  ;;  %v12830_v5 = vld [vmem:[#allocation14 + $0x88] ss:$16 sps:$4 sm:$0xff]  }
 0x550   :  { %v15653_v13 = vpop.eup %13284  ;;  %13302 = vrcp.f32 %v6822_v12  ;;  %v10841_v9 = vmul.f32 -1.442695, %v6462_v2  ;;  %v7183_v34 = vsub.f32 1.0, %v13273_v14  ;;  %v7273_v27 = vmul.f32 %v7177_v57, %v16900_v40  ;;  %v13488_v57 = vld [vmem:[#allocation2 + $0x110] sm:$0xff] }
 0x551   :  { %16899 = vst [vmem:[#allocation82_spill] sm:$0xff] %v15651_v18  ;;  %v15656_v29 = vpop.eup %13286  ;;  %13304 = vrcp.f32 %v6823_v61  ;;  %8927 = vmatmul.mubr.bf16.gmra.mrb[84].mxu0 %v15651_v18  ;;  %v10842_v51 = vmul.f32 -1.442695, %v6463_v49  ;;  %v7176_v45 = vsub.f32 1.0, %v15625_v1  ;;  %v7182_v30 = vsub.f32 1.0, %v15631_v58  ;;  %v16902_v49 = vld [vmem:[#allocation127_spill] sm:$0xff] }
 0x552   :  { %v15661_v28 = vpop.eup %13288  ;;  %13306 = vpow2.f32 %v10835_v46  ;;  %9004 = vmatpush1.bf16.msra.mxu0 %v12827_v31  ;;  %v6339_v36 = vpop.f32.mrb[108].mxu1  ;;  %v7279_v2 = vmul.f32 %v7183_v34, %v16901_v4  ;;  %v7369_v14 = vadd.f32 %v7273_v27, %v7081_v0  ;;  %v7086_v24 = vmul.f32 %v13488_v57, %v15631_v58  ;;  %v16903_v40 = vld [vmem:[#allocation128_spill] sm:$0xff]  ;;  %v12835_v46 = vld [vmem:[#allocation14 + $0xac] ss:$16 sps:$4 sm:$0xff]  }
 0x553   :  { %v13291_v20 = vpop.eup %13290  ;;  %13308 = vpow2.f32 %v10836_v47  ;;  %v6468_v12 = vadd.f32 %v15579_v32, %v6339_v36  ;;  %9005 = vmatprep.subr.bf16.mxu0 %v12832_v59  ;;  %v6341_v1 = vpop.f32.mrb[109].mxu1  ;;  %v7272_v61 = vmul.f32 %v7176_v45, %v16902_v49  ;;  %v7278_v18 = vmul.f32 %v7182_v30, %v16903_v40 }
 0x554   :  { %v13293_v31 = vpop.eup %13292  ;;  %v6828_v26 = vadd.f32 1.0, %v13291_v20  ;;  %13310 = vpow2.f32 %v10841_v9  ;;  %v7375_v34 = vadd.f32 %v7279_v2, %v7087_v10  ;;  %v6469_v0 = vadd.f32 %v15583_v42, %v6341_v1  ;;  %v6343_v27 = vpop.f32.mrb[110].mxu1  ;;  %v12833_v20 = vld [vmem:[#allocation14 + $0xa8] ss:$16 sps:$4 sm:$0xff]   ;;  %v12838_v1 = vld [vmem:[#allocation14 + $0xcc] ss:$16 sps:$4 sm:$0xff]  }
 0x555   :  { %v13295_v4 = vpop.eup %13294  ;;  %v6829_v58 = vadd.f32 1.0, %v13293_v31  ;;  %13312 = vpow2.f32 %v10842_v51  ;;  %v10847_v47 = vmul.f32 -1.442695, %v6468_v12  ;;  %v7368_v36 = vadd.f32 %v7272_v61, %v15644_v19  ;;  %v6345_v59 = vpop.f32.mrb[111].mxu1  ;;  %v13489_v61 = vld [vmem:[#allocation2 + $0x148] sm:$0xff] }
 0x556   :  { %v13297_v57 = vpop.eup %13296  ;;  %13314 = vrcp.f32 %v6828_v26  ;;  %v6834_v45 = vadd.f32 1.0, %v13295_v4  ;;  %v15670_v49 = vpack.c.bf16 %v7375_v34, %v7369_v14  ;;  %v10848_v30 = vmul.f32 -1.442695, %v6469_v0  ;;  %9006 = vmatpush1.bf16.msra.mxu0 %v12830_v5  ;;  %v13490_v0 = vld [vmem:[#allocation2 + $0x178] sm:$0xff]  ;;  %v16906_v4 = vld [vmem:[#allocation130_spill] sm:$0xff] }
 0x557   :  { %13316 = vrcp.f32 %v6829_v58  ;;  %v6835_v10 = vadd.f32 1.0, %v13297_v57  ;;  %v7374_v9 = vadd.f32 %v7278_v18, %v7086_v24  ;;  %v6474_v2 = vadd.f32 %v15579_v32, %v6343_v27  ;;  %9007 = vmatprep.subr.bf16.mxu0 %v12835_v46  ;;  %v16905_v46 = vld [vmem:[#allocation129_spill] sm:$0xff] }
 0x558   :  { %v15673_v51 = vpop.eup %13298  ;;  %13318 = vrcp.f32 %v6834_v45  ;;  %8936 = vmatprep.mubr.bf16.mxu0 %v15670_v49  ;;  %v6475_v26 = vadd.f32 %v15583_v42, %v6345_v59  ;;  %v7189_v19 = vsub.f32 1.0, %v15653_v13  ;;  %v7195_v18 = vsub.f32 1.0, %v15661_v28  ;;  %v12836_v42 = vld [vmem:[#allocation14 + $0xc8] ss:$16 sps:$4 sm:$0xff]  }
 0x559   :  { %v13301_v14 = vpop.eup %13300  ;;  %13320 = vrcp.f32 %v6835_v10  ;;  %v15678_v5 = vpack.c.bf16 %v7374_v9, %v7368_v36  ;;  %v10853_v12 = vmul.f32 -1.442695, %v6474_v2  ;;  %v7093_v40 = vmul.f32 %v13489_v61, %v15653_v13  ;;  %v12841_v36 = vld [vmem:[#allocation14 + $0xec] ss:$16 sps:$4 sm:$0xff]   ;;  %v13491_v13 = vld [vmem:[#allocation2 + $0x140] sm:$0xff]  ;;  %v16908_v61 = vld [vmem:[#allocation132_spill] sm:$0xff] }
 0x55a   :  { %v15681_v24 = vpop.eup %13302  ;;  %13322 = vpow2.f32 %v10847_v47  ;;  %v10854_v32 = vmul.f32 -1.442695, %v6475_v26  ;;  %9008 = vmatpush1.bf16.msra.mxu0 %v12833_v20  ;;  %v7285_v31 = vmul.f32 %v7189_v19, %v16905_v46  ;;  %v7099_v27 = vmul.f32 %v13490_v0, %v15661_v28  ;;  %v16907_v2 = vld [vmem:[#allocation131_spill] sm:$0xff] }
 0x55b   :  { %16904 = vst [vmem:[#allocation83_spill] sm:$0xff] %v15678_v5  ;;  %v13305_v34 = vpop.eup %13304  ;;  %13324 = vpow2.f32 %v10848_v30  ;;  %8937 = vmatmul.mubr.bf16.gmra.mrb[88].mxu0 %v15678_v5  ;;  %v7291_v58 = vmul.f32 %v7195_v18, %v16906_v4  ;;  %9009 = vmatprep.subr.bf16.mxu0 %v12838_v1  ;;  %v7188_v47 = vsub.f32 1.0, %v15649_v38  ;;  %v7092_v45 = vmul.f32 %v13491_v13, %v15649_v38  ;;  %v13492_v1 = vld [vmem:[#allocation2 + $0x170] sm:$0xff] }
 0x55c   :  { %v13307_v59 = vpop.eup %13306  ;;  %13326 = vpow2.f32 %v10853_v12  ;;  %v7381_v57 = vadd.f32 %v7285_v31, %v7093_v40  ;;  %v7194_v20 = vsub.f32 1.0, %v15656_v29  ;;  %v7098_v18 = vmul.f32 %v13492_v1, %v15656_v29  ;;  %v12839_v12 = vld [vmem:[#allocation14 + $0xe8] ss:$16 sps:$4 sm:$0xff]  }
 0x55d   :  { %v13309_v30 = vpop.eup %13308  ;;  %v6840_v10 = vadd.f32 1.0, %v13307_v59  ;;  %13328 = vpow2.f32 %v10854_v32  ;;  %v7387_v9 = vadd.f32 %v7291_v58, %v7099_v27  ;;  %v7284_v28 = vmul.f32 %v7188_v47, %v16907_v2  ;;  %v12844_v32 = vld [vmem:[#allocation14 + $0x10c] ss:$16 sps:$4 sm:$0xff]   ;;  %v13495_v1 = vld [vmem:[#allocation2 + $0x1a0] sm:$0xff] }
 0x55e   :  { %v13311_v26 = vpop.eup %13310  ;;  %v6841_v19 = vadd.f32 1.0, %v13309_v30  ;;  %v7290_v46 = vmul.f32 %v7194_v20, %v16908_v61  ;;  %9010 = vmatpush1.bf16.msra.mxu0 %v12836_v42  ;;  %v7201_v40 = vsub.f32 1.0, %v13301_v14  ;;  %v7207_v59 = vsub.f32 1.0, %v13305_v34  ;;  %v13493_v42 = vld [vmem:[#allocation2 + $0x1a8] sm:$0xff]  ;;  %v13494_v20 = vld [vmem:[#allocation2 + $0x1d8] sm:$0xff] }
 0x55f   :  { %v13313_v31 = vpop.eup %13312  ;;  %13330 = vrcp.f32 %v6840_v10  ;;  %v6846_v38 = vadd.f32 1.0, %v13311_v26  ;;  %v15694_v0 = vpack.c.bf16 %v7387_v9, %v7381_v57  ;;  %v7380_v4 = vadd.f32 %v7284_v28, %v7092_v45  ;;  %9011 = vmatprep.subr.bf16.mxu0 %v12841_v36  ;;  %v16910_v10 = vld [vmem:[#allocation133_spill] sm:$0xff]  ;;  %v16912_v45 = vld [vmem:[#allocation134_spill] sm:$0xff] }
 0x560   :  { %v15696_v27 = vpop.eup %13314  ;;  %13332 = vrcp.f32 %v6841_v19  ;;  %v6847_v58 = vadd.f32 1.0, %v13313_v31  ;;  %v7386_v47 = vadd.f32 %v7290_v46, %v7098_v18  ;;  %v7105_v13 = vmul.f32 %v13493_v42, %v13301_v14  ;;  %v12842_v28 = vld [vmem:[#allocation14 + $0x108] ss:$16 sps:$4 sm:$0xff]   ;;  %v12847_v46 = vld [vmem:[#allocation14 + $0x12c] ss:$16 sps:$4 sm:$0xff]  }
 0x561   :  { %16909 = vst [vmem:[#allocation86_spill] sm:$0xff] %v15694_v0  ;;  %v13317_v29 = vpop.eup %13316  ;;  %13334 = vrcp.f32 %v6846_v38  ;;  %8946 = vmatprep.mubr.bf16.mxu0 %v15694_v0  ;;  %v7111_v30 = vmul.f32 %v13494_v20, %v13305_v34  ;;  %v7297_v57 = vmul.f32 %v7201_v40, %v16910_v10  ;;  %v7303_v2 = vmul.f32 %v7207_v59, %v16912_v45  ;;  %v13496_v18 = vld [vmem:[#allocation2 + $0x1d0] sm:$0xff]  ;;  %v16915_v45 = vld [vmem:[#allocation137_spill] sm:$0xff] }
 0x562   :  { %v15700_v9 = vpop.eup %13318  ;;  %13336 = vrcp.f32 %v6847_v58  ;;  %v15702_v36 = vpack.c.bf16 %v7386_v47, %v7380_v4  ;;  %9012 = vmatpush1.bf16.msra.mxu0 %v12839_v12  ;;  %v7200_v26 = vsub.f32 1.0, %v15673_v51  ;;  %v7104_v14 = vmul.f32 %v13495_v1, %v15673_v51  ;;  %v16913_v4 = vld [vmem:[#allocation135_spill] sm:$0xff]  ;;  %v16914_v42 = vld [vmem:[#allocation136_spill] sm:$0xff] }
 0x563   :  { %v13321_v19 = vpop.eup %13320  ;;  %9013 = vmatprep.subr.bf16.mxu0 %v12844_v32  ;;  %v7110_v34 = vmul.f32 %v13496_v18, %v15681_v24  ;;  %v7206_v61 = vsub.f32 1.0, %v15681_v24  ;;  %v7213_v40 = vsub.f32 1.0, %v13317_v29  ;;  %v7393_v12 = vadd.f32 %v7297_v57, %v7105_v13  ;;  %v13497_v51 = vld [vmem:[#allocation2 + $0x208] sm:$0xff]  ;;  %v12845_v5 = vld [vmem:[#allocation14 + $0x128] ss:$16 sps:$4 sm:$0xff]  }
 0x564   :  { %16911 = vst [vmem:[#allocation87_spill] sm:$0xff] %v15702_v36  ;;  %v13323_v31 = vpop.eup %13322  ;;  %8947 = vmatmul.mubr.bf16.gmra.mrb[92].mxu0 %v15702_v36  ;;  %v7399_v38 = vadd.f32 %v7303_v2, %v7111_v30  ;;  %v7296_v58 = vmul.f32 %v7200_v26, %v16913_v4  ;;  %v7219_v47 = vsub.f32 1.0, %v13321_v19  ;;  %v7117_v10 = vmul.f32 %v13497_v51, %v13317_v29  ;;  %v13498_v36 = vld [vmem:[#allocation2 + $0x238] sm:$0xff]  ;;  %v16916_v30 = vld [vmem:[#allocation138_spill] sm:$0xff]  ;;  %v16917_v51 = vld [vmem:[#allocation139_spill] sm:$0xff] }
 0x565   :  { %v13325_v59 = vpop.eup %13324  ;;  %v6852_v32 = vadd.f32 1.0, %v13323_v31  ;;  %v7302_v20 = vmul.f32 %v7206_v61, %v16914_v42  ;;  %v7309_v1 = vmul.f32 %v7213_v40, %v16915_v45  ;;  %v7123_v13 = vmul.f32 %v13498_v36, %v13321_v19  ;;  %v12850_v61 = vld [vmem:[#allocation14 + $0x14c] ss:$16 sps:$4 sm:$0xff]   ;;  %v13500_v42 = vld [vmem:[#allocation2 + $0x230] sm:$0xff] }
 0x566   :  { %v13327_v18 = vpop.eup %13326  ;;  %v6853_v24 = vadd.f32 1.0, %v13325_v59  ;;  %v15713_v0 = vpack.c.bf16 %v7399_v38, %v7393_v12  ;;  %9014 = vmatpush1.bf16.msra.mxu0 %v12842_v28  ;;  %v7315_v57 = vmul.f32 %v7219_v47, %v16916_v30  ;;  %v7392_v31 = vadd.f32 %v7296_v58, %v7104_v14  ;;  %v16918_v45 = vld [vmem:[#allocation140_spill] sm:$0xff]  ;;  %v16919_v30 = vld [vmem:[#allocation143_spill] sm:$0xff] }
 0x567   :  { %v13329_v2 = vpop.eup %13328  ;;  %13338 = vrcp.f32 %v6852_v32  ;;  %v6858_v26 = vadd.f32 1.0, %v13327_v18  ;;  %v7398_v4 = vadd.f32 %v7302_v20, %v7110_v34  ;;  %9015 = vmatprep.subr.bf16.mxu0 %v12847_v46  ;;  %v7405_v40 = vadd.f32 %v7309_v1, %v7117_v10  ;;  %v12848_v34 = vld [vmem:[#allocation14 + $0x148] ss:$16 sps:$4 sm:$0xff]   ;;  %v12853_v18 = vld [vmem:[#allocation14 + $0x16c] ss:$16 sps:$4 sm:$0xff]  }
 0x568   :  { %13340 = vrcp.f32 %v6853_v24  ;;  %v6859_v29 = vadd.f32 1.0, %v13329_v2  ;;  %8956 = vmatprep.mubr.bf16.mxu0 %v15713_v0  ;;  %v7411_v12 = vadd.f32 %v7315_v57, %v7123_v13  ;;  %v7212_v36 = vsub.f32 1.0, %v15696_v27  ;;  %v13499_v46 = vld [vmem:[#allocation2 + $0x200] sm:$0xff] }
 0x569   :  { %v13331_v38 = vpop.eup %13330  ;;  %13342 = vrcp.f32 %v6858_v26  ;;  %v15717_v28 = vpack.c.bf16 %v7398_v4, %v7392_v31  ;;  %v7218_v19 = vsub.f32 1.0, %v15700_v9  ;;  %v7116_v58 = vmul.f32 %v13499_v46, %v15696_v27  ;;  %v12851_v31 = vld [vmem:[#allocation14 + $0x168] ss:$16 sps:$4 sm:$0xff]  }
 0x56a   :  { %v13333_v47 = vpop.eup %13332  ;;  %13344 = vrcp.f32 %v6859_v29  ;;  %9016 = vmatpush1.bf16.msra.mxu0 %v12845_v5  ;;  %v15721_v14 = vpack.c.bf16 %v7411_v12, %v7405_v40  ;;  %v7224_v59 = vsub.f32 1.0, %v13331_v38  ;;  %v7122_v20 = vmul.f32 %v13500_v42, %v15700_v9  ;;  %v16920_v9 = vld [vmem:[#allocation141_spill] sm:$0xff]  ;;  %v13502_v40 = vld [vmem:[#allocation2 + $0x290] sm:$0xff]  ;;  %v13503_v42 = vld [vmem:[#allocation2 + $0x268] sm:$0xff] }
 0x56b   :  { %v13335_v32 = vpop.eup %13334  ;;  %9017 = vmatprep.subr.bf16.mxu0 %v12850_v61  ;;  %v7308_v10 = vmul.f32 %v7212_v36, %v16917_v51  ;;  %v7314_v1 = vmul.f32 %v7218_v19, %v16918_v45  ;;  %v7225_v24 = vsub.f32 1.0, %v13333_v47  ;;  %v13501_v61 = vld [vmem:[#allocation2 + $0x260] sm:$0xff]  ;;  %v16921_v36 = vld [vmem:[#allocation144_spill] sm:$0xff]  ;;  %v13504_v51 = vld [vmem:[#allocation2 + $0x298] sm:$0xff] }
 0x56c   :  { %v13337_v13 = vpop.eup %13336  ;;  %8957 = vmatmul.mubr.bf16.gmra.mrb[96].mxu0 %v15717_v28  ;;  %v7230_v5 = vsub.f32 1.0, %v13335_v32  ;;  %v7320_v57 = vmul.f32 %v7224_v59, %v16919_v30  ;;  %v7128_v29 = vmul.f32 %v13501_v61, %v13331_v38  ;;  %v7134_v12 = vmul.f32 %v13502_v40, %v13335_v32  ;;  %v12854_v32 = vld [vmem:[#allocation14 + $0x188] ss:$16 sps:$4 sm:$0xff]  }
 0x56d   :  { %8966 = vmatprep.mubr.bf16.mxu0 %v15721_v14  ;;  %v7404_v27 = vadd.f32 %v7308_v10, %v7116_v58  ;;  %v7410_v2 = vadd.f32 %v7314_v1, %v7122_v20  ;;  %v7231_v26 = vsub.f32 1.0, %v13337_v13  ;;  %v7321_v4 = vmul.f32 %v7225_v24, %v16920_v9  ;;  %v16922_v58 = vld [vmem:[#allocation142_spill] sm:$0xff]  ;;  %v12856_v10 = vld [vmem:[#allocation14 + $0x18c] ss:$16 sps:$4 sm:$0xff]  }
 0x56e   :  { %9018 = vmatpush1.bf16.msra.mxu0 %v12848_v34  ;;  %v7326_v19 = vmul.f32 %v7230_v5, %v16921_v36  ;;  %v7129_v59 = vmul.f32 %v13503_v42, %v13333_v47  ;;  %v7135_v45 = vmul.f32 %v13504_v51, %v13337_v13  ;;  %v7416_v34 = vadd.f32 %v7320_v57, %v7128_v29  ;;  %v12859_v47 = vld [vmem:[#allocation14 + $0x1ac] ss:$16 sps:$4 sm:$0xff]   ;;  %v13505_v36 = vld [vmem:[#allocation2 + $0x2c0] sm:$0xff]  ;;  %v13506_v42 = vld [vmem:[#allocation2 + $0x2f0] sm:$0xff] }
 0x56f   :  { %v15732_v46 = vpack.c.bf16 %v7410_v2, %v7404_v27  ;;  %9019 = vmatprep.subr.bf16.mxu0 %v12853_v18  ;;  %v7327_v20 = vmul.f32 %v7231_v26, %v16922_v58  ;;  %v16924_v26 = vld [vmem:[#allocation97_spill] sm:$0xff]  ;;  %v16926_v51 = vld [vmem:[#allocation99_spill] sm:$0xff] }
 0x570   :  { %v7422_v1 = vadd.f32 %v7326_v19, %v7134_v12  ;;  %v7417_v24 = vadd.f32 %v7321_v4, %v7129_v59  ;;  %v12857_v12 = vld [vmem:[#allocation14 + $0x1a8] ss:$16 sps:$4 sm:$0xff]   ;;  %v13507_v58 = vld [vmem:[#allocation2 + $0x2c8] sm:$0xff] }
 0x571   :  { %v13339_v30 = vpop.eup %13338  ;;  %v7423_v9 = vadd.f32 %v7327_v20, %v7135_v45 }
 0x572   :  { %v13341_v38 = vpop.eup %13340  ;;  %9020 = vmatpush1.bf16.msra.mxu0 %v12851_v31  ;;  %v15735_v61 = vpack.c.bf16 %v7422_v1, %v7416_v34  ;;  %v7236_v5 = vsub.f32 1.0, %v13339_v30  ;;  %v16925_v31 = vld [vmem:[#allocation145_spill] sm:$0xff]  ;;  %v7140_v19 = vmul.f32 %v13505_v36, %v13339_v30  ;;  %v16927_v1 = vld [vmem:[#allocation146_spill] sm:$0xff] }
 0x573   :  { %v13343_v27 = vpop.eup %13342  ;;  %v15737_v18 = vpack.c.bf16 %v7423_v9, %v7417_v24  ;;  %9021 = vmatprep.subr.bf16.mxu0 %v12856_v10  ;;  %v7237_v13 = vsub.f32 1.0, %v13341_v38  ;;  %v7141_v20 = vmul.f32 %v13507_v58, %v13341_v38  ;;  %v13508_v10 = vld [vmem:[#allocation2 + $0x2f8] sm:$0xff]  ;;  %v12863_v38 = vld [vmem:[#allocation14 + $0x1e8] ss:$16 sps:$4 sm:$0xff]  }
 0x574   :  { %v13345_v2 = vpop.eup %13344  ;;  %8967 = vmatmul.mubr.bf16.gmra.mrb[100].mxu0 %v15732_v46  ;;  %v7242_v57 = vsub.f32 1.0, %v13343_v27  ;;  %v7332_v29 = vmul.f32 %v7236_v5, %v16924_v26  ;;  %v7146_v59 = vmul.f32 %v13506_v42, %v13343_v27  ;;  %v12862_v9 = vld [vmem:[#allocation14 + $0x1cc] ss:$16 sps:$4 sm:$0xff]   ;;  %v266_v42 = vld [vmem:[#allocation5] sm:$0xff] }
 0x575   :  { %16923 = vst [vmem:[#allocation88_spill] sm:$0xff] %v15737_v18  ;;  %8976 = vmatprep.mubr.bf16.mxu0 %v15737_v18  ;;  %v7243_v4 = vsub.f32 1.0, %v13345_v2  ;;  %v7333_v40 = vmul.f32 %v7237_v13, %v16925_v31  ;;  %v7147_v34 = vmul.f32 %v13508_v10, %v13345_v2  ;;  %v12865_v27 = vld [vmem:[#allocation14 + $0x1ec] ss:$16 sps:$4 sm:$0xff]   ;;  %v12866_v2 = vld [vmem:[#allocation14 + $0x208] ss:$16 sps:$4 sm:$0xff]  }
 0x576   :  { %9022 = vmatpush1.bf16.msra.mxu0 %v12854_v32  ;;  %v7338_v45 = vmul.f32 %v7242_v57, %v16926_v51  ;;  %v7428_v5 = vadd.f32 %v7332_v29, %v7140_v19  ;;  %v12860_v32 = vld [vmem:[#allocation14 + $0x1c8] ss:$16 sps:$4 sm:$0xff]   ;;  %v12871_v57 = vld [vmem:[#allocation14 + $0x22c] ss:$16 sps:$4 sm:$0xff]  }
 0x577   :  { %9023 = vmatprep.subr.bf16.mxu0 %v12859_v47  ;;  %v7339_v24 = vmul.f32 %v7243_v4, %v16927_v1  ;;  %v7429_v18 = vadd.f32 %v7333_v40, %v7141_v20  ;;  %v12868_v47 = vld [vmem:[#allocation14 + $0x20c] ss:$16 sps:$4 sm:$0xff]   ;;  %v12872_v4 = vld [vmem:[#allocation14 + $0x248] ss:$16 sps:$4 sm:$0xff]  }
 0x578   :  { %v7434_v26 = vadd.f32 %v7338_v45, %v7146_v59  ;;  %v12874_v29 = vld [vmem:[#allocation14 + $0x24c] ss:$16 sps:$4 sm:$0xff]   ;;  %v12884_v51 = vld [vmem:[#allocation14 + $0x2c8] ss:$16 sps:$4 sm:$0xff]  }
 0x579   :  { %v7435_v13 = vadd.f32 %v7339_v24, %v7147_v34  ;;  %v12877_v40 = vld [vmem:[#allocation14 + $0x26c] ss:$16 sps:$4 sm:$0xff]   ;;  %v12890_v58 = vld [vmem:[#allocation14 + $0x308] ss:$16 sps:$4 sm:$0xff]  }
 0x57a   :  { %9024 = vmatpush1.bf16.msra.mxu0 %v12857_v12  ;;  %v15745_v31 = vpack.c.bf16 %v7434_v26, %v7428_v5  ;;  %v12880_v12 = vld [vmem:[#allocation14 + $0x28c] ss:$16 sps:$4 sm:$0xff]   ;;  %v12893_v10 = vld [vmem:[#allocation14 + $0x328] ss:$16 sps:$4 sm:$0xff]  }
 0x57b   :  { %v15747_v30 = vpack.c.bf16 %v7435_v13, %v7429_v18  ;;  %9025 = vmatprep.subr.bf16.mxu0 %v12862_v9  ;;  %v12869_v18 = vld [vmem:[#allocation14 + $0x228] ss:$16 sps:$4 sm:$0xff]   ;;  %v12883_v36 = vld [vmem:[#allocation14 + $0x2ac] ss:$16 sps:$4 sm:$0xff]  }
 0x57c   :  { %8977 = vmatmul.mubr.bf16.gmra.mrb[104].mxu0 %v15735_v61  ;;  %v267_v19 = vld [vmem:[#allocation5 + $0x8] sm:$0xff] }
 0x57d   :  { %8986 = vmatprep.mubr.bf16.mxu0 %v15747_v30  ;;  %v15759_v59 = vpack.c.bf16 %v267_v19, %v267_v19  ;;  %v12892_v45 = vld [vmem:[#allocation14 + $0x30c] ss:$16 sps:$4 sm:$0xff]   ;;  %v16929_v19 = vld [vmem:[#allocation80_spill] sm:$0xff] }
 0x57e   :  { %9026 = vmatpush1.bf16.msra.mxu0 %v12860_v32  ;;  %v12895_v20 = vld [vmem:[#allocation14 + $0x32c] ss:$16 sps:$4 sm:$0xff]  }
 0x57f   :  { %9027 = vmatprep.subr.bf16.mxu0 %v12865_v27  ;;  %9372 = vmatprep.subr.bf16.mxu1 %v15759_v59  ;;  %v12898_v34 = vld [vmem:[#allocation14 + $0x34c] ss:$16 sps:$4 sm:$0xff]  }
 0x580   :  { %v12901_v1 = vld [vmem:[#allocation14 + $0x36c] ss:$16 sps:$4 sm:$0xff]  }
 0x581   :  { %v12904_v24 = vld [vmem:[#allocation14 + $0x38c] ss:$16 sps:$4 sm:$0xff]  }
 0x582   :  { %9028 = vmatpush1.bf16.msra.mxu0 %v12863_v38  ;;  %v12907_v9 = vld [vmem:[#allocation14 + $0x3ac] ss:$16 sps:$4 sm:$0xff]  }
 0x583   :  { %9110 = vmatprep.subr.bf16.mxu0 %v12868_v47  ;;  %v12910_v5 = vld [vmem:[#allocation14 + $0x3cc] ss:$16 sps:$4 sm:$0xff]  }
 0x584   :  { %8987 = vmatmul.mubr.bf16.gmra.mrb[108].mxu0 %v15745_v31  ;;  %v12913_v26 = vld [vmem:[#allocation14 + $0x3ec] ss:$16 sps:$4 sm:$0xff]  }
 0x585   :  { %9029 = vmatprep.mubr.bf16.mxu0 %v15422_v39  ;;  %v12875_v39 = vld [vmem:[#allocation14 + $0x268] ss:$16 sps:$4 sm:$0xff]   ;;  %v12916_v13 = vld [vmem:[#allocation14 + $0x40c] ss:$16 sps:$4 sm:$0xff]  }
 0x586   :  { %v12919_v32 = vld [vmem:[#allocation14 + $0x42c] ss:$16 sps:$4 sm:$0xff]  }
 0x587   :  { %v12922_v27 = vld [vmem:[#allocation14 + $0x44c] ss:$16 sps:$4 sm:$0xff]  }
 0x588   :  { %v12925_v38 = vld [vmem:[#allocation14 + $0x46c] ss:$16 sps:$4 sm:$0xff]  }
 0x589   :  { %v12928_v47 = vld [vmem:[#allocation14 + $0x48c] ss:$16 sps:$4 sm:$0xff]  }
 0x58c   :  { %9030 = vmatmul.mubr.bf16.vlgmr.msra.gmra.mrb[112].mxu0 %v15424_v62  ;;  %v12878_v62 = vld [vmem:[#allocation14 + $0x288] ss:$16 sps:$4 sm:$0xff]  }
 0x58d   :  { %9111 = vmatpush1.bf16.msra.mxu0 %v12866_v2  ;;  %9039 = vmatprep.mubr.bf16.mxu0 %v15442_v3  ;;  %v12881_v3 = vld [vmem:[#allocation14 + $0x2a8] ss:$16 sps:$4 sm:$0xff]   ;;  %v12931_v2 = vld [vmem:[#allocation14 + $0x4ac] ss:$16 sps:$4 sm:$0xff]  }
 0x58e   :  { %9112 = vmatprep.subr.bf16.mxu0 %v12871_v57  ;;  %v12934_v57 = vld [vmem:[#allocation14 + $0x4cc] ss:$16 sps:$4 sm:$0xff]  }
 0x591   :  { %9113 = vmatpush1.bf16.msra.mxu0 %v12869_v18  ;;  %v269_v18 = vld [vmem:[#allocation5 + $0x18] sm:$0xff] }
 0x592   :  { %9114 = vmatprep.subr.bf16.mxu0 %v12874_v29  ;;  %v15781_v29 = vpack.c.bf16 %v269_v18, %v269_v18 }
 0x594   :  { %9040 = vmatmul.mubr.bf16.gmra.mrb[116].mxu0 %v15460_v63  ;;  %v12886_v63 = vld [vmem:[#allocation14 + $0x2cc] ss:$16 sps:$4 sm:$0xff]  }
 0x595   :  { %9115 = vmatpush1.bf16.msra.mxu0 %v12872_v4  ;;  %9049 = vmatprep.mubr.bf16.mxu0 %v15479_v52  ;;  %v15761_v52 = vpack.c.bf16 %v266_v42, %v266_v42  ;;  %v12938_v4 = vld [vmem:[#allocation14 + $0x508] ss:$16 sps:$4 sm:$0xff]  }
 0x596   :  { %9116 = vmatprep.subr.bf16.mxu0 %v12877_v40  ;;  %v12943_v40 = vld [vmem:[#allocation14 + $0x52c] ss:$16 sps:$4 sm:$0xff]   ;;  %v12953_v42 = vld [vmem:[#allocation14 + $0x5a8] ss:$16 sps:$4 sm:$0xff]  }
 0x597   :  { %9373 = vmatpush1.bf16.xpose.msra.mxu1 %v15761_v52 }
 0x598   :  { %9469 = vmatprep.subr.bf16.mxu1 %v15781_v29 }
 0x599   :  { %9117 = vmatpush1.bf16.msra.mxu0 %v12875_v39  ;;  %v12941_v39 = vld [vmem:[#allocation14 + $0x528] ss:$16 sps:$4 sm:$0xff]  }
 0x59a   :  { %9118 = vmatprep.subr.bf16.mxu0 %v12880_v12  ;;  %v12946_v12 = vld [vmem:[#allocation14 + $0x54c] ss:$16 sps:$4 sm:$0xff]  }
 0x59c   :  { %9050 = vmatmul.mubr.bf16.gmra.mrb[120].mxu0 %v15487_v6  ;;  %v12889_v6 = vld [vmem:[#allocation14 + $0x2ec] ss:$16 sps:$4 sm:$0xff]  }
 0x59d   :  { %9119 = vmatpush1.bf16.msra.mxu0 %v12878_v62  ;;  %9059 = vmatprep.mubr.bf16.mxu0 %v15503_v33  ;;  %v12887_v33 = vld [vmem:[#allocation14 + $0x2e8] ss:$16 sps:$4 sm:$0xff]   ;;  %v12949_v62 = vld [vmem:[#allocation14 + $0x56c] ss:$16 sps:$4 sm:$0xff]  }
 0x59e   :  { %9120 = vmatprep.subr.bf16.mxu0 %v12883_v36  ;;  %v12952_v36 = vld [vmem:[#allocation14 + $0x58c] ss:$16 sps:$4 sm:$0xff]  }
 0x5a1   :  { %9121 = vmatpush1.bf16.msra.mxu0 %v12881_v3  ;;  %v12955_v3 = vld [vmem:[#allocation14 + $0x5ac] ss:$16 sps:$4 sm:$0xff]  }
 0x5a2   :  { %9122 = vmatprep.subr.bf16.mxu0 %v12886_v63  ;;  %v12958_v63 = vld [vmem:[#allocation14 + $0x5cc] ss:$16 sps:$4 sm:$0xff]  }
 0x5a4   :  { %9060 = vmatmul.mubr.bf16.gmra.mrb[124].mxu0 %v15511_v48  ;;  %v12896_v48 = vld [vmem:[#allocation14 + $0x348] ss:$16 sps:$4 sm:$0xff]  }
 0x5a5   :  { %9123 = vmatpush1.bf16.msra.mxu0 %v12884_v51  ;;  %9069 = vmatprep.mubr.bf16.mxu0 %v15522_v23  ;;  %v12899_v23 = vld [vmem:[#allocation14 + $0x368] ss:$16 sps:$4 sm:$0xff]   ;;  %v12961_v51 = vld [vmem:[#allocation14 + $0x5ec] ss:$16 sps:$4 sm:$0xff]  }
 0x5a6   :  { %9124 = vmatprep.subr.bf16.mxu0 %v12889_v6  ;;  %v16931_v6 = vld [vmem:[#allocation76_spill] sm:$0xff] }
 0x5a9   :  { %9125 = vmatpush1.bf16.msra.mxu0 %v12887_v33  ;;  %v12959_v33 = vld [vmem:[#allocation14 + $0x5e8] ss:$16 sps:$4 sm:$0xff]  }
 0x5aa   :  { %9126 = vmatprep.subr.bf16.mxu0 %v12892_v45  ;;  %v16932_v45 = vld [vmem:[#allocation77_spill] sm:$0xff] }
 0x5ac   :  { %9070 = vmatmul.mubr.bf16.gmra.mrb[128].mxu0 %v15526_v15  ;;  %v12902_v15 = vld [vmem:[#allocation14 + $0x388] ss:$16 sps:$4 sm:$0xff]  }
 0x5ad   :  { %9127 = vmatpush1.bf16.msra.mxu0 %v12890_v58  ;;  %9079 = vmatprep.mubr.bf16.mxu0 %v15530_v56  ;;  %v12905_v56 = vld [vmem:[#allocation14 + $0x3a8] ss:$16 sps:$4 sm:$0xff]   ;;  %v16933_v58 = vld [vmem:[#allocation81_spill] sm:$0xff] }
 0x5ae   :  { %9128 = vmatprep.subr.bf16.mxu0 %v12895_v20  ;;  %v16934_v20 = vld [vmem:[#allocation82_spill] sm:$0xff] }
 0x5b1   :  { %9129 = vmatpush1.bf16.msra.mxu0 %v12893_v10  ;;  %v15797_v10 = vld [vmem:[#allocation16] sm:$0xf] }
 0x5b2   :  { %9130 = vmatprep.subr.bf16.mxu0 %v12898_v34 }
 0x5b4   :  { %9080 = vmatmul.mubr.bf16.gmra.mrb[132].mxu0 %v15541_v43  ;;  %v12908_v43 = vld [vmem:[#allocation14 + $0x3c8] ss:$16 sps:$4 sm:$0xff]  }
 0x5b5   :  { %9131 = vmatpush1.bf16.msra.mxu0 %v12896_v48  ;;  %9089 = vmatprep.mubr.bf16.mxu0 %v15546_v54  ;;  %v12911_v54 = vld [vmem:[#allocation14 + $0x3e8] ss:$16 sps:$4 sm:$0xff]   ;;  %v16935_v48 = vld [vmem:[#allocation25_spill] sm:$0xff] }
 0x5b6   :  { %9132 = vmatprep.subr.bf16.mxu0 %v12901_v1  ;;  %v15802_v1 = vrot.slane %v15797_v10, %v16935_v48 }
 0x5b9   :  { %9133 = vmatpush1.bf16.msra.mxu0 %v12899_v23  ;;  %v16936_v23 = vld [vmem:[#allocation26_spill] sm:$0xff] }
 0x5ba   :  { %9134 = vmatprep.subr.bf16.mxu0 %v12904_v24  ;;  %v15806_v24 = vrot.slane %v15797_v10, %v16936_v23 }
 0x5bc   :  { %9090 = vmatmul.mubr.bf16.gmra.mrb[136].mxu0 %v15544_v50  ;;  %v12914_v50 = vld [vmem:[#allocation14 + $0x408] ss:$16 sps:$4 sm:$0xff]  }
 0x5bd   :  { %9135 = vmatpush1.bf16.msra.mxu0 %v12902_v15  ;;  %9099 = vmatprep.mubr.bf16.mxu0 %v15556_v22  ;;  %v12917_v22 = vld [vmem:[#allocation14 + $0x428] ss:$16 sps:$4 sm:$0xff]  }
 0x5be   :  { %9136 = vmatprep.subr.bf16.mxu0 %v12907_v9 }
 0x5c1   :  { %9137 = vmatpush1.bf16.msra.mxu0 %v12905_v56 }
 0x5c2   :  { %9138 = vmatprep.subr.bf16.mxu0 %v12910_v5 }
 0x5c4   :  { %9100 = vmatmul.mubr.bf16.gmra.mrb[140].mxu0 %v15554_v37  ;;  %v12920_v37 = vld [vmem:[#allocation14 + $0x448] ss:$16 sps:$4 sm:$0xff]  }
 0x5c5   :  { %9139 = vmatpush1.bf16.msra.mxu0 %v12908_v43  ;;  %9142 = vmatprep.mubr.bf16.mxu0 %v15203_v55  ;;  %v12923_v55 = vld [vmem:[#allocation14 + $0x468] ss:$16 sps:$4 sm:$0xff]  }
 0x5c6   :  { %9140 = vmatprep.subr.bf16.mxu0 %v12913_v26  ;;  %v268_v43 = vld [vmem:[#allocation5 + $0x10] sm:$0xff] }
 0x5c9   :  { %9141 = vmatpush1.bf16.msra.mxu0 %v12911_v54  ;;  %v16937_v54 = vld [vmem:[#allocation83_spill] sm:$0xff] }
 0x5ca   :  { %9223 = vmatprep.subr.bf16.mxu0 %v12916_v13 }
 0x5cc   :  { %9143 = vmatmul.mubr.bf16.vlgmr.msra.gmra.mrb[112].mxu0 %v16882_v11  ;;  %v12926_v11 = vld [vmem:[#allocation14 + $0x488] ss:$16 sps:$4 sm:$0xff]  }
 0x5cd   :  { %9224 = vmatpush1.bf16.msra.mxu0 %v12914_v50  ;;  %9152 = vmatprep.mubr.bf16.mxu0 %v16883_v25  ;;  %v12929_v25 = vld [vmem:[#allocation14 + $0x4a8] ss:$16 sps:$4 sm:$0xff]  }
 0x5ce   :  { %9225 = vmatprep.subr.bf16.mxu0 %v12919_v32  ;;  %v16938_v50 = vld [vmem:[#allocation86_spill] sm:$0xff] }
 0x5d1   :  { %9226 = vmatpush1.bf16.msra.mxu0 %v12917_v22  ;;  %v15824_v22 = vpack.c.bf16 %v268_v43, %v268_v43 }
 0x5d2   :  { %9227 = vmatprep.subr.bf16.mxu0 %v12922_v27 }
 0x5d4   :  { %9153 = vmatmul.mubr.bf16.gmra.mrb[116].mxu0 %v16884_v21  ;;  %v12932_v21 = vld [vmem:[#allocation14 + $0x4c8] ss:$16 sps:$4 sm:$0xff]  }
 0x5d5   :  { %9228 = vmatpush1.bf16.msra.mxu0 %v12920_v37  ;;  %9162 = vmatprep.mubr.bf16.mxu0 %v15276_v60  ;;  %v12937_v60 = vld [vmem:[#allocation14 + $0x4ec] ss:$16 sps:$4 sm:$0xff]  }
 0x5d6   :  { %9229 = vmatprep.subr.bf16.mxu0 %v12925_v38  ;;  %v16939_v37 = vld [vmem:[#allocation87_spill] sm:$0xff] }
 0x5d9   :  { %9230 = vmatpush1.bf16.msra.mxu0 %v12923_v55 }
 0x5da   :  { %9231 = vmatprep.subr.bf16.mxu0 %v12928_v47 }
 0x5dc   :  { %9163 = vmatmul.mubr.bf16.gmra.mrb[120].mxu0 %v15281_v17  ;;  %v12935_v17 = vld [vmem:[#allocation14 + $0x4e8] ss:$16 sps:$4 sm:$0xff]  }
 0x5dd   :  { %9232 = vmatpush1.bf16.msra.mxu0 %v12926_v11  ;;  %9172 = vmatprep.mubr.bf16.mxu0 %v15301_v41  ;;  %v12940_v41 = vld [vmem:[#allocation14 + $0x50c] ss:$16 sps:$4 sm:$0xff]  }
 0x5de   :  { %9233 = vmatprep.subr.bf16.mxu0 %v12931_v2 }
 0x5e1   :  { %9234 = vmatpush1.bf16.msra.mxu0 %v12929_v25 }
 0x5e2   :  { %9235 = vmatprep.subr.bf16.mxu0 %v12934_v57 }
 0x5e4   :  { %9173 = vmatmul.mubr.bf16.gmra.mrb[124].mxu0 %v15308_v16  ;;  %v12944_v16 = vld [vmem:[#allocation14 + $0x548] ss:$16 sps:$4 sm:$0xff]  }
 0x5e5   :  { %9236 = vmatpush1.bf16.msra.mxu0 %v12932_v21  ;;  %9182 = vmatprep.mubr.bf16.mxu0 %v15321_v44  ;;  %v12947_v44 = vld [vmem:[#allocation14 + $0x568] ss:$16 sps:$4 sm:$0xff]  }
 0x5e6   :  { %9237 = vmatprep.subr.bf16.mxu0 %v12937_v60 }
 0x5e9   :  { %9238 = vmatpush1.bf16.msra.mxu0 %v12935_v17 }
 0x5ea   :  { %9239 = vmatprep.subr.bf16.mxu0 %v12940_v41 }
 0x5ec   :  { %9183 = vmatmul.mubr.bf16.gmra.mrb[128].mxu0 %v15323_v8  ;;  %v12950_v8 = vld [vmem:[#allocation14 + $0x588] ss:$16 sps:$4 sm:$0xff]  }
 0x5ed   :  { %9240 = vmatpush1.bf16.msra.mxu0 %v12938_v4  ;;  %9192 = vmatprep.mubr.bf16.mxu0 %v15325_v7  ;;  %v16928_v7 = vld [vmem:[#allocation91_spill] sm:$0xff] }
 0x5ee   :  { %9241 = vmatprep.subr.bf16.mxu0 %v12943_v40 }
 0x5f1   :  { %9242 = vmatpush1.bf16.msra.mxu0 %v12941_v39 }
 0x5f2   :  { %9243 = vmatprep.subr.bf16.mxu0 %v12946_v12 }
 0x5f4   :  { %9193 = vmatmul.mubr.bf16.gmra.mrb[132].mxu0 %v15339_v35  ;;  %v12956_v35 = vld [vmem:[#allocation14 + $0x5c8] ss:$16 sps:$4 sm:$0xff]  }
 0x5f5   :  { %9244 = vmatpush1.bf16.msra.mxu0 %v12944_v16  ;;  %9202 = vmatprep.mubr.bf16.mxu0 %v15343_v53  ;;  %v16930_v53 = vld [vmem:[#allocation96_spill] sm:$0xff] }
 0x5f6   :  { %9245 = vmatprep.subr.bf16.mxu0 %v12949_v62  ;;  %v16940_v62 = vld [vmem:[#allocation88_spill] sm:$0xff] }
 0x5f9   :  { %9246 = vmatpush1.bf16.msra.mxu0 %v12947_v44 }
 0x5fa   :  { %9247 = vmatprep.subr.bf16.mxu0 %v12952_v36 }
 0x5fc   :  { %9203 = vmatmul.mubr.bf16.gmra.mrb[136].mxu0 %v16928_v7 }
 0x5fd   :  { %9248 = vmatpush1.bf16.msra.mxu0 %v12950_v8  ;;  %9212 = vmatprep.mubr.bf16.mxu0 %v16929_v19 }
 0x5fe   :  { %9249 = vmatprep.subr.bf16.mxu0 %v12955_v3 }
 0x601   :  { %9250 = vmatpush1.bf16.msra.mxu0 %v12953_v42 }
 0x602   :  { %9251 = vmatprep.subr.bf16.mxu0 %v12958_v63 }
 0x604   :  { %9213 = vmatmul.mubr.bf16.gmra.mrb[140].mxu0 %v16930_v53 }
 0x605   :  { %9252 = vmatpush1.bf16.msra.mxu0 %v12956_v35  ;;  %9255 = vmatprep.mubr.bf16.mxu0 %v16931_v6 }
 0x606   :  { %9253 = vmatprep.subr.bf16.mxu0 %v12961_v51 }
 0x609   :  { %9254 = vmatpush1.bf16.msra.mxu0 %v12959_v33 }
 0x60c   :  { %9256 = vmatmul.mubr.bf16.vlgmr.msra.gmra.mrb[112].mxu0 %v16932_v45 }
 0x60d   :  { %9265 = vmatprep.mubr.bf16.mxu0 %v16933_v58 }
 0x614   :  { %9266 = vmatmul.mubr.bf16.gmra.mrb[116].mxu0 %v16934_v20 }
 0x615   :  { %9275 = vmatprep.mubr.bf16.mxu0 %v15670_v49 }
 0x617   :  { %v8918_v34 = vpop.f32.mrb[80].mxu0 }
 0x618   :  { %v8920_v15 = vpop.f32.mrb[81].mxu0  ;;  %v15819_v13 = vadd.f32 %v8918_v34, %v15806_v24  ;;  %v16941_v34 = vmov 0  }
 0x619   :  { %v8922_v9 = vpop.f32.mrb[82].mxu0  ;;  %v15812_v26 = vadd.f32 %v8920_v15, %v15802_v1 }
 0x61a   :  { %v15809_v56 = vadd.f32 %v8922_v9, %v15806_v24  ;;  %v8924_v5 = vpop.f32.mrb[83].mxu0 }
 0x61b   :  { %v15815_v49 = vadd.f32 %v8924_v5, %v15802_v1 }
 0x61c   :  { %9276 = vmatmul.mubr.bf16.gmra.mrb[120].mxu0 %v16937_v54  ;;  %v9340_v27 = vpack.c.bf16 %v15809_v56, %v15819_v13 }
 0x61d   :  { %9285 = vmatprep.mubr.bf16.mxu0 %v16938_v50  ;;  %v9341_v32 = vpack.c.bf16 %v15815_v49, %v15812_v26 }
 0x61f   :  { %9404 = vmatprep.mubr.bf16.mxu1 %v9341_v32 }
 0x620   :  { %9405 = vmatmul.mubr.bf16.vlgmr.msra.gmra.mrb[112].mxu1 %v9340_v27 }
 0x621   :  { %9470 = vmatpush1.bf16.xpose.msra.mxu1 %v15824_v22 }
 0x624   :  { %9286 = vmatmul.mubr.bf16.gmra.mrb[124].mxu0 %v16939_v37  ;;  %v8928_v38 = vpop.f32.mrb[84].mxu0 }
 0x625   :  { %9295 = vmatprep.mubr.bf16.mxu0 %v15713_v0  ;;  %v8930_v55 = vpop.f32.mrb[85].mxu0  ;;  %v15841_v18 = vadd.f32 %v8928_v38, %v15806_v24 }
 0x626   :  { %v8932_v47 = vpop.f32.mrb[86].mxu0  ;;  %v15835_v25 = vadd.f32 %v8930_v55, %v15802_v1 }
 0x627   :  { %v15832_v11 = vadd.f32 %v8932_v47, %v15806_v24  ;;  %v8934_v2 = vpop.f32.mrb[87].mxu0 }
 0x628   :  { %v15838_v57 = vadd.f32 %v8934_v2, %v15802_v1 }
 0x629   :  { %v9344_v0 = vpack.c.bf16 %v15832_v11, %v15841_v18 }
 0x62a   :  { %v9345_v21 = vpack.c.bf16 %v15838_v57, %v15835_v25 }
 0x62c   :  { %9296 = vmatmul.mubr.bf16.gmra.mrb[128].mxu0 %v15717_v28  ;;  %9412 = vmatprep.mubr.bf16.mxu1 %v9345_v21 }
 0x62d   :  { %9305 = vmatprep.mubr.bf16.mxu0 %v15721_v14  ;;  %9413 = vmatmul.mubr.bf16.gmra.mrb[116].mxu1 %v9344_v0 }
 0x62e   :  { %v8938_v60 = vpop.f32.mrb[88].mxu0 }
 0x62f   :  { %v8940_v17 = vpop.f32.mrb[89].mxu0  ;;  %v15859_v16 = vadd.f32 %v8938_v60, %v15806_v24 }
 0x630   :  { %v8942_v41 = vpop.f32.mrb[90].mxu0  ;;  %v15853_v39 = vadd.f32 %v8940_v17, %v15802_v1 }
 0x631   :  { %v15850_v4 = vadd.f32 %v8942_v41, %v15806_v24  ;;  %v8944_v40 = vpop.f32.mrb[91].mxu0 }
 0x632   :  { %v15856_v12 = vadd.f32 %v8944_v40, %v15802_v1 }
 0x633   :  { %v9348_v14 = vpack.c.bf16 %v15850_v4, %v15859_v16 }
 0x634   :  { %v9349_v28 = vpack.c.bf16 %v15856_v12, %v15853_v39  ;;  %9306 = vmatmul.mubr.bf16.gmra.mrb[132].mxu0 %v15732_v46 }
 0x635   :  { %9315 = vmatprep.mubr.bf16.mxu0 %v16940_v62 }
 0x636   :  { %9420 = vmatprep.mubr.bf16.mxu1 %v9349_v28 }
 0x637   :  { %v8948_v44 = vpop.f32.mrb[92].mxu0  ;;  %9421 = vmatmul.mubr.bf16.gmra.mrb[120].mxu1 %v9348_v14 }
 0x638   :  { %v8950_v36 = vpop.f32.mrb[93].mxu0  ;;  %v15877_v46 = vadd.f32 %v8948_v44, %v15806_v24 }
 0x639   :  { %v8952_v8 = vpop.f32.mrb[94].mxu0  ;;  %v15871_v19 = vadd.f32 %v8950_v36, %v15802_v1 }
 0x63a   :  { %v15868_v3 = vadd.f32 %v8952_v8, %v15806_v24  ;;  %v8954_v7 = vpop.f32.mrb[95].mxu0 }
 0x63b   :  { %v15874_v42 = vadd.f32 %v8954_v7, %v15802_v1 }
 0x63c   :  { %9316 = vmatmul.mubr.bf16.gmra.mrb[136].mxu0 %v15735_v61  ;;  %v9352_v35 = vpack.c.bf16 %v15868_v3, %v15877_v46 }
 0x63d   :  { %v9353_v63 = vpack.c.bf16 %v15874_v42, %v15871_v19  ;;  %9325 = vmatprep.mubr.bf16.mxu0 %v15747_v30 }
 0x63f   :  { %v8958_v51 = vpop.f32.mrb[96].mxu0  ;;  %9428 = vmatprep.mubr.bf16.mxu1 %v9353_v63 }
 0x640   :  { %v8960_v53 = vpop.f32.mrb[97].mxu0  ;;  %9429 = vmatmul.mubr.bf16.gmra.mrb[124].mxu1 %v9352_v35  ;;  %v15895_v30 = vadd.f32 %v8958_v51, %v15806_v24 }
 0x641   :  { %v8962_v6 = vpop.f32.mrb[98].mxu0  ;;  %v15889_v58 = vadd.f32 %v8960_v53, %v15802_v1  ;;  %v16942_v53 = vld [vmem:[#allocation70_spill] sm:$0xff] }
 0x642   :  { %v15886_v33 = vadd.f32 %v8962_v6, %v15806_v24  ;;  %v8964_v45 = vpop.f32.mrb[99].mxu0  ;;  %v15953_v6 = vrot.slane %v15797_v10, %v16942_v53 }
 0x643   :  { %v15892_v61 = vadd.f32 %v8964_v45, %v15802_v1  ;;  %v16943_v45 = vld [vmem:[#allocation73_spill] sm:$0xff] }
 0x644   :  { %9326 = vmatmul.mubr.bf16.gmra.mrb[140].mxu0 %v15745_v31  ;;  %v9356_v48 = vpack.c.bf16 %v15886_v33, %v15895_v30 }
 0x645   :  { %v9357_v20 = vpack.c.bf16 %v15892_v61, %v15889_v58  ;;  %9868 = vmatprep.mubr.bf16.mxu0 %v16941_v34 }
 0x647   :  { %v8968_v23 = vpop.f32.mrb[100].mxu0  ;;  %9436 = vmatprep.mubr.bf16.mxu1 %v9357_v20 }
 0x648   :  { %v8970_v15 = vpop.f32.mrb[101].mxu0  ;;  %9437 = vmatmul.mubr.bf16.gmra.mrb[128].mxu1 %v9356_v48  ;;  %v15913_v50 = vadd.f32 %v8968_v23, %v15806_v24 }
 0x649   :  { %v8972_v9 = vpop.f32.mrb[102].mxu0  ;;  %v15907_v54 = vadd.f32 %v8970_v15, %v15802_v1 }
 0x64a   :  { %v15904_v5 = vadd.f32 %v8972_v9, %v15806_v24  ;;  %v8974_v43 = vpop.f32.mrb[103].mxu0 }
 0x64b   :  { %v15910_v31 = vadd.f32 %v8974_v43, %v15802_v1 }
 0x64c   :  { %v9360_v27 = vpack.c.bf16 %v15904_v5, %v15913_v50 }
 0x64d   :  { %v9361_v32 = vpack.c.bf16 %v15910_v31, %v15907_v54 }
 0x64f   :  { %v8978_v37 = vpop.f32.mrb[104].mxu0  ;;  %9444 = vmatprep.mubr.bf16.mxu1 %v9361_v32 }
 0x650   :  { %v8980_v38 = vpop.f32.mrb[105].mxu0  ;;  %9445 = vmatmul.mubr.bf16.gmra.mrb[132].mxu1 %v9360_v27  ;;  %v15929_v60 = vadd.f32 %v8978_v37, %v15806_v24 }
 0x651   :  { %v8982_v55 = vpop.f32.mrb[106].mxu0  ;;  %v15923_v21 = vadd.f32 %v8980_v38, %v15802_v1 }
 0x652   :  { %v15920_v47 = vadd.f32 %v8982_v55, %v15806_v24  ;;  %v8984_v2 = vpop.f32.mrb[107].mxu0 }
 0x653   :  { %v15926_v0 = vadd.f32 %v8984_v2, %v15802_v1 }
 0x654   :  { %v9364_v41 = vpack.c.bf16 %v15920_v47, %v15929_v60 }
 0x655   :  { %v9365_v17 = vpack.c.bf16 %v15926_v0, %v15923_v21 }
 0x657   :  { %v8988_v40 = vpop.f32.mrb[108].mxu0  ;;  %9452 = vmatprep.mubr.bf16.mxu1 %v9365_v17 }
 0x658   :  { %v15936_v28 = vadd.f32 %v8988_v40, %v15806_v24  ;;  %v8990_v14 = vpop.f32.mrb[109].mxu0  ;;  %9453 = vmatmul.mubr.bf16.gmra.mrb[136].mxu1 %v9364_v41 }
 0x659   :  { %v15939_v62 = vadd.f32 %v8990_v14, %v15802_v1  ;;  %v8992_v44 = vpop.f32.mrb[110].mxu0 }
 0x65a   :  { %v15942_v36 = vadd.f32 %v8992_v44, %v15806_v24  ;;  %v8994_v8 = vpop.f32.mrb[111].mxu0  ;;  %v15957_v24 = vrot.slane %v15797_v10, %v16943_v45 }
 0x65b   :  { %v15945_v7 = vadd.f32 %v8994_v8, %v15802_v1 }
 0x65c   :  { %v9368_v35 = vpack.c.bf16 %v15942_v36, %v15936_v28 }
 0x65d   :  { %v9369_v63 = vpack.c.bf16 %v15945_v7, %v15939_v62 }
 0x65f   :  { %9460 = vmatprep.mubr.bf16.mxu1 %v9369_v63 }
 0x660   :  { %9461 = vmatmul.mubr.bf16.gmra.mrb[140].mxu1 %v9368_v35 }
 0x6df   :  { %v9257_v51 = vpop.f32.mrb[112].mxu0 }
 0x6e0   :  { %v9259_v20 = vpop.f32.mrb[113].mxu0  ;;  %v15969_v43 = vadd.f32 %v9257_v51, %v15957_v24 }
 0x6e1   :  { %v9261_v1 = vpop.f32.mrb[114].mxu0  ;;  %v15963_v15 = vadd.f32 %v9259_v20, %v15953_v6 }
 0x6e2   :  { %v15960_v48 = vadd.f32 %v9261_v1, %v15957_v24  ;;  %v9263_v23 = vpop.f32.mrb[115].mxu0  ;;  %16947 = vst [vmem:[#allocation94_spill] sm:$0xff] %v15969_v43 }
 0x6e3   :  { %16945 = vst [vmem:[#allocation92_spill] sm:$0xff] %v15963_v15  ;;  %v15966_v9 = vadd.f32 %v9263_v23, %v15953_v6 }
 0x6e4   :  { %16944 = vst [vmem:[#allocation89_spill] sm:$0xff] %v15960_v48  ;;  %v9342_v10 = vpack.c.bf16 %v15960_v48, %v15969_v43 }
 0x6e5   :  { %16946 = vst [vmem:[#allocation93_spill] sm:$0xff] %v15966_v9  ;;  %v9343_v32 = vpack.c.bf16 %v15966_v9, %v15963_v15 }
 0x6e7   :  { %v9267_v27 = vpop.f32.mrb[116].mxu0  ;;  %9501 = vmatprep.mubr.bf16.mxu1 %v9343_v32 }
 0x6e8   :  { %v9269_v37 = vpop.f32.mrb[117].mxu0  ;;  %9502 = vmatmul.mubr.bf16.vlgmr.msra.gmra.mrb[112].mxu1 %v9342_v10  ;;  %v15985_v40 = vadd.f32 %v9267_v27, %v15957_v24 }
 0x6e9   :  { %v9271_v38 = vpop.f32.mrb[118].mxu0  ;;  %v15979_v17 = vadd.f32 %v9269_v37, %v15953_v6 }
 0x6ea   :  { %v15976_v55 = vadd.f32 %v9271_v38, %v15957_v24  ;;  %v9273_v2 = vpop.f32.mrb[119].mxu0  ;;  %16951 = vst [vmem:[#allocation101_spill] sm:$0xff] %v15985_v40 }
 0x6eb   :  { %16949 = vst [vmem:[#allocation98_spill] sm:$0xff] %v15979_v17  ;;  %v15982_v41 = vadd.f32 %v9273_v2, %v15953_v6 }
 0x6ec   :  { %16948 = vst [vmem:[#allocation95_spill] sm:$0xff] %v15976_v55  ;;  %v9346_v44 = vpack.c.bf16 %v15976_v55, %v15985_v40 }
 0x6ed   :  { %16950 = vst [vmem:[#allocation100_spill] sm:$0xff] %v15982_v41  ;;  %v9347_v14 = vpack.c.bf16 %v15982_v41, %v15979_v17 }
 0x6ef   :  { %v9277_v8 = vpop.f32.mrb[120].mxu0  ;;  %9509 = vmatprep.mubr.bf16.mxu1 %v9347_v14 }
 0x6f0   :  { %v9279_v63 = vpop.f32.mrb[121].mxu0  ;;  %9510 = vmatmul.mubr.bf16.gmra.mrb[116].mxu1 %v9346_v44  ;;  %v16001_v1 = vadd.f32 %v9277_v8, %v15957_v24 }
 0x6f1   :  { %v9281_v35 = vpop.f32.mrb[122].mxu0  ;;  %v15995_v45 = vadd.f32 %v9279_v63, %v15953_v6 }
 0x6f2   :  { %v15992_v51 = vadd.f32 %v9281_v35, %v15957_v24  ;;  %v9283_v53 = vpop.f32.mrb[123].mxu0  ;;  %16955 = vst [vmem:[#allocation105_spill] sm:$0xff] %v16001_v1 }
 0x6f3   :  { %16953 = vst [vmem:[#allocation103_spill] sm:$0xff] %v15995_v45  ;;  %v15998_v20 = vadd.f32 %v9283_v53, %v15953_v6 }
 0x6f4   :  { %16952 = vst [vmem:[#allocation102_spill] sm:$0xff] %v15992_v51  ;;  %v9350_v32 = vpack.c.bf16 %v15992_v51, %v16001_v1  ;;  %v276_v51 = vld [vmem:[%s16421_s3 + $0x30] sm:$0xff] }
 0x6f5   :  { %16954 = vst [vmem:[#allocation104_spill] sm:$0xff] %v15998_v20  ;;  %v9351_v23 = vpack.c.bf16 %v15998_v20, %v15995_v45  ;;  %vm9588_vm8 = vcmp.gt.f32.partialorder %v276_v51, 0.0 }
 0x6f7   :  { %v9287_v10 = vpop.f32.mrb[124].mxu0  ;;  %9517 = vmatprep.mubr.bf16.mxu1 %v9351_v23 }
 0x6f8   :  { %v9289_v27 = vpop.f32.mrb[125].mxu0  ;;  %9518 = vmatmul.mubr.bf16.gmra.mrb[120].mxu1 %v9350_v32  ;;  %v16017_v8 = vadd.f32 %v9287_v10, %v15957_v24 }
 0x6f9   :  { %v9291_v37 = vpop.f32.mrb[126].mxu0  ;;  %v16011_v14 = vadd.f32 %v9289_v27, %v15953_v6 }
 0x6fa   :  { %v16008_v38 = vadd.f32 %v9291_v37, %v15957_v24  ;;  %v9293_v2 = vpop.f32.mrb[127].mxu0  ;;  %16959 = vst [vmem:[#allocation109_spill] sm:$0xff] %v16017_v8 }
 0x6fb   :  { %16957 = vst [vmem:[#allocation107_spill] sm:$0xff] %v16011_v14  ;;  %v16014_v44 = vadd.f32 %v9293_v2, %v15953_v6 }
 0x6fc   :  { %16956 = vst [vmem:[#allocation106_spill] sm:$0xff] %v16008_v38  ;;  %v9354_v35 = vpack.c.bf16 %v16008_v38, %v16017_v8 }
 0x6fd   :  { %16958 = vst [vmem:[#allocation108_spill] sm:$0xff] %v16014_v44  ;;  %v9355_v63 = vpack.c.bf16 %v16014_v44, %v16011_v14 }
 0x6ff   :  { %v9297_v53 = vpop.f32.mrb[128].mxu0  ;;  %9525 = vmatprep.mubr.bf16.mxu1 %v9355_v63 }
 0x700   :  { %v9299_v23 = vpop.f32.mrb[129].mxu0  ;;  %9526 = vmatmul.mubr.bf16.gmra.mrb[124].mxu1 %v9354_v35  ;;  %v16033_v44 = vadd.f32 %v9297_v53, %v15957_v24 }
 0x701   :  { %v9301_v32 = vpop.f32.mrb[130].mxu0  ;;  %v16027_v2 = vadd.f32 %v9299_v23, %v15953_v6 }
 0x702   :  { %v16024_v27 = vadd.f32 %v9301_v32, %v15957_v24  ;;  %v9303_v37 = vpop.f32.mrb[131].mxu0  ;;  %16963 = vst [vmem:[#allocation116_spill] sm:$0xff] %v16033_v44 }
 0x703   :  { %16961 = vst [vmem:[#allocation112_spill] sm:$0xff] %v16027_v2  ;;  %v16030_v10 = vadd.f32 %v9303_v37, %v15953_v6 }
 0x704   :  { %16960 = vst [vmem:[#allocation111_spill] sm:$0xff] %v16024_v27  ;;  %v9358_v63 = vpack.c.bf16 %v16024_v27, %v16033_v44 }
 0x705   :  { %16962 = vst [vmem:[#allocation110_spill] sm:$0xff] %v16030_v10  ;;  %v9359_v38 = vpack.c.bf16 %v16030_v10, %v16027_v2 }
 0x707   :  { %v9307_v35 = vpop.f32.mrb[132].mxu0  ;;  %9533 = vmatprep.mubr.bf16.mxu1 %v9359_v38 }
 0x708   :  { %v9309_v32 = vpop.f32.mrb[133].mxu0  ;;  %9534 = vmatmul.mubr.bf16.gmra.mrb[128].mxu1 %v9358_v63  ;;  %v16049_v10 = vadd.f32 %v9307_v35, %v15957_v24 }
 0x709   :  { %v9311_v14 = vpop.f32.mrb[134].mxu0  ;;  %v16043_v37 = vadd.f32 %v9309_v32, %v15953_v6 }
 0x70a   :  { %v16040_v23 = vadd.f32 %v9311_v14, %v15957_v24  ;;  %v9313_v8 = vpop.f32.mrb[135].mxu0  ;;  %16967 = vst [vmem:[#allocation31_spill] sm:$0xff] %v16049_v10 }
 0x70b   :  { %16965 = vst [vmem:[#allocation117_spill] sm:$0xff] %v16043_v37  ;;  %v16046_v53 = vadd.f32 %v9313_v8, %v15953_v6 }
 0x70c   :  { %16964 = vst [vmem:[#allocation113_spill] sm:$0xff] %v16040_v23  ;;  %v9362_v38 = vpack.c.bf16 %v16040_v23, %v16049_v10 }
 0x70d   :  { %16966 = vst [vmem:[#allocation114_spill] sm:$0xff] %v16046_v53  ;;  %v9363_v27 = vpack.c.bf16 %v16046_v53, %v16043_v37 }
 0x70f   :  { %v9317_v63 = vpop.f32.mrb[136].mxu0  ;;  %9541 = vmatprep.mubr.bf16.mxu1 %v9363_v27 }
 0x710   :  { %v9319_v14 = vpop.f32.mrb[137].mxu0  ;;  %9542 = vmatmul.mubr.bf16.gmra.mrb[132].mxu1 %v9362_v38  ;;  %v16065_v53 = vadd.f32 %v9317_v63, %v15957_v24 }
 0x711   :  { %v9321_v2 = vpop.f32.mrb[138].mxu0  ;;  %v16059_v8 = vadd.f32 %v9319_v14, %v15953_v6 }
 0x712   :  { %v16056_v32 = vadd.f32 %v9321_v2, %v15957_v24  ;;  %v9323_v44 = vpop.f32.mrb[139].mxu0  ;;  %16971 = vst [vmem:[#allocation43_spill] sm:$0xff] %v16065_v53 }
 0x713   :  { %16969 = vst [vmem:[#allocation37_spill] sm:$0xff] %v16059_v8  ;;  %v16062_v35 = vadd.f32 %v9323_v44, %v15953_v6 }
 0x714   :  { %16968 = vst [vmem:[#allocation32_spill] sm:$0xff] %v16056_v32  ;;  %v9366_v27 = vpack.c.bf16 %v16056_v32, %v16065_v53  ;;  %v274_v53 = vld [vmem:[%s16421_s3 + $0x20] sm:$0xff] }
 0x715   :  { %16970 = vst [vmem:[#allocation38_spill] sm:$0xff] %v16062_v35  ;;  %v9367_v23 = vpack.c.bf16 %v16062_v35, %v16059_v8  ;;  %vm9586_vm6 = vcmp.gt.f32.partialorder %v274_v53, 0.0 }
 0x717   :  { %v9327_v38 = vpop.f32.mrb[140].mxu0  ;;  %9549 = vmatprep.mubr.bf16.mxu1 %v9367_v23 }
 0x718   :  { %v9329_v2 = vpop.f32.mrb[141].mxu0  ;;  %9550 = vmatmul.mubr.bf16.gmra.mrb[136].mxu1 %v9366_v27  ;;  %v16081_v35 = vadd.f32 %v9327_v38, %v15957_v24 }
 0x719   :  { %v9331_v37 = vpop.f32.mrb[142].mxu0  ;;  %v16075_v44 = vadd.f32 %v9329_v2, %v15953_v6 }
 0x71a   :  { %v16072_v14 = vadd.f32 %v9331_v37, %v15957_v24  ;;  %v9333_v10 = vpop.f32.mrb[143].mxu0  ;;  %16975 = vst [vmem:[#allocation53_spill] sm:$0xff] %v16081_v35  ;;  %v270_v37 = vld [vmem:[%s16421_s3] sm:$0xff] }
 0x71b   :  { %16973 = vst [vmem:[#allocation51_spill] sm:$0xff] %v16075_v44  ;;  %v16078_v63 = vadd.f32 %v9333_v10, %v15953_v6  ;;  %v271_v6 = vld [vmem:[%s16421_s3 + $0x8] sm:$0xff]  ;;  %vm9582_vm1 = vcmp.gt.f32.partialorder %v270_v37, 0.0  ;;  %v273_v37 = vld [vmem:[%s16421_s3 + $0x18] sm:$0xff] }
 0x71c   :  { %16972 = vst [vmem:[#allocation44_spill] sm:$0xff] %v16072_v14  ;;  %v9370_v23 = vpack.c.bf16 %v16072_v14, %v16081_v35  ;;  %vm9583_vm3 = vcmp.gt.f32.partialorder %v271_v6, 0.0  ;;  %vm9585_vm5 = vcmp.gt.f32.partialorder %v273_v37, 0.0 }
 0x71d   :  { %16974 = vst [vmem:[#allocation52_spill] sm:$0xff] %v16078_v63  ;;  %v9371_v32 = vpack.c.bf16 %v16078_v63, %v16075_v44  ;;  %v272_v44 = vld [vmem:[%s16421_s3 + $0x10] sm:$0xff] }
 0x71e   :  { %vm9584_vm4 = vcmp.gt.f32.partialorder %v272_v44, 0.0  ;;  %v275_v44 = vld [vmem:[%s16421_s3 + $0x28] sm:$0xff] }
 0x71f   :  { %9557 = vmatprep.mubr.bf16.mxu1 %v9371_v32  ;;  %vm9587_vm7 = vcmp.gt.f32.partialorder %v275_v44, 0.0  ;;  %v277_v44 = vld [vmem:[%s16421_s3 + $0x38] sm:$0xff] }
 0x720   :  { %9558 = vmatmul.mubr.bf16.gmra.mrb[140].mxu1 %v9370_v23  ;;  %vm9589_vm9 = vcmp.gt.f32.partialorder %v277_v44, 0.0  ;;  %v279_v44 = vld [vmem:[%s16421_s3 + $0x48] sm:$0xff] }
 0x721   :  { %vm9591_vm11 = vcmp.gt.f32.partialorder %v279_v44, 0.0  ;;  %v281_v44 = vld [vmem:[%s16421_s3 + $0x58] sm:$0xff] }
 0x722   :  { %vm9593_vm13 = vcmp.gt.f32.partialorder %v281_v44, 0.0  ;;  %v283_v44 = vld [vmem:[%s16421_s3 + $0x68] sm:$0xff] }
 0x723   :  { %vm9595_vm15 = vcmp.gt.f32.partialorder %v283_v44, 0.0  ;;  %v285_v44 = vld [vmem:[%s16421_s3 + $0x78] sm:$0xff] }
 0x7bb   :  { %v9503_v10 = vpop.f32.mrb[112].mxu1 }
 0x7bc   :  { %v9566_v24 = vmul.f32 0.044194173, %v9503_v10  ;;  %v9505_v27 = vpop.f32.mrb[113].mxu1 }
 0x7bd   :  { %v9506_v38 = vpop.f32.mrb[114].mxu1 }
 0x7be   :  { %v9567_v2 = vmul.f32 0.044194173, %v9506_v38  ;;  %v9508_v63 = vpop.f32.mrb[115].mxu1  ;;  %v16093_v14 = vsel %vm9582_vm1, %v9566_v24, -1e+09  ;;  %vm9597_vm1 = vcmp.gt.f32.partialorder %v285_v44, 0.0 }
 0x7bf   :  { %v9615_v32 = vsel %vm9614_vm2, %v16093_v14, -inf }
 0x7c0   :  { %9616 = vmax.xlane.f32.xlu0 %v9615_v32  ;;  %v16097_v23 = vsel %vm9583_vm3, %v9567_v2, -1e+09  ;;  %vm9823_vm3 = vcmask 1043456  }
 0x7c1   :  { %v9618_v63 = vsel %vm9614_vm2, %v16097_v23, -inf  ;;  %11047 = vmatprep.subr.msk.bf16.mxu0 %vm9823_vm3, %v15759_v59 }
 0x7c3   :  { %v9511_v10 = vpop.f32.mrb[116].mxu1 }
 0x7c4   :  { %v9568_v6 = vmul.f32 0.044194173, %v9511_v10  ;;  %9619 = vmax.xlane.f32.xlu0 %v9618_v63  ;;  %v9513_v24 = vpop.f32.mrb[117].mxu1 }
 0x7c5   :  { %v9514_v27 = vpop.f32.mrb[118].mxu1 }
 0x7c6   :  { %v9569_v38 = vmul.f32 0.044194173, %v9514_v27  ;;  %v9516_v2 = vpop.f32.mrb[119].mxu1  ;;  %v16107_v32 = vsel %vm9584_vm4, %v9568_v6, -1e+09 }
 0x7c7   :  { %v9621_v35 = vsel %vm9614_vm2, %v16107_v32, -inf }
 0x7c8   :  { %9622 = vmax.xlane.f32.xlu1 %v9621_v35  ;;  %v16111_v8 = vsel %vm9585_vm5, %v9569_v38, -1e+09 }
 0x7c9   :  { %v9624_v37 = vsel %vm9614_vm2, %v16111_v8, -inf }
 0x7cb   :  { %v9519_v10 = vpop.f32.mrb[120].mxu1 }
 0x7cc   :  { %v9570_v63 = vmul.f32 0.044194173, %v9519_v10  ;;  %9625 = vmax.xlane.f32.xlu1 %v9624_v37  ;;  %v9521_v6 = vpop.f32.mrb[121].mxu1 }
 0x7cd   :  { %v9522_v24 = vpop.f32.mrb[122].mxu1 }
 0x7ce   :  { %v9571_v35 = vmul.f32 0.044194173, %v9522_v24  ;;  %v9524_v27 = vpop.f32.mrb[123].mxu1  ;;  %v16121_v38 = vsel %vm9586_vm6, %v9570_v63, -1e+09 }
 0x7cf   :  { %v9627_v2 = vsel %vm9614_vm2, %v16121_v38, -inf }
 0x7d0   :  { %9628 = vmax.xlane.f32.xlu0 %v9627_v2  ;;  %v16125_v20 = vsel %vm9587_vm7, %v9571_v35, -1e+09 }
 0x7d1   :  { %v9630_v53 = vsel %vm9614_vm2, %v16125_v20, -inf }
 0x7d2   :  { %9631 = vmax.xlane.f32.xlu1 %v9630_v53  ;;  %v278_v53 = vld [vmem:[%s16421_s3 + $0x40] sm:$0xff] }
 0x7d3   :  { %v9527_v10 = vpop.f32.mrb[124].mxu1  ;;  %vm9590_vm10 = vcmp.gt.f32.partialorder %v278_v53, 0.0 }
 0x7d4   :  { %v9572_v37 = vmul.f32 0.044194173, %v9527_v10  ;;  %v9529_v63 = vpop.f32.mrb[125].mxu1 }
 0x7d5   :  { %v9530_v6 = vpop.f32.mrb[126].mxu1 }
 0x7d6   :  { %v9573_v24 = vmul.f32 0.044194173, %v9530_v6  ;;  %v9532_v35 = vpop.f32.mrb[127].mxu1  ;;  %v16135_v27 = vsel %vm9588_vm8, %v9572_v37, -1e+09 }
 0x7d7   :  { %v9633_v2 = vsel %vm9614_vm2, %v16135_v27, -inf }
 0x7d8   :  { %9634 = vmax.xlane.f32.xlu0 %v9633_v2  ;;  %v16139_v45 = vsel %vm9589_vm9, %v9573_v24, -1e+09 }
 0x7d9   :  { %v9636_v51 = vsel %vm9614_vm2, %v16139_v45, -inf }
 0x7da   :  { %9637 = vmax.xlane.f32.xlu1 %v9636_v51  ;;  %v280_v51 = vld [vmem:[%s16421_s3 + $0x50] sm:$0xff] }
 0x7db   :  { %v9535_v10 = vpop.f32.mrb[128].mxu1  ;;  %vm9592_vm12 = vcmp.gt.f32.partialorder %v280_v51, 0.0 }
 0x7dc   :  { %v9574_v37 = vmul.f32 0.044194173, %v9535_v10  ;;  %v9537_v63 = vpop.f32.mrb[129].mxu1 }
 0x7dd   :  { %v9538_v6 = vpop.f32.mrb[130].mxu1 }
 0x7de   :  { %v9575_v24 = vmul.f32 0.044194173, %v9538_v6  ;;  %v9540_v35 = vpop.f32.mrb[131].mxu1  ;;  %v16149_v2 = vsel %vm9590_vm10, %v9574_v37, -1e+09 }
 0x7df   :  { %v9639_v1 = vsel %vm9614_vm2, %v16149_v2, -inf }
 0x7e0   :  { %9640 = vmax.xlane.f32.xlu0 %v9639_v1  ;;  %v16153_v41 = vsel %vm9591_vm11, %v9575_v24, -1e+09 }
 0x7e1   :  { %v9642_v53 = vsel %vm9614_vm2, %v16153_v41, -inf }
 0x7e2   :  { %9643 = vmax.xlane.f32.xlu1 %v9642_v53  ;;  %v282_v53 = vld [vmem:[%s16421_s3 + $0x60] sm:$0xff] }
 0x7e3   :  { %v9543_v10 = vpop.f32.mrb[132].mxu1  ;;  %vm9594_vm14 = vcmp.gt.f32.partialorder %v282_v53, 0.0 }
 0x7e4   :  { %v9576_v37 = vmul.f32 0.044194173, %v9543_v10  ;;  %v9545_v63 = vpop.f32.mrb[133].mxu1 }
 0x7e5   :  { %v9546_v6 = vpop.f32.mrb[134].mxu1 }
 0x7e6   :  { %v9577_v1 = vmul.f32 0.044194173, %v9546_v6  ;;  %v9548_v24 = vpop.f32.mrb[135].mxu1  ;;  %v16163_v35 = vsel %vm9592_vm12, %v9576_v37, -1e+09 }
 0x7e7   :  { %v9645_v55 = vsel %vm9614_vm2, %v16163_v35, -inf }
 0x7e8   :  { %9646 = vmax.xlane.f32.xlu0 %v9645_v55  ;;  %v16167_v17 = vsel %vm9593_vm13, %v9577_v1, -1e+09 }
 0x7e9   :  { %v9648_v51 = vsel %vm9614_vm2, %v16167_v17, -inf }
 0x7ea   :  { %9649 = vmax.xlane.f32.xlu1 %v9648_v51  ;;  %v284_v51 = vld [vmem:[%s16421_s3 + $0x70] sm:$0xff]  ;;  %s13757_s3 = smov [#allocation17]  }
 0x7eb   :  { %v9551_v10 = vpop.f32.mrb[136].mxu1  ;;  %vm9596_vm0 = vcmp.gt.f32.partialorder %v284_v51, 0.0  ;;  %v9825_v51 = vsel %vm9823_vm3, %v15761_v52, 0  ;;  %s10131_s23 = sshll.u32 %s13757_s3, 4  ;;  %s10132_s23 = int_to_ptr.vmem [resolvable:$true] %s10131_s23 }
 0x7ec   :  { %v9578_v37 = vmul.f32 0.044194173, %v9551_v10  ;;  %v9553_v63 = vpop.f32.mrb[137].mxu1  ;;  %9837 = vmatpush1.bf16.msra.mxu0 %v9825_v51  ;;  %s13707_s27 = scalar_lea.vmem %s10132_s23, 8192  ;;  %p13712_p3 = scmp.lt.s32.totalorder %s10132_s23, %s10132_s23 }
 0x7ed   :  { %v9554_v6 = vpop.f32.mrb[138].mxu1  ;;  %11056 = vmatprep.subr.msk.bf16.mxu0 %vm9823_vm3, %v15781_v29  ;;  %p13708_p2 = scmp.ne.s32.totalorder %s10132_s23, %s13707_s27  ;;  %p13713_p4 = scmp.lt.s32.totalorder %s13707_s27, %s13707_s27 }
 0x7ee   :  { %v9579_v55 = vmul.f32 0.044194173, %v9554_v6  ;;  %v9556_v1 = vpop.f32.mrb[139].mxu1  ;;  %v16177_v24 = vsel %vm9594_vm14, %v9578_v37, -1e+09 }
 0x7ef   :  { %v9651_v40 = vsel %vm9614_vm2, %v16177_v24, -inf  ;;  %p13714_p5 = por %p13713_p4, %p13712_p3 }
 0x7f0   :  { %9652 = vmax.xlane.f32.xlu0 %v9651_v40  ;;  %v16181_v9 = vsel %vm9595_vm15, %v9579_v55, -1e+09 }
 0x7f1   :  { %v9654_v53 = vsel %vm9614_vm2, %v16181_v9, -inf  ;;  %p13715_p6 = pnand %p13714_p5, %p13708_p2 }
 0x7f2   :  { %9655 = vmax.xlane.f32.xlu1 %v9654_v53 }
 0x7f3   :  { %v9559_v10 = vpop.f32.mrb[140].mxu1 }
 0x7f4   :  { %v9580_v37 = vmul.f32 0.044194173, %v9559_v10  ;;  %v9561_v63 = vpop.f32.mrb[141].mxu1 }
 0x7f5   :  { %v9562_v6 = vpop.f32.mrb[142].mxu1 }
 0x7f6   :  { %v9581_v40 = vmul.f32 0.044194173, %v9562_v6  ;;  %v9564_v55 = vpop.f32.mrb[143].mxu1  ;;  %v16191_v1 = vsel %vm9596_vm0, %v9580_v37, -1e+09 }
 0x7f7   :  { %v9657_v48 = vsel %vm9614_vm2, %v16191_v1, -inf }
 0x7f8   :  { %9658 = vmax.xlane.f32.xlu0 %v9657_v48  ;;  %v16195_v15 = vsel %vm9597_vm1, %v9581_v40, -1e+09 }
 0x7f9   :  { %v9660_v53 = vsel %vm9614_vm2, %v16195_v15, -inf }
 0x7fa   :  { %9661 = vmax.xlane.f32.xlu1 %v9660_v53 }
 0x84d   :  { %v9617_v44 = vpop.xlane.xlu0 %9616 }
 0x84e   :  { %v9663_v48 = vsub.f32 %v16093_v14, %v9617_v44 }
 0x850   :  { %v9679_v10 = vmul.f32 1.442695, %v9663_v48 }
 0x851   :  { %v9620_v37 = vpop.xlane.xlu0 %9619 }
 0x852   :  { %13346 = vpow2.f32 %v9679_v10  ;;  %v9664_v63 = vsub.f32 %v16097_v23, %v9620_v37 }
 0x854   :  { %v9681_v6 = vmul.f32 1.442695, %v9664_v63 }
 0x855   :  { %v9623_v40 = vpop.xlane.xlu1 %9622 }
 0x856   :  { %13348 = vpow2.f32 %v9681_v6  ;;  %v9665_v59 = vsub.f32 %v16107_v32, %v9623_v40 }
 0x858   :  { %v9683_v55 = vmul.f32 1.442695, %v9665_v59 }
 0x859   :  { %v9626_v53 = vpop.xlane.xlu1 %9625 }
 0x85a   :  { %13350 = vpow2.f32 %v9683_v55  ;;  %v9666_v52 = vsub.f32 %v16111_v8, %v9626_v53 }
 0x85c   :  { %v16209_v51 = vpop.eup %13346  ;;  %v9685_v29 = vmul.f32 1.442695, %v9666_v52 }
 0x85d   :  { %v9629_v43 = vpop.xlane.xlu0 %9628  ;;  %v9711_v14 = vsel %vm9614_vm2, %v16209_v51, 0.0 }
 0x85e   :  { %13352 = vpow2.f32 %v9685_v29  ;;  %v9667_v23 = vsub.f32 %v16121_v38, %v9629_v43  ;;  %9712 = vadd.xlane.f32.xlu0 %v9711_v14 }
 0x85f   :  { %v9632_v44 = vpop.xlane.xlu1 %9631 }
 0x860   :  { %v16214_v48 = vpop.eup %13348  ;;  %v9687_v32 = vmul.f32 1.442695, %v9667_v23  ;;  %v9668_v10 = vsub.f32 %v16125_v20, %v9632_v44 }
 0x861   :  { %v9714_v8 = vsel %vm9614_vm2, %v16214_v48, 0.0 }
 0x862   :  { %13354 = vpow2.f32 %v9687_v32  ;;  %v9689_v37 = vmul.f32 1.442695, %v9668_v10  ;;  %9715 = vadd.xlane.f32.xlu1 %v9714_v8 }
 0x864   :  { %v16219_v63 = vpop.eup %13350  ;;  %13356 = vpow2.f32 %v9689_v37 }
 0x865   :  { %v9635_v6 = vpop.xlane.xlu0 %9634  ;;  %v9717_v43 = vsel %vm9614_vm2, %v16219_v63, 0.0 }
 0x866   :  { %v9669_v38 = vsub.f32 %v16135_v27, %v9635_v6  ;;  %9718 = vadd.xlane.f32.xlu0 %v9717_v43 }
 0x867   :  { %v9638_v40 = vpop.xlane.xlu1 %9637 }
 0x868   :  { %v16224_v59 = vpop.eup %13352  ;;  %v9691_v20 = vmul.f32 1.442695, %v9669_v38  ;;  %v9670_v55 = vsub.f32 %v16139_v45, %v9638_v40 }
 0x869   :  { %v9720_v53 = vsel %vm9614_vm2, %v16224_v59, 0.0 }
 0x86a   :  { %13358 = vpow2.f32 %v9691_v20  ;;  %v9693_v52 = vmul.f32 1.442695, %v9670_v55  ;;  %9721 = vadd.xlane.f32.xlu1 %v9720_v53 }
 0x86c   :  { %v16229_v29 = vpop.eup %13354  ;;  %13360 = vpow2.f32 %v9693_v52 }
 0x86d   :  { %v9641_v14 = vpop.xlane.xlu0 %9640  ;;  %v9723_v27 = vsel %vm9614_vm2, %v16229_v29, 0.0 }
 0x86e   :  { %v16233_v23 = vpop.eup %13356  ;;  %v9671_v44 = vsub.f32 %v16149_v2, %v9641_v14  ;;  %9724 = vadd.xlane.f32.xlu0 %v9723_v27 }
 0x86f   :  { %v9644_v32 = vpop.xlane.xlu1 %9643  ;;  %v9726_v45 = vsel %vm9614_vm2, %v16233_v23, 0.0 }
 0x870   :  { %v9695_v10 = vmul.f32 1.442695, %v9671_v44  ;;  %v9672_v8 = vsub.f32 %v16153_v41, %v9644_v32  ;;  %9727 = vadd.xlane.f32.xlu1 %v9726_v45 }
 0x872   :  { %13362 = vpow2.f32 %v9695_v10  ;;  %v9697_v37 = vmul.f32 1.442695, %v9672_v8 }
 0x874   :  { %v16239_v6 = vpop.eup %13358  ;;  %13364 = vpow2.f32 %v9697_v37 }
 0x875   :  { %v9647_v43 = vpop.xlane.xlu0 %9646  ;;  %v9729_v38 = vsel %vm9614_vm2, %v16239_v6, 0.0 }
 0x876   :  { %v16243_v40 = vpop.eup %13360  ;;  %v9673_v2 = vsub.f32 %v16163_v35, %v9647_v43  ;;  %9730 = vadd.xlane.f32.xlu0 %v9729_v38 }
 0x877   :  { %v9650_v20 = vpop.xlane.xlu1 %9649  ;;  %v9732_v55 = vsel %vm9614_vm2, %v16243_v40, 0.0 }
 0x878   :  { %v9699_v41 = vmul.f32 1.442695, %v9673_v2  ;;  %v9674_v53 = vsub.f32 %v16167_v17, %v9650_v20  ;;  %9733 = vadd.xlane.f32.xlu1 %v9732_v55 }
 0x87a   :  { %13366 = vpow2.f32 %v9699_v41  ;;  %v9701_v52 = vmul.f32 1.442695, %v9674_v53 }
 0x87c   :  { %v16249_v14 = vpop.eup %13362  ;;  %13368 = vpow2.f32 %v9701_v52 }
 0x87d   :  { %v9653_v27 = vpop.xlane.xlu0 %9652  ;;  %v9735_v44 = vsel %vm9614_vm2, %v16249_v14, 0.0 }
 0x87e   :  { %v16253_v32 = vpop.eup %13364  ;;  %v9675_v35 = vsub.f32 %v16177_v24, %v9653_v27  ;;  %9736 = vadd.xlane.f32.xlu0 %v9735_v44 }
 0x87f   :  { %v9656_v45 = vpop.xlane.xlu1 %9655  ;;  %v9738_v10 = vsel %vm9614_vm2, %v16253_v32, 0.0 }
 0x880   :  { %v9703_v17 = vmul.f32 1.442695, %v9675_v35  ;;  %v9676_v8 = vsub.f32 %v16181_v9, %v9656_v45  ;;  %9739 = vadd.xlane.f32.xlu1 %v9738_v10 }
 0x882   :  { %13370 = vpow2.f32 %v9703_v17  ;;  %v9705_v37 = vmul.f32 1.442695, %v9676_v8 }
 0x884   :  { %v16259_v43 = vpop.eup %13366  ;;  %13372 = vpow2.f32 %v9705_v37 }
 0x885   :  { %v9659_v38 = vpop.xlane.xlu0 %9658  ;;  %v9741_v2 = vsel %vm9614_vm2, %v16259_v43, 0.0 }
 0x886   :  { %v16263_v20 = vpop.eup %13368  ;;  %v9677_v24 = vsub.f32 %v16191_v1, %v9659_v38  ;;  %9742 = vadd.xlane.f32.xlu0 %v9741_v2 }
 0x887   :  { %v9662_v55 = vpop.xlane.xlu1 %9661  ;;  %v9744_v41 = vsel %vm9614_vm2, %v16263_v20, 0.0 }
 0x888   :  { %v9707_v9 = vmul.f32 1.442695, %v9677_v24  ;;  %v9678_v53 = vsub.f32 %v16195_v15, %v9662_v55  ;;  %9745 = vadd.xlane.f32.xlu1 %v9744_v41 }
 0x88a   :  { %13374 = vpow2.f32 %v9707_v9  ;;  %v9709_v52 = vmul.f32 1.442695, %v9678_v53 }
 0x88c   :  { %v16269_v27 = vpop.eup %13370  ;;  %13376 = vpow2.f32 %v9709_v52 }
 0x88d   :  { %v9747_v44 = vsel %vm9614_vm2, %v16269_v27, 0.0 }
 0x88e   :  { %v16273_v35 = vpop.eup %13372  ;;  %9748 = vadd.xlane.f32.xlu0 %v9747_v44 }
 0x88f   :  { %v9750_v1 = vsel %vm9614_vm2, %v16273_v35, 0.0 }
 0x890   :  { %9751 = vadd.xlane.f32.xlu1 %v9750_v1  ;;  %v9831_v1 = vsel %vm9823_vm3, %v15824_v22, 0 }
 0x894   :  { %v16277_v45 = vpop.eup %13374 }
 0x895   :  { %v9753_v15 = vsel %vm9614_vm2, %v16277_v45, 0.0 }
 0x896   :  { %v16281_v10 = vpop.eup %13376  ;;  %9754 = vadd.xlane.f32.xlu0 %v9753_v15 }
 0x897   :  { %v9756_v17 = vsel %vm9614_vm2, %v16281_v10, 0.0 }
 0x898   :  { %9757 = vadd.xlane.f32.xlu1 %v9756_v17 }
 0x8eb   :  { %v9713_v8 = vpop.xlane.xlu0 %9712 }
 0x8ec   :  { %13378 = vrcp.f32 %v9713_v8 }
 0x8ef   :  { %v9716_v37 = vpop.xlane.xlu1 %9715 }
 0x8f0   :  { %13380 = vrcp.f32 %v9716_v37 }
 0x8f3   :  { %v9719_v38 = vpop.xlane.xlu0 %9718 }
 0x8f4   :  { %13382 = vrcp.f32 %v9719_v38 }
 0x8f6   :  { %v13379_v24 = vpop.eup %13378 }
 0x8f7   :  { %v9722_v2 = vpop.xlane.xlu1 %9721  ;;  %v9760_v41 = vmul.f32 %v13379_v24, %v16209_v51 }
 0x8f8   :  { %13384 = vrcp.f32 %v9722_v2 }
 0x8fa   :  { %v13381_v55 = vpop.eup %13380 }
 0x8fb   :  { %v9762_v9 = vmul.f32 %v13381_v55, %v16214_v48  ;;  %v9725_v53 = vpop.xlane.xlu0 %9724 }
 0x8fc   :  { %13386 = vrcp.f32 %v9725_v53 }
 0x8fd   :  { %v16287_v52 = vpack.c.bf16 %v9762_v9, %v9760_v41  ;;  %v9728_v44 = vpop.xlane.xlu1 %9727 }
 0x8fe   :  { %13388 = vrcp.f32 %v9728_v44  ;;  %v13383_v15 = vpop.eup %13382 }
 0x8ff   :  { %11048 = vmatmul.mubr.msk.bf16.vlgmr.msra.gmra.mrb[144].mxu0 %vm9614_vm2, %v16287_v52  ;;  %v9764_v48 = vmul.f32 %v13383_v15, %v16219_v63 }
 0x900   :  { %9950 = vmatpush1.bf16.msra.mxu0 %v9831_v1  ;;  %9878 = vmatprep.mubr.bf16.mxu0 %v16941_v34 }
 0x902   :  { %v13385_v17 = vpop.eup %13384 }
 0x903   :  { %v9731_v51 = vpop.xlane.xlu0 %9730  ;;  %v9766_v8 = vmul.f32 %v13385_v17, %v16224_v59 }
 0x904   :  { %13390 = vrcp.f32 %v9731_v51 }
 0x905   :  { %v9734_v37 = vpop.xlane.xlu1 %9733  ;;  %v16296_v38 = vpack.c.bf16 %v9766_v8, %v9764_v48 }
 0x906   :  { %13392 = vrcp.f32 %v9734_v37  ;;  %v13387_v22 = vpop.eup %13386 }
 0x907   :  { %11049 = vmatmul.mubr.msk.bf16.gmra.mrb[148].mxu0 %vm9614_vm2, %v16296_v38  ;;  %v9768_v41 = vmul.f32 %v13387_v22, %v16229_v29 }
 0x908   :  { %v13389_v2 = vpop.eup %13388  ;;  %9888 = vmatprep.mubr.bf16.mxu0 %v16941_v34 }
 0x909   :  { %v9770_v24 = vmul.f32 %v13389_v2, %v16233_v23 }
 0x90b   :  { %v9737_v55 = vpop.xlane.xlu0 %9736  ;;  %v9793_v59 = vpack.c.bf16 %v9770_v24, %v9768_v41 }
 0x90c   :  { %13394 = vrcp.f32 %v9737_v55 }
 0x90d   :  { %v9740_v63 = vpop.xlane.xlu1 %9739 }
 0x90e   :  { %13396 = vrcp.f32 %v9740_v63  ;;  %v13391_v9 = vpop.eup %13390 }
 0x90f   :  { %11050 = vmatmul.mubr.msk.bf16.gmra.mrb[152].mxu0 %vm9614_vm2, %v9793_v59  ;;  %v9772_v15 = vmul.f32 %v13391_v9, %v16239_v6 }
 0x910   :  { %v13393_v53 = vpop.eup %13392  ;;  %9898 = vmatprep.mubr.bf16.mxu0 %v16941_v34 }
 0x911   :  { %v9774_v44 = vmul.f32 %v13393_v53, %v16243_v40 }
 0x913   :  { %v9743_v1 = vpop.xlane.xlu0 %9742  ;;  %v9794_v17 = vpack.c.bf16 %v9774_v44, %v9772_v15 }
 0x914   :  { %13398 = vrcp.f32 %v9743_v1 }
 0x915   :  { %v9746_v23 = vpop.xlane.xlu1 %9745 }
 0x916   :  { %13400 = vrcp.f32 %v9746_v23  ;;  %v13395_v29 = vpop.eup %13394 }
 0x917   :  { %11051 = vmatmul.mubr.msk.bf16.gmra.mrb[156].mxu0 %vm9614_vm2, %v9794_v17  ;;  %v9776_v37 = vmul.f32 %v13395_v29, %v16249_v14 }
 0x918   :  { %v13397_v51 = vpop.eup %13396  ;;  %9908 = vmatprep.mubr.bf16.mxu0 %v16941_v34 }
 0x919   :  { %v9778_v48 = vmul.f32 %v13397_v51, %v16253_v32 }
 0x91b   :  { %v9749_v8 = vpop.xlane.xlu0 %9748  ;;  %v9795_v22 = vpack.c.bf16 %v9778_v48, %v9776_v37 }
 0x91c   :  { %13402 = vrcp.f32 %v9749_v8 }
 0x91d   :  { %v9752_v40 = vpop.xlane.xlu1 %9751 }
 0x91e   :  { %13404 = vrcp.f32 %v9752_v40  ;;  %v13399_v6 = vpop.eup %13398 }
 0x91f   :  { %11052 = vmatmul.mubr.msk.bf16.gmra.mrb[160].mxu0 %vm9614_vm2, %v9795_v22  ;;  %v9780_v41 = vmul.f32 %v13399_v6, %v16259_v43 }
 0x920   :  { %v13401_v2 = vpop.eup %13400  ;;  %9918 = vmatprep.mubr.bf16.mxu0 %v16941_v34 }
 0x921   :  { %v9782_v24 = vmul.f32 %v13401_v2, %v16263_v20 }
 0x923   :  { %v9755_v55 = vpop.xlane.xlu0 %9754  ;;  %v9796_v63 = vpack.c.bf16 %v9782_v24, %v9780_v41 }
 0x924   :  { %13406 = vrcp.f32 %v9755_v55 }
 0x925   :  { %v9758_v32 = vpop.xlane.xlu1 %9757 }
 0x926   :  { %13408 = vrcp.f32 %v9758_v32  ;;  %v13403_v14 = vpop.eup %13402 }
 0x927   :  { %11053 = vmatmul.mubr.msk.bf16.gmra.mrb[164].mxu0 %vm9614_vm2, %v9796_v63  ;;  %v9784_v44 = vmul.f32 %v13403_v14, %v16269_v27 }
 0x928   :  { %v13405_v9 = vpop.eup %13404  ;;  %9928 = vmatprep.mubr.bf16.mxu0 %v16941_v34 }
 0x929   :  { %v9786_v53 = vmul.f32 %v13405_v9, %v16273_v35 }
 0x92b   :  { %v9797_v1 = vpack.c.bf16 %v9786_v53, %v9784_v44 }
 0x92e   :  { %v13407_v15 = vpop.eup %13406 }
 0x92f   :  { %11054 = vmatmul.mubr.msk.bf16.gmra.mrb[168].mxu0 %vm9614_vm2, %v9797_v1  ;;  %v9788_v23 = vmul.f32 %v13407_v15, %v16277_v45 }
 0x930   :  { %v13409_v20 = vpop.eup %13408  ;;  %9938 = vmatprep.mubr.bf16.mxu0 %v16941_v34 }
 0x931   :  { %v9790_v43 = vmul.f32 %v13409_v20, %v16281_v10 }
 0x933   :  { %v9798_v29 = vpack.c.bf16 %v9790_v43, %v9788_v23 }
 0x937   :  { %11055 = vmatmul.mubr.msk.bf16.gmra.mrb[172].mxu0 %vm9614_vm2, %v9798_v29 }
 0x938   :  { %9981 = vmatprep.mubr.bf16.mxu0 %v16941_v34 }
 0x93f   :  { %11057 = vmatmul.mubr.msk.bf16.vlgmr.msra.gmra.mrb[176].mxu0 %vm9614_vm2, %v16287_v52 }
 0x940   :  { %9991 = vmatprep.mubr.bf16.mxu0 %v16941_v34 }
 0x947   :  { %11058 = vmatmul.mubr.msk.bf16.gmra.mrb[180].mxu0 %vm9614_vm2, %v16296_v38 }
 0x948   :  { %10001 = vmatprep.mubr.bf16.mxu0 %v16941_v34 }
 0x94f   :  { %11059 = vmatmul.mubr.msk.bf16.gmra.mrb[184].mxu0 %vm9614_vm2, %v9793_v59 }
 0x950   :  { %10011 = vmatprep.mubr.bf16.mxu0 %v16941_v34 }
 0x957   :  { %11060 = vmatmul.mubr.msk.bf16.gmra.mrb[188].mxu0 %vm9614_vm2, %v9794_v17 }
 0x958   :  { %10021 = vmatprep.mubr.bf16.mxu0 %v16941_v34 }
 0x95f   :  { %11061 = vmatmul.mubr.msk.bf16.gmra.mrb[192].mxu0 %vm9614_vm2, %v9795_v22 }
 0x960   :  { %10031 = vmatprep.mubr.bf16.mxu0 %v16941_v34 }
 0x967   :  { %11062 = vmatmul.mubr.msk.bf16.gmra.mrb[196].mxu0 %vm9614_vm2, %v9796_v63 }
 0x968   :  { %10041 = vmatprep.mubr.bf16.mxu0 %v16941_v34 }
 0x96f   :  { %11063 = vmatmul.mubr.msk.bf16.gmra.mrb[200].mxu0 %vm9614_vm2, %v9797_v1 }
 0x970   :  { %10051 = vmatprep.mubr.bf16.mxu0 %v16941_v34 }
 0x977   :  { %11064 = vmatmul.mubr.msk.bf16.gmra.mrb[204].mxu0 %vm9614_vm2, %v9798_v29 }
 0x9d2   :  { %v9870_v27 = vpop.f32.mrb[144].mxu0 }
 0x9d3   :  { %v9871_v35 = vadd.f32 %v15819_v13, %v9870_v27  ;;  %v9872_v45 = vpop.f32.mrb[145].mxu0 }
 0x9d4   :  { %v9873_v10 = vadd.f32 %v15812_v26, %v9872_v45  ;;  %v9874_v52 = vpop.f32.mrb[146].mxu0 }
 0x9d5   :  { %10062 = vst [vmem:[#allocation17] sm:$0xff] %v9871_v35  ;;  %v9875_v38 = vadd.f32 %v15809_v56, %v9874_v52  ;;  %v9876_v59 = vpop.f32.mrb[147].mxu0 }
 0x9d6   :  { %10063 = vst [vmem:[#allocation17 + $0x8] sm:$0xff] %v9873_v10  ;;  %v9877_v17 = vadd.f32 %v15815_v49, %v9876_v59 }
 0x9d7   :  { %10066 = vst [vmem:[#allocation17 + $0x20] sm:$0xff] %v9875_v38 }
 0x9d8   :  { %10067 = vst [vmem:[#allocation17 + $0x28] sm:$0xff] %v9877_v17 }
 0x9da   :  { %v9880_v51 = vpop.f32.mrb[148].mxu0 }
 0x9db   :  { %v9881_v34 = vadd.f32 %v15841_v18, %v9880_v51  ;;  %v9882_v48 = vpop.f32.mrb[149].mxu0  ;;  %v16977_v51 = vld [vmem:[#allocation92_spill] sm:$0xff] }
 0x9dc   :  { %v9883_v8 = vadd.f32 %v15835_v25, %v9882_v48  ;;  %v9884_v13 = vpop.f32.mrb[150].mxu0  ;;  %v16978_v48 = vld [vmem:[#allocation89_spill] sm:$0xff] }
 0x9dd   :  { %10070 = vst [vmem:[#allocation17 + $0x40] sm:$0xff] %v9881_v34  ;;  %v9885_v26 = vadd.f32 %v15832_v11, %v9884_v13  ;;  %v9886_v37 = vpop.f32.mrb[151].mxu0  ;;  %v16979_v13 = vld [vmem:[#allocation93_spill] sm:$0xff] }
 0x9de   :  { %10071 = vst [vmem:[#allocation17 + $0x48] sm:$0xff] %v9883_v8  ;;  %v9887_v56 = vadd.f32 %v15838_v57, %v9886_v37 }
 0x9df   :  { %10074 = vst [vmem:[#allocation17 + $0x60] sm:$0xff] %v9885_v26 }
 0x9e0   :  { %10075 = vst [vmem:[#allocation17 + $0x68] sm:$0xff] %v9887_v56 }
 0x9e2   :  { %v9890_v40 = vpop.f32.mrb[152].mxu0 }
 0x9e3   :  { %v9891_v49 = vadd.f32 %v15859_v16, %v9890_v40  ;;  %v9892_v22 = vpop.f32.mrb[153].mxu0  ;;  %v16981_v40 = vld [vmem:[#allocation98_spill] sm:$0xff] }
 0x9e4   :  { %v9893_v6 = vadd.f32 %v15853_v39, %v9892_v22  ;;  %v9894_v18 = vpop.f32.mrb[154].mxu0 }
 0x9e5   :  { %10078 = vst [vmem:[#allocation17 + $0x80] sm:$0xff] %v9891_v49  ;;  %v9895_v25 = vadd.f32 %v15850_v4, %v9894_v18  ;;  %v9896_v2 = vpop.f32.mrb[155].mxu0 }
 0x9e6   :  { %10079 = vst [vmem:[#allocation17 + $0x88] sm:$0xff] %v9893_v6  ;;  %v9897_v11 = vadd.f32 %v15856_v12, %v9896_v2  ;;  %v16982_v6 = vld [vmem:[#allocation95_spill] sm:$0xff]  ;;  %v16983_v2 = vld [vmem:[#allocation100_spill] sm:$0xff] }
 0x9e7   :  { %10082 = vst [vmem:[#allocation17 + $0xa0] sm:$0xff] %v9895_v25 }
 0x9e8   :  { %10083 = vst [vmem:[#allocation17 + $0xa8] sm:$0xff] %v9897_v11 }
 0x9ea   :  { %v9900_v24 = vpop.f32.mrb[156].mxu0 }
 0x9eb   :  { %v9901_v57 = vadd.f32 %v15877_v46, %v9900_v24  ;;  %v9902_v55 = vpop.f32.mrb[157].mxu0 }
 0x9ec   :  { %v9903_v41 = vadd.f32 %v15871_v19, %v9902_v55  ;;  %v9904_v16 = vpop.f32.mrb[158].mxu0 }
 0x9ed   :  { %10086 = vst [vmem:[#allocation17 + $0xc0] sm:$0xff] %v9901_v57  ;;  %v9905_v39 = vadd.f32 %v15868_v3, %v9904_v16  ;;  %v9906_v32 = vpop.f32.mrb[159].mxu0  ;;  %v16984_v57 = vld [vmem:[#allocation105_spill] sm:$0xff]  ;;  %v16985_v16 = vld [vmem:[#allocation103_spill] sm:$0xff] }
 0x9ee   :  { %10087 = vst [vmem:[#allocation17 + $0xc8] sm:$0xff] %v9903_v41  ;;  %v9907_v4 = vadd.f32 %v15874_v42, %v9906_v32 }
 0x9ef   :  { %10090 = vst [vmem:[#allocation17 + $0xe0] sm:$0xff] %v9905_v39 }
 0x9f0   :  { %10091 = vst [vmem:[#allocation17 + $0xe8] sm:$0xff] %v9907_v4  ;;  %v16986_v4 = vld [vmem:[#allocation102_spill] sm:$0xff] }
 0x9f2   :  { %v9910_v63 = vpop.f32.mrb[160].mxu0 }
 0x9f3   :  { %v9911_v12 = vadd.f32 %v15895_v30, %v9910_v63  ;;  %v9912_v14 = vpop.f32.mrb[161].mxu0 }
 0x9f4   :  { %v9913_v9 = vadd.f32 %v15889_v58, %v9912_v14  ;;  %v9914_v46 = vpop.f32.mrb[162].mxu0  ;;  %v16987_v14 = vld [vmem:[#allocation104_spill] sm:$0xff] }
 0x9f5   :  { %10094 = vst [vmem:[#allocation17 + $0x100] sm:$0xff] %v9911_v12  ;;  %v9915_v19 = vadd.f32 %v15886_v33, %v9914_v46  ;;  %v9916_v53 = vpop.f32.mrb[163].mxu0 }
 0x9f6   :  { %10095 = vst [vmem:[#allocation17 + $0x108] sm:$0xff] %v9913_v9  ;;  %v9917_v3 = vadd.f32 %v15892_v61, %v9916_v53 }
 0x9f7   :  { %10098 = vst [vmem:[#allocation17 + $0x120] sm:$0xff] %v9915_v19  ;;  %v16988_v19 = vld [vmem:[#allocation109_spill] sm:$0xff] }
 0x9f8   :  { %10099 = vst [vmem:[#allocation17 + $0x128] sm:$0xff] %v9917_v3 }
 0x9fa   :  { %v9920_v44 = vpop.f32.mrb[164].mxu0 }
 0x9fb   :  { %v9921_v42 = vadd.f32 %v15913_v50, %v9920_v44  ;;  %v9922_v1 = vpop.f32.mrb[165].mxu0  ;;  %v16989_v44 = vld [vmem:[#allocation107_spill] sm:$0xff] }
 0x9fc   :  { %v9923_v15 = vadd.f32 %v15907_v54, %v9922_v1  ;;  %v9924_v30 = vpop.f32.mrb[166].mxu0 }
 0x9fd   :  { %10102 = vst [vmem:[#allocation17 + $0x140] sm:$0xff] %v9921_v42  ;;  %v9925_v58 = vadd.f32 %v15904_v5, %v9924_v30  ;;  %v9926_v20 = vpop.f32.mrb[167].mxu0 }
 0x9fe   :  { %10103 = vst [vmem:[#allocation17 + $0x148] sm:$0xff] %v9923_v15  ;;  %v9927_v33 = vadd.f32 %v15910_v31, %v9926_v20  ;;  %v16990_v15 = vld [vmem:[#allocation106_spill] sm:$0xff]  ;;  %v16991_v20 = vld [vmem:[#allocation108_spill] sm:$0xff] }
 0x9ff   :  { %10106 = vst [vmem:[#allocation17 + $0x160] sm:$0xff] %v9925_v58 }
 0xa00   :  { %10107 = vst [vmem:[#allocation17 + $0x168] sm:$0xff] %v9927_v33 }
 0xa02   :  { %v9930_v43 = vpop.f32.mrb[168].mxu0 }
 0xa03   :  { %v9931_v61 = vadd.f32 %v15929_v60, %v9930_v43  ;;  %v9932_v23 = vpop.f32.mrb[169].mxu0 }
 0xa04   :  { %v9933_v29 = vadd.f32 %v15923_v21, %v9932_v23  ;;  %v9934_v50 = vpop.f32.mrb[170].mxu0 }
 0xa05   :  { %10110 = vst [vmem:[#allocation17 + $0x180] sm:$0xff] %v9931_v61  ;;  %v9935_v54 = vadd.f32 %v15920_v47, %v9934_v50  ;;  %v9936_v27 = vpop.f32.mrb[171].mxu0  ;;  %v16992_v61 = vld [vmem:[#allocation116_spill] sm:$0xff] }
 0xa06   :  { %10111 = vst [vmem:[#allocation17 + $0x188] sm:$0xff] %v9933_v29  ;;  %v9937_v5 = vadd.f32 %v15926_v0, %v9936_v27  ;;  %v16976_v0 = vld [vmem:[#allocation94_spill] sm:$0xff]  ;;  %v16993_v50 = vld [vmem:[#allocation112_spill] sm:$0xff] }
 0xa07   :  { %10114 = vst [vmem:[#allocation17 + $0x1a0] sm:$0xff] %v9935_v54 }
 0xa08   :  { %10115 = vst [vmem:[#allocation17 + $0x1a8] sm:$0xff] %v9937_v5  ;;  %v16994_v5 = vld [vmem:[#allocation111_spill] sm:$0xff] }
 0xa0a   :  { %v9940_v35 = vpop.f32.mrb[172].mxu0 }
 0xa0b   :  { %v9941_v31 = vadd.f32 %v15936_v28, %v9940_v35  ;;  %v9942_v45 = vpop.f32.mrb[173].mxu0 }
 0xa0c   :  { %v9943_v10 = vadd.f32 %v15939_v62, %v9942_v45  ;;  %v9944_v60 = vpop.f32.mrb[174].mxu0  ;;  %v16995_v45 = vld [vmem:[#allocation110_spill] sm:$0xff] }
 0xa0d   :  { %10118 = vst [vmem:[#allocation17 + $0x1c0] sm:$0xff] %v9941_v31  ;;  %v9945_v21 = vadd.f32 %v15942_v36, %v9944_v60  ;;  %v9946_v52 = vpop.f32.mrb[175].mxu0 }
 0xa0e   :  { %10119 = vst [vmem:[#allocation17 + $0x1c8] sm:$0xff] %v9943_v10  ;;  %v9947_v47 = vadd.f32 %v15945_v7, %v9946_v52  ;;  %v16980_v7 = vld [vmem:[#allocation101_spill] sm:$0xff] }
 0xa0f   :  { %10122 = vst [vmem:[#allocation17 + $0x1e0] sm:$0xff] %v9945_v21  ;;  %v16996_v21 = vld [vmem:[#allocation31_spill] sm:$0xff] }
 0xa10   :  { %10123 = vst [vmem:[#allocation17 + $0x1e8] sm:$0xff] %v9947_v47 }
 0xa12   :  { %v9983_v38 = vpop.f32.mrb[176].mxu0 }
 0xa13   :  { %v9984_v59 = vadd.f32 %v16976_v0, %v9983_v38  ;;  %v9985_v17 = vpop.f32.mrb[177].mxu0  ;;  %v16997_v38 = vld [vmem:[#allocation117_spill] sm:$0xff] }
 0xa14   :  { %v9986_v34 = vadd.f32 %v16977_v51, %v9985_v17  ;;  %v9987_v28 = vpop.f32.mrb[178].mxu0  ;;  %v16998_v17 = vld [vmem:[#allocation113_spill] sm:$0xff] }
 0xa15   :  { %10064 = vst [vmem:[#allocation17 + $0x10] sm:$0xff] %v9984_v59  ;;  %v9988_v62 = vadd.f32 %v16978_v48, %v9987_v28  ;;  %v9989_v8 = vpop.f32.mrb[179].mxu0  ;;  %v16999_v28 = vld [vmem:[#allocation114_spill] sm:$0xff] }
 0xa16   :  { %10065 = vst [vmem:[#allocation17 + $0x18] sm:$0xff] %v9986_v34  ;;  %v9990_v36 = vadd.f32 %v16979_v13, %v9989_v8  ;;  %v17000_v8 = vld [vmem:[#allocation43_spill] sm:$0xff] }
 0xa17   :  { %10068 = vst [vmem:[#allocation17 + $0x30] sm:$0xff] %v9988_v62 }
 0xa18   :  { %10069 = vst [vmem:[#allocation17 + $0x38] sm:$0xff] %v9990_v36 }
 0xa1a   :  { %v9993_v26 = vpop.f32.mrb[180].mxu0 }
 0xa1b   :  { %v9994_v37 = vadd.f32 %v16980_v7, %v9993_v26  ;;  %v9995_v56 = vpop.f32.mrb[181].mxu0  ;;  %v17001_v26 = vld [vmem:[#allocation37_spill] sm:$0xff] }
 0xa1c   :  { %v9996_v49 = vadd.f32 %v16981_v40, %v9995_v56  ;;  %v9997_v22 = vpop.f32.mrb[182].mxu0  ;;  %v17002_v56 = vld [vmem:[#allocation32_spill] sm:$0xff] }
 0xa1d   :  { %10072 = vst [vmem:[#allocation17 + $0x50] sm:$0xff] %v9994_v37  ;;  %v9998_v18 = vadd.f32 %v16982_v6, %v9997_v22  ;;  %v9999_v25 = vpop.f32.mrb[183].mxu0  ;;  %v17003_v22 = vld [vmem:[#allocation38_spill] sm:$0xff] }
 0xa1e   :  { %10073 = vst [vmem:[#allocation17 + $0x58] sm:$0xff] %v9996_v49  ;;  %v10000_v11 = vadd.f32 %v16983_v2, %v9999_v25  ;;  %v17004_v25 = vld [vmem:[#allocation53_spill] sm:$0xff] }
 0xa1f   :  { %10076 = vst [vmem:[#allocation17 + $0x70] sm:$0xff] %v9998_v18 }
 0xa20   :  { %10077 = vst [vmem:[#allocation17 + $0x78] sm:$0xff] %v10000_v11 }
 0xa22   :  { %v10003_v24 = vpop.f32.mrb[184].mxu0 }
 0xa23   :  { %v10004_v55 = vadd.f32 %v16984_v57, %v10003_v24  ;;  %v10005_v41 = vpop.f32.mrb[185].mxu0  ;;  %v17005_v24 = vld [vmem:[#allocation51_spill] sm:$0xff] }
 0xa24   :  { %v10006_v39 = vadd.f32 %v16985_v16, %v10005_v41  ;;  %v10007_v32 = vpop.f32.mrb[186].mxu0  ;;  %v17006_v41 = vld [vmem:[#allocation44_spill] sm:$0xff] }
 0xa25   :  { %10080 = vst [vmem:[#allocation17 + $0x90] sm:$0xff] %v10004_v55  ;;  %v10008_v63 = vadd.f32 %v16986_v4, %v10007_v32  ;;  %v10009_v12 = vpop.f32.mrb[187].mxu0  ;;  %v17007_v32 = vld [vmem:[#allocation52_spill] sm:$0xff] }
 0xa26   :  { %10081 = vst [vmem:[#allocation17 + $0x98] sm:$0xff] %v10006_v39  ;;  %v10010_v9 = vadd.f32 %v16987_v14, %v10009_v12 }
 0xa27   :  { %10084 = vst [vmem:[#allocation17 + $0xb0] sm:$0xff] %v10008_v63 }
 0xa28   :  { %10085 = vst [vmem:[#allocation17 + $0xb8] sm:$0xff] %v10010_v9 }
 0xa2a   :  { %v10013_v46 = vpop.f32.mrb[188].mxu0 }
 0xa2b   :  { %v10014_v53 = vadd.f32 %v16988_v19, %v10013_v46  ;;  %v10015_v3 = vpop.f32.mrb[189].mxu0 }
 0xa2c   :  { %v10016_v42 = vadd.f32 %v16989_v44, %v10015_v3  ;;  %v10017_v1 = vpop.f32.mrb[190].mxu0 }
 0xa2d   :  { %10088 = vst [vmem:[#allocation17 + $0xd0] sm:$0xff] %v10014_v53  ;;  %v10018_v30 = vadd.f32 %v16990_v15, %v10017_v1  ;;  %v10019_v58 = vpop.f32.mrb[191].mxu0 }
 0xa2e   :  { %10089 = vst [vmem:[#allocation17 + $0xd8] sm:$0xff] %v10016_v42  ;;  %v10020_v33 = vadd.f32 %v16991_v20, %v10019_v58 }
 0xa2f   :  { %10092 = vst [vmem:[#allocation17 + $0xf0] sm:$0xff] %v10018_v30 }
 0xa30   :  { %10093 = vst [vmem:[#allocation17 + $0xf8] sm:$0xff] %v10020_v33 }
 0xa32   :  { %v10023_v43 = vpop.f32.mrb[192].mxu0 }
 0xa33   :  { %v10024_v23 = vadd.f32 %v16992_v61, %v10023_v43  ;;  %v10025_v29 = vpop.f32.mrb[193].mxu0 }
 0xa34   :  { %v10026_v54 = vadd.f32 %v16993_v50, %v10025_v29  ;;  %v10027_v27 = vpop.f32.mrb[194].mxu0 }
 0xa35   :  { %10096 = vst [vmem:[#allocation17 + $0x110] sm:$0xff] %v10024_v23  ;;  %v10028_v35 = vadd.f32 %v16994_v5, %v10027_v27  ;;  %v10029_v31 = vpop.f32.mrb[195].mxu0 }
 0xa36   :  { %10097 = vst [vmem:[#allocation17 + $0x118] sm:$0xff] %v10026_v54  ;;  %v10030_v10 = vadd.f32 %v16995_v45, %v10029_v31 }
 0xa37   :  { %10100 = vst [vmem:[#allocation17 + $0x130] sm:$0xff] %v10028_v35 }
 0xa38   :  { %10101 = vst [vmem:[#allocation17 + $0x138] sm:$0xff] %v10030_v10 }
 0xa3a   :  { %v10033_v60 = vpop.f32.mrb[196].mxu0 }
 0xa3b   :  { %v10034_v52 = vadd.f32 %v16996_v21, %v10033_v60  ;;  %v10035_v47 = vpop.f32.mrb[197].mxu0 }
 0xa3c   :  { %v10036_v0 = vadd.f32 %v16997_v38, %v10035_v47  ;;  %v10037_v59 = vpop.f32.mrb[198].mxu0 }
 0xa3d   :  { %10104 = vst [vmem:[#allocation17 + $0x150] sm:$0xff] %v10034_v52  ;;  %v10038_v51 = vadd.f32 %v16998_v17, %v10037_v59  ;;  %v10039_v34 = vpop.f32.mrb[199].mxu0 }
 0xa3e   :  { %10105 = vst [vmem:[#allocation17 + $0x158] sm:$0xff] %v10036_v0  ;;  %v10040_v48 = vadd.f32 %v16999_v28, %v10039_v34 }
 0xa3f   :  { %10108 = vst [vmem:[#allocation17 + $0x170] sm:$0xff] %v10038_v51 }
 0xa40   :  { %10109 = vst [vmem:[#allocation17 + $0x178] sm:$0xff] %v10040_v48 }
 0xa42   :  { %v10043_v62 = vpop.f32.mrb[200].mxu0 }
 0xa43   :  { %v10044_v13 = vadd.f32 %v17000_v8, %v10043_v62  ;;  %v10045_v36 = vpop.f32.mrb[201].mxu0 }
 0xa44   :  { %v10046_v7 = vadd.f32 %v17001_v26, %v10045_v36  ;;  %v10047_v37 = vpop.f32.mrb[202].mxu0 }
 0xa45   :  { %10112 = vst [vmem:[#allocation17 + $0x190] sm:$0xff] %v10044_v13  ;;  %v10048_v40 = vadd.f32 %v17002_v56, %v10047_v37  ;;  %v10049_v49 = vpop.f32.mrb[203].mxu0 }
 0xa46   :  { %10113 = vst [vmem:[#allocation17 + $0x198] sm:$0xff] %v10046_v7  ;;  %v10050_v6 = vadd.f32 %v17003_v22, %v10049_v49 }
 0xa47   :  { %10116 = vst [vmem:[#allocation17 + $0x1b0] sm:$0xff] %v10048_v40 }
 0xa48   :  { %10117 = vst [vmem:[#allocation17 + $0x1b8] sm:$0xff] %v10050_v6 }
 0xa4a   :  { %v10053_v18 = vpop.f32.mrb[204].mxu0 }
 0xa4b   :  { %v10054_v2 = vadd.f32 %v17004_v25, %v10053_v18  ;;  %v10055_v11 = vpop.f32.mrb[205].mxu0 }
 0xa4c   :  { %v10056_v57 = vadd.f32 %v17005_v24, %v10055_v11  ;;  %v10057_v55 = vpop.f32.mrb[206].mxu0 }
 0xa4d   :  { %10120 = vst [vmem:[#allocation17 + $0x1d0] sm:$0xff] %v10054_v2  ;;  %v10058_v16 = vadd.f32 %v17006_v41, %v10057_v55  ;;  %v10059_v39 = vpop.f32.mrb[207].mxu0 }
 0xa4e   :  { %10121 = vst [vmem:[#allocation17 + $0x1d8] sm:$0xff] %v10056_v57  ;;  %v10060_v4 = vadd.f32 %v17007_v32, %v10059_v39 }
 0xa4f   :  { %10124 = vst [vmem:[#allocation17 + $0x1f0] sm:$0xff] %v10058_v16 }
 0xa50   :  { %10125 = vst [vmem:[#allocation17 + $0x1f8] sm:$0xff] %v10060_v4 }
 0xa51   :  { %13718 = shalt.err (!%p13715_p6)
}
 0xa52   :  { %s13719_s12 = scalar_lea.hbm %s16429_s11, 8192 }
 0xa53   :  { %p13720_p7 = scmp.ne.s32.totalorder %s16429_s11, %s13719_s12  ;;  %p13723_p8 = scmp.lt.u32.totalorder %s13719_s12, %s16429_s11 }
 0xa55   :  { %p13725_p9 = pnand %p13723_p8, %p13720_p7 }
 0xa57   :  { %13728 = shalt.err (!%p13725_p9)
}
 0xa58   :  { %s13758_s6 = smov 512   ;;  %s13759_s20 = smov 32  }
 0xa59   :  { %10137 = dma.vmem_to_hbm [thread:$0]  %s10132_s23, 8192, %s16429_s11, [#allocation4], %s13758_s6, %s13758_s6, %s13759_s20  }
 0xa5a   :  { %13739 = dma.done.wait [#allocation4], 8192  }
 0xa5b   :  { %13740 = vsyncadd [#allocation4], 4294959104 }
 0xa5c   :  { %10141 = vsyncpa [#allocation3], 1 }
 0xa5d   :  { %10142 = vsyncpa [#allocation6], 1 }
 0xa5e   :  { %10143 = vsyncpa [#allocation9], 1 }
 0xa5f   :  { %10144 = vsyncpa [#allocation12], 1 }
 0xa60   :  { %10145 = vsyncpa [#allocation15], 1 }
 0xa61   :  { %10146 = vsyncpa [#allocation4], 1 }

</bundles_post_ra>
